<compile_context>
chip_gen: v7x
topology: tpu7x:2x2x1
jax: 0.10.0
libtpu: 0.0.40
codegen_flags: <defaults>
</compile_context>

<pallas_src>
import jax
import jax.numpy as jnp
from jax.experimental import pallas as pl
from jax.experimental.pallas import tpu as pltpu

_SUBLANE = 8


def encoder_kernel(x_ref,
                   w1_ref, b1_ref,
                   w2_ref, b2_ref,
                   w3a_ref, w3b_ref, b3_ref,
                   w4_ref, b4_ref,
                   o_ref):
    """Processes `gt` point groups (m = gt*n point rows) per grid step.

    x_ref : (gt*n, 8) f32   xyz zero-padded to 8 lanes
    w1    : (8, 128)  f32   (BN1 folded, zero-padded rows)     b1: (1, 128) f32
    w2    : (128,256) bf16                                     b2: (1, 256) f32
    w3a/b : (256,512) bf16  (BN2 folded; global/local halves)  b3: (1, 512) f32
    w4    : (512, C)  bf16                                     b4: (1, C)   f32
    o_ref : (gt, C)
    """
    gt, _ = o_ref.shape
    m = x_ref.shape[0]
    n = m // gt

    # first_conv[0..2]: Conv1d(3->128,k=1) + BN (folded) + ReLU.
    # K=8 -> negligible MXU time; keep f32 for accuracy headroom.
    h1 = jnp.dot(x_ref[...], w1_ref[...],
                 preferred_element_type=jnp.float32) + b1_ref[...]
    h1 = jnp.maximum(h1, 0.0)

    # first_conv[3]: Conv1d(128->256,k=1).  bf16 inputs, f32 accumulation.
    f = jnp.dot(h1.astype(jnp.bfloat16), w2_ref[...],
                preferred_element_type=jnp.float32) + b2_ref[...]          # (m, 256)

    # Per-group global max pool over the n points.
    fg = jnp.max(f.reshape(gt, n, -1), axis=1)                             # (gt, 256)

    # second_conv[0..2]: Conv1d(512->512) + BN (folded) + ReLU.
    # Input channels are [global(256) ; local(256)]; split the weight instead of
    # materializing the concat.  The global half (and b3) is computed once per
    # group and broadcast over the n points.
    g_part = jnp.dot(fg.astype(jnp.bfloat16), w3a_ref[...],
                     preferred_element_type=jnp.float32) + b3_ref[...]     # (gt, 512)
    f_part = jnp.dot(f.astype(jnp.bfloat16), w3b_ref[...],
                     preferred_element_type=jnp.float32)                   # (m, 512)
    h2 = f_part.reshape(gt, n, -1) + g_part[:, None, :]
    h2 = jnp.maximum(h2, 0.0).reshape(m, -1)

    # second_conv[3]: Conv1d(512->encoder_channel), bias deferred past the max.
    o = jnp.dot(h2.astype(jnp.bfloat16), w4_ref[...],
                preferred_element_type=jnp.float32)                        # (m, C)

    # Final per-group max pool, then the per-channel bias -> lane-dense store.
    o_ref[...] = (jnp.max(o.reshape(gt, n, -1), axis=1)
                  + b4_ref[...]).astype(o_ref.dtype)


def _pick_groups_per_step(bg, n, target_rows=2048):
    """Groups per grid step (`gt`, a divisor of bg).

    * m = gt*n targets ~1-2k rows so per-step MXU work dwarfs the ~0.35 us
      grid-step overhead and the MXU M dim stays large / 256-aligned.
    * gt is 8-aligned (unless gt == bg) so the (gt, C) output block and the
      (gt*n, 8) input block satisfy the (8,128) tiling constraint and output
      stores stay unmasked.
    * Keeps >= 2 grid steps (v7x shards the "parallel" grid over 2 TensorCores)
      only when each step still has >= 512 rows; otherwise a single larger
      step is preferred (the v5e/v6e single-TC case).
    """
    divisors = [d for d in range(1, bg + 1) if bg % d == 0]
    valid = [d for d in divisors if d == bg or d % _SUBLANE == 0]
    under = [d for d in valid if d * n <= target_rows]
    if not under:
        # Every aligned divisor overshoots the target: take the smallest one
        # to bound per-step VMEM.
        return min(valid)
    gt = max(under)
    smaller = [d for d in under if d < bg]
    if gt == bg and smaller and max(smaller) * n >= 512:
        gt = max(smaller)
    return gt


def encoder_forward(point_groups, params, eps=1e-5):
    """point_groups: (B, G, N, 3) -> (B, G, encoder_channel). Eval-mode forward."""
    bs, g, n, c_in = point_groups.shape
    assert c_in == 3
    bg = bs * g

    # ---- fold eval-mode BatchNorm + conv bias into the preceding 1x1 convs (f32) ----
    s1 = params["bn1_gamma"] * jax.lax.rsqrt(params["bn1_var"] + eps)
    w1 = params["w1"] * s1[None, :]
    b1 = params["b1"] * s1 + params["bn1_beta"] - params["bn1_mean"] * s1

    s2 = params["bn2_gamma"] * jax.lax.rsqrt(params["bn2_var"] + eps)
    w3 = params["w3"] * s2[None, :]
    b3 = params["b3"] * s2 + params["bn2_beta"] - params["bn2_mean"] * s2

    w2, b2 = params["w2"], params["b2"]
    w4, b4 = params["w4"], params["b4"]
    c_out = w4.shape[1]

    # Pad xyz (3) -> 8 lanes; pad w1 rows to match (zero rows, exact math).
    # x is presented 2-D (bg*n, 8) so the kernel needs no reshape of its block.
    x = jnp.pad(point_groups.reshape(bg * n, 3), ((0, 0), (0, 5)))
    w1 = jnp.pad(w1, ((0, 5), (0, 0)))                                     # (8, 128)

    # Split the 512-in conv into [global ; local] halves.
    w3a, w3b = w3[:256, :], w3[256:, :]

    # bf16 weights for the wide matmuls; biases stay f32.
    bf = jnp.bfloat16
    w2b, w3ab, w3bb, w4b = (a.astype(bf) for a in (w2, w3a, w3b, w4))
    b1r, b2r, b3r, b4r = (b.reshape(1, -1).astype(jnp.float32)
                          for b in (b1, b2, b3, b4))

    gt = _pick_groups_per_step(bg, n)
    grid = (bg // gt,)

    # Grid-invariant operands: single pipeline buffer (no redundant second
    # weight buffer in VMEM, no useless re-prefetch slots).
    def const_spec(a):
        nd = a.ndim
        return pl.BlockSpec(a.shape, lambda i, nd=nd: (0,) * nd,
                            pipeline_mode=pl.Buffered(1))

    out = pl.pallas_call(
        encoder_kernel,
        out_shape=jax.ShapeDtypeStruct((bg, c_out), point_groups.dtype),
        grid=grid,
        in_specs=[
            pl.BlockSpec((gt * n, 8), lambda i: (i, 0)),
            const_spec(w1), const_spec(b1r),
            const_spec(w2b), const_spec(b2r),
            const_spec(w3ab), const_spec(w3bb), const_spec(b3r),
            const_spec(w4b), const_spec(b4r),
        ],
        out_specs=pl.BlockSpec((gt, c_out), lambda i: (i, 0)),
        compiler_params=pltpu.CompilerParams(
            dimension_semantics=("parallel",),
            # ~9.5 KiB/row of intermediates -> ~20 MiB at the 2048-row target,
            # plus <1 MiB of single-buffered weights and the lane-padded x
            # buffers.  48 MiB leaves headroom on every generation (v7x has
            # 64 MiB physical VMEM; v5e/v6e scoped defaults are 16/32 MiB).
            vmem_limit_bytes=48 * 1024 * 1024,
        ),
    )(x, w1, b1r, w2b, b2r, w3ab, w3bb, b3r, w4b, b4r)

    return out.reshape(bs, g, c_out)


# ----- Pure-JAX f32 reference (mirrors the PyTorch module, BN in eval mode) -----
def encoder_reference(point_groups, p, eps=1e-5):
    bs, g, n, _ = point_groups.shape
    x = point_groups.reshape(bs * g, n, 3)

    h = x @ p["w1"] + p["b1"]
    h = (h - p["bn1_mean"]) / jnp.sqrt(p["bn1_var"] + eps) * p["bn1_gamma"] + p["bn1_beta"]
    h = jnp.maximum(h, 0.0)
    f = h @ p["w2"] + p["b2"]                                   # (BG, N, 256)

    fg = jnp.max(f, axis=1, keepdims=True)                      # (BG, 1, 256)
    feat = jnp.concatenate([jnp.broadcast_to(fg, f.shape), f], axis=-1)   # (BG, N, 512)

    h2 = feat @ p["w3"] + p["b3"]
    h2 = (h2 - p["bn2_mean"]) / jnp.sqrt(p["bn2_var"] + eps) * p["bn2_gamma"] + p["bn2_beta"]
    h2 = jnp.maximum(h2, 0.0)
    o = h2 @ p["w4"] + p["b4"]                                  # (BG, N, C)
    return jnp.max(o, axis=1).reshape(bs, g, -1)


def init_params(key, encoder_channel=256):
    ks = jax.random.split(key, 16)

    def lin_w(k, fan_in, fan_out):
        return jax.random.normal(k, (fan_in, fan_out), jnp.float32) / jnp.sqrt(fan_in)

    def vec(k, m, scale=0.1):
        return scale * jax.random.normal(k, (m,), jnp.float32)

    return {
        "w1": lin_w(ks[0], 3, 128),            "b1": vec(ks[1], 128),
        "bn1_gamma": 1.0 + vec(ks[2], 128),    "bn1_beta": vec(ks[3], 128),
        "bn1_mean": vec(ks[4], 128),
        "bn1_var": 1.0 + 0.1 * jnp.abs(jax.random.normal(ks[5], (128,), jnp.float32)),
        "w2": lin_w(ks[6], 128, 256),          "b2": vec(ks[7], 256),
        "w3": lin_w(ks[8], 512, 512),          "b3": vec(ks[9], 512),
        "bn2_gamma": 1.0 + vec(ks[10], 512),   "bn2_beta": vec(ks[11], 512),
        "bn2_mean": vec(ks[12], 512),
        "bn2_var": 1.0 + 0.1 * jnp.abs(jax.random.normal(ks[13], (512,), jnp.float32)),
        "w4": lin_w(ks[14], 512, encoder_channel), "b4": vec(ks[15], encoder_channel),
    }


if __name__ == "__main__":
    B, G, N = 2, 8, 32                 # 16 groups -> one 512-row step at this tiny size
    encoder_channel = 256

    key = jax.random.PRNGKey(0)
    kx, kp = jax.random.split(key)
    point_groups = jax.random.normal(kx, (B, G, N, 3), jnp.float32)
    params = init_params(kp, encoder_channel)

    out = encoder_forward(point_groups, params)
    out = jax.block_until_ready(out)

    ref = encoder_reference(point_groups, params)
    assert out.shape == (B, G, encoder_channel)
    # bf16 matmul inputs with f32 accumulation -> compare with a matching tolerance.
    assert jnp.allclose(out, ref, atol=3e-2, rtol=3e-2), "mismatch vs reference"

    print("KERNEL_OK")
</pallas_src>

<mosaic_0001>
module attributes {stable_mosaic.version = 11 : i64} {
  func.func @encoder_kernel(%arg0: i32, %arg1: memref<512x8xf32, #tpu.memory_space<vmem>>, %arg2: memref<8x128xf32, #tpu.memory_space<vmem>>, %arg3: memref<1x128xf32, #tpu.memory_space<vmem>>, %arg4: memref<128x256xbf16, #tpu.memory_space<vmem>>, %arg5: memref<1x256xf32, #tpu.memory_space<vmem>>, %arg6: memref<256x512xbf16, #tpu.memory_space<vmem>>, %arg7: memref<256x512xbf16, #tpu.memory_space<vmem>>, %arg8: memref<1x512xf32, #tpu.memory_space<vmem>>, %arg9: memref<512x256xbf16, #tpu.memory_space<vmem>>, %arg10: memref<1x256xf32, #tpu.memory_space<vmem>>, %arg11: memref<16x256xf32, #tpu.memory_space<vmem>>) attributes {dimension_semantics = [#tpu.dimension_semantics<parallel>], iteration_bounds = array<i64: 1>, scalar_prefetch = 0 : i64, scratch_operands = 0 : i64, tpu.core_type = #tpu.core_type<tc>, window_params = [{transform_indices = @transform_0, window_bounds = array<i64: 512, 8>}, {pipeline_mode = #tpu.pipeline_mode<synchronous>, transform_indices = @transform_1, window_bounds = array<i64: 8, 128>}, {pipeline_mode = #tpu.pipeline_mode<synchronous>, transform_indices = @transform_2, window_bounds = array<i64: 1, 128>}, {pipeline_mode = #tpu.pipeline_mode<synchronous>, transform_indices = @transform_3, window_bounds = array<i64: 128, 256>}, {pipeline_mode = #tpu.pipeline_mode<synchronous>, transform_indices = @transform_4, window_bounds = array<i64: 1, 256>}, {pipeline_mode = #tpu.pipeline_mode<synchronous>, transform_indices = @transform_5, window_bounds = array<i64: 256, 512>}, {pipeline_mode = #tpu.pipeline_mode<synchronous>, transform_indices = @transform_6, window_bounds = array<i64: 256, 512>}, {pipeline_mode = #tpu.pipeline_mode<synchronous>, transform_indices = @transform_7, window_bounds = array<i64: 1, 512>}, {pipeline_mode = #tpu.pipeline_mode<synchronous>, transform_indices = @transform_8, window_bounds = array<i64: 512, 256>}, {pipeline_mode = #tpu.pipeline_mode<synchronous>, transform_indices = @transform_9, window_bounds = array<i64: 1, 256>}, {transform_indices = @transform_10, window_bounds = array<i64: 16, 256>}]} {
    %c0 = arith.constant 0 : index
    %c0_0 = arith.constant 0 : index
    %0 = vector.load %arg1[%c0, %c0_0] : memref<512x8xf32, #tpu.memory_space<vmem>>, vector<512x8xf32>
    %c0_1 = arith.constant 0 : index
    %c0_2 = arith.constant 0 : index
    %1 = vector.load %arg2[%c0_1, %c0_2] : memref<8x128xf32, #tpu.memory_space<vmem>>, vector<8x128xf32>
    %cst = arith.constant dense<0.000000e+00> : vector<512x128xf32>
    %2 = tpu.matmul %0, %1, %cst {dimension_numbers = #tpu.dot_dimension_numbers<[1], [0], [0], [1], [0, 0, 1, 1], [], []>} : vector<512x8xf32>, vector<8x128xf32>, vector<512x128xf32> -> vector<512x128xf32>
    %c0_3 = arith.constant 0 : index
    %c0_4 = arith.constant 0 : index
    %3 = vector.load %arg3[%c0_3, %c0_4] : memref<1x128xf32, #tpu.memory_space<vmem>>, vector<1x128xf32>
    %4 = vector.broadcast %3 : vector<1x128xf32> to vector<512x128xf32>
    %5 = arith.addf %2, %4 : vector<512x128xf32>
    %cst_5 = arith.constant 0.000000e+00 : f32
    %6 = vector.broadcast %cst_5 : f32 to vector<512x128xf32>
    %7 = arith.maximumf %5, %6 : vector<512x128xf32>
    %8 = arith.truncf %7 : vector<512x128xf32> to vector<512x128xbf16>
    %c0_6 = arith.constant 0 : index
    %c0_7 = arith.constant 0 : index
    %9 = vector.load %arg4[%c0_6, %c0_7] : memref<128x256xbf16, #tpu.memory_space<vmem>>, vector<128x256xbf16>
    %cst_8 = arith.constant dense<0.000000e+00> : vector<512x256xf32>
    %10 = tpu.matmul %8, %9, %cst_8 {dimension_numbers = #tpu.dot_dimension_numbers<[1], [0], [0], [1], [0, 0, 1, 1], [], []>} : vector<512x128xbf16>, vector<128x256xbf16>, vector<512x256xf32> -> vector<512x256xf32>
    %c0_9 = arith.constant 0 : index
    %c0_10 = arith.constant 0 : index
    %11 = vector.load %arg5[%c0_9, %c0_10] : memref<1x256xf32, #tpu.memory_space<vmem>>, vector<1x256xf32>
    %12 = vector.broadcast %11 : vector<1x256xf32> to vector<512x256xf32>
    %13 = arith.addf %10, %12 : vector<512x256xf32>
    %14 = vector.shape_cast %13 : vector<512x256xf32> to vector<16x32x256xf32>
    %cst_11 = arith.constant dense<0xFF800000> : vector<16x256xf32>
    %15 = vector.multi_reduction <maximumf>, %14, %cst_11 [1] : vector<16x32x256xf32> to vector<16x256xf32>
    %16 = arith.truncf %15 : vector<16x256xf32> to vector<16x256xbf16>
    %c0_12 = arith.constant 0 : index
    %c0_13 = arith.constant 0 : index
    %17 = vector.load %arg6[%c0_12, %c0_13] : memref<256x512xbf16, #tpu.memory_space<vmem>>, vector<256x512xbf16>
    %cst_14 = arith.constant dense<0.000000e+00> : vector<16x512xf32>
    %18 = tpu.matmul %16, %17, %cst_14 {dimension_numbers = #tpu.dot_dimension_numbers<[1], [0], [0], [1], [0, 0, 1, 1], [], []>} : vector<16x256xbf16>, vector<256x512xbf16>, vector<16x512xf32> -> vector<16x512xf32>
    %c0_15 = arith.constant 0 : index
    %c0_16 = arith.constant 0 : index
    %19 = vector.load %arg8[%c0_15, %c0_16] : memref<1x512xf32, #tpu.memory_space<vmem>>, vector<1x512xf32>
    %20 = vector.broadcast %19 : vector<1x512xf32> to vector<16x512xf32>
    %21 = arith.addf %18, %20 : vector<16x512xf32>
    %22 = arith.truncf %13 : vector<512x256xf32> to vector<512x256xbf16>
    %c0_17 = arith.constant 0 : index
    %c0_18 = arith.constant 0 : index
    %23 = vector.load %arg7[%c0_17, %c0_18] : memref<256x512xbf16, #tpu.memory_space<vmem>>, vector<256x512xbf16>
    %cst_19 = arith.constant dense<0.000000e+00> : vector<512x512xf32>
    %24 = tpu.matmul %22, %23, %cst_19 {dimension_numbers = #tpu.dot_dimension_numbers<[1], [0], [0], [1], [0, 0, 1, 1], [], []>} : vector<512x256xbf16>, vector<256x512xbf16>, vector<512x512xf32> -> vector<512x512xf32>
    %25 = vector.shape_cast %24 : vector<512x512xf32> to vector<16x32x512xf32>
    %26 = vector.shape_cast %21 : vector<16x512xf32> to vector<16x1x512xf32>
    %27 = vector.broadcast %26 : vector<16x1x512xf32> to vector<16x32x512xf32>
    %28 = arith.addf %25, %27 : vector<16x32x512xf32>
    %cst_20 = arith.constant 0.000000e+00 : f32
    %29 = vector.broadcast %cst_20 : f32 to vector<16x32x512xf32>
    %30 = arith.maximumf %28, %29 : vector<16x32x512xf32>
    %31 = vector.shape_cast %30 : vector<16x32x512xf32> to vector<512x512xf32>
    %32 = arith.truncf %31 : vector<512x512xf32> to vector<512x512xbf16>
    %c0_21 = arith.constant 0 : index
    %c0_22 = arith.constant 0 : index
    %33 = vector.load %arg9[%c0_21, %c0_22] : memref<512x256xbf16, #tpu.memory_space<vmem>>, vector<512x256xbf16>
    %cst_23 = arith.constant dense<0.000000e+00> : vector<512x256xf32>
    %34 = tpu.matmul %32, %33, %cst_23 {dimension_numbers = #tpu.dot_dimension_numbers<[1], [0], [0], [1], [0, 0, 1, 1], [], []>} : vector<512x512xbf16>, vector<512x256xbf16>, vector<512x256xf32> -> vector<512x256xf32>
    %35 = vector.shape_cast %34 : vector<512x256xf32> to vector<16x32x256xf32>
    %cst_24 = arith.constant dense<0xFF800000> : vector<16x256xf32>
    %36 = vector.multi_reduction <maximumf>, %35, %cst_24 [1] : vector<16x32x256xf32> to vector<16x256xf32>
    %c0_25 = arith.constant 0 : index
    %c0_26 = arith.constant 0 : index
    %37 = vector.load %arg10[%c0_25, %c0_26] : memref<1x256xf32, #tpu.memory_space<vmem>>, vector<1x256xf32>
    %38 = vector.broadcast %37 : vector<1x256xf32> to vector<16x256xf32>
    %39 = arith.addf %36, %38 : vector<16x256xf32>
    %c0_27 = arith.constant 0 : index
    %c0_28 = arith.constant 0 : index
    %40 = vector.load %arg11[%c0_27, %c0_28] : memref<16x256xf32, #tpu.memory_space<vmem>>, vector<16x256xf32>
    tpu.vector_store %arg11[%c0_27, %c0_28], %39 {strides = array<i32>} : memref<16x256xf32, #tpu.memory_space<vmem>>, vector<16x256xf32>,
    return
  }
  func.func @transform_0(%arg0: i32) -> (i32, i32) {
    %c0_i32 = arith.constant 0 : i32
    %c0_i32_0 = arith.constant 0 : i32
    return %arg0, %c0_i32 : i32, i32
  }
  func.func @transform_1(%arg0: i32) -> (i32, i32) {
    %c0_i32 = arith.constant 0 : i32
    %c0_i32_0 = arith.constant 0 : i32
    %c0_i32_1 = arith.constant 0 : i32
    return %c0_i32, %c0_i32_0 : i32, i32
  }
  func.func @transform_2(%arg0: i32) -> (i32, i32) {
    %c0_i32 = arith.constant 0 : i32
    %c0_i32_0 = arith.constant 0 : i32
    %c0_i32_1 = arith.constant 0 : i32
    return %c0_i32, %c0_i32_0 : i32, i32
  }
  func.func @transform_3(%arg0: i32) -> (i32, i32) {
    %c0_i32 = arith.constant 0 : i32
    %c0_i32_0 = arith.constant 0 : i32
    %c0_i32_1 = arith.constant 0 : i32
    return %c0_i32, %c0_i32_0 : i32, i32
  }
  func.func @transform_4(%arg0: i32) -> (i32, i32) {
    %c0_i32 = arith.constant 0 : i32
    %c0_i32_0 = arith.constant 0 : i32
    %c0_i32_1 = arith.constant 0 : i32
    return %c0_i32, %c0_i32_0 : i32, i32
  }
  func.func @transform_5(%arg0: i32) -> (i32, i32) {
    %c0_i32 = arith.constant 0 : i32
    %c0_i32_0 = arith.constant 0 : i32
    %c0_i32_1 = arith.constant 0 : i32
    return %c0_i32, %c0_i32_0 : i32, i32
  }
  func.func @transform_6(%arg0: i32) -> (i32, i32) {
    %c0_i32 = arith.constant 0 : i32
    %c0_i32_0 = arith.constant 0 : i32
    %c0_i32_1 = arith.constant 0 : i32
    return %c0_i32, %c0_i32_0 : i32, i32
  }
  func.func @transform_7(%arg0: i32) -> (i32, i32) {
    %c0_i32 = arith.constant 0 : i32
    %c0_i32_0 = arith.constant 0 : i32
    %c0_i32_1 = arith.constant 0 : i32
    return %c0_i32, %c0_i32_0 : i32, i32
  }
  func.func @transform_8(%arg0: i32) -> (i32, i32) {
    %c0_i32 = arith.constant 0 : i32
    %c0_i32_0 = arith.constant 0 : i32
    %c0_i32_1 = arith.constant 0 : i32
    return %c0_i32, %c0_i32_0 : i32, i32
  }
  func.func @transform_9(%arg0: i32) -> (i32, i32) {
    %c0_i32 = arith.constant 0 : i32
    %c0_i32_0 = arith.constant 0 : i32
    %c0_i32_1 = arith.constant 0 : i32
    return %c0_i32, %c0_i32_0 : i32, i32
  }
  func.func @transform_10(%arg0: i32) -> (i32, i32) {
    %c0_i32 = arith.constant 0 : i32
    %c0_i32_0 = arith.constant 0 : i32
    return %arg0, %c0_i32 : i32, i32
  }
}

</mosaic_0001>

<bundles_post_ra>
// kernel: tpu_custom_call.1
= control target key start
LH: loop header
LB: loop body
LE: loop exit
PB: predicated region body
PF: predicated region fallthrough
CT: control target
= control target key end

     0   :  { %15 = vsyncpa [#allocation3], 0  ;;  %s9816_s0 = inlined_call_operand.vmem [shape: f32[512,8], index: 0, kind: input, shape index: {}]   ;;  %s9817_s1 = inlined_call_operand.vmem [shape: f32[8,128], index: 1, kind: input, shape index: {}]   ;;  %s9818_s2 = inlined_call_operand.vmem [shape: f32[1,128], index: 2, kind: input, shape index: {}]   ;;  %s9819_s3 = inlined_call_operand.hbm [shape: bf16[128,256], index: 3, kind: input, shape index: {}]   ;;  %s9820_s4 = inlined_call_operand.vmem [shape: f32[1,256], index: 4, kind: input, shape index: {}]   ;;  %s9821_s5 = inlined_call_operand.vmem [shape: bf16[256,512], index: 5, kind: input, shape index: {}]   ;;  %s9822_s6 = inlined_call_operand.hbm [shape: bf16[256,512], index: 6, kind: input, shape index: {}]   ;;  %s9823_s7 = inlined_call_operand.vmem [shape: f32[1,512], index: 7, kind: input, shape index: {}]   ;;  %s9824_s8 = inlined_call_operand.hbm [shape: bf16[512,256], index: 8, kind: input, shape index: {}]   ;;  %s9825_s9 = inlined_call_operand.vmem [shape: f32[1,256], index: 9, kind: input, shape index: {}]   ;;  %s9826_s10 = inlined_call_operand.hbm [shape: f32[16,256], index: 10, kind: output, shape index: {}]  }
   0x1   :  { %16 = vsyncpa [#allocation6], 0 }
   0x2   :  { %17 = vsyncpa [#allocation4], 0  ;;  %s7037_s13 = smov [#allocation5]   ;;  %s6943_s17 = scalar_lea.hbm %s9822_s6, 8192 }
   0x3   :  { %s45_s14 = sshll.u32 %s7037_s13, 4  ;;  %p6944_p0 = scmp.ne.s32.totalorder %s9822_s6, %s6943_s17  ;;  %s46_s14 = int_to_ptr.vmem [resolvable:$true] %s45_s14 }
   0x4   :  { %p6947_p1 = scmp.lt.u32.totalorder %s6943_s17, %s9822_s6 }
   0x6   :  { %p6949_p2 = pnand %p6947_p1, %p6944_p0 }
   0x8   :  { %6952 = shalt.err (!%p6949_p2)
}
   0x9   :  { %s6953_s22 = scalar_lea.vmem %s46_s14, 8192  ;;  %p6958_p4 = scmp.lt.s32.totalorder %s46_s14, %s46_s14 }
   0xa   :  { %p6954_p3 = scmp.ne.s32.totalorder %s46_s14, %s6953_s22  ;;  %p6959_p5 = scmp.lt.s32.totalorder %s6953_s22, %s6953_s22 }
   0xc   :  { %p6960_p6 = por %p6959_p5, %p6958_p4 }
   0xe   :  { %p6961_p7 = pnand %p6960_p6, %p6954_p3 }
  0x10   :  { %6964 = shalt.err (!%p6961_p7)
}
  0x11   :  { %s7038_s23 = smov 256   ;;  %s7039_s24 = smov 16  }
  0x12   :  { %51 = dma.hbm_to_vmem [thread:$0]  %s9822_s6, 8192, %s46_s14, [#allocation6], %s7038_s23, %s7038_s23, %s7039_s24  }
  0x13   :  { %s7040_s27 = smov [#allocation2]   ;;  %s6965_s11 = scalar_lea.hbm %s9819_s3, 2048 }
  0x14   :  { %s29_s28 = sshll.u32 %s7040_s27, 4  ;;  %p6966_p8 = scmp.ne.s32.totalorder %s9819_s3, %s6965_s11  ;;  %s30_s28 = int_to_ptr.vmem [resolvable:$true] %s29_s28 }
  0x15   :  { %p6969_p9 = scmp.lt.u32.totalorder %s6965_s11, %s9819_s3 }
  0x17   :  { %p6971_p10 = pnand %p6969_p9, %p6966_p8 }
  0x19   :  { %6974 = shalt.err (!%p6971_p10)
}
  0x1a   :  { %s6975_s17 = scalar_lea.vmem %s30_s28, 2048  ;;  %p6980_p12 = scmp.lt.s32.totalorder %s30_s28, %s30_s28 }
  0x1b   :  { %p6976_p11 = scmp.ne.s32.totalorder %s30_s28, %s6975_s17  ;;  %p6981_p13 = scmp.lt.s32.totalorder %s6975_s17, %s6975_s17 }
  0x1d   :  { %p6982_p0 = por %p6981_p13, %p6980_p12 }
  0x1f   :  { %p6983_p1 = pnand %p6982_p0, %p6976_p11 }
  0x21   :  { %6986 = shalt.err (!%p6983_p1)
}
  0x22   :  { %s7041_s6 = smov 128   ;;  %s7042_s14 = smov 8  }
  0x23   :  { %35 = dma.hbm_to_vmem [thread:$0]  %s9819_s3, 2048, %s30_s28, [#allocation3], %s7041_s6, %s7041_s6, %s7042_s14  }
  0x24   :  { %s7043_s20 = smov [#allocation7]   ;;  %s6987_s26 = scalar_lea.hbm %s9824_s8, 8192 }
  0x25   :  { %s59_s21 = sshll.u32 %s7043_s20, 4  ;;  %p6988_p2 = scmp.ne.s32.totalorder %s9824_s8, %s6987_s26  ;;  %s60_s21 = int_to_ptr.vmem [resolvable:$true] %s59_s21 }
  0x26   :  { %p6991_p3 = scmp.lt.u32.totalorder %s6987_s26, %s9824_s8 }
  0x28   :  { %p6993_p4 = pnand %p6991_p3, %p6988_p2 }
  0x2a   :  { %6996 = shalt.err (!%p6993_p4)
}
  0x2b   :  { %s6997_s12 = scalar_lea.vmem %s60_s21, 8192  ;;  %p7002_p6 = scmp.lt.s32.totalorder %s60_s21, %s60_s21 }
  0x2c   :  { %p6998_p5 = scmp.ne.s32.totalorder %s60_s21, %s6997_s12  ;;  %p7003_p7 = scmp.lt.s32.totalorder %s6997_s12, %s6997_s12 }
  0x2e   :  { %p7004_p8 = por %p7003_p7, %p7002_p6 }
  0x30   :  { %p7005_p9 = pnand %p7004_p8, %p6998_p5 }
  0x32   :  { %7008 = shalt.err (!%p7005_p9)
}
  0x33   :  { %65 = dma.hbm_to_vmem [thread:$0]  %s9824_s8, 8192, %s60_s21, [#allocation6], %s7041_s6, %s7041_s6, %s7042_s14  }
  0x34   :  { %7031 = dma.done.wait [#allocation3], 2048  }
  0x35   :  { %7032 = vsyncadd [#allocation3], 4294965248 }
  0x36   :  { %7033 = dma.done.wait [#allocation6], 16384  }
  0x37   :  { %7034 = vsyncadd [#allocation6], 4294950912  ;;  %vm150_vm0 = vcmask 64512   ;;  %v142_v0 = vld [vmem:[%s9817_s1] sm:$0xff]  ;;  %v79_v2 = vld [vmem:[%s9816_s0 + $0x8] sm:$0xff]  ;;  %vm1755_vm1 = vcmask 1041409  }
  0x38   :  { %v78_v1 = vld [vmem:[%s9816_s0] sm:$0xff]  ;;  %6332 = vmatprep.subr.mxu0 %v142_v0  ;;  %v80_v3 = vld [vmem:[%s9816_s0 + $0x10] sm:$0xff]  ;;  %v81_v4 = vld [vmem:[%s9816_s0 + $0x18] sm:$0xff]  ;;  %vm1757_vm2 = vcmask 1042434   ;;  %vm1759_vm3 = vcmask 1043459   ;;  %vm1761_vm4 = vcmask 1044484  }
  0x39   :  { %6334 = vmatprep.mubr.msk.f32.mxu0 %vm150_vm0, %v78_v1  ;;  %6333 = vmatpush3.msra.mxu0 %v142_v0  ;;  %v82_v5 = vld [vmem:[%s9816_s0 + $0x20] sm:$0xff]  ;;  %v83_v6 = vld [vmem:[%s9816_s0 + $0x28] sm:$0xff]  ;;  %v84_v7 = vld [vmem:[%s9816_s0 + $0x30] sm:$0xff]  ;;  %vm1763_vm5 = vcmask 1045509   ;;  %vm1765_vm6 = vcmask 1046534   ;;  %vm1767_vm7 = vcmask 1047559  }
  0x3a   :  { %6335 = vmatmul.mubr.msk.f32.vlgmr.msra.gmra.mrb[0].mxu0 %vm150_vm0, %v79_v2  ;;  %v85_v8 = vld [vmem:[%s9816_s0 + $0x38] sm:$0xff]  ;;  %v86_v9 = vld [vmem:[%s9816_s0 + $0x40] sm:$0xff]  ;;  %v87_v10 = vld [vmem:[%s9816_s0 + $0x48] sm:$0xff]  ;;  %v7044_v2 = vmov 0  }
  0x3b   :  { %6337 = vmatprep.mubr.msk.f32.mxu0 %vm150_vm0, %v80_v3  ;;  %v88_v11 = vld [vmem:[%s9816_s0 + $0x50] sm:$0xff]  ;;  %v6600_v12 = vld [vmem:[#allocation2 + $0x4] ss:$8 sps:$4 sm:$0xff]   ;;  %v6602_v13 = vld [vmem:[#allocation2] ss:$8 sps:$4 sm:$0xff]   ;;  %964 = vmatprep.mubr.bf16.mxu1 %v7044_v2 }
  0x3c   :  { %932 = vmatprep.subr.bf16.mxu1 %v6600_v12  ;;  %v6603_v14 = vld [vmem:[#allocation2 + $0x14] ss:$8 sps:$4 sm:$0xff]   ;;  %v6605_v16 = vld [vmem:[#allocation2 + $0x10] ss:$8 sps:$4 sm:$0xff]   ;;  %v90_v17 = vld [vmem:[%s9816_s0 + $0x60] sm:$0xff] }
  0x3d   :  { %v89_v15 = vld [vmem:[%s9816_s0 + $0x58] sm:$0xff]  ;;  %933 = vmatpush1.bf16.msra.mxu1 %v6602_v13  ;;  %v6606_v18 = vld [vmem:[#allocation2 + $0x24] ss:$8 sps:$4 sm:$0xff]   ;;  %v92_v20 = vld [vmem:[%s9816_s0 + $0x70] sm:$0xff] }
  0x3e   :  { %6338 = vmatmul.mubr.msk.f32.gmra.mrb[2].mxu0 %vm150_vm0, %v81_v4  ;;  %934 = vmatprep.subr.bf16.mxu1 %v6603_v14  ;;  %v91_v19 = vld [vmem:[%s9816_s0 + $0x68] sm:$0xff]  ;;  %v6609_v22 = vld [vmem:[#allocation2 + $0x34] ss:$8 sps:$4 sm:$0xff]   ;;  %v6611_v24 = vld [vmem:[#allocation2 + $0x30] ss:$8 sps:$4 sm:$0xff]  }
  0x3f   :  { %6340 = vmatprep.mubr.msk.f32.mxu0 %vm150_vm0, %v82_v5  ;;  %v6608_v21 = vld [vmem:[#allocation2 + $0x20] ss:$8 sps:$4 sm:$0xff]   ;;  %v93_v23 = vld [vmem:[%s9816_s0 + $0x78] sm:$0xff]  ;;  %v6612_v26 = vld [vmem:[#allocation2 + $0x44] ss:$8 sps:$4 sm:$0xff]  }
  0x40   :  { %v94_v25 = vld [vmem:[%s9816_s0 + $0x80] sm:$0xff]  ;;  %v95_v27 = vld [vmem:[%s9816_s0 + $0x88] sm:$0xff]  ;;  %v96_v29 = vld [vmem:[%s9816_s0 + $0x90] sm:$0xff] }
  0x41   :  { %935 = vmatpush1.bf16.msra.mxu1 %v6605_v16  ;;  %v6614_v28 = vld [vmem:[#allocation2 + $0x40] ss:$8 sps:$4 sm:$0xff]   ;;  %v6615_v30 = vld [vmem:[#allocation2 + $0x54] ss:$8 sps:$4 sm:$0xff]   ;;  %v6617_v32 = vld [vmem:[#allocation2 + $0x50] ss:$8 sps:$4 sm:$0xff]  }
  0x42   :  { %6341 = vmatmul.mubr.msk.f32.gmra.mrb[4].mxu0 %vm150_vm0, %v83_v6  ;;  %936 = vmatprep.subr.bf16.mxu1 %v6606_v18  ;;  %v97_v31 = vld [vmem:[%s9816_s0 + $0x98] sm:$0xff]  ;;  %v98_v33 = vld [vmem:[%s9816_s0 + $0xa0] sm:$0xff]  ;;  %v99_v34 = vld [vmem:[%s9816_s0 + $0xa8] sm:$0xff] }
  0x43   :  { %6343 = vmatprep.mubr.msk.f32.mxu0 %vm150_vm0, %v84_v7  ;;  %v100_v35 = vld [vmem:[%s9816_s0 + $0xb0] sm:$0xff]  ;;  %v101_v36 = vld [vmem:[%s9816_s0 + $0xb8] sm:$0xff]  ;;  %v102_v37 = vld [vmem:[%s9816_s0 + $0xc0] sm:$0xff] }
  0x44   :  { %v103_v38 = vld [vmem:[%s9816_s0 + $0xc8] sm:$0xff]  ;;  %v104_v39 = vld [vmem:[%s9816_s0 + $0xd0] sm:$0xff]  ;;  %v105_v40 = vld [vmem:[%s9816_s0 + $0xd8] sm:$0xff] }
  0x45   :  { %937 = vmatpush1.bf16.msra.mxu1 %v6608_v21  ;;  %v106_v41 = vld [vmem:[%s9816_s0 + $0xe0] sm:$0xff]  ;;  %v107_v42 = vld [vmem:[%s9816_s0 + $0xe8] sm:$0xff]  ;;  %v108_v43 = vld [vmem:[%s9816_s0 + $0xf0] sm:$0xff] }
  0x46   :  { %6344 = vmatmul.mubr.msk.f32.gmra.mrb[6].mxu0 %vm150_vm0, %v85_v8  ;;  %938 = vmatprep.subr.bf16.mxu1 %v6609_v22  ;;  %v109_v44 = vld [vmem:[%s9816_s0 + $0xf8] sm:$0xff]  ;;  %v110_v45 = vld [vmem:[%s9816_s0 + $0x100] sm:$0xff]  ;;  %v111_v46 = vld [vmem:[%s9816_s0 + $0x108] sm:$0xff] }
  0x47   :  { %6346 = vmatprep.mubr.msk.f32.mxu0 %vm150_vm0, %v86_v9  ;;  %v112_v47 = vld [vmem:[%s9816_s0 + $0x110] sm:$0xff]  ;;  %v113_v48 = vld [vmem:[%s9816_s0 + $0x118] sm:$0xff]  ;;  %v114_v49 = vld [vmem:[%s9816_s0 + $0x120] sm:$0xff] }
  0x48   :  { %v115_v50 = vld [vmem:[%s9816_s0 + $0x128] sm:$0xff]  ;;  %v116_v51 = vld [vmem:[%s9816_s0 + $0x130] sm:$0xff]  ;;  %v117_v52 = vld [vmem:[%s9816_s0 + $0x138] sm:$0xff] }
  0x49   :  { %939 = vmatpush1.bf16.msra.mxu1 %v6611_v24  ;;  %v118_v53 = vld [vmem:[%s9816_s0 + $0x140] sm:$0xff]  ;;  %v119_v54 = vld [vmem:[%s9816_s0 + $0x148] sm:$0xff]  ;;  %v120_v55 = vld [vmem:[%s9816_s0 + $0x150] sm:$0xff] }
  0x4a   :  { %6347 = vmatmul.mubr.msk.f32.gmra.mrb[8].mxu0 %vm150_vm0, %v87_v10  ;;  %940 = vmatprep.subr.bf16.mxu1 %v6612_v26  ;;  %v121_v56 = vld [vmem:[%s9816_s0 + $0x158] sm:$0xff]  ;;  %v122_v57 = vld [vmem:[%s9816_s0 + $0x160] sm:$0xff]  ;;  %v123_v60 = vld [vmem:[%s9816_s0 + $0x168] sm:$0xff] }
  0x4b   :  { %6349 = vmatprep.mubr.msk.f32.mxu0 %vm150_vm0, %v88_v11  ;;  %v6618_v58 = vld [vmem:[#allocation2 + $0x64] ss:$8 sps:$4 sm:$0xff]   ;;  %v6620_v59 = vld [vmem:[#allocation2 + $0x60] ss:$8 sps:$4 sm:$0xff]   ;;  %v6621_v61 = vld [vmem:[#allocation2 + $0x74] ss:$8 sps:$4 sm:$0xff]  }
  0x4c   :  { %v124_v62 = vld [vmem:[%s9816_s0 + $0x170] sm:$0xff]  ;;  %v125_v0 = vld [vmem:[%s9816_s0 + $0x178] sm:$0xff]  ;;  %v126_v1 = vld [vmem:[%s9816_s0 + $0x180] sm:$0xff] }
  0x4d   :  { %941 = vmatpush1.bf16.msra.mxu1 %v6614_v28  ;;  %v6623_v63 = vld [vmem:[#allocation2 + $0x70] ss:$8 sps:$4 sm:$0xff]   ;;  %v127_v3 = vld [vmem:[%s9816_s0 + $0x188] sm:$0xff]  ;;  %v130_v6 = vld [vmem:[%s9816_s0 + $0x1a0] sm:$0xff] }
  0x4e   :  { %6350 = vmatmul.mubr.msk.f32.gmra.mrb[10].mxu0 %vm150_vm0, %v89_v15  ;;  %942 = vmatprep.subr.bf16.mxu1 %v6615_v30  ;;  %v128_v4 = vld [vmem:[%s9816_s0 + $0x190] sm:$0xff]  ;;  %v129_v5 = vld [vmem:[%s9816_s0 + $0x198] sm:$0xff]  ;;  %v131_v7 = vld [vmem:[%s9816_s0 + $0x1a8] sm:$0xff] }
  0x4f   :  { %6352 = vmatprep.mubr.msk.f32.mxu0 %vm150_vm0, %v90_v17  ;;  %v132_v8 = vld [vmem:[%s9816_s0 + $0x1b0] sm:$0xff]  ;;  %v133_v9 = vld [vmem:[%s9816_s0 + $0x1b8] sm:$0xff]  ;;  %v134_v10 = vld [vmem:[%s9816_s0 + $0x1c0] sm:$0xff] }
  0x50   :  { %v135_v11 = vld [vmem:[%s9816_s0 + $0x1c8] sm:$0xff]  ;;  %v136_v12 = vld [vmem:[%s9816_s0 + $0x1d0] sm:$0xff]  ;;  %v137_v13 = vld [vmem:[%s9816_s0 + $0x1d8] sm:$0xff] }
  0x51   :  { %943 = vmatpush1.bf16.msra.mxu1 %v6617_v32  ;;  %v138_v14 = vld [vmem:[%s9816_s0 + $0x1e0] sm:$0xff]  ;;  %v139_v15 = vld [vmem:[%s9816_s0 + $0x1e8] sm:$0xff]  ;;  %v140_v16 = vld [vmem:[%s9816_s0 + $0x1f0] sm:$0xff] }
  0x52   :  { %6353 = vmatmul.mubr.msk.f32.gmra.mrb[12].mxu0 %vm150_vm0, %v91_v19  ;;  %944 = vmatprep.subr.bf16.mxu1 %v6618_v58  ;;  %v141_v17 = vld [vmem:[%s9816_s0 + $0x1f8] sm:$0xff]  ;;  %v7404_v18 = vld [vmem:[%s9818_s2] ss:$0 sm:$0xff] }
  0x53   :  { %6355 = vmatprep.mubr.msk.f32.mxu0 %vm150_vm0, %v92_v20 }
  0x55   :  { %945 = vmatpush1.bf16.msra.mxu1 %v6620_v59 }
  0x56   :  { %6356 = vmatmul.mubr.msk.f32.gmra.mrb[14].mxu0 %vm150_vm0, %v93_v23  ;;  %946 = vmatprep.subr.bf16.mxu1 %v6621_v61 }
  0x57   :  { %6358 = vmatprep.mubr.msk.f32.mxu0 %vm150_vm0, %v94_v25 }
  0x59   :  { %947 = vmatpush1.bf16.msra.mxu1 %v6623_v63 }
  0x5a   :  { %6359 = vmatmul.mubr.msk.f32.gmra.mrb[16].mxu0 %vm150_vm0, %v95_v27 }
  0x5b   :  { %6361 = vmatprep.mubr.msk.f32.mxu0 %vm150_vm0, %v96_v29 }
  0x5e   :  { %6362 = vmatmul.mubr.msk.f32.gmra.mrb[18].mxu0 %vm150_vm0, %v97_v31 }
  0x5f   :  { %6364 = vmatprep.mubr.msk.f32.mxu0 %vm150_vm0, %v98_v33 }
  0x62   :  { %6365 = vmatmul.mubr.msk.f32.gmra.mrb[20].mxu0 %vm150_vm0, %v99_v34 }
  0x63   :  { %6367 = vmatprep.mubr.msk.f32.mxu0 %vm150_vm0, %v100_v35 }
  0x66   :  { %6368 = vmatmul.mubr.msk.f32.gmra.mrb[22].mxu0 %vm150_vm0, %v101_v36 }
  0x67   :  { %6370 = vmatprep.mubr.msk.f32.mxu0 %vm150_vm0, %v102_v37 }
  0x6a   :  { %6371 = vmatmul.mubr.msk.f32.gmra.mrb[24].mxu0 %vm150_vm0, %v103_v38 }
  0x6b   :  { %6373 = vmatprep.mubr.msk.f32.mxu0 %vm150_vm0, %v104_v39 }
  0x6e   :  { %6374 = vmatmul.mubr.msk.f32.gmra.mrb[26].mxu0 %vm150_vm0, %v105_v40 }
  0x6f   :  { %6376 = vmatprep.mubr.msk.f32.mxu0 %vm150_vm0, %v106_v41 }
  0x72   :  { %6377 = vmatmul.mubr.msk.f32.gmra.mrb[28].mxu0 %vm150_vm0, %v107_v42 }
  0x73   :  { %6379 = vmatprep.mubr.msk.f32.mxu0 %vm150_vm0, %v108_v43 }
  0x76   :  { %6380 = vmatmul.mubr.msk.f32.gmra.mrb[30].mxu0 %vm150_vm0, %v109_v44 }
  0x77   :  { %6382 = vmatprep.mubr.msk.f32.mxu0 %vm150_vm0, %v110_v45 }
  0x7a   :  { %6383 = vmatmul.mubr.msk.f32.gmra.mrb[32].mxu0 %vm150_vm0, %v111_v46 }
  0x7b   :  { %6385 = vmatprep.mubr.msk.f32.mxu0 %vm150_vm0, %v112_v47 }
  0x7e   :  { %6386 = vmatmul.mubr.msk.f32.gmra.mrb[34].mxu0 %vm150_vm0, %v113_v48 }
  0x7f   :  { %6388 = vmatprep.mubr.msk.f32.mxu0 %vm150_vm0, %v114_v49 }
  0x82   :  { %6389 = vmatmul.mubr.msk.f32.gmra.mrb[36].mxu0 %vm150_vm0, %v115_v50 }
  0x83   :  { %6391 = vmatprep.mubr.msk.f32.mxu0 %vm150_vm0, %v116_v51 }
  0x86   :  { %6392 = vmatmul.mubr.msk.f32.gmra.mrb[38].mxu0 %vm150_vm0, %v117_v52 }
  0x87   :  { %6394 = vmatprep.mubr.msk.f32.mxu0 %vm150_vm0, %v118_v53 }
  0x8a   :  { %6395 = vmatmul.mubr.msk.f32.gmra.mrb[40].mxu0 %vm150_vm0, %v119_v54 }
  0x8b   :  { %6397 = vmatprep.mubr.msk.f32.mxu0 %vm150_vm0, %v120_v55 }
  0x8e   :  { %6398 = vmatmul.mubr.msk.f32.gmra.mrb[42].mxu0 %vm150_vm0, %v121_v56 }
  0x8f   :  { %6400 = vmatprep.mubr.msk.f32.mxu0 %vm150_vm0, %v122_v57 }
  0x92   :  { %6401 = vmatmul.mubr.msk.f32.gmra.mrb[44].mxu0 %vm150_vm0, %v123_v60 }
  0x93   :  { %6403 = vmatprep.mubr.msk.f32.mxu0 %vm150_vm0, %v124_v62 }
  0x96   :  { %6404 = vmatmul.mubr.msk.f32.gmra.mrb[46].mxu0 %vm150_vm0, %v125_v0 }
  0x97   :  { %6406 = vmatprep.mubr.msk.f32.mxu0 %vm150_vm0, %v126_v1 }
  0x9a   :  { %6407 = vmatmul.mubr.msk.f32.gmra.mrb[48].mxu0 %vm150_vm0, %v127_v3 }
  0x9b   :  { %6409 = vmatprep.mubr.msk.f32.mxu0 %vm150_vm0, %v128_v4 }
  0x9e   :  { %6410 = vmatmul.mubr.msk.f32.gmra.mrb[50].mxu0 %vm150_vm0, %v129_v5 }
  0x9f   :  { %6412 = vmatprep.mubr.msk.f32.mxu0 %vm150_vm0, %v130_v6 }
  0xa2   :  { %6413 = vmatmul.mubr.msk.f32.gmra.mrb[52].mxu0 %vm150_vm0, %v131_v7 }
  0xa3   :  { %6415 = vmatprep.mubr.msk.f32.mxu0 %vm150_vm0, %v132_v8 }
  0xa6   :  { %6416 = vmatmul.mubr.msk.f32.gmra.mrb[54].mxu0 %vm150_vm0, %v133_v9 }
  0xa7   :  { %6418 = vmatprep.mubr.msk.f32.mxu0 %vm150_vm0, %v134_v10 }
  0xaa   :  { %6419 = vmatmul.mubr.msk.f32.gmra.mrb[56].mxu0 %vm150_vm0, %v135_v11 }
  0xab   :  { %6421 = vmatprep.mubr.msk.f32.mxu0 %vm150_vm0, %v136_v12 }
  0xae   :  { %6422 = vmatmul.mubr.msk.f32.gmra.mrb[58].mxu0 %vm150_vm0, %v137_v13 }
  0xaf   :  { %6424 = vmatprep.mubr.msk.f32.mxu0 %vm150_vm0, %v138_v14 }
  0xb2   :  { %6425 = vmatmul.mubr.msk.f32.gmra.mrb[60].mxu0 %vm150_vm0, %v139_v15 }
  0xb3   :  { %6427 = vmatprep.mubr.msk.f32.mxu0 %vm150_vm0, %v140_v16 }
  0xb6   :  { %6428 = vmatmul.mubr.msk.f32.gmra.mrb[62].mxu0 %vm150_vm0, %v141_v17 }
 0x10d   :  { %v6336_v19 = vpop.f32.mrb[0].mxu0 }
 0x10e   :  { %v415_v20 = vadd.f32 %v6336_v19, %v7404_v18  ;;  %v409_v21 = vpop.f32.mrb[1].mxu0 }
 0x10f   :  { %v410_v22 = vadd.f32 %v7404_v18, %v409_v21 }
 0x110   :  { %v729_v23 = vmax.f32 %v415_v20, 0.0 }
 0x111   :  { %v728_v24 = vmax.f32 %v410_v22, 0.0  ;;  %v6339_v25 = vpop.f32.mrb[2].mxu0 }
 0x112   :  { %v425_v26 = vadd.f32 %v6339_v25, %v7404_v18  ;;  %v419_v27 = vpop.f32.mrb[3].mxu0 }
 0x113   :  { %v420_v28 = vadd.f32 %v7404_v18, %v419_v27  ;;  %v792_v29 = vpack.c.bf16 %v729_v23, %v728_v24 }
 0x114   :  { %v731_v30 = vmax.f32 %v425_v26, 0.0 }
 0x115   :  { %v730_v31 = vmax.f32 %v420_v28, 0.0  ;;  %965 = vmatmul.mubr.bf16.vlgmr.msra.gmra.mrb[0].mxu1 %v792_v29  ;;  %v6342_v32 = vpop.f32.mrb[4].mxu0 }
 0x116   :  { %v435_v33 = vadd.f32 %v6342_v32, %v7404_v18  ;;  %974 = vmatprep.mubr.bf16.mxu1 %v7044_v2  ;;  %v429_v34 = vpop.f32.mrb[5].mxu0 }
 0x117   :  { %v430_v35 = vadd.f32 %v7404_v18, %v429_v34  ;;  %v793_v36 = vpack.c.bf16 %v731_v30, %v730_v31 }
 0x118   :  { %v733_v37 = vmax.f32 %v435_v33, 0.0 }
 0x119   :  { %v732_v38 = vmax.f32 %v430_v35, 0.0  ;;  %v6345_v39 = vpop.f32.mrb[6].mxu0 }
 0x11a   :  { %v445_v40 = vadd.f32 %v6345_v39, %v7404_v18  ;;  %v439_v41 = vpop.f32.mrb[7].mxu0 }
 0x11b   :  { %v440_v42 = vadd.f32 %v7404_v18, %v439_v41  ;;  %v794_v43 = vpack.c.bf16 %v733_v37, %v732_v38 }
 0x11c   :  { %v735_v44 = vmax.f32 %v445_v40, 0.0 }
 0x11d   :  { %975 = vmatmul.mubr.bf16.gmra.mrb[4].mxu1 %v793_v36  ;;  %v734_v45 = vmax.f32 %v440_v42, 0.0  ;;  %v6348_v46 = vpop.f32.mrb[8].mxu0 }
 0x11e   :  { %984 = vmatprep.mubr.bf16.mxu1 %v7044_v2  ;;  %v455_v47 = vadd.f32 %v6348_v46, %v7404_v18  ;;  %v449_v48 = vpop.f32.mrb[9].mxu0 }
 0x11f   :  { %v450_v49 = vadd.f32 %v7404_v18, %v449_v48  ;;  %v795_v50 = vpack.c.bf16 %v735_v44, %v734_v45 }
 0x120   :  { %v737_v51 = vmax.f32 %v455_v47, 0.0 }
 0x121   :  { %v736_v52 = vmax.f32 %v450_v49, 0.0  ;;  %v6351_v53 = vpop.f32.mrb[10].mxu0 }
 0x122   :  { %v465_v54 = vadd.f32 %v6351_v53, %v7404_v18  ;;  %v459_v55 = vpop.f32.mrb[11].mxu0 }
 0x123   :  { %v460_v56 = vadd.f32 %v7404_v18, %v459_v55  ;;  %v796_v57 = vpack.c.bf16 %v737_v51, %v736_v52 }
 0x124   :  { %v739_v58 = vmax.f32 %v465_v54, 0.0 }
 0x125   :  { %985 = vmatmul.mubr.bf16.gmra.mrb[8].mxu1 %v794_v43  ;;  %v738_v59 = vmax.f32 %v460_v56, 0.0  ;;  %v6354_v60 = vpop.f32.mrb[12].mxu0 }
 0x126   :  { %994 = vmatprep.mubr.bf16.mxu1 %v7044_v2  ;;  %v475_v61 = vadd.f32 %v6354_v60, %v7404_v18  ;;  %v469_v62 = vpop.f32.mrb[13].mxu0 }
 0x127   :  { %v470_v63 = vadd.f32 %v7404_v18, %v469_v62  ;;  %v797_v0 = vpack.c.bf16 %v739_v58, %v738_v59 }
 0x128   :  { %v741_v1 = vmax.f32 %v475_v61, 0.0 }
 0x129   :  { %v740_v3 = vmax.f32 %v470_v63, 0.0  ;;  %v6357_v4 = vpop.f32.mrb[14].mxu0 }
 0x12a   :  { %v485_v5 = vadd.f32 %v6357_v4, %v7404_v18  ;;  %v479_v6 = vpop.f32.mrb[15].mxu0 }
 0x12b   :  { %v480_v7 = vadd.f32 %v7404_v18, %v479_v6  ;;  %v798_v8 = vpack.c.bf16 %v741_v1, %v740_v3 }
 0x12c   :  { %v743_v9 = vmax.f32 %v485_v5, 0.0 }
 0x12d   :  { %995 = vmatmul.mubr.bf16.gmra.mrb[12].mxu1 %v795_v50  ;;  %v742_v10 = vmax.f32 %v480_v7, 0.0  ;;  %v6360_v11 = vpop.f32.mrb[16].mxu0 }
 0x12e   :  { %1004 = vmatprep.mubr.bf16.mxu1 %v7044_v2  ;;  %v495_v12 = vadd.f32 %v6360_v11, %v7404_v18  ;;  %v489_v13 = vpop.f32.mrb[17].mxu0 }
 0x12f   :  { %v490_v14 = vadd.f32 %v7404_v18, %v489_v13  ;;  %v799_v15 = vpack.c.bf16 %v743_v9, %v742_v10 }
 0x130   :  { %v745_v16 = vmax.f32 %v495_v12, 0.0 }
 0x131   :  { %v744_v17 = vmax.f32 %v490_v14, 0.0  ;;  %v6363_v19 = vpop.f32.mrb[18].mxu0 }
 0x132   :  { %v505_v20 = vadd.f32 %v6363_v19, %v7404_v18  ;;  %v499_v21 = vpop.f32.mrb[19].mxu0 }
 0x133   :  { %v500_v22 = vadd.f32 %v7404_v18, %v499_v21  ;;  %v7430_v23 = vpack.c.bf16 %v745_v16, %v744_v17  ;;  %v6626_v17 = vld [vmem:[#allocation5 + $0xc] ss:$16 sps:$4 sm:$0xff]  }
 0x134   :  { %v747_v24 = vmax.f32 %v505_v20, 0.0  ;;  %v6624_v20 = vld [vmem:[#allocation5 + $0x8] ss:$16 sps:$4 sm:$0xff]   ;;  %3001 = vmatprep.subr.bf16.mxu1 %v6626_v17 }
 0x135   :  { %1005 = vmatmul.mubr.bf16.gmra.mrb[16].mxu1 %v796_v57  ;;  %v746_v25 = vmax.f32 %v500_v22, 0.0  ;;  %v6366_v26 = vpop.f32.mrb[20].mxu0  ;;  %v6642_v17 = vld [vmem:[#allocation5 + $0xc8] ss:$16 sps:$4 sm:$0xff]  }
 0x136   :  { %1014 = vmatprep.mubr.bf16.mxu1 %v7044_v2  ;;  %v515_v27 = vadd.f32 %v6366_v26, %v7404_v18  ;;  %v509_v28 = vpop.f32.mrb[21].mxu0  ;;  %3002 = vmatpush1.bf16.msra.mxu1 %v6624_v20 }
 0x137   :  { %v510_v29 = vadd.f32 %v7404_v18, %v509_v28  ;;  %v7435_v30 = vpack.c.bf16 %v747_v24, %v746_v25  ;;  %v6629_v24 = vld [vmem:[#allocation5 + $0x2c] ss:$16 sps:$4 sm:$0xff]  }
 0x138   :  { %v749_v31 = vmax.f32 %v515_v27, 0.0  ;;  %v6627_v27 = vld [vmem:[#allocation5 + $0x28] ss:$16 sps:$4 sm:$0xff]   ;;  %3003 = vmatprep.subr.bf16.mxu1 %v6629_v24 }
 0x139   :  { %v748_v32 = vmax.f32 %v510_v29, 0.0  ;;  %v6369_v33 = vpop.f32.mrb[22].mxu0 }
 0x13a   :  { %v525_v34 = vadd.f32 %v6369_v33, %v7404_v18  ;;  %v519_v35 = vpop.f32.mrb[23].mxu0  ;;  %3004 = vmatpush1.bf16.msra.mxu1 %v6627_v27 }
 0x13b   :  { %v520_v36 = vadd.f32 %v7404_v18, %v519_v35  ;;  %v7439_v37 = vpack.c.bf16 %v749_v31, %v748_v32 }
 0x13c   :  { %v751_v38 = vmax.f32 %v525_v34, 0.0 }
 0x13d   :  { %1015 = vmatmul.mubr.bf16.gmra.mrb[20].mxu1 %v797_v0  ;;  %v750_v39 = vmax.f32 %v520_v36, 0.0  ;;  %v6372_v40 = vpop.f32.mrb[24].mxu0 }
 0x13e   :  { %1024 = vmatprep.mubr.bf16.mxu1 %v7044_v2  ;;  %v535_v41 = vadd.f32 %v6372_v40, %v7404_v18  ;;  %v529_v42 = vpop.f32.mrb[25].mxu0  ;;  %v6630_v40 = vld [vmem:[#allocation5 + $0x48] ss:$16 sps:$4 sm:$0xff]  }
 0x13f   :  { %v530_v43 = vadd.f32 %v7404_v18, %v529_v42  ;;  %v7444_v44 = vpack.c.bf16 %v751_v38, %v750_v39  ;;  %v6632_v38 = vld [vmem:[#allocation5 + $0x4c] ss:$16 sps:$4 sm:$0xff]  }
 0x140   :  { %v753_v45 = vmax.f32 %v535_v41, 0.0  ;;  %3005 = vmatprep.subr.bf16.mxu1 %v6632_v38 }
 0x141   :  { %v752_v46 = vmax.f32 %v530_v43, 0.0  ;;  %v6375_v47 = vpop.f32.mrb[26].mxu0  ;;  %v6635_v43 = vld [vmem:[#allocation5 + $0x6c] ss:$16 sps:$4 sm:$0xff]   ;;  %3006 = vmatpush1.bf16.msra.mxu1 %v6630_v40 }
 0x142   :  { %v545_v48 = vadd.f32 %v6375_v47, %v7404_v18  ;;  %v539_v49 = vpop.f32.mrb[27].mxu0  ;;  %v6633_v47 = vld [vmem:[#allocation5 + $0x68] ss:$16 sps:$4 sm:$0xff]   ;;  %3007 = vmatprep.subr.bf16.mxu1 %v6635_v43 }
 0x143   :  { %v540_v50 = vadd.f32 %v7404_v18, %v539_v49  ;;  %v7448_v51 = vpack.c.bf16 %v753_v45, %v752_v46 }
 0x144   :  { %v755_v52 = vmax.f32 %v545_v48, 0.0 }
 0x145   :  { %1025 = vmatmul.mubr.bf16.gmra.mrb[24].mxu1 %v798_v8  ;;  %v754_v53 = vmax.f32 %v540_v50, 0.0  ;;  %v6378_v54 = vpop.f32.mrb[28].mxu0 }
 0x146   :  { %1034 = vmatprep.mubr.bf16.mxu1 %v7044_v2  ;;  %v555_v55 = vadd.f32 %v6378_v54, %v7404_v18  ;;  %v549_v56 = vpop.f32.mrb[29].mxu0  ;;  %3008 = vmatpush1.bf16.msra.mxu1 %v6633_v47  ;;  %v6653_v47 = vld [vmem:[#allocation5 + $0x12c] ss:$16 sps:$4 sm:$0xff]  }
 0x147   :  { %v550_v57 = vadd.f32 %v7404_v18, %v549_v56  ;;  %v7453_v58 = vpack.c.bf16 %v755_v52, %v754_v53 }
 0x148   :  { %v757_v59 = vmax.f32 %v555_v55, 0.0 }
 0x149   :  { %v756_v60 = vmax.f32 %v550_v57, 0.0  ;;  %v6381_v61 = vpop.f32.mrb[30].mxu0  ;;  %v6638_v57 = vld [vmem:[#allocation5 + $0x8c] ss:$16 sps:$4 sm:$0xff]  }
 0x14a   :  { %v565_v62 = vadd.f32 %v6381_v61, %v7404_v18  ;;  %v559_v63 = vpop.f32.mrb[31].mxu0  ;;  %3009 = vmatprep.subr.bf16.mxu1 %v6638_v57  ;;  %v6656_v57 = vld [vmem:[#allocation5 + $0x14c] ss:$16 sps:$4 sm:$0xff]  }
 0x14b   :  { %v560_v0 = vadd.f32 %v7404_v18, %v559_v63  ;;  %v7457_v1 = vpack.c.bf16 %v757_v59, %v756_v60  ;;  %v6636_v60 = vld [vmem:[#allocation5 + $0x88] ss:$16 sps:$4 sm:$0xff]  }
 0x14c   :  { %v759_v3 = vmax.f32 %v565_v62, 0.0  ;;  %3010 = vmatpush1.bf16.msra.mxu1 %v6636_v60  ;;  %v6654_v60 = vld [vmem:[#allocation5 + $0x148] ss:$16 sps:$4 sm:$0xff]  }
 0x14d   :  { %1035 = vmatmul.mubr.bf16.gmra.mrb[28].mxu1 %v799_v15  ;;  %v758_v4 = vmax.f32 %v560_v0, 0.0  ;;  %v6384_v5 = vpop.f32.mrb[32].mxu0 }
 0x14e   :  { %1044 = vmatprep.mubr.bf16.mxu1 %v7044_v2  ;;  %v575_v6 = vadd.f32 %v6384_v5, %v7404_v18  ;;  %v569_v7 = vpop.f32.mrb[33].mxu0  ;;  %v6641_v5 = vld [vmem:[#allocation5 + $0xac] ss:$16 sps:$4 sm:$0xff]  }
 0x14f   :  { %v570_v8 = vadd.f32 %v7404_v18, %v569_v7  ;;  %v7462_v9 = vpack.c.bf16 %v759_v3, %v758_v4  ;;  %v6639_v7 = vld [vmem:[#allocation5 + $0xa8] ss:$16 sps:$4 sm:$0xff]   ;;  %3011 = vmatprep.subr.bf16.mxu1 %v6641_v5 }
 0x150   :  { %v761_v10 = vmax.f32 %v575_v6, 0.0  ;;  %3012 = vmatpush1.bf16.msra.mxu1 %v6639_v7 }
 0x151   :  { %v760_v11 = vmax.f32 %v570_v8, 0.0  ;;  %v6387_v12 = vpop.f32.mrb[34].mxu0 }
 0x152   :  { %v585_v13 = vadd.f32 %v6387_v12, %v7404_v18  ;;  %v579_v14 = vpop.f32.mrb[35].mxu0 }
 0x153   :  { %v580_v16 = vadd.f32 %v7404_v18, %v579_v14  ;;  %v7466_v15 = vpack.c.bf16 %v761_v10, %v760_v11  ;;  %v6644_v14 = vld [vmem:[#allocation5 + $0xcc] ss:$16 sps:$4 sm:$0xff]  }
 0x154   :  { %v763_v19 = vmax.f32 %v585_v13, 0.0  ;;  %3013 = vmatprep.subr.bf16.mxu1 %v6644_v14 }
 0x155   :  { %1045 = vmatmul.mubr.bf16.gmra.mrb[32].mxu1 %v7430_v23  ;;  %v762_v21 = vmax.f32 %v580_v16, 0.0  ;;  %v6390_v22 = vpop.f32.mrb[36].mxu0 }
 0x156   :  { %1054 = vmatprep.mubr.bf16.mxu1 %v7044_v2  ;;  %v595_v25 = vadd.f32 %v6390_v22, %v7404_v18  ;;  %v589_v26 = vpop.f32.mrb[37].mxu0  ;;  %3014 = vmatpush1.bf16.msra.mxu1 %v6642_v17 }
 0x157   :  { %v590_v28 = vadd.f32 %v7404_v18, %v589_v26  ;;  %v7472_v29 = vpack.c.bf16 %v763_v19, %v762_v21  ;;  %v6647_v26 = vld [vmem:[#allocation5 + $0xec] ss:$16 sps:$4 sm:$0xff]  }
 0x158   :  { %v765_v31 = vmax.f32 %v595_v25, 0.0  ;;  %3015 = vmatprep.subr.bf16.mxu1 %v6647_v26 }
 0x159   :  { %v764_v32 = vmax.f32 %v590_v28, 0.0  ;;  %v6393_v33 = vpop.f32.mrb[38].mxu0  ;;  %v6645_v28 = vld [vmem:[#allocation5 + $0xe8] ss:$16 sps:$4 sm:$0xff]  }
 0x15a   :  { %v605_v23 = vadd.f32 %v6393_v33, %v7404_v18  ;;  %v599_v34 = vpop.f32.mrb[39].mxu0  ;;  %3016 = vmatpush1.bf16.msra.mxu1 %v6645_v28  ;;  %v6665_v28 = vld [vmem:[#allocation5 + $0x1ac] ss:$16 sps:$4 sm:$0xff]  }
 0x15b   :  { %v600_v35 = vadd.f32 %v7404_v18, %v599_v34  ;;  %v7476_v36 = vpack.c.bf16 %v765_v31, %v764_v32 }
 0x15c   :  { %v767_v39 = vmax.f32 %v605_v23, 0.0 }
 0x15d   :  { %1055 = vmatmul.mubr.bf16.gmra.mrb[36].mxu1 %v7435_v30  ;;  %v766_v41 = vmax.f32 %v600_v35, 0.0  ;;  %v6396_v42 = vpop.f32.mrb[40].mxu0  ;;  %v6650_v35 = vld [vmem:[#allocation5 + $0x10c] ss:$16 sps:$4 sm:$0xff]  }
 0x15e   :  { %1064 = vmatprep.mubr.bf16.mxu1 %v7044_v2  ;;  %v615_v45 = vadd.f32 %v6396_v42, %v7404_v18  ;;  %v609_v46 = vpop.f32.mrb[41].mxu0  ;;  %3017 = vmatprep.subr.bf16.mxu1 %v6650_v35 }
 0x15f   :  { %v610_v48 = vadd.f32 %v7404_v18, %v609_v46  ;;  %v7482_v49 = vpack.c.bf16 %v767_v39, %v766_v41  ;;  %v6648_v39 = vld [vmem:[#allocation5 + $0x108] ss:$16 sps:$4 sm:$0xff]  }
 0x160   :  { %v769_v50 = vmax.f32 %v615_v45, 0.0  ;;  %3018 = vmatpush1.bf16.msra.mxu1 %v6648_v39  ;;  %v6668_v39 = vld [vmem:[#allocation5 + $0x1cc] ss:$16 sps:$4 sm:$0xff]  }
 0x161   :  { %v768_v52 = vmax.f32 %v610_v48, 0.0  ;;  %v6399_v53 = vpop.f32.mrb[42].mxu0  ;;  %3019 = vmatprep.subr.bf16.mxu1 %v6653_v47  ;;  %v6669_v47 = vld [vmem:[#allocation5 + $0x1e8] ss:$16 sps:$4 sm:$0xff]  }
 0x162   :  { %v625_v30 = vadd.f32 %v6399_v53, %v7404_v18  ;;  %v619_v54 = vpop.f32.mrb[43].mxu0 }
 0x163   :  { %v620_v55 = vadd.f32 %v7404_v18, %v619_v54  ;;  %v7486_v56 = vpack.c.bf16 %v769_v50, %v768_v52  ;;  %v6651_v50 = vld [vmem:[#allocation5 + $0x128] ss:$16 sps:$4 sm:$0xff]  }
 0x164   :  { %v771_v59 = vmax.f32 %v625_v30, 0.0  ;;  %3020 = vmatpush1.bf16.msra.mxu1 %v6651_v50 }
 0x165   :  { %1065 = vmatmul.mubr.bf16.gmra.mrb[40].mxu1 %v7439_v37  ;;  %v770_v61 = vmax.f32 %v620_v55, 0.0  ;;  %v6402_v62 = vpop.f32.mrb[44].mxu0  ;;  %3021 = vmatprep.subr.bf16.mxu1 %v6656_v57 }
 0x166   :  { %1074 = vmatprep.mubr.bf16.mxu1 %v7044_v2  ;;  %v635_v63 = vadd.f32 %v6402_v62, %v7404_v18  ;;  %v629_v0 = vpop.f32.mrb[45].mxu0 }
 0x167   :  { %v630_v3 = vadd.f32 %v7404_v18, %v629_v0  ;;  %v7492_v4 = vpack.c.bf16 %v771_v59, %v770_v61 }
 0x168   :  { %v773_v6 = vmax.f32 %v635_v63, 0.0  ;;  %3022 = vmatpush1.bf16.msra.mxu1 %v6654_v60 }
 0x169   :  { %v772_v8 = vmax.f32 %v630_v3, 0.0  ;;  %v6405_v10 = vpop.f32.mrb[46].mxu0 }
 0x16a   :  { %v645_v37 = vadd.f32 %v6405_v10, %v7404_v18  ;;  %v639_v11 = vpop.f32.mrb[47].mxu0 }
 0x16b   :  { %v640_v12 = vadd.f32 %v7404_v18, %v639_v11  ;;  %v7496_v13 = vpack.c.bf16 %v773_v6, %v772_v8  ;;  %v6659_v6 = vld [vmem:[#allocation5 + $0x16c] ss:$16 sps:$4 sm:$0xff]   ;;  %v6657_v8 = vld [vmem:[#allocation5 + $0x168] ss:$16 sps:$4 sm:$0xff]  }
 0x16c   :  { %v775_v16 = vmax.f32 %v645_v37, 0.0  ;;  %3023 = vmatprep.subr.bf16.mxu1 %v6659_v6 }
 0x16d   :  { %1075 = vmatmul.mubr.bf16.gmra.mrb[44].mxu1 %v7444_v44  ;;  %v774_v19 = vmax.f32 %v640_v12, 0.0  ;;  %v6408_v20 = vpop.f32.mrb[48].mxu0 }
 0x16e   :  { %1084 = vmatprep.mubr.bf16.mxu1 %v7044_v2  ;;  %v655_v21 = vadd.f32 %v6408_v20, %v7404_v18  ;;  %v649_v22 = vpop.f32.mrb[49].mxu0  ;;  %3024 = vmatpush1.bf16.msra.mxu1 %v6657_v8 }
 0x16f   :  { %v650_v24 = vadd.f32 %v7404_v18, %v649_v22  ;;  %v7502_v25 = vpack.c.bf16 %v775_v16, %v774_v19  ;;  %v6662_v16 = vld [vmem:[#allocation5 + $0x18c] ss:$16 sps:$4 sm:$0xff]   ;;  %v6660_v19 = vld [vmem:[#allocation5 + $0x188] ss:$16 sps:$4 sm:$0xff]  }
 0x170   :  { %v777_v27 = vmax.f32 %v655_v21, 0.0  ;;  %3025 = vmatprep.subr.bf16.mxu1 %v6662_v16 }
 0x171   :  { %v776_v31 = vmax.f32 %v650_v24, 0.0  ;;  %v6411_v32 = vpop.f32.mrb[50].mxu0 }
 0x172   :  { %v665_v44 = vadd.f32 %v6411_v32, %v7404_v18  ;;  %v659_v33 = vpop.f32.mrb[51].mxu0  ;;  %3026 = vmatpush1.bf16.msra.mxu1 %v6660_v19  ;;  %v6663_v32 = vld [vmem:[#allocation5 + $0x1a8] ss:$16 sps:$4 sm:$0xff]  }
 0x173   :  { %v660_v23 = vadd.f32 %v7404_v18, %v659_v33  ;;  %v7506_v34 = vpack.c.bf16 %v777_v27, %v776_v31  ;;  %3027 = vmatprep.subr.bf16.mxu1 %v6665_v28 }
 0x174   :  { %v779_v38 = vmax.f32 %v665_v44, 0.0 }
 0x175   :  { %1085 = vmatmul.mubr.bf16.gmra.mrb[48].mxu1 %v7448_v51  ;;  %v778_v40 = vmax.f32 %v660_v23, 0.0  ;;  %v6414_v41 = vpop.f32.mrb[52].mxu0 }
 0x176   :  { %1094 = vmatprep.mubr.bf16.mxu1 %v7044_v2  ;;  %v675_v42 = vadd.f32 %v6414_v41, %v7404_v18  ;;  %v669_v43 = vpop.f32.mrb[53].mxu0  ;;  %3028 = vmatpush1.bf16.msra.mxu1 %v6663_v32  ;;  %v6666_v41 = vld [vmem:[#allocation5 + $0x1c8] ss:$16 sps:$4 sm:$0xff]  }
 0x177   :  { %v670_v45 = vadd.f32 %v7404_v18, %v669_v43  ;;  %v7512_v46 = vpack.c.bf16 %v779_v38, %v778_v40  ;;  %3029 = vmatprep.subr.bf16.mxu1 %v6668_v39 }
 0x178   :  { %v781_v48 = vmax.f32 %v675_v42, 0.0 }
 0x179   :  { %v780_v52 = vmax.f32 %v670_v45, 0.0  ;;  %v6417_v53 = vpop.f32.mrb[54].mxu0  ;;  %v6671_v45 = vld [vmem:[#allocation5 + $0x1ec] ss:$16 sps:$4 sm:$0xff]  }
 0x17a   :  { %v685_v51 = vadd.f32 %v6417_v53, %v7404_v18  ;;  %v679_v30 = vpop.f32.mrb[55].mxu0  ;;  %3030 = vmatpush1.bf16.msra.mxu1 %v6666_v41 }
 0x17b   :  { %v680_v54 = vadd.f32 %v7404_v18, %v679_v30  ;;  %v7516_v55 = vpack.c.bf16 %v781_v48, %v780_v52  ;;  %3031 = vmatprep.subr.bf16.mxu1 %v6671_v45 }
 0x17c   :  { %v783_v59 = vmax.f32 %v685_v51, 0.0 }
 0x17d   :  { %1095 = vmatmul.mubr.bf16.gmra.mrb[52].mxu1 %v7453_v58  ;;  %v782_v61 = vmax.f32 %v680_v54, 0.0  ;;  %v6420_v62 = vpop.f32.mrb[56].mxu0 }
 0x17e   :  { %1104 = vmatprep.mubr.bf16.mxu1 %v7044_v2  ;;  %v695_v63 = vadd.f32 %v6420_v62, %v7404_v18  ;;  %v689_v0 = vpop.f32.mrb[57].mxu0  ;;  %3032 = vmatpush1.bf16.msra.mxu1 %v6669_v47 }
 0x17f   :  { %v690_v3 = vadd.f32 %v7404_v18, %v689_v0  ;;  %v7522_v5 = vpack.c.bf16 %v783_v59, %v782_v61 }
 0x180   :  { %v785_v7 = vmax.f32 %v695_v63, 0.0 }
 0x181   :  { %v784_v10 = vmax.f32 %v690_v3, 0.0  ;;  %v6423_v37 = vpop.f32.mrb[58].mxu0 }
 0x182   :  { %v705_v58 = vadd.f32 %v6423_v37, %v7404_v18  ;;  %v699_v11 = vpop.f32.mrb[59].mxu0 }
 0x183   :  { %v700_v12 = vadd.f32 %v7404_v18, %v699_v11  ;;  %v7526_v14 = vpack.c.bf16 %v785_v7, %v784_v10 }
 0x184   :  { %v787_v17 = vmax.f32 %v705_v58, 0.0 }
 0x185   :  { %1105 = vmatmul.mubr.bf16.gmra.mrb[56].mxu1 %v7457_v1  ;;  %v786_v20 = vmax.f32 %v700_v12, 0.0  ;;  %v6426_v21 = vpop.f32.mrb[60].mxu0 }
 0x186   :  { %1114 = vmatprep.mubr.bf16.mxu1 %v7044_v2  ;;  %v715_v22 = vadd.f32 %v6426_v21, %v7404_v18  ;;  %v709_v24 = vpop.f32.mrb[61].mxu0 }
 0x187   :  { %v710_v26 = vadd.f32 %v7404_v18, %v709_v24  ;;  %v7532_v27 = vpack.c.bf16 %v787_v17, %v786_v20 }
 0x188   :  { %v789_v31 = vmax.f32 %v715_v22, 0.0 }
 0x189   :  { %v788_v44 = vmax.f32 %v710_v26, 0.0  ;;  %v6429_v33 = vpop.f32.mrb[62].mxu0 }
 0x18a   :  { %v725_v1 = vadd.f32 %v6429_v33, %v7404_v18  ;;  %v719_v23 = vpop.f32.mrb[63].mxu0 }
 0x18b   :  { %v720_v35 = vadd.f32 %v7404_v18, %v719_v23  ;;  %v7536_v38 = vpack.c.bf16 %v789_v31, %v788_v44  ;;  %v842_v18 = vlaneseq }
 0x18c   :  { %v791_v40 = vmax.f32 %v725_v1, 0.0 }
 0x18d   :  { %1115 = vmatmul.mubr.bf16.gmra.mrb[60].mxu1 %v7462_v9  ;;  %v790_v42 = vmax.f32 %v720_v35, 0.0  ;;  %v7562_v9 = vshrl.u32 %v842_v18, 7 }
 0x18e   :  { %1124 = vmatprep.mubr.bf16.mxu1 %v7044_v2 }
 0x18f   :  { %v7540_v43 = vpack.c.bf16 %v791_v40, %v790_v42  ;;  %9911 = vst [vmem:[#allocation12_spill] sm:$0xff] %v7562_v9 }
 0x195   :  { %1125 = vmatmul.mubr.bf16.gmra.mrb[64].mxu1 %v7466_v15  ;;  %v7565_v15 = vsub.s32 0, %v7562_v9 }
 0x196   :  { %1134 = vmatprep.mubr.bf16.mxu1 %v7044_v2 }
 0x197   :  { %9912 = vst [vmem:[#allocation13_spill] sm:$0xff] %v7565_v15 }
 0x19d   :  { %1135 = vmatmul.mubr.bf16.gmra.mrb[68].mxu1 %v7472_v29  ;;  %v840_v29 = vld [vmem:[%s9820_s4] sm:$0x3] }
 0x19e   :  { %1144 = vmatprep.mubr.bf16.mxu1 %v7044_v2 }
 0x1a5   :  { %1145 = vmatmul.mubr.bf16.gmra.mrb[72].mxu1 %v7476_v36  ;;  %v7571_v36 = vsub.s32 1, %v7562_v9 }
 0x1a6   :  { %1154 = vmatprep.mubr.bf16.mxu1 %v7044_v2 }
 0x1a7   :  { %9913 = vst [vmem:[#allocation14_spill] sm:$0xff] %v7571_v36 }
 0x1ad   :  { %1155 = vmatmul.mubr.bf16.gmra.mrb[76].mxu1 %v7482_v49  ;;  %v7576_v49 = vrot.slane %v840_v29, %v7565_v15 }
 0x1ae   :  { %1164 = vmatprep.mubr.bf16.mxu1 %v7044_v2 }
 0x1b5   :  { %1165 = vmatmul.mubr.bf16.gmra.mrb[80].mxu1 %v7486_v56 }
 0x1b6   :  { %1174 = vmatprep.mubr.bf16.mxu1 %v7044_v2 }
 0x1bd   :  { %1175 = vmatmul.mubr.bf16.gmra.mrb[84].mxu1 %v7492_v4  ;;  %v7579_v4 = vrot.slane %v840_v29, %v7571_v36 }
 0x1be   :  { %1184 = vmatprep.mubr.bf16.mxu1 %v7044_v2 }
 0x1c5   :  { %1185 = vmatmul.mubr.bf16.gmra.mrb[88].mxu1 %v7496_v13 }
 0x1c6   :  { %1194 = vmatprep.mubr.bf16.mxu1 %v7044_v2 }
 0x1cd   :  { %1195 = vmatmul.mubr.bf16.gmra.mrb[92].mxu1 %v7502_v25 }
 0x1ce   :  { %1204 = vmatprep.mubr.bf16.mxu1 %v7044_v2 }
 0x1d5   :  { %1205 = vmatmul.mubr.bf16.gmra.mrb[96].mxu1 %v7506_v34 }
 0x1d6   :  { %1214 = vmatprep.mubr.bf16.mxu1 %v7044_v2 }
 0x1dd   :  { %1215 = vmatmul.mubr.bf16.gmra.mrb[100].mxu1 %v7512_v46 }
 0x1de   :  { %1224 = vmatprep.mubr.bf16.mxu1 %v7044_v2 }
 0x1e5   :  { %1225 = vmatmul.mubr.bf16.gmra.mrb[104].mxu1 %v7516_v55 }
 0x1e6   :  { %1234 = vmatprep.mubr.bf16.mxu1 %v7044_v2 }
 0x1e8   :  { %v966_v56 = vpop.f32.mrb[0].mxu1 }
 0x1e9   :  { %v968_v13 = vpop.f32.mrb[1].mxu1  ;;  %v967_v34 = vadd.f32 %v966_v56, %v7576_v49 }
 0x1ea   :  { %v970_v25 = vpop.f32.mrb[2].mxu1  ;;  %v969_v50 = vadd.f32 %v968_v13, %v7579_v4 }
 0x1eb   :  { %v971_v46 = vadd.f32 %v970_v25, %v7576_v49  ;;  %v972_v48 = vpop.f32.mrb[3].mxu1 }
 0x1ec   :  { %v973_v52 = vadd.f32 %v972_v48, %v7579_v4  ;;  %v6674_v48 = vld [vmem:[%s9821_s5 + $0x4] ss:$16 sps:$4 sm:$0xff]  }
 0x1ed   :  { %v1285_v53 = vmax.f32 %v967_v34, %v971_v46  ;;  %v7585_v51 = vpack.c.bf16 %v971_v46, %v967_v34  ;;  %1235 = vmatmul.mubr.bf16.gmra.mrb[108].mxu1 %v7522_v5  ;;  %v6672_v46 = vld [vmem:[%s9821_s5] ss:$16 sps:$4 sm:$0xff]   ;;  %2114 = vmatprep.subr.bf16.mxu0 %v6674_v48 }
 0x1ee   :  { %v1294_v30 = vmax.f32 %v969_v50, %v973_v52  ;;  %1244 = vmatprep.mubr.bf16.mxu1 %v7044_v2  ;;  %v7589_v54 = vpack.c.bf16 %v973_v52, %v969_v50  ;;  %2115 = vmatpush1.bf16.msra.mxu0 %v6672_v46 }
 0x1f0   :  { %v976_v55 = vpop.f32.mrb[4].mxu1 }
 0x1f1   :  { %v977_v57 = vadd.f32 %v976_v55, %v7576_v49  ;;  %v978_v59 = vpop.f32.mrb[5].mxu1 }
 0x1f2   :  { %v979_v60 = vadd.f32 %v978_v59, %v7579_v4  ;;  %v980_v61 = vpop.f32.mrb[6].mxu1 }
 0x1f3   :  { %v1286_v62 = vmax.f32 %v1285_v53, %v977_v57  ;;  %v981_v63 = vadd.f32 %v980_v61, %v7576_v49  ;;  %v982_v0 = vpop.f32.mrb[7].mxu1 }
 0x1f4   :  { %v1295_v3 = vmax.f32 %v1294_v30, %v979_v60  ;;  %v983_v6 = vadd.f32 %v982_v0, %v7579_v4 }
 0x1f5   :  { %v1287_v5 = vmax.f32 %v1286_v62, %v981_v63  ;;  %1245 = vmatmul.mubr.bf16.gmra.mrb[112].mxu1 %v7526_v14  ;;  %v7596_v7 = vpack.c.bf16 %v981_v63, %v977_v57 }
 0x1f6   :  { %v1296_v8 = vmax.f32 %v1295_v3, %v983_v6  ;;  %1254 = vmatprep.mubr.bf16.mxu1 %v7044_v2  ;;  %v7599_v10 = vpack.c.bf16 %v983_v6, %v979_v60 }
 0x1f7   :  { %v1288_v58 = vrot.slane %v1287_v5, 4 }
 0x1f8   :  { %v986_v37 = vpop.f32.mrb[8].mxu1  ;;  %v1297_v12 = vrot.slane %v1296_v8, 4 }
 0x1f9   :  { %v988_v11 = vpop.f32.mrb[9].mxu1  ;;  %v987_v17 = vadd.f32 %v986_v37, %v7576_v49  ;;  %v1289_v22 = vmax.f32 %v1287_v5, %v1288_v58 }
 0x1fa   :  { %v990_v16 = vpop.f32.mrb[10].mxu1  ;;  %v989_v21 = vadd.f32 %v988_v11, %v7579_v4  ;;  %v1298_v28 = vmax.f32 %v1296_v8, %v1297_v12 }
 0x1fb   :  { %v991_v19 = vadd.f32 %v990_v16, %v7576_v49  ;;  %v992_v20 = vpop.f32.mrb[11].mxu1  ;;  %v1290_v33 = vrot.slane %v1289_v22, 2 }
 0x1fc   :  { %v993_v14 = vadd.f32 %v992_v20, %v7579_v4  ;;  %v1299_v35 = vrot.slane %v1298_v28, 2 }
 0x1fd   :  { %v1303_v24 = vmax.f32 %v987_v17, %v991_v19  ;;  %1255 = vmatmul.mubr.bf16.gmra.mrb[116].mxu1 %v7532_v27  ;;  %v7606_v26 = vpack.c.bf16 %v991_v19, %v987_v17  ;;  %v1291_v18 = vmax.f32 %v1289_v22, %v1290_v33 }
 0x1fe   :  { %v1312_v31 = vmax.f32 %v989_v21, %v993_v14  ;;  %1264 = vmatprep.mubr.bf16.mxu1 %v7044_v2  ;;  %v7609_v32 = vpack.c.bf16 %v993_v14, %v989_v21  ;;  %v1300_v13 = vmax.f32 %v1298_v28, %v1299_v35 }
 0x200   :  { %v996_v44 = vpop.f32.mrb[12].mxu1  ;;  %v1301_v57 = vrot.slane %v1300_v13, 1 }
 0x201   :  { %v997_v1 = vadd.f32 %v996_v44, %v7576_v49  ;;  %v998_v23 = vpop.f32.mrb[13].mxu1 }
 0x202   :  { %v999_v39 = vadd.f32 %v998_v23, %v7579_v4  ;;  %v1000_v40 = vpop.f32.mrb[14].mxu1  ;;  %v1302_v11 = vmax.f32 %v1300_v13, %v1301_v57 }
 0x203   :  { %v1304_v41 = vmax.f32 %v1303_v24, %v997_v1  ;;  %v1001_v27 = vadd.f32 %v1000_v40, %v7576_v49  ;;  %v1002_v42 = vpop.f32.mrb[15].mxu1 }
 0x204   :  { %v1313_v45 = vmax.f32 %v1312_v31, %v999_v39  ;;  %v1003_v47 = vadd.f32 %v1002_v42, %v7579_v4  ;;  %v1574_v31 = vpack.c.bf16 %v1302_v11, %v1302_v11 }
 0x205   :  { %v1305_v29 = vmax.f32 %v1304_v41, %v1001_v27  ;;  %1265 = vmatmul.mubr.bf16.gmra.mrb[120].mxu1 %v7536_v38  ;;  %v7616_v56 = vpack.c.bf16 %v1001_v27, %v997_v1  ;;  %v1292_v38 = vrot.slane %v1291_v18, 1 }
 0x206   :  { %v1314_v25 = vmax.f32 %v1313_v45, %v1003_v47  ;;  %1274 = vmatprep.mubr.bf16.mxu1 %v7044_v2  ;;  %v7619_v34 = vpack.c.bf16 %v1003_v47, %v999_v39 }
 0x207   :  { %v1306_v50 = vrot.slane %v1305_v29, 4  ;;  %v1293_v5 = vmax.f32 %v1291_v18, %v1292_v38 }
 0x208   :  { %v1315_v52 = vrot.slane %v1314_v25, 4  ;;  %v1006_v53 = vpop.f32.mrb[16].mxu1 }
 0x209   :  { %v1307_v30 = vmax.f32 %v1305_v29, %v1306_v50  ;;  %v1008_v55 = vpop.f32.mrb[17].mxu1  ;;  %v1007_v61 = vadd.f32 %v1006_v53, %v7576_v49  ;;  %v1573_v14 = vpack.c.bf16 %v1293_v5, %v1293_v5  ;;  %v1724_v29 = vunpack.c.l.b16 %v1574_v31 }
 0x20a   :  { %v1316_v2 = vmax.f32 %v1314_v25, %v1315_v52  ;;  %v1010_v59 = vpop.f32.mrb[18].mxu1  ;;  %v1009_v3 = vadd.f32 %v1008_v55, %v7579_v4  ;;  %v6677_v55 = vld [vmem:[%s9821_s5 + $0x24] ss:$16 sps:$4 sm:$0xff]  }
 0x20b   :  { %v1308_v60 = vrot.slane %v1307_v30, 2  ;;  %v1011_v62 = vadd.f32 %v1010_v59, %v7576_v49  ;;  %v1012_v63 = vpop.f32.mrb[19].mxu1  ;;  %v1723_v42 = vunpack.c.l.b16 %v1573_v14  ;;  %v6680_v59 = vld [vmem:[%s9821_s5 + $0x44] ss:$16 sps:$4 sm:$0xff]   ;;  %2116 = vmatprep.subr.bf16.mxu0 %v6677_v55 }
 0x20c   :  { %v1317_v0 = vrot.slane %v1316_v2, 2  ;;  %v1013_v6 = vadd.f32 %v1012_v63, %v7579_v4  ;;  %v6683_v55 = vld [vmem:[%s9821_s5 + $0x64] ss:$16 sps:$4 sm:$0xff]  }
 0x20d   :  { %v1309_v8 = vmax.f32 %v1307_v30, %v1308_v60  ;;  %v1321_v37 = vmax.f32 %v1007_v61, %v1011_v62  ;;  %1275 = vmatmul.mubr.bf16.gmra.mrb[124].mxu1 %v7540_v43  ;;  %v7632_v58 = vpack.c.bf16 %v1011_v62, %v1007_v61  ;;  %v6675_v30 = vld [vmem:[%s9821_s5 + $0x20] ss:$16 sps:$4 sm:$0xff]  }
 0x20e   :  { %v1318_v12 = vmax.f32 %v1316_v2, %v1317_v0  ;;  %v1330_v16 = vmax.f32 %v1009_v3, %v1013_v6  ;;  %3033 = vmatprep.mubr.bf16.mxu1 %v7589_v54  ;;  %v7635_v17 = vpack.c.bf16 %v1013_v6, %v1009_v3  ;;  %2117 = vmatpush1.bf16.msra.mxu0 %v6675_v30  ;;  %v6678_v6 = vld [vmem:[%s9821_s5 + $0x40] ss:$16 sps:$4 sm:$0xff]  }
 0x20f   :  { %v1310_v19 = vrot.slane %v1309_v8, 1  ;;  %2118 = vmatprep.subr.bf16.mxu0 %v6680_v59  ;;  %v6681_v30 = vld [vmem:[%s9821_s5 + $0x60] ss:$16 sps:$4 sm:$0xff]   ;;  %v6686_v59 = vld [vmem:[%s9821_s5 + $0x84] ss:$16 sps:$4 sm:$0xff]  }
 0x210   :  { %v1319_v20 = vrot.slane %v1318_v12, 1  ;;  %v1016_v21 = vpop.f32.mrb[20].mxu1 }
 0x211   :  { %v1311_v22 = vmax.f32 %v1309_v8, %v1310_v19  ;;  %v1017_v24 = vadd.f32 %v1016_v21, %v7576_v49  ;;  %v1018_v28 = vpop.f32.mrb[21].mxu1 }
 0x212   :  { %v1320_v44 = vmax.f32 %v1318_v12, %v1319_v20  ;;  %v1019_v43 = vadd.f32 %v1018_v28, %v7579_v4  ;;  %v1020_v33 = vpop.f32.mrb[22].mxu1  ;;  %2119 = vmatpush1.bf16.msra.mxu0 %v6678_v6 }
 0x213   :  { %v1575_v1 = vpack.c.bf16 %v1311_v22, %v1311_v22  ;;  %v1322_v23 = vmax.f32 %v1321_v37, %v1017_v24  ;;  %v1021_v35 = vadd.f32 %v1020_v33, %v7576_v49  ;;  %v1022_v39 = vpop.f32.mrb[23].mxu1  ;;  %2120 = vmatprep.subr.bf16.mxu0 %v6683_v55 }
 0x214   :  { %v1576_v40 = vpack.c.bf16 %v1320_v44, %v1320_v44  ;;  %v1331_v41 = vmax.f32 %v1330_v16, %v1019_v43  ;;  %v1023_v27 = vadd.f32 %v1022_v39, %v7579_v4 }
 0x215   :  { %v1725_v45 = vunpack.c.l.b16 %v1575_v1  ;;  %v1323_v47 = vmax.f32 %v1322_v23, %v1021_v35  ;;  %3034 = vmatmul.mubr.bf16.vlgmr.msra.gmra.mrb[128].mxu1 %v7585_v51  ;;  %v7642_v18 = vpack.c.bf16 %v1021_v35, %v1017_v24 }
 0x216   :  { %v1726_v13 = vunpack.c.l.b16 %v1576_v40  ;;  %v1332_v25 = vmax.f32 %v1331_v41, %v1023_v27  ;;  %3043 = vmatprep.mubr.bf16.mxu1 %v7599_v10  ;;  %v7645_v46 = vpack.c.bf16 %v1023_v27, %v1019_v43  ;;  %2121 = vmatpush1.bf16.msra.mxu0 %v6681_v30 }
 0x217   :  { %v1756_v48 = vsel %vm1755_vm1, %v1725_v45, %v1723_v42  ;;  %v1324_v50 = vrot.slane %v1323_v47, 4  ;;  %2122 = vmatprep.subr.bf16.mxu0 %v6686_v59 }
 0x218   :  { %v7649_v52 = vsel %vm1755_vm1, %v1726_v13, %v1724_v29  ;;  %v1333_v53 = vrot.slane %v1332_v25, 4  ;;  %v1026_v38 = vpop.f32.mrb[24].mxu1 }
 0x219   :  { %v1325_v57 = vmax.f32 %v1323_v47, %v1324_v50  ;;  %v1028_v2 = vpop.f32.mrb[25].mxu1  ;;  %v1027_v63 = vadd.f32 %v1026_v38, %v7576_v49 }
 0x21a   :  { %v1334_v60 = vmax.f32 %v1332_v25, %v1333_v53  ;;  %v1030_v61 = vpop.f32.mrb[26].mxu1  ;;  %v1029_v8 = vadd.f32 %v1028_v2, %v7579_v4 }
 0x21b   :  { %v1326_v62 = vrot.slane %v1325_v57, 2  ;;  %v1031_v0 = vadd.f32 %v1030_v61, %v7576_v49  ;;  %v1032_v3 = vpop.f32.mrb[27].mxu1 }
 0x21c   :  { %v1335_v5 = vrot.slane %v1334_v60, 2  ;;  %v1033_v37 = vadd.f32 %v1032_v3, %v7579_v4 }
 0x21d   :  { %v1327_v11 = vmax.f32 %v1325_v57, %v1326_v62  ;;  %v1339_v12 = vmax.f32 %v1027_v63, %v1031_v0  ;;  %3044 = vmatmul.mubr.bf16.gmra.mrb[132].mxu1 %v7596_v7  ;;  %v7668_v16 = vpack.c.bf16 %v1031_v0, %v1027_v63  ;;  %v6684_v0 = vld [vmem:[%s9821_s5 + $0x80] ss:$16 sps:$4 sm:$0xff]  }
 0x21e   :  { %v1336_v19 = vmax.f32 %v1334_v60, %v1335_v5  ;;  %v1348_v20 = vmax.f32 %v1029_v8, %v1033_v37  ;;  %3053 = vmatprep.mubr.bf16.mxu1 %v7609_v32  ;;  %v7671_v21 = vpack.c.bf16 %v1033_v37, %v1029_v8  ;;  %2123 = vmatpush1.bf16.msra.mxu0 %v6684_v0 }
 0x21f   :  { %v1328_v14 = vrot.slane %v1327_v11, 1 }
 0x220   :  { %v1337_v22 = vrot.slane %v1336_v19, 1  ;;  %v1036_v24 = vpop.f32.mrb[28].mxu1 }
 0x221   :  { %v1329_v28 = vmax.f32 %v1327_v11, %v1328_v14  ;;  %v1037_v31 = vadd.f32 %v1036_v24, %v7576_v49  ;;  %v1038_v44 = vpop.f32.mrb[29].mxu1 }
 0x222   :  { %v1338_v43 = vmax.f32 %v1336_v19, %v1337_v22  ;;  %v1039_v33 = vadd.f32 %v1038_v44, %v7579_v4  ;;  %v1040_v1 = vpop.f32.mrb[30].mxu1 }
 0x223   :  { %v1577_v23 = vpack.c.bf16 %v1329_v28, %v1329_v28  ;;  %v1340_v35 = vmax.f32 %v1339_v12, %v1037_v31  ;;  %v1041_v39 = vadd.f32 %v1040_v1, %v7576_v49  ;;  %v1042_v40 = vpop.f32.mrb[31].mxu1 }
 0x224   :  { %v1578_v41 = vpack.c.bf16 %v1338_v43, %v1338_v43  ;;  %v1349_v27 = vmax.f32 %v1348_v20, %v1039_v33  ;;  %v1043_v42 = vadd.f32 %v1042_v40, %v7579_v4 }
 0x225   :  { %v1727_v45 = vunpack.c.l.b16 %v1577_v23  ;;  %v1341_v47 = vmax.f32 %v1340_v35, %v1041_v39  ;;  %3054 = vmatmul.mubr.bf16.gmra.mrb[136].mxu1 %v7606_v26  ;;  %v7678_v29 = vpack.c.bf16 %v1041_v39, %v1037_v31 }
 0x226   :  { %v1728_v13 = vunpack.c.l.b16 %v1578_v41  ;;  %v1350_v25 = vmax.f32 %v1349_v27, %v1043_v42  ;;  %3063 = vmatprep.mubr.bf16.mxu1 %v7619_v34  ;;  %v7681_v50 = vpack.c.bf16 %v1043_v42, %v1039_v33 }
 0x227   :  { %v1758_v53 = vsel %vm1757_vm2, %v1727_v45, %v1756_v48  ;;  %v1342_v38 = vrot.slane %v1341_v47, 4 }
 0x228   :  { %v1351_v57 = vrot.slane %v1350_v25, 4  ;;  %v1046_v2 = vpop.f32.mrb[32].mxu1  ;;  %v1770_v60 = vsel %vm1757_vm2, %v1728_v13, %v7649_v52 }
 0x229   :  { %v1343_v61 = vmax.f32 %v1341_v47, %v1342_v38  ;;  %v1048_v48 = vpop.f32.mrb[33].mxu1  ;;  %v1047_v6 = vadd.f32 %v1046_v2, %v7576_v49 }
 0x22a   :  { %v1352_v62 = vmax.f32 %v1350_v25, %v1351_v57  ;;  %v1050_v63 = vpop.f32.mrb[34].mxu1  ;;  %v1049_v52 = vadd.f32 %v1048_v48, %v7579_v4  ;;  %v6687_v48 = vld [vmem:[%s9821_s5 + $0xa0] ss:$16 sps:$4 sm:$0xff]  }
 0x22b   :  { %v1344_v3 = vrot.slane %v1343_v61, 2  ;;  %v1051_v5 = vadd.f32 %v1050_v63, %v7576_v49  ;;  %v1052_v8 = vpop.f32.mrb[35].mxu1 }
 0x22c   :  { %v1353_v37 = vrot.slane %v1352_v62, 2  ;;  %v1053_v11 = vadd.f32 %v1052_v8, %v7579_v4 }
 0x22d   :  { %v1345_v12 = vmax.f32 %v1343_v61, %v1344_v3  ;;  %v1357_v19 = vmax.f32 %v1047_v6, %v1051_v5  ;;  %3064 = vmatmul.mubr.bf16.gmra.mrb[140].mxu1 %v7616_v56  ;;  %v7703_v20 = vpack.c.bf16 %v1051_v5, %v1047_v6  ;;  %v6692_v3 = vld [vmem:[%s9821_s5 + $0xc4] ss:$16 sps:$4 sm:$0xff]  }
 0x22e   :  { %v1354_v14 = vmax.f32 %v1352_v62, %v1353_v37  ;;  %v1366_v22 = vmax.f32 %v1049_v52, %v1053_v11  ;;  %3073 = vmatprep.mubr.bf16.mxu1 %v7635_v17  ;;  %v7706_v24 = vpack.c.bf16 %v1053_v11, %v1049_v52  ;;  %v6689_v62 = vld [vmem:[%s9821_s5 + $0xa4] ss:$16 sps:$4 sm:$0xff]   ;;  %v6690_v52 = vld [vmem:[%s9821_s5 + $0xc0] ss:$16 sps:$4 sm:$0xff]  }
 0x22f   :  { %v1346_v28 = vrot.slane %v1345_v12, 1  ;;  %2124 = vmatprep.subr.bf16.mxu0 %v6689_v62 }
 0x230   :  { %v1355_v31 = vrot.slane %v1354_v14, 1  ;;  %v1056_v44 = vpop.f32.mrb[36].mxu1  ;;  %2125 = vmatpush1.bf16.msra.mxu0 %v6687_v48 }
 0x231   :  { %v1347_v43 = vmax.f32 %v1345_v12, %v1346_v28  ;;  %v1057_v33 = vadd.f32 %v1056_v44, %v7576_v49  ;;  %v1058_v1 = vpop.f32.mrb[37].mxu1  ;;  %2126 = vmatprep.subr.bf16.mxu0 %v6692_v3 }
 0x232   :  { %v1356_v23 = vmax.f32 %v1354_v14, %v1355_v31  ;;  %v1059_v35 = vadd.f32 %v1058_v1, %v7579_v4  ;;  %v1060_v39 = vpop.f32.mrb[38].mxu1 }
 0x233   :  { %v1579_v40 = vpack.c.bf16 %v1347_v43, %v1347_v43  ;;  %v1358_v41 = vmax.f32 %v1357_v19, %v1057_v33  ;;  %v1061_v27 = vadd.f32 %v1060_v39, %v7576_v49  ;;  %v1062_v42 = vpop.f32.mrb[39].mxu1 }
 0x234   :  { %v1580_v45 = vpack.c.bf16 %v1356_v23, %v1356_v23  ;;  %v1367_v47 = vmax.f32 %v1366_v22, %v1059_v35  ;;  %v1063_v13 = vadd.f32 %v1062_v42, %v7579_v4  ;;  %2127 = vmatpush1.bf16.msra.mxu0 %v6690_v52 }
 0x235   :  { %v1729_v25 = vunpack.c.l.b16 %v1579_v40  ;;  %v1359_v38 = vmax.f32 %v1358_v41, %v1061_v27  ;;  %3074 = vmatmul.mubr.bf16.gmra.mrb[144].mxu1 %v7632_v58  ;;  %v7713_v30 = vpack.c.bf16 %v1061_v27, %v1057_v33 }
 0x236   :  { %v1730_v55 = vunpack.c.l.b16 %v1580_v45  ;;  %v1368_v57 = vmax.f32 %v1367_v47, %v1063_v13  ;;  %3083 = vmatprep.mubr.bf16.mxu1 %v7645_v46  ;;  %v7716_v2 = vpack.c.bf16 %v1063_v13, %v1059_v35 }
 0x237   :  { %v1760_v59 = vsel %vm1759_vm3, %v1729_v25, %v1758_v53  ;;  %v1360_v61 = vrot.slane %v1359_v38, 4 }
 0x238   :  { %v1369_v63 = vrot.slane %v1368_v57, 4  ;;  %v1066_v0 = vpop.f32.mrb[40].mxu1  ;;  %v1771_v6 = vsel %vm1759_vm3, %v1730_v55, %v1770_v60 }
 0x239   :  { %v1361_v5 = vmax.f32 %v1359_v38, %v1360_v61  ;;  %v1068_v8 = vpop.f32.mrb[41].mxu1  ;;  %v1067_v12 = vadd.f32 %v1066_v0, %v7576_v49 }
 0x23a   :  { %v1370_v53 = vmax.f32 %v1368_v57, %v1369_v63  ;;  %v1070_v37 = vpop.f32.mrb[42].mxu1  ;;  %v1069_v60 = vadd.f32 %v1068_v8, %v7579_v4 }
 0x23b   :  { %v1362_v11 = vrot.slane %v1361_v5, 2  ;;  %v1071_v19 = vadd.f32 %v1070_v37, %v7576_v49  ;;  %v1072_v14 = vpop.f32.mrb[43].mxu1 }
 0x23c   :  { %v1371_v22 = vrot.slane %v1370_v53, 2  ;;  %v1073_v28 = vadd.f32 %v1072_v14, %v7579_v4 }
 0x23d   :  { %v1363_v31 = vmax.f32 %v1361_v5, %v1362_v11  ;;  %v1375_v44 = vmax.f32 %v1067_v12, %v1071_v19  ;;  %3084 = vmatmul.mubr.bf16.gmra.mrb[148].mxu1 %v7642_v18  ;;  %v7737_v43 = vpack.c.bf16 %v1071_v19, %v1067_v12  ;;  %v6693_v11 = vld [vmem:[%s9821_s5 + $0xe0] ss:$16 sps:$4 sm:$0xff]   ;;  %v6695_v12 = vld [vmem:[%s9821_s5 + $0xe4] ss:$16 sps:$4 sm:$0xff]  }
 0x23e   :  { %v1372_v33 = vmax.f32 %v1370_v53, %v1371_v22  ;;  %v1384_v1 = vmax.f32 %v1069_v60, %v1073_v28  ;;  %3093 = vmatprep.mubr.bf16.mxu1 %v7671_v21  ;;  %v7740_v23 = vpack.c.bf16 %v1073_v28, %v1069_v60  ;;  %v6698_v22 = vld [vmem:[%s9821_s5 + $0x104] ss:$16 sps:$4 sm:$0xff]   ;;  %2128 = vmatprep.subr.bf16.mxu0 %v6695_v12 }
 0x23f   :  { %v1364_v35 = vrot.slane %v1363_v31, 1  ;;  %2129 = vmatpush1.bf16.msra.mxu0 %v6693_v11 }
 0x240   :  { %v1373_v39 = vrot.slane %v1372_v33, 1  ;;  %v1076_v40 = vpop.f32.mrb[44].mxu1  ;;  %2130 = vmatprep.subr.bf16.mxu0 %v6698_v22 }
 0x241   :  { %v1365_v41 = vmax.f32 %v1363_v31, %v1364_v35  ;;  %v1077_v27 = vadd.f32 %v1076_v40, %v7576_v49  ;;  %v1078_v42 = vpop.f32.mrb[45].mxu1 }
 0x242   :  { %v1374_v45 = vmax.f32 %v1372_v33, %v1373_v39  ;;  %v1079_v47 = vadd.f32 %v1078_v42, %v7579_v4  ;;  %v1080_v13 = vpop.f32.mrb[46].mxu1  ;;  %v6696_v33 = vld [vmem:[%s9821_s5 + $0x100] ss:$16 sps:$4 sm:$0xff]  }
 0x243   :  { %v1581_v25 = vpack.c.bf16 %v1365_v41, %v1365_v41  ;;  %v1376_v38 = vmax.f32 %v1375_v44, %v1077_v27  ;;  %v1081_v55 = vadd.f32 %v1080_v13, %v7576_v49  ;;  %v1082_v57 = vpop.f32.mrb[47].mxu1  ;;  %2131 = vmatpush1.bf16.msra.mxu0 %v6696_v33 }
 0x244   :  { %v1582_v61 = vpack.c.bf16 %v1374_v45, %v1374_v45  ;;  %v1385_v48 = vmax.f32 %v1384_v1, %v1079_v47  ;;  %v1083_v62 = vadd.f32 %v1082_v57, %v7579_v4 }
 0x245   :  { %v1731_v63 = vunpack.c.l.b16 %v1581_v25  ;;  %v1377_v0 = vmax.f32 %v1376_v38, %v1081_v55  ;;  %3094 = vmatmul.mubr.bf16.gmra.mrb[152].mxu1 %v7668_v16  ;;  %v7747_v3 = vpack.c.bf16 %v1081_v55, %v1077_v27 }
 0x246   :  { %v1732_v5 = vunpack.c.l.b16 %v1582_v61  ;;  %v1386_v8 = vmax.f32 %v1385_v48, %v1083_v62  ;;  %3103 = vmatprep.mubr.bf16.mxu1 %v7681_v50  ;;  %v7750_v53 = vpack.c.bf16 %v1083_v62, %v1079_v47 }
 0x247   :  { %9914 = vst [vmem:[#allocation15_spill] sm:$0xff] %v7747_v3  ;;  %v1762_v37 = vsel %vm1761_vm4, %v1731_v63, %v1760_v59  ;;  %v1378_v52 = vrot.slane %v1377_v0, 4 }
 0x248   :  { %v1387_v19 = vrot.slane %v1386_v8, 4  ;;  %v1086_v14 = vpop.f32.mrb[48].mxu1  ;;  %v1772_v60 = vsel %vm1761_vm4, %v1732_v5, %v1771_v6 }
 0x249   :  { %v1379_v28 = vmax.f32 %v1377_v0, %v1378_v52  ;;  %v1088_v31 = vpop.f32.mrb[49].mxu1  ;;  %v1087_v35 = vadd.f32 %v1086_v14, %v7576_v49 }
 0x24a   :  { %v1388_v59 = vmax.f32 %v1386_v8, %v1387_v19  ;;  %v1090_v44 = vpop.f32.mrb[50].mxu1  ;;  %v1089_v6 = vadd.f32 %v1088_v31, %v7579_v4 }
 0x24b   :  { %v1380_v1 = vrot.slane %v1379_v28, 2  ;;  %v1091_v39 = vadd.f32 %v1090_v44, %v7576_v49  ;;  %v1092_v40 = vpop.f32.mrb[51].mxu1 }
 0x24c   :  { %v1389_v41 = vrot.slane %v1388_v59, 2  ;;  %v1093_v27 = vadd.f32 %v1092_v40, %v7579_v4 }
 0x24d   :  { %v1381_v42 = vmax.f32 %v1379_v28, %v1380_v1  ;;  %v1393_v45 = vmax.f32 %v1087_v35, %v1091_v39  ;;  %3104 = vmatmul.mubr.bf16.gmra.mrb[156].mxu1 %v7678_v29  ;;  %v7771_v47 = vpack.c.bf16 %v1091_v39, %v1087_v35 }
 0x24e   :  { %v1390_v13 = vmax.f32 %v1388_v59, %v1389_v41  ;;  %v1402_v25 = vmax.f32 %v1089_v6, %v1093_v27  ;;  %3113 = vmatprep.mubr.bf16.mxu1 %v7706_v24  ;;  %v7774_v38 = vpack.c.bf16 %v1093_v27, %v1089_v6  ;;  %v6699_v41 = vld [vmem:[%s9821_s5 + $0x120] ss:$16 sps:$4 sm:$0xff]   ;;  %v6701_v6 = vld [vmem:[%s9821_s5 + $0x124] ss:$16 sps:$4 sm:$0xff]  }
 0x24f   :  { %9915 = vst [vmem:[#allocation16_spill] sm:$0xff] %v7771_v47  ;;  %v1382_v55 = vrot.slane %v1381_v42, 1  ;;  %2132 = vmatprep.subr.bf16.mxu0 %v6701_v6 }
 0x250   :  { %9916 = vst [vmem:[#allocation17_spill] sm:$0xff] %v7774_v38  ;;  %v1391_v57 = vrot.slane %v1390_v13, 1  ;;  %v1096_v61 = vpop.f32.mrb[52].mxu1  ;;  %2133 = vmatpush1.bf16.msra.mxu0 %v6699_v41 }
 0x251   :  { %v1383_v48 = vmax.f32 %v1381_v42, %v1382_v55  ;;  %v1097_v62 = vadd.f32 %v1096_v61, %v7576_v49  ;;  %v1098_v63 = vpop.f32.mrb[53].mxu1  ;;  %v6702_v61 = vld [vmem:[%s9821_s5 + $0x140] ss:$16 sps:$4 sm:$0xff]  }
 0x252   :  { %v1392_v0 = vmax.f32 %v1390_v13, %v1391_v57  ;;  %v1099_v5 = vadd.f32 %v1098_v63, %v7579_v4  ;;  %v1100_v8 = vpop.f32.mrb[54].mxu1 }
 0x253   :  { %v1583_v52 = vpack.c.bf16 %v1383_v48, %v1383_v48  ;;  %v1394_v11 = vmax.f32 %v1393_v45, %v1097_v62  ;;  %v1101_v12 = vadd.f32 %v1100_v8, %v7576_v49  ;;  %v1102_v19 = vpop.f32.mrb[55].mxu1  ;;  %v6704_v45 = vld [vmem:[%s9821_s5 + $0x144] ss:$16 sps:$4 sm:$0xff]  }
 0x254   :  { %v1584_v14 = vpack.c.bf16 %v1392_v0, %v1392_v0  ;;  %v1403_v22 = vmax.f32 %v1402_v25, %v1099_v5  ;;  %v1103_v28 = vadd.f32 %v1102_v19, %v7579_v4  ;;  %2134 = vmatprep.subr.bf16.mxu0 %v6704_v45 }
 0x255   :  { %v1733_v31 = vunpack.c.l.b16 %v1583_v52  ;;  %v1395_v59 = vmax.f32 %v1394_v11, %v1101_v12  ;;  %3114 = vmatmul.mubr.bf16.gmra.mrb[160].mxu1 %v7703_v20  ;;  %v7781_v44 = vpack.c.bf16 %v1101_v12, %v1097_v62  ;;  %2135 = vmatpush1.bf16.msra.mxu0 %v6702_v61 }
 0x256   :  { %v1734_v33 = vunpack.c.l.b16 %v1584_v14  ;;  %v1404_v1 = vmax.f32 %v1403_v22, %v1103_v28  ;;  %3123 = vmatprep.mubr.bf16.mxu1 %v7716_v2  ;;  %v7784_v35 = vpack.c.bf16 %v1103_v28, %v1099_v5 }
 0x257   :  { %9917 = vst [vmem:[#allocation18_spill] sm:$0xff] %v7781_v44  ;;  %v7787_v39 = vsel %vm1763_vm5, %v1733_v31, %v1762_v37  ;;  %v1396_v40 = vrot.slane %v1395_v59, 4 }
 0x258   :  { %9918 = vst [vmem:[#allocation19_spill] sm:$0xff] %v7784_v35  ;;  %v1405_v27 = vrot.slane %v1404_v1, 4  ;;  %v1106_v42 = vpop.f32.mrb[56].mxu1  ;;  %v1773_v13 = vsel %vm1763_vm5, %v1734_v33, %v1772_v60 }
 0x259   :  { %v1397_v25 = vmax.f32 %v1395_v59, %v1396_v40  ;;  %v1108_v37 = vpop.f32.mrb[57].mxu1  ;;  %v1107_v62 = vadd.f32 %v1106_v42, %v7576_v49 }
 0x25a   :  { %v1406_v55 = vmax.f32 %v1404_v1, %v1405_v27  ;;  %v1110_v57 = vpop.f32.mrb[58].mxu1  ;;  %v1109_v60 = vadd.f32 %v1108_v37, %v7579_v4 }
 0x25b   :  { %v1398_v48 = vrot.slane %v1397_v25, 2  ;;  %v1111_v63 = vadd.f32 %v1110_v57, %v7576_v49  ;;  %v1112_v0 = vpop.f32.mrb[59].mxu1 }
 0x25c   :  { %v1407_v5 = vrot.slane %v1406_v55, 2  ;;  %v1113_v8 = vadd.f32 %v1112_v0, %v7579_v4  ;;  %v6705_v0 = vld [vmem:[%s9821_s5 + $0x160] ss:$16 sps:$4 sm:$0xff]  }
 0x25d   :  { %v1399_v52 = vmax.f32 %v1397_v25, %v1398_v48  ;;  %v1411_v11 = vmax.f32 %v1107_v62, %v1111_v63  ;;  %3124 = vmatmul.mubr.bf16.gmra.mrb[164].mxu1 %v7713_v30  ;;  %v7807_v12 = vpack.c.bf16 %v1111_v63, %v1107_v62 }
 0x25e   :  { %v1408_v19 = vmax.f32 %v1406_v55, %v1407_v5  ;;  %v1420_v14 = vmax.f32 %v1109_v60, %v1113_v8  ;;  %3133 = vmatprep.mubr.bf16.mxu1 %v7740_v23  ;;  %v7810_v22 = vpack.c.bf16 %v1113_v8, %v1109_v60  ;;  %v6707_v5 = vld [vmem:[%s9821_s5 + $0x164] ss:$16 sps:$4 sm:$0xff]  }
 0x25f   :  { %9919 = vst [vmem:[#allocation20_spill] sm:$0xff] %v7807_v12  ;;  %v1400_v28 = vrot.slane %v1399_v52, 1  ;;  %2136 = vmatprep.subr.bf16.mxu0 %v6707_v5 }
 0x260   :  { %9920 = vst [vmem:[#allocation21_spill] sm:$0xff] %v7810_v22  ;;  %v1409_v31 = vrot.slane %v1408_v19, 1  ;;  %v1116_v59 = vpop.f32.mrb[60].mxu1  ;;  %2137 = vmatpush1.bf16.msra.mxu0 %v6705_v0 }
 0x261   :  { %v1401_v33 = vmax.f32 %v1399_v52, %v1400_v28  ;;  %v1117_v1 = vadd.f32 %v1116_v59, %v7576_v49  ;;  %v1118_v40 = vpop.f32.mrb[61].mxu1  ;;  %v6710_v52 = vld [vmem:[%s9821_s5 + $0x184] ss:$16 sps:$4 sm:$0xff]   ;;  %v6708_v59 = vld [vmem:[%s9821_s5 + $0x180] ss:$16 sps:$4 sm:$0xff]  }
 0x262   :  { %v1410_v41 = vmax.f32 %v1408_v19, %v1409_v31  ;;  %v1119_v6 = vadd.f32 %v1118_v40, %v7579_v4  ;;  %v1120_v27 = vpop.f32.mrb[62].mxu1  ;;  %2138 = vmatprep.subr.bf16.mxu0 %v6710_v52 }
 0x263   :  { %v1585_v42 = vpack.c.bf16 %v1401_v33, %v1401_v33  ;;  %v1412_v45 = vmax.f32 %v1411_v11, %v1117_v1  ;;  %v1121_v25 = vadd.f32 %v1120_v27, %v7576_v49  ;;  %v1122_v37 = vpop.f32.mrb[63].mxu1 }
 0x264   :  { %v1586_v55 = vpack.c.bf16 %v1410_v41, %v1410_v41  ;;  %v1421_v57 = vmax.f32 %v1420_v14, %v1119_v6  ;;  %v1123_v61 = vadd.f32 %v1122_v37, %v7579_v4  ;;  %2139 = vmatpush1.bf16.msra.mxu0 %v6708_v59 }
 0x265   :  { %v1735_v48 = vunpack.c.l.b16 %v1585_v42  ;;  %v1413_v62 = vmax.f32 %v1412_v45, %v1121_v25  ;;  %3134 = vmatmul.mubr.bf16.gmra.mrb[168].mxu1 %v7737_v43  ;;  %v7817_v63 = vpack.c.bf16 %v1121_v25, %v1117_v1 }
 0x266   :  { %v1422_v60 = vmax.f32 %v1421_v57, %v1123_v61  ;;  %3143 = vmatprep.mubr.bf16.mxu1 %v7750_v53  ;;  %v7826_v8 = vpack.c.bf16 %v1123_v61, %v1119_v6  ;;  %v1736_v11 = vunpack.c.l.b16 %v1586_v55 }
 0x267   :  { %v1414_v19 = vrot.slane %v1413_v62, 4  ;;  %v7833_v14 = vsel %vm1765_vm6, %v1735_v48, %v7787_v39  ;;  %v6713_v48 = vld [vmem:[%s9821_s5 + $0x1a4] ss:$16 sps:$4 sm:$0xff]  }
 0x268   :  { %9921 = vst [vmem:[#allocation22_spill] sm:$0xff] %v7826_v8  ;;  %v1423_v28 = vrot.slane %v1422_v60, 4  ;;  %v1126_v31 = vpop.f32.mrb[64].mxu1  ;;  %v1774_v33 = vsel %vm1765_vm6, %v1736_v11, %v1773_v13  ;;  %2140 = vmatprep.subr.bf16.mxu0 %v6713_v48 }
 0x269   :  { %v1415_v1 = vmax.f32 %v1413_v62, %v1414_v19  ;;  %v1128_v40 = vpop.f32.mrb[65].mxu1  ;;  %v1127_v42 = vadd.f32 %v1126_v31, %v7576_v49 }
 0x26a   :  { %v1424_v41 = vmax.f32 %v1422_v60, %v1423_v28  ;;  %v1130_v6 = vpop.f32.mrb[66].mxu1  ;;  %v1129_v37 = vadd.f32 %v1128_v40, %v7579_v4  ;;  %v6711_v60 = vld [vmem:[%s9821_s5 + $0x1a0] ss:$16 sps:$4 sm:$0xff]  }
 0x26b   :  { %v1416_v27 = vrot.slane %v1415_v1, 2  ;;  %v1131_v39 = vadd.f32 %v1130_v6, %v7576_v49  ;;  %v1132_v45 = vpop.f32.mrb[67].mxu1  ;;  %2141 = vmatpush1.bf16.msra.mxu0 %v6711_v60  ;;  %v6714_v6 = vld [vmem:[%s9821_s5 + $0x1c0] ss:$16 sps:$4 sm:$0xff]  }
 0x26c   :  { %v1425_v25 = vrot.slane %v1424_v41, 2  ;;  %v1133_v55 = vadd.f32 %v1132_v45, %v7579_v4 }
 0x26d   :  { %v1417_v57 = vmax.f32 %v1415_v1, %v1416_v27  ;;  %v1429_v61 = vmax.f32 %v1127_v42, %v1131_v39  ;;  %3144 = vmatmul.mubr.bf16.gmra.mrb[172].mxu1 %v7747_v3  ;;  %v7844_v13 = vpack.c.bf16 %v1131_v39, %v1127_v42  ;;  %v6716_v1 = vld [vmem:[%s9821_s5 + $0x1c4] ss:$16 sps:$4 sm:$0xff]  }
 0x26e   :  { %v1426_v62 = vmax.f32 %v1424_v41, %v1425_v25  ;;  %v1438_v0 = vmax.f32 %v1129_v37, %v1133_v55  ;;  %3153 = vmatprep.mubr.bf16.mxu1 %v7774_v38  ;;  %v7850_v5 = vpack.c.bf16 %v1133_v55, %v1129_v37  ;;  %2142 = vmatprep.subr.bf16.mxu0 %v6716_v1 }
 0x26f   :  { %9922 = vst [vmem:[#allocation23_spill] sm:$0xff] %v7844_v13  ;;  %v1418_v52 = vrot.slane %v1417_v57, 1  ;;  %2143 = vmatpush1.bf16.msra.mxu0 %v6714_v6  ;;  %v6722_v6 = vld [vmem:[%s9821_s5 + $0xc] ss:$16 sps:$4 sm:$0xff]  }
 0x270   :  { %9923 = vst [vmem:[#allocation24_spill] sm:$0xff] %v7850_v5  ;;  %v1427_v11 = vrot.slane %v1426_v62, 1  ;;  %v1136_v19 = vpop.f32.mrb[68].mxu1 }
 0x271   :  { %v1419_v28 = vmax.f32 %v1417_v57, %v1418_v52  ;;  %v1137_v31 = vadd.f32 %v1136_v19, %v7576_v49  ;;  %v1138_v59 = vpop.f32.mrb[69].mxu1 }
 0x272   :  { %v1139_v40 = vadd.f32 %v1138_v59, %v7579_v4  ;;  %v1140_v41 = vpop.f32.mrb[70].mxu1  ;;  %v1428_v27 = vmax.f32 %v1426_v62, %v1427_v11  ;;  %v6719_v62 = vld [vmem:[%s9821_s5 + $0x1e4] ss:$16 sps:$4 sm:$0xff]  }
 0x273   :  { %v1587_v42 = vpack.c.bf16 %v1419_v28, %v1419_v28  ;;  %v1430_v39 = vmax.f32 %v1429_v61, %v1137_v31  ;;  %v1141_v45 = vadd.f32 %v1140_v41, %v7576_v49  ;;  %v1142_v25 = vpop.f32.mrb[71].mxu1  ;;  %v6717_v61 = vld [vmem:[%s9821_s5 + $0x1e0] ss:$16 sps:$4 sm:$0xff]   ;;  %2144 = vmatprep.subr.bf16.mxu0 %v6719_v62 }
 0x274   :  { %v1439_v37 = vmax.f32 %v1438_v0, %v1139_v40  ;;  %v1143_v55 = vadd.f32 %v1142_v25, %v7579_v4  ;;  %v1588_v57 = vpack.c.bf16 %v1428_v27, %v1428_v27  ;;  %2145 = vmatpush1.bf16.msra.mxu0 %v6717_v61 }
 0x275   :  { %v1737_v48 = vunpack.c.l.b16 %v1587_v42  ;;  %v1431_v60 = vmax.f32 %v1430_v39, %v1141_v45  ;;  %3154 = vmatmul.mubr.bf16.gmra.mrb[176].mxu1 %v7771_v47  ;;  %v7866_v52 = vpack.c.bf16 %v1141_v45, %v1137_v31  ;;  %2157 = vmatprep.subr.bf16.mxu0 %v6722_v6 }
 0x276   :  { %v1440_v0 = vmax.f32 %v1439_v37, %v1143_v55  ;;  %3163 = vmatprep.mubr.bf16.mxu1 %v7784_v35  ;;  %v7875_v11 = vpack.c.bf16 %v1143_v55, %v1139_v40  ;;  %v1738_v19 = vunpack.c.l.b16 %v1588_v57 }
 0x277   :  { %9924 = vst [vmem:[#allocation25_spill] sm:$0xff] %v7866_v52  ;;  %v7879_v28 = vsel %vm1767_vm7, %v1737_v48, %v7833_v14  ;;  %v1432_v1 = vrot.slane %v1431_v60, 4 }
 0x278   :  { %9925 = vst [vmem:[#allocation26_spill] sm:$0xff] %v7875_v11  ;;  %v1146_v31 = vpop.f32.mrb[72].mxu1  ;;  %v7882_v59 = vsel %vm1767_vm7, %v1738_v19, %v1774_v33  ;;  %v1441_v27 = vrot.slane %v1440_v0, 4 }
 0x279   :  { %v1148_v41 = vpop.f32.mrb[73].mxu1  ;;  %v1147_v42 = vadd.f32 %v1146_v31, %v7576_v49  ;;  %v1433_v33 = vmax.f32 %v1431_v60, %v1432_v1 }
 0x27a   :  { %v1150_v40 = vpop.f32.mrb[74].mxu1  ;;  %v1149_v14 = vadd.f32 %v1148_v41, %v7579_v4  ;;  %v1442_v57 = vmax.f32 %v1440_v0, %v1441_v27 }
 0x27b   :  { %v1151_v39 = vadd.f32 %v1150_v40, %v7576_v49  ;;  %v1152_v45 = vpop.f32.mrb[75].mxu1  ;;  %v1434_v19 = vrot.slane %v1433_v33, 2 }
 0x27c   :  { %v1153_v25 = vadd.f32 %v1152_v45, %v7579_v4  ;;  %v1443_v41 = vrot.slane %v1442_v57, 2 }
 0x27d   :  { %v1447_v37 = vmax.f32 %v1147_v42, %v1151_v39  ;;  %3164 = vmatmul.mubr.bf16.gmra.mrb[180].mxu1 %v7781_v44  ;;  %v7892_v55 = vpack.c.bf16 %v1151_v39, %v1147_v42  ;;  %v1435_v27 = vmax.f32 %v1433_v33, %v1434_v19 }
 0x27e   :  { %v1456_v48 = vmax.f32 %v1149_v14, %v1153_v25  ;;  %3173 = vmatprep.mubr.bf16.mxu1 %v7810_v22  ;;  %v7895_v61 = vpack.c.bf16 %v1153_v25, %v1149_v14  ;;  %v1444_v25 = vmax.f32 %v1442_v57, %v1443_v41 }
 0x27f   :  { %9926 = vst [vmem:[#allocation27_spill] sm:$0xff] %v7892_v55 }
 0x280   :  { %9927 = vst [vmem:[#allocation28_spill] sm:$0xff] %v7895_v61  ;;  %v1156_v62 = vpop.f32.mrb[76].mxu1  ;;  %v1445_v47 = vrot.slane %v1444_v25, 1 }
 0x281   :  { %v1157_v31 = vadd.f32 %v1156_v62, %v7576_v49  ;;  %v1158_v6 = vpop.f32.mrb[77].mxu1 }
 0x282   :  { %v1159_v40 = vadd.f32 %v1158_v6, %v7579_v4  ;;  %v1160_v60 = vpop.f32.mrb[78].mxu1 }
 0x283   :  { %v1448_v1 = vmax.f32 %v1447_v37, %v1157_v31  ;;  %v1161_v45 = vadd.f32 %v1160_v60, %v7576_v49  ;;  %v1162_v42 = vpop.f32.mrb[79].mxu1  ;;  %v1436_v60 = vrot.slane %v1435_v27, 1 }
 0x284   :  { %v1457_v39 = vmax.f32 %v1456_v48, %v1159_v40  ;;  %v1163_v0 = vadd.f32 %v1162_v42, %v7579_v4 }
 0x285   :  { %v1449_v9 = vmax.f32 %v1448_v1, %v1161_v45  ;;  %3174 = vmatmul.mubr.bf16.gmra.mrb[184].mxu1 %v7807_v12  ;;  %v7902_v14 = vpack.c.bf16 %v1161_v45, %v1157_v31 }
 0x286   :  { %v1458_v62 = vmax.f32 %v1457_v39, %v1163_v0  ;;  %3183 = vmatprep.mubr.bf16.mxu1 %v7826_v8  ;;  %v7905_v22 = vpack.c.bf16 %v1163_v0, %v1159_v40  ;;  %v1437_v39 = vmax.f32 %v1435_v27, %v1436_v60 }
 0x287   :  { %9928 = vst [vmem:[#allocation29_spill] sm:$0xff] %v7902_v14  ;;  %v1450_v6 = vrot.slane %v1449_v9, 4 }
 0x288   :  { %9929 = vst [vmem:[#allocation30_spill] sm:$0xff] %v7905_v22  ;;  %v1459_v37 = vrot.slane %v1458_v62, 4  ;;  %v1166_v44 = vpop.f32.mrb[80].mxu1 }
 0x289   :  { %v1451_v35 = vmax.f32 %v1449_v9, %v1450_v6  ;;  %v1168_v48 = vpop.f32.mrb[81].mxu1  ;;  %v1167_v1 = vadd.f32 %v1166_v44, %v7576_v49 }
 0x28a   :  { %v1460_v42 = vmax.f32 %v1458_v62, %v1459_v37  ;;  %v1170_v33 = vpop.f32.mrb[82].mxu1  ;;  %v1169_v45 = vadd.f32 %v1168_v48, %v7579_v4  ;;  %v1446_v62 = vmax.f32 %v1444_v25, %v1445_v47  ;;  %v1589_v48 = vpack.c.bf16 %v1437_v39, %v1437_v39 }
 0x28b   :  { %v1452_v19 = vrot.slane %v1451_v35, 2  ;;  %v1171_v31 = vadd.f32 %v1170_v33, %v7576_v49  ;;  %v1172_v57 = vpop.f32.mrb[83].mxu1 }
 0x28c   :  { %v1461_v41 = vrot.slane %v1460_v42, 2  ;;  %v1173_v40 = vadd.f32 %v1172_v57, %v7579_v4  ;;  %v1590_v60 = vpack.c.bf16 %v1446_v62, %v1446_v62 }
 0x28d   :  { %v1453_v0 = vmax.f32 %v1451_v35, %v1452_v19  ;;  %v1465_v8 = vmax.f32 %v1167_v1, %v1171_v31  ;;  %3184 = vmatmul.mubr.bf16.gmra.mrb[188].mxu1 %v7817_v63  ;;  %v7912_v9 = vpack.c.bf16 %v1171_v31, %v1167_v1 }
 0x28e   :  { %v1462_v6 = vmax.f32 %v1460_v42, %v1461_v41  ;;  %v1474_v37 = vmax.f32 %v1169_v45, %v1173_v40  ;;  %3193 = vmatprep.mubr.bf16.mxu1 %v7850_v5  ;;  %v7915_v44 = vpack.c.bf16 %v1173_v40, %v1169_v45  ;;  %v1739_v5 = vunpack.c.l.b16 %v1589_v48 }
 0x28f   :  { %9930 = vst [vmem:[#allocation31_spill] sm:$0xff] %v7912_v9  ;;  %v1454_v33 = vrot.slane %v1453_v0, 1 }
 0x290   :  { %9931 = vst [vmem:[#allocation32_spill] sm:$0xff] %v7915_v44  ;;  %v1463_v12 = vrot.slane %v1462_v6, 1  ;;  %v1176_v38 = vpop.f32.mrb[84].mxu1 }
 0x291   :  { %v1455_v3 = vmax.f32 %v1453_v0, %v1454_v33  ;;  %v1177_v27 = vadd.f32 %v1176_v38, %v7576_v49  ;;  %v1178_v35 = vpop.f32.mrb[85].mxu1 }
 0x292   :  { %v1464_v19 = vmax.f32 %v1462_v6, %v1463_v12  ;;  %v1179_v1 = vadd.f32 %v1178_v35, %v7579_v4  ;;  %v1180_v31 = vpop.f32.mrb[86].mxu1  ;;  %v1740_v12 = vunpack.c.l.b16 %v1590_v60 }
 0x293   :  { %v1591_v47 = vpack.c.bf16 %v1455_v3, %v1455_v3  ;;  %v1466_v25 = vmax.f32 %v1465_v8, %v1177_v27  ;;  %v1181_v42 = vadd.f32 %v1180_v31, %v7576_v49  ;;  %v1182_v57 = vpop.f32.mrb[87].mxu1 }
 0x294   :  { %v1592_v41 = vpack.c.bf16 %v1464_v19, %v1464_v19  ;;  %v1475_v45 = vmax.f32 %v1474_v37, %v1179_v1  ;;  %v1183_v40 = vadd.f32 %v1182_v57, %v7579_v4 }
 0x295   :  { %v1741_v39 = vunpack.c.l.b16 %v1591_v47  ;;  %v1467_v0 = vmax.f32 %v1466_v25, %v1181_v42  ;;  %3194 = vmatmul.mubr.bf16.gmra.mrb[192].mxu1 %v7844_v13  ;;  %v7922_v38 = vpack.c.bf16 %v1181_v42, %v1177_v27 }
 0x296   :  { %v1742_v62 = vunpack.c.l.b16 %v1592_v41  ;;  %v1476_v6 = vmax.f32 %v1475_v45, %v1183_v40  ;;  %3203 = vmatprep.mubr.bf16.mxu1 %v7875_v11  ;;  %v7925_v3 = vpack.c.bf16 %v1183_v40, %v1179_v1 }
 0x297   :  { %9932 = vst [vmem:[#allocation33_spill] sm:$0xff] %v7922_v38  ;;  %v1776_v8 = vsel %vm1755_vm1, %v1741_v39, %v1739_v5  ;;  %v1468_v33 = vrot.slane %v1467_v0, 4 }
 0x298   :  { %9933 = vst [vmem:[#allocation34_spill] sm:$0xff] %v7925_v3  ;;  %v1783_v37 = vsel %vm1755_vm1, %v1742_v62, %v1740_v12  ;;  %v1477_v35 = vrot.slane %v1476_v6, 4  ;;  %v1186_v48 = vpop.f32.mrb[88].mxu1 }
 0x299   :  { %v1469_v19 = vmax.f32 %v1467_v0, %v1468_v33  ;;  %v1188_v31 = vpop.f32.mrb[89].mxu1  ;;  %v1187_v60 = vadd.f32 %v1186_v48, %v7576_v49 }
 0x29a   :  { %v1478_v47 = vmax.f32 %v1476_v6, %v1477_v35  ;;  %v1190_v25 = vpop.f32.mrb[90].mxu1  ;;  %v1189_v1 = vadd.f32 %v1188_v31, %v7579_v4 }
 0x29b   :  { %v1470_v27 = vrot.slane %v1469_v19, 2  ;;  %v1191_v42 = vadd.f32 %v1190_v25, %v7576_v49  ;;  %v1192_v57 = vpop.f32.mrb[91].mxu1 }
 0x29c   :  { %v1479_v41 = vrot.slane %v1478_v47, 2  ;;  %v1193_v5 = vadd.f32 %v1192_v57, %v7579_v4 }
 0x29d   :  { %v1471_v45 = vmax.f32 %v1469_v19, %v1470_v27  ;;  %v1483_v40 = vmax.f32 %v1187_v60, %v1191_v42  ;;  %3204 = vmatmul.mubr.bf16.gmra.mrb[196].mxu1 %v7866_v52  ;;  %v7934_v39 = vpack.c.bf16 %v1191_v42, %v1187_v60 }
 0x29e   :  { %v1480_v0 = vmax.f32 %v1478_v47, %v1479_v41  ;;  %v1492_v12 = vmax.f32 %v1189_v1, %v1193_v5  ;;  %3213 = vmatprep.mubr.bf16.mxu1 %v7895_v61  ;;  %v7937_v62 = vpack.c.bf16 %v1193_v5, %v1189_v1 }
 0x29f   :  { %9934 = vst [vmem:[#allocation35_spill] sm:$0xff] %v7934_v39  ;;  %v1472_v6 = vrot.slane %v1471_v45, 1 }
 0x2a0   :  { %9935 = vst [vmem:[#allocation36_spill] sm:$0xff] %v7937_v62  ;;  %v1481_v33 = vrot.slane %v1480_v0, 1  ;;  %v1196_v35 = vpop.f32.mrb[92].mxu1 }
 0x2a1   :  { %v1473_v48 = vmax.f32 %v1471_v45, %v1472_v6  ;;  %v1197_v31 = vadd.f32 %v1196_v35, %v7576_v49  ;;  %v1198_v25 = vpop.f32.mrb[93].mxu1 }
 0x2a2   :  { %v1482_v57 = vmax.f32 %v1480_v0, %v1481_v33  ;;  %v1199_v19 = vadd.f32 %v1198_v25, %v7579_v4  ;;  %v1200_v27 = vpop.f32.mrb[94].mxu1 }
 0x2a3   :  { %v1593_v52 = vpack.c.bf16 %v1473_v48, %v1473_v48  ;;  %v1484_v60 = vmax.f32 %v1483_v40, %v1197_v31  ;;  %v1201_v47 = vadd.f32 %v1200_v27, %v7576_v49  ;;  %v1202_v42 = vpop.f32.mrb[95].mxu1 }
 0x2a4   :  { %v1594_v41 = vpack.c.bf16 %v1482_v57, %v1482_v57  ;;  %v1493_v61 = vmax.f32 %v1492_v12, %v1199_v19  ;;  %v1203_v1 = vadd.f32 %v1202_v42, %v7579_v4 }
 0x2a5   :  { %v1743_v5 = vunpack.c.l.b16 %v1593_v52  ;;  %v1485_v11 = vmax.f32 %v1484_v60, %v1201_v47  ;;  %3214 = vmatmul.mubr.bf16.gmra.mrb[200].mxu1 %v7892_v55  ;;  %v7944_v45 = vpack.c.bf16 %v1201_v47, %v1197_v31 }
 0x2a6   :  { %v1744_v6 = vunpack.c.l.b16 %v1594_v41  ;;  %v1494_v0 = vmax.f32 %v1493_v61, %v1203_v1  ;;  %3223 = vmatprep.mubr.bf16.mxu1 %v7905_v22  ;;  %v7947_v33 = vpack.c.bf16 %v1203_v1, %v1199_v19 }
 0x2a7   :  { %9936 = vst [vmem:[#allocation37_spill] sm:$0xff] %v7944_v45  ;;  %v1777_v40 = vsel %vm1757_vm2, %v1743_v5, %v1776_v8  ;;  %v1486_v35 = vrot.slane %v1485_v11, 4 }
 0x2a8   :  { %9937 = vst [vmem:[#allocation38_spill] sm:$0xff] %v7947_v33  ;;  %v1495_v48 = vrot.slane %v1494_v0, 4  ;;  %v1206_v25 = vpop.f32.mrb[96].mxu1  ;;  %v1784_v12 = vsel %vm1757_vm2, %v1744_v6, %v1783_v37 }
 0x2a9   :  { %v1487_v57 = vmax.f32 %v1485_v11, %v1486_v35  ;;  %v1208_v52 = vpop.f32.mrb[97].mxu1  ;;  %v1207_v31 = vadd.f32 %v1206_v25, %v7576_v49 }
 0x2aa   :  { %v1496_v27 = vmax.f32 %v1494_v0, %v1495_v48  ;;  %v1210_v60 = vpop.f32.mrb[98].mxu1  ;;  %v1209_v19 = vadd.f32 %v1208_v52, %v7579_v4 }
 0x2ab   :  { %v1488_v42 = vrot.slane %v1487_v57, 2  ;;  %v1211_v61 = vadd.f32 %v1210_v60, %v7576_v49  ;;  %v1212_v47 = vpop.f32.mrb[99].mxu1 }
 0x2ac   :  { %v1497_v41 = vrot.slane %v1496_v27, 2  ;;  %v1213_v8 = vadd.f32 %v1212_v47, %v7579_v4 }
 0x2ad   :  { %v1489_v1 = vmax.f32 %v1487_v57, %v1488_v42  ;;  %v1501_v5 = vmax.f32 %v1207_v31, %v1211_v61  ;;  %3224 = vmatmul.mubr.bf16.gmra.mrb[204].mxu1 %v7902_v14  ;;  %v7956_v37 = vpack.c.bf16 %v1211_v61, %v1207_v31 }
 0x2ae   :  { %v1498_v11 = vmax.f32 %v1496_v27, %v1497_v41  ;;  %v1510_v6 = vmax.f32 %v1209_v19, %v1213_v8  ;;  %3233 = vmatprep.mubr.bf16.mxu1 %v7915_v44  ;;  %v7959_v0 = vpack.c.bf16 %v1213_v8, %v1209_v19 }
 0x2af   :  { %9938 = vst [vmem:[#allocation39_spill] sm:$0xff] %v7956_v37  ;;  %v1490_v35 = vrot.slane %v1489_v1, 1 }
 0x2b0   :  { %9939 = vst [vmem:[#allocation40_spill] sm:$0xff] %v7959_v0  ;;  %v1499_v48 = vrot.slane %v1498_v11, 1  ;;  %v1216_v25 = vpop.f32.mrb[100].mxu1 }
 0x2b1   :  { %v1491_v60 = vmax.f32 %v1489_v1, %v1490_v35  ;;  %v1217_v52 = vadd.f32 %v1216_v25, %v7576_v49  ;;  %v1218_v22 = vpop.f32.mrb[101].mxu1 }
 0x2b2   :  { %v1500_v47 = vmax.f32 %v1498_v11, %v1499_v48  ;;  %v1219_v57 = vadd.f32 %v1218_v22, %v7579_v4  ;;  %v1220_v42 = vpop.f32.mrb[102].mxu1 }
 0x2b3   :  { %v1595_v14 = vpack.c.bf16 %v1491_v60, %v1491_v60  ;;  %v1502_v31 = vmax.f32 %v1501_v5, %v1217_v52  ;;  %v1221_v27 = vadd.f32 %v1220_v42, %v7576_v49  ;;  %v1222_v61 = vpop.f32.mrb[103].mxu1 }
 0x2b4   :  { %v1596_v41 = vpack.c.bf16 %v1500_v47, %v1500_v47  ;;  %v1511_v44 = vmax.f32 %v1510_v6, %v1219_v57  ;;  %v1223_v19 = vadd.f32 %v1222_v61, %v7579_v4 }
 0x2b5   :  { %v1745_v8 = vunpack.c.l.b16 %v1595_v14  ;;  %v1503_v55 = vmax.f32 %v1502_v31, %v1221_v27  ;;  %3234 = vmatmul.mubr.bf16.gmra.mrb[208].mxu1 %v7912_v9  ;;  %v7966_v1 = vpack.c.bf16 %v1221_v27, %v1217_v52 }
 0x2b6   :  { %v1746_v35 = vunpack.c.l.b16 %v1596_v41  ;;  %v1512_v11 = vmax.f32 %v1511_v44, %v1223_v19  ;;  %3243 = vmatprep.mubr.bf16.mxu1 %v7925_v3  ;;  %v7969_v22 = vpack.c.bf16 %v1223_v19, %v1219_v57 }
 0x2b7   :  { %9940 = vst [vmem:[#allocation41_spill] sm:$0xff] %v7966_v1  ;;  %v1778_v5 = vsel %vm1759_vm3, %v1745_v8, %v1777_v40  ;;  %v1504_v48 = vrot.slane %v1503_v55, 4 }
 0x2b8   :  { %9941 = vst [vmem:[#allocation42_spill] sm:$0xff] %v7969_v22  ;;  %v1513_v25 = vrot.slane %v1512_v11, 4  ;;  %v1226_v60 = vpop.f32.mrb[104].mxu1  ;;  %v1785_v6 = vsel %vm1759_vm3, %v1746_v35, %v1784_v12 }
 0x2b9   :  { %v1505_v47 = vmax.f32 %v1503_v55, %v1504_v48  ;;  %v1228_v14 = vpop.f32.mrb[105].mxu1  ;;  %v1227_v52 = vadd.f32 %v1226_v60, %v7576_v49 }
 0x2ba   :  { %v1514_v42 = vmax.f32 %v1512_v11, %v1513_v25  ;;  %v1230_v31 = vpop.f32.mrb[106].mxu1  ;;  %v1229_v57 = vadd.f32 %v1228_v14, %v7579_v4 }
 0x2bb   :  { %v1506_v61 = vrot.slane %v1505_v47, 2  ;;  %v1231_v44 = vadd.f32 %v1230_v31, %v7576_v49  ;;  %v1232_v27 = vpop.f32.mrb[107].mxu1 }
 0x2bc   :  { %v1515_v41 = vrot.slane %v1514_v42, 2  ;;  %v1233_v40 = vadd.f32 %v1232_v27, %v7579_v4 }
 0x2bd   :  { %v1507_v19 = vmax.f32 %v1505_v47, %v1506_v61  ;;  %v1519_v8 = vmax.f32 %v1227_v52, %v1231_v44  ;;  %3244 = vmatmul.mubr.bf16.gmra.mrb[212].mxu1 %v7922_v38  ;;  %v7978_v12 = vpack.c.bf16 %v1231_v44, %v1227_v52 }
 0x2be   :  { %v1516_v55 = vmax.f32 %v1514_v42, %v1515_v41  ;;  %v1528_v35 = vmax.f32 %v1229_v57, %v1233_v40  ;;  %3253 = vmatprep.mubr.bf16.mxu1 %v7937_v62  ;;  %v7981_v11 = vpack.c.bf16 %v1233_v40, %v1229_v57 }
 0x2bf   :  { %9942 = vst [vmem:[#allocation43_spill] sm:$0xff] %v7978_v12  ;;  %v1508_v48 = vrot.slane %v1507_v19, 1 }
 0x2c0   :  { %9943 = vst [vmem:[#allocation44_spill] sm:$0xff] %v7981_v11  ;;  %v1517_v25 = vrot.slane %v1516_v55, 1  ;;  %v1236_v60 = vpop.f32.mrb[108].mxu1 }
 0x2c1   :  { %v1509_v31 = vmax.f32 %v1507_v19, %v1508_v48  ;;  %v1237_v14 = vadd.f32 %v1236_v60, %v7576_v49  ;;  %v1238_v3 = vpop.f32.mrb[109].mxu1 }
 0x2c2   :  { %v1518_v27 = vmax.f32 %v1516_v55, %v1517_v25  ;;  %v1239_v47 = vadd.f32 %v1238_v3, %v7579_v4  ;;  %v1240_v61 = vpop.f32.mrb[110].mxu1 }
 0x2c3   :  { %v1597_v38 = vpack.c.bf16 %v1509_v31, %v1509_v31  ;;  %v1520_v52 = vmax.f32 %v1519_v8, %v1237_v14  ;;  %v1241_v42 = vadd.f32 %v1240_v61, %v7576_v49  ;;  %v1242_v44 = vpop.f32.mrb[111].mxu1 }
 0x2c4   :  { %v1598_v41 = vpack.c.bf16 %v1518_v27, %v1518_v27  ;;  %v1529_v62 = vmax.f32 %v1528_v35, %v1239_v47  ;;  %v1243_v57 = vadd.f32 %v1242_v44, %v7579_v4 }
 0x2c5   :  { %v1747_v40 = vunpack.c.l.b16 %v1597_v38  ;;  %v1521_v9 = vmax.f32 %v1520_v52, %v1241_v42  ;;  %3254 = vmatmul.mubr.bf16.gmra.mrb[216].mxu1 %v7934_v39  ;;  %v7988_v19 = vpack.c.bf16 %v1241_v42, %v1237_v14 }
 0x2c6   :  { %v1748_v48 = vunpack.c.l.b16 %v1598_v41  ;;  %v1530_v55 = vmax.f32 %v1529_v62, %v1243_v57  ;;  %3263 = vmatprep.mubr.bf16.mxu1 %v7947_v33  ;;  %v7991_v3 = vpack.c.bf16 %v1243_v57, %v1239_v47 }
 0x2c7   :  { %9944 = vst [vmem:[#allocation45_spill] sm:$0xff] %v7988_v19  ;;  %v1779_v8 = vsel %vm1761_vm4, %v1747_v40, %v1778_v5  ;;  %v1522_v25 = vrot.slane %v1521_v9, 4 }
 0x2c8   :  { %9945 = vst [vmem:[#allocation46_spill] sm:$0xff] %v7991_v3  ;;  %v1531_v60 = vrot.slane %v1530_v55, 4  ;;  %v1246_v31 = vpop.f32.mrb[112].mxu1  ;;  %v1786_v35 = vsel %vm1761_vm4, %v1748_v48, %v1785_v6 }
 0x2c9   :  { %v1523_v27 = vmax.f32 %v1521_v9, %v1522_v25  ;;  %v1248_v38 = vpop.f32.mrb[113].mxu1  ;;  %v1247_v14 = vadd.f32 %v1246_v31, %v7576_v49 }
 0x2ca   :  { %v1532_v61 = vmax.f32 %v1530_v55, %v1531_v60  ;;  %v1250_v52 = vpop.f32.mrb[114].mxu1  ;;  %v1249_v47 = vadd.f32 %v1248_v38, %v7579_v4 }
 0x2cb   :  { %v1524_v44 = vrot.slane %v1523_v27, 2  ;;  %v1251_v62 = vadd.f32 %v1250_v52, %v7576_v49  ;;  %v1252_v42 = vpop.f32.mrb[115].mxu1 }
 0x2cc   :  { %v1533_v41 = vrot.slane %v1532_v61, 2  ;;  %v1253_v5 = vadd.f32 %v1252_v42, %v7579_v4 }
 0x2cd   :  { %v1525_v57 = vmax.f32 %v1523_v27, %v1524_v44  ;;  %v1537_v40 = vmax.f32 %v1247_v14, %v1251_v62  ;;  %3264 = vmatmul.mubr.bf16.gmra.mrb[220].mxu1 %v7944_v45  ;;  %v8000_v6 = vpack.c.bf16 %v1251_v62, %v1247_v14 }
 0x2ce   :  { %v1534_v9 = vmax.f32 %v1532_v61, %v1533_v41  ;;  %v1546_v48 = vmax.f32 %v1249_v47, %v1253_v5  ;;  %3273 = vmatprep.mubr.bf16.mxu1 %v7959_v0  ;;  %v8003_v55 = vpack.c.bf16 %v1253_v5, %v1249_v47 }
 0x2cf   :  { %9946 = vst [vmem:[#allocation47_spill] sm:$0xff] %v8000_v6  ;;  %v1526_v25 = vrot.slane %v1525_v57, 1 }
 0x2d0   :  { %9947 = vst [vmem:[#allocation48_spill] sm:$0xff] %v8003_v55  ;;  %v1535_v60 = vrot.slane %v1534_v9, 1  ;;  %v1256_v31 = vpop.f32.mrb[116].mxu1 }
 0x2d1   :  { %v1527_v52 = vmax.f32 %v1525_v57, %v1526_v25  ;;  %v1257_v38 = vadd.f32 %v1256_v31, %v7576_v49  ;;  %v1258_v33 = vpop.f32.mrb[117].mxu1 }
 0x2d2   :  { %v1536_v42 = vmax.f32 %v1534_v9, %v1535_v60  ;;  %v1259_v27 = vadd.f32 %v1258_v33, %v7579_v4  ;;  %v1260_v44 = vpop.f32.mrb[118].mxu1 }
 0x2d3   :  { %v1599_v45 = vpack.c.bf16 %v1527_v52, %v1527_v52  ;;  %v1538_v14 = vmax.f32 %v1537_v40, %v1257_v38  ;;  %v1261_v61 = vadd.f32 %v1260_v44, %v7576_v49  ;;  %v1262_v62 = vpop.f32.mrb[119].mxu1 }
 0x2d4   :  { %v1600_v41 = vpack.c.bf16 %v1536_v42, %v1536_v42  ;;  %v1547_v0 = vmax.f32 %v1546_v48, %v1259_v27  ;;  %v1263_v47 = vadd.f32 %v1262_v62, %v7579_v4 }
 0x2d5   :  { %v1749_v5 = vunpack.c.l.b16 %v1599_v45  ;;  %v1539_v39 = vmax.f32 %v1538_v14, %v1261_v61  ;;  %3274 = vmatmul.mubr.bf16.gmra.mrb[224].mxu1 %v7956_v37  ;;  %v8010_v57 = vpack.c.bf16 %v1261_v61, %v1257_v38 }
 0x2d6   :  { %v1750_v25 = vunpack.c.l.b16 %v1600_v41  ;;  %v1548_v9 = vmax.f32 %v1547_v0, %v1263_v47  ;;  %3283 = vmatprep.mubr.bf16.mxu1 %v7969_v22  ;;  %v8013_v33 = vpack.c.bf16 %v1263_v47, %v1259_v27 }
 0x2d7   :  { %9948 = vst [vmem:[#allocation49_spill] sm:$0xff] %v8010_v57  ;;  %v1780_v40 = vsel %vm1763_vm5, %v1749_v5, %v1779_v8  ;;  %v1540_v60 = vrot.slane %v1539_v39, 4 }
 0x2d8   :  { %9949 = vst [vmem:[#allocation50_spill] sm:$0xff] %v8013_v33  ;;  %v1549_v31 = vrot.slane %v1548_v9, 4  ;;  %v1266_v52 = vpop.f32.mrb[120].mxu1  ;;  %v1787_v48 = vsel %vm1763_vm5, %v1750_v25, %v1786_v35 }
 0x2d9   :  { %v1541_v42 = vmax.f32 %v1539_v39, %v1540_v60  ;;  %v1268_v45 = vpop.f32.mrb[121].mxu1  ;;  %v1267_v38 = vadd.f32 %v1266_v52, %v7576_v49 }
 0x2da   :  { %v1550_v44 = vmax.f32 %v1548_v9, %v1549_v31  ;;  %v1270_v14 = vpop.f32.mrb[122].mxu1  ;;  %v1269_v27 = vadd.f32 %v1268_v45, %v7579_v4 }
 0x2db   :  { %v1542_v62 = vrot.slane %v1541_v42, 2  ;;  %v1271_v0 = vadd.f32 %v1270_v14, %v7576_v49  ;;  %v1272_v61 = vpop.f32.mrb[123].mxu1 }
 0x2dc   :  { %v1551_v41 = vrot.slane %v1550_v44, 2  ;;  %v1273_v8 = vadd.f32 %v1272_v61, %v7579_v4 }
 0x2dd   :  { %v1543_v47 = vmax.f32 %v1541_v42, %v1542_v62  ;;  %v1555_v5 = vmax.f32 %v1267_v38, %v1271_v0  ;;  %v8021_v22 = vpack.c.bf16 %v1271_v0, %v1267_v38  ;;  %3284 = vmatmul.mubr.bf16.gmra.mrb[228].mxu1 %v7966_v1 }
 0x2de   :  { %v1552_v39 = vmax.f32 %v1550_v44, %v1551_v41  ;;  %v1564_v35 = vmax.f32 %v1269_v27, %v1273_v8  ;;  %v8024_v25 = vpack.c.bf16 %v1273_v8, %v1269_v27  ;;  %3293 = vmatprep.mubr.bf16.mxu1 %v7981_v11 }
 0x2df   :  { %9950 = vst [vmem:[#allocation51_spill] sm:$0xff] %v8021_v22  ;;  %v1544_v9 = vrot.slane %v1543_v47, 1 }
 0x2e0   :  { %9951 = vst [vmem:[#allocation52_spill] sm:$0xff] %v8024_v25  ;;  %v1553_v60 = vrot.slane %v1552_v39, 1  ;;  %v1276_v31 = vpop.f32.mrb[124].mxu1 }
 0x2e1   :  { %v1545_v52 = vmax.f32 %v1543_v47, %v1544_v9  ;;  %v1277_v45 = vadd.f32 %v1276_v31, %v7576_v49  ;;  %v1278_v14 = vpop.f32.mrb[125].mxu1 }
 0x2e2   :  { %v1554_v61 = vmax.f32 %v1552_v39, %v1553_v60  ;;  %v1279_v42 = vadd.f32 %v1278_v14, %v7579_v4  ;;  %v1280_v62 = vpop.f32.mrb[126].mxu1 }
 0x2e3   :  { %v1601_v38 = vpack.c.bf16 %v1545_v52, %v1545_v52  ;;  %v1556_v0 = vmax.f32 %v1555_v5, %v1277_v45  ;;  %v1281_v44 = vadd.f32 %v1280_v62, %v7576_v49  ;;  %v1282_v41 = vpop.f32.mrb[127].mxu1 }
 0x2e4   :  { %v1602_v27 = vpack.c.bf16 %v1554_v61, %v1554_v61  ;;  %v1565_v8 = vmax.f32 %v1564_v35, %v1279_v42  ;;  %v1283_v11 = vadd.f32 %v1282_v41, %v7579_v4 }
 0x2e5   :  { %v1751_v1 = vunpack.c.l.b16 %v1601_v38  ;;  %v1557_v37 = vmax.f32 %v1556_v0, %v1281_v44  ;;  %v8031_v13 = vpack.c.bf16 %v1281_v44, %v1277_v45  ;;  %3294 = vmatmul.mubr.bf16.gmra.mrb[232].mxu1 %v7978_v12 }
 0x2e6   :  { %v1566_v47 = vmax.f32 %v1565_v8, %v1283_v11  ;;  %v8034_v39 = vpack.c.bf16 %v1283_v11, %v1279_v42  ;;  %3303 = vmatprep.mubr.bf16.mxu1 %v7991_v3  ;;  %v1752_v9 = vunpack.c.l.b16 %v1602_v27  ;;  %v6764_v3 = vld [vmem:[%s9821_s5 + $0x1cc] ss:$16 sps:$4 sm:$0xff]  }
 0x2e7   :  { %9952 = vst [vmem:[#allocation53_spill] sm:$0xff] %v8031_v13  ;;  %v1558_v5 = vrot.slane %v1557_v37, 4  ;;  %v1781_v49 = vsel %vm1765_vm6, %v1751_v1, %v1780_v40 }
 0x2e8   :  { %9953 = vst [vmem:[#allocation54_spill] sm:$0xff] %v8034_v39  ;;  %v1567_v60 = vrot.slane %v1566_v47, 4  ;;  %v8038_v31 = vpop.f32.mrb[128].mxu1  ;;  %v1788_v4 = vsel %vm1765_vm6, %v1752_v9, %v1787_v48 }
 0x2e9   :  { %9954 = vst [vmem:[#allocation55_spill] sm:$0xff] %v8038_v31  ;;  %v1559_v35 = vmax.f32 %v1557_v37, %v1558_v5  ;;  %v8041_v52 = vpop.f32.mrb[129].mxu1 }
 0x2ea   :  { %9955 = vst [vmem:[#allocation56_spill] sm:$0xff] %v8041_v52  ;;  %v1568_v45 = vmax.f32 %v1566_v47, %v1567_v60  ;;  %v8043_v14 = vpop.f32.mrb[130].mxu1  ;;  %v8168_v52 = vld [vmem:[#allocation7 + $0x104] ss:$8 sps:$4 sm:$0xff]  }
 0x2eb   :  { %9956 = vst [vmem:[#allocation57_spill] sm:$0xff] %v8043_v14  ;;  %v1560_v61 = vrot.slane %v1559_v35, 2  ;;  %v8045_v11 = vpop.f32.mrb[131].mxu1  ;;  %v6744_v14 = vld [vmem:[%s9821_s5 + $0x108] ss:$16 sps:$4 sm:$0xff]   ;;  %6430 = vmatprep.subr.bf16.mxu1 %v8168_v52 }
 0x2ec   :  { %9957 = vst [vmem:[#allocation58_spill] sm:$0xff] %v8045_v11  ;;  %v1569_v42 = vrot.slane %v1568_v45, 2  ;;  %v6825_v11 = vld [vmem:[#allocation7 + $0x100] ss:$8 sps:$4 sm:$0xff]  }
 0x2ed   :  { %v1561_v62 = vmax.f32 %v1559_v35, %v1560_v61  ;;  %3304 = vmatmul.mubr.bf16.gmra.mrb[236].mxu1 %v7988_v19  ;;  %v6833_v19 = vld [vmem:[#allocation7 + $0x114] ss:$8 sps:$4 sm:$0xff]  }
 0x2ee   :  { %v1570_v38 = vmax.f32 %v1568_v45, %v1569_v42  ;;  %3313 = vmatprep.mubr.bf16.mxu1 %v8003_v55  ;;  %6446 = vmatpush1.bf16.msra.mxu1 %v6825_v11  ;;  %v6753_v11 = vld [vmem:[%s9821_s5 + $0x168] ss:$16 sps:$4 sm:$0xff]  }
 0x2ef   :  { %v1562_v1 = vrot.slane %v1561_v62, 1  ;;  %v6831_v55 = vld [vmem:[#allocation7 + $0x110] ss:$8 sps:$4 sm:$0xff]   ;;  %6431 = vmatprep.subr.bf16.mxu1 %v6833_v19 }
 0x2f0   :  { %v1571_v40 = vrot.slane %v1570_v38, 1  ;;  %v8049_v0 = vpop.f32.mrb[132].mxu1  ;;  %v6765_v19 = vld [vmem:[%s9821_s5 + $0x1e8] ss:$16 sps:$4 sm:$0xff]  }
 0x2f1   :  { %9958 = vst [vmem:[#allocation59_spill] sm:$0xff] %v8049_v0  ;;  %v1563_v37 = vmax.f32 %v1561_v62, %v1562_v1  ;;  %v8051_v48 = vpop.f32.mrb[133].mxu1 }
 0x2f2   :  { %9959 = vst [vmem:[#allocation60_spill] sm:$0xff] %v8051_v48  ;;  %v1572_v44 = vmax.f32 %v1570_v38, %v1571_v40  ;;  %v8053_v41 = vpop.f32.mrb[134].mxu1  ;;  %v6720_v38 = vld [vmem:[%s9821_s5 + $0x8] ss:$16 sps:$4 sm:$0xff]   ;;  %6447 = vmatpush1.bf16.msra.mxu1 %v6831_v55  ;;  %v6770_v55 = vld [vmem:[#allocation5 + $0x4] ss:$16 sps:$4 sm:$0xff]  }
 0x2f3   :  { %9960 = vst [vmem:[#allocation61_spill] sm:$0xff] %v8053_v41  ;;  %v1603_v27 = vpack.c.bf16 %v1563_v37, %v1563_v37  ;;  %v8055_v8 = vpop.f32.mrb[135].mxu1 }
 0x2f4   :  { %9961 = vst [vmem:[#allocation62_spill] sm:$0xff] %v8055_v8  ;;  %v1604_v47 = vpack.c.bf16 %v1572_v44, %v1572_v44  ;;  %v6726_v44 = vld [vmem:[%s9821_s5 + $0x48] ss:$16 sps:$4 sm:$0xff]   ;;  %v6746_v8 = vld [vmem:[%s9821_s5 + $0x10c] ss:$16 sps:$4 sm:$0xff]  }
 0x2f5   :  { %v1753_v9 = vunpack.c.l.b16 %v1603_v27  ;;  %3314 = vmatmul.mubr.bf16.gmra.mrb[240].mxu1 %v8000_v6 }
 0x2f6   :  { %3323 = vmatprep.mubr.bf16.mxu1 %v8013_v33  ;;  %v1754_v5 = vunpack.c.l.b16 %v1604_v47  ;;  %v6731_v47 = vld [vmem:[%s9821_s5 + $0x6c] ss:$16 sps:$4 sm:$0xff]   ;;  %v6756_v33 = vld [vmem:[%s9821_s5 + $0x188] ss:$16 sps:$4 sm:$0xff]  }
 0x2f7   :  { %v1782_v60 = vsel %vm1767_vm7, %v1753_v9, %v1781_v49  ;;  %v6725_v49 = vld [vmem:[%s9821_s5 + $0x2c] ss:$16 sps:$4 sm:$0xff]  }
 0x2f8   :  { %v8060_v35 = vpop.f32.mrb[136].mxu1  ;;  %v1789_v45 = vsel %vm1767_vm7, %v1754_v5, %v1788_v4  ;;  %v8064_v61 = vpack.c.b16 %v1782_v60, %v7879_v28  ;;  %v6723_v28 = vld [vmem:[%s9821_s5 + $0x28] ss:$16 sps:$4 sm:$0xff]   ;;  %v6734_v60 = vld [vmem:[%s9821_s5 + $0x8c] ss:$16 sps:$4 sm:$0xff]  }
 0x2f9   :  { %v8066_v42 = vpop.f32.mrb[137].mxu1  ;;  %v1791_v62 = vpack.c.b16 %v1789_v45, %v7882_v59  ;;  %v6728_v59 = vld [vmem:[%s9821_s5 + $0x4c] ss:$16 sps:$4 sm:$0xff]   ;;  %v6729_v5 = vld [vmem:[%s9821_s5 + $0x68] ss:$16 sps:$4 sm:$0xff]  }
 0x2fa   :  { %v8072_v1 = vpop.f32.mrb[138].mxu1 }
 0x2fb   :  { %2146 = vmatprep.mubr.bf16.mxu0 %v1791_v62  ;;  %v8077_v40 = vpop.f32.mrb[139].mxu1 }
 0x2fc   :  { %2147 = vmatmul.mubr.bf16.vlgmr.msra.gmra.mrb[64].mxu0 %v8064_v61 }
 0x2fd   :  { %2158 = vmatpush1.bf16.msra.mxu0 %v6720_v38  ;;  %2189 = vmatprep.mubr.bf16.mxu0 %v1791_v62  ;;  %v6732_v38 = vld [vmem:[%s9821_s5 + $0x88] ss:$16 sps:$4 sm:$0xff]  }
 0x2fe   :  { %3324 = vmatmul.mubr.bf16.gmra.mrb[244].mxu1 %v8010_v57  ;;  %2159 = vmatprep.subr.bf16.mxu0 %v6725_v49 }
 0x2ff   :  { %3333 = vmatprep.mubr.bf16.mxu1 %v8024_v25 }
 0x300   :  { %v8088_v4 = vpop.f32.mrb[140].mxu1 }
 0x301   :  { %2160 = vmatpush1.bf16.msra.mxu0 %v6723_v28  ;;  %v8090_v37 = vpop.f32.mrb[141].mxu1  ;;  %v6737_v28 = vld [vmem:[%s9821_s5 + $0xac] ss:$16 sps:$4 sm:$0xff]  }
 0x302   :  { %v8095_v27 = vpop.f32.mrb[142].mxu1  ;;  %2161 = vmatprep.subr.bf16.mxu0 %v6728_v59 }
 0x303   :  { %v8100_v9 = vpop.f32.mrb[143].mxu1 }
 0x305   :  { %2162 = vmatpush1.bf16.msra.mxu0 %v6726_v44  ;;  %v6735_v44 = vld [vmem:[%s9821_s5 + $0xa8] ss:$16 sps:$4 sm:$0xff]  }
 0x306   :  { %3334 = vmatmul.mubr.bf16.gmra.mrb[248].mxu1 %v8021_v22  ;;  %2163 = vmatprep.subr.bf16.mxu0 %v6731_v47  ;;  %v6740_v47 = vld [vmem:[%s9821_s5 + $0xcc] ss:$16 sps:$4 sm:$0xff]  }
 0x307   :  { %3343 = vmatprep.mubr.bf16.mxu1 %v8034_v39 }
 0x308   :  { %v8110_v45 = vpop.f32.mrb[144].mxu1 }
 0x309   :  { %2164 = vmatpush1.bf16.msra.mxu0 %v6729_v5  ;;  %v8112_v62 = vpop.f32.mrb[145].mxu1 }
 0x30a   :  { %v8117_v49 = vpop.f32.mrb[146].mxu1  ;;  %2165 = vmatprep.subr.bf16.mxu0 %v6734_v60 }
 0x30b   :  { %v8122_v59 = vpop.f32.mrb[147].mxu1 }
 0x30d   :  { %2166 = vmatpush1.bf16.msra.mxu0 %v6732_v38  ;;  %v6738_v38 = vld [vmem:[%s9821_s5 + $0xc8] ss:$16 sps:$4 sm:$0xff]  }
 0x30e   :  { %3344 = vmatmul.mubr.bf16.gmra.mrb[252].mxu1 %v8031_v13  ;;  %2167 = vmatprep.subr.bf16.mxu0 %v6737_v28  ;;  %v6743_v28 = vld [vmem:[%s9821_s5 + $0xec] ss:$16 sps:$4 sm:$0xff]  }
 0x30f   :  { %v6752_v13 = vld [vmem:[%s9821_s5 + $0x14c] ss:$16 sps:$4 sm:$0xff]  }
 0x310   :  { %v8131_v5 = vpop.f32.mrb[148].mxu1 }
 0x311   :  { %2168 = vmatpush1.bf16.msra.mxu0 %v6735_v44  ;;  %v8133_v60 = vpop.f32.mrb[149].mxu1  ;;  %v6741_v44 = vld [vmem:[%s9821_s5 + $0xe8] ss:$16 sps:$4 sm:$0xff]  }
 0x312   :  { %v8138_v41 = vpop.f32.mrb[150].mxu1  ;;  %2169 = vmatprep.subr.bf16.mxu0 %v6740_v47 }
 0x313   :  { %v8143_v0 = vpop.f32.mrb[151].mxu1 }
 0x315   :  { %2170 = vmatpush1.bf16.msra.mxu0 %v6738_v38  ;;  %v6749_v38 = vld [vmem:[%s9821_s5 + $0x12c] ss:$16 sps:$4 sm:$0xff]  }
 0x316   :  { %2171 = vmatprep.subr.bf16.mxu0 %v6743_v28 }
 0x318   :  { %v8151_v48 = vpop.f32.mrb[152].mxu1 }
 0x319   :  { %2172 = vmatpush1.bf16.msra.mxu0 %v6741_v44  ;;  %v8153_v47 = vpop.f32.mrb[153].mxu1  ;;  %v6747_v44 = vld [vmem:[%s9821_s5 + $0x128] ss:$16 sps:$4 sm:$0xff]  }
 0x31a   :  { %v8158_v31 = vpop.f32.mrb[154].mxu1  ;;  %2173 = vmatprep.subr.bf16.mxu0 %v6746_v8 }
 0x31b   :  { %v8163_v28 = vpop.f32.mrb[155].mxu1 }
 0x31d   :  { %2174 = vmatpush1.bf16.msra.mxu0 %v6744_v14  ;;  %v6750_v14 = vld [vmem:[%s9821_s5 + $0x148] ss:$16 sps:$4 sm:$0xff]  }
 0x31e   :  { %2175 = vmatprep.subr.bf16.mxu0 %v6749_v38  ;;  %v6755_v38 = vld [vmem:[%s9821_s5 + $0x16c] ss:$16 sps:$4 sm:$0xff]  }
 0x320   :  { %v8174_v8 = vpop.f32.mrb[156].mxu1 }
 0x321   :  { %2176 = vmatpush1.bf16.msra.mxu0 %v6747_v44  ;;  %v8176_v39 = vpop.f32.mrb[157].mxu1  ;;  %v6758_v44 = vld [vmem:[%s9821_s5 + $0x18c] ss:$16 sps:$4 sm:$0xff]  }
 0x322   :  { %v8181_v22 = vpop.f32.mrb[158].mxu1  ;;  %2177 = vmatprep.subr.bf16.mxu0 %v6752_v13 }
 0x323   :  { %v8186_v25 = vpop.f32.mrb[159].mxu1 }
 0x325   :  { %2178 = vmatpush1.bf16.msra.mxu0 %v6750_v14  ;;  %v6761_v14 = vld [vmem:[%s9821_s5 + $0x1ac] ss:$16 sps:$4 sm:$0xff]  }
 0x326   :  { %2179 = vmatprep.subr.bf16.mxu0 %v6755_v38 }
 0x328   :  { %v8194_v57 = vpop.f32.mrb[160].mxu1 }
 0x329   :  { %9962 = vst [vmem:[#allocation63_spill] sm:$0xff] %v8194_v57  ;;  %2180 = vmatpush1.bf16.msra.mxu0 %v6753_v11  ;;  %v8196_v13 = vpop.f32.mrb[161].mxu1  ;;  %v6759_v11 = vld [vmem:[%s9821_s5 + $0x1a8] ss:$16 sps:$4 sm:$0xff]  }
 0x32a   :  { %v8201_v6 = vpop.f32.mrb[162].mxu1  ;;  %2181 = vmatprep.subr.bf16.mxu0 %v6758_v44 }
 0x32b   :  { %9963 = vst [vmem:[#allocation64_spill] sm:$0xff] %v8201_v6  ;;  %v8206_v38 = vpop.f32.mrb[163].mxu1 }
 0x32c   :  { %9964 = vst [vmem:[#allocation65_spill] sm:$0xff] %v8206_v38 }
 0x32d   :  { %2182 = vmatpush1.bf16.msra.mxu0 %v6756_v33  ;;  %v6762_v33 = vld [vmem:[%s9821_s5 + $0x1c8] ss:$16 sps:$4 sm:$0xff]  }
 0x32e   :  { %2183 = vmatprep.subr.bf16.mxu0 %v6761_v14  ;;  %v6767_v14 = vld [vmem:[%s9821_s5 + $0x1ec] ss:$16 sps:$4 sm:$0xff]  }
 0x330   :  { %v8214_v44 = vpop.f32.mrb[164].mxu1 }
 0x331   :  { %9965 = vst [vmem:[#allocation66_spill] sm:$0xff] %v8214_v44  ;;  %2184 = vmatpush1.bf16.msra.mxu0 %v6759_v11  ;;  %v8216_v12 = vpop.f32.mrb[165].mxu1 }
 0x332   :  { %9966 = vst [vmem:[#allocation67_spill] sm:$0xff] %v8216_v12  ;;  %v8221_v6 = vpop.f32.mrb[166].mxu1  ;;  %2185 = vmatprep.subr.bf16.mxu0 %v6764_v3  ;;  %v6773_v12 = vld [vmem:[#allocation5 + $0x24] ss:$16 sps:$4 sm:$0xff]  }
 0x333   :  { %9967 = vst [vmem:[#allocation68_spill] sm:$0xff] %v8221_v6  ;;  %v8226_v57 = vpop.f32.mrb[167].mxu1  ;;  %v6768_v6 = vld [vmem:[#allocation5] ss:$16 sps:$4 sm:$0xff]  }
 0x334   :  { %9968 = vst [vmem:[#allocation69_spill] sm:$0xff] %v8226_v57  ;;  %v6839_v57 = vld [vmem:[#allocation7 + $0x124] ss:$8 sps:$4 sm:$0xff]  }
 0x335   :  { %2186 = vmatpush1.bf16.msra.mxu0 %v6762_v33  ;;  %v6771_v33 = vld [vmem:[#allocation5 + $0x20] ss:$16 sps:$4 sm:$0xff]   ;;  %6432 = vmatprep.subr.bf16.mxu1 %v6839_v57 }
 0x336   :  { %2187 = vmatprep.subr.bf16.mxu0 %v6767_v14  ;;  %v6837_v14 = vld [vmem:[#allocation7 + $0x120] ss:$8 sps:$4 sm:$0xff]  }
 0x337   :  { %6448 = vmatpush1.bf16.msra.mxu1 %v6837_v14  ;;  %v6780_v14 = vld [vmem:[#allocation5 + $0x80] ss:$16 sps:$4 sm:$0xff]  }
 0x338   :  { %v8231_v11 = vpop.f32.mrb[168].mxu1 }
 0x339   :  { %9969 = vst [vmem:[#allocation70_spill] sm:$0xff] %v8231_v11  ;;  %2188 = vmatpush1.bf16.msra.mxu0 %v6765_v19  ;;  %v8233_v44 = vpop.f32.mrb[169].mxu1  ;;  %v6776_v11 = vld [vmem:[#allocation5 + $0x44] ss:$16 sps:$4 sm:$0xff]  }
 0x33a   :  { %9970 = vst [vmem:[#allocation71_spill] sm:$0xff] %v8233_v44  ;;  %v8235_v3 = vpop.f32.mrb[170].mxu1  ;;  %2648 = vmatprep.subr.bf16.mxu0 %v6770_v55  ;;  %v6774_v55 = vld [vmem:[#allocation5 + $0x40] ss:$16 sps:$4 sm:$0xff]  }
 0x33b   :  { %9971 = vst [vmem:[#allocation72_spill] sm:$0xff] %v8235_v3  ;;  %v8237_v38 = vpop.f32.mrb[171].mxu1 }
 0x33c   :  { %9972 = vst [vmem:[#allocation73_spill] sm:$0xff] %v8237_v38  ;;  %2190 = vmatmul.mubr.bf16.vlgmr.msra.gmra.mrb[68].mxu0 %v8064_v61  ;;  %v6779_v61 = vld [vmem:[#allocation5 + $0x64] ss:$16 sps:$4 sm:$0xff]  }
 0x33d   :  { %2649 = vmatpush1.bf16.msra.mxu0 %v6768_v6  ;;  %2680 = vmatprep.mubr.bf16.mxu0 %v7589_v54  ;;  %v6777_v54 = vld [vmem:[#allocation5 + $0x60] ss:$16 sps:$4 sm:$0xff]   ;;  %v6782_v38 = vld [vmem:[#allocation5 + $0x84] ss:$16 sps:$4 sm:$0xff]  }
 0x33e   :  { %2650 = vmatprep.subr.bf16.mxu0 %v6773_v12 }
 0x340   :  { %v8241_v19 = vpop.f32.mrb[172].mxu1 }
 0x341   :  { %9973 = vst [vmem:[#allocation74_spill] sm:$0xff] %v8241_v19  ;;  %2651 = vmatpush1.bf16.msra.mxu0 %v6771_v33  ;;  %v8243_v3 = vpop.f32.mrb[173].mxu1  ;;  %v6785_v19 = vld [vmem:[#allocation5 + $0xa4] ss:$16 sps:$4 sm:$0xff]  }
 0x342   :  { %9974 = vst [vmem:[#allocation75_spill] sm:$0xff] %v8243_v3  ;;  %v8245_v44 = vpop.f32.mrb[174].mxu1  ;;  %2652 = vmatprep.subr.bf16.mxu0 %v6776_v11  ;;  %v6783_v11 = vld [vmem:[#allocation5 + $0xa0] ss:$16 sps:$4 sm:$0xff]  }
 0x343   :  { %9975 = vst [vmem:[#allocation76_spill] sm:$0xff] %v8245_v44  ;;  %v8247_v6 = vpop.f32.mrb[175].mxu1  ;;  %v6843_v44 = vld [vmem:[#allocation7 + $0x130] ss:$8 sps:$4 sm:$0xff]  }
 0x344   :  { %9976 = vst [vmem:[#allocation77_spill] sm:$0xff] %v8247_v6  ;;  %v6845_v6 = vld [vmem:[#allocation7 + $0x134] ss:$8 sps:$4 sm:$0xff]  }
 0x345   :  { %2653 = vmatpush1.bf16.msra.mxu0 %v6774_v55  ;;  %v6788_v55 = vld [vmem:[#allocation5 + $0xc4] ss:$16 sps:$4 sm:$0xff]   ;;  %6433 = vmatprep.subr.bf16.mxu1 %v6845_v6 }
 0x346   :  { %2654 = vmatprep.subr.bf16.mxu0 %v6779_v61  ;;  %6449 = vmatpush1.bf16.msra.mxu1 %v6843_v44  ;;  %v6792_v44 = vld [vmem:[#allocation5 + $0x100] ss:$16 sps:$4 sm:$0xff]  }
 0x348   :  { %v8249_v12 = vpop.f32.mrb[176].mxu1 }
 0x349   :  { %9977 = vst [vmem:[#allocation78_spill] sm:$0xff] %v8249_v12  ;;  %2655 = vmatpush1.bf16.msra.mxu0 %v6777_v54  ;;  %v8251_v57 = vpop.f32.mrb[177].mxu1  ;;  %v6786_v12 = vld [vmem:[#allocation5 + $0xc0] ss:$16 sps:$4 sm:$0xff]  }
 0x34a   :  { %9978 = vst [vmem:[#allocation79_spill] sm:$0xff] %v8251_v57  ;;  %v8253_v33 = vpop.f32.mrb[178].mxu1  ;;  %2656 = vmatprep.subr.bf16.mxu0 %v6782_v38  ;;  %v6791_v38 = vld [vmem:[#allocation5 + $0xe4] ss:$16 sps:$4 sm:$0xff]  }
 0x34b   :  { %9979 = vst [vmem:[#allocation80_spill] sm:$0xff] %v8253_v33  ;;  %v8255_v3 = vpop.f32.mrb[179].mxu1 }
 0x34c   :  { %9980 = vst [vmem:[#allocation81_spill] sm:$0xff] %v8255_v3  ;;  %v6794_v3 = vld [vmem:[#allocation5 + $0x104] ss:$16 sps:$4 sm:$0xff]  }
 0x34d   :  { %2657 = vmatpush1.bf16.msra.mxu0 %v6780_v14  ;;  %v6789_v14 = vld [vmem:[#allocation5 + $0xe0] ss:$16 sps:$4 sm:$0xff]  }
 0x34e   :  { %2658 = vmatprep.subr.bf16.mxu0 %v6785_v19 }
 0x350   :  { %v8257_v61 = vpop.f32.mrb[180].mxu1 }
 0x351   :  { %9981 = vst [vmem:[#allocation82_spill] sm:$0xff] %v8257_v61  ;;  %2659 = vmatpush1.bf16.msra.mxu0 %v6783_v11  ;;  %v8259_v54 = vpop.f32.mrb[181].mxu1  ;;  %v6797_v61 = vld [vmem:[#allocation5 + $0x124] ss:$16 sps:$4 sm:$0xff]  }
 0x352   :  { %9982 = vst [vmem:[#allocation83_spill] sm:$0xff] %v8259_v54  ;;  %v8261_v57 = vpop.f32.mrb[182].mxu1  ;;  %2660 = vmatprep.subr.bf16.mxu0 %v6788_v55  ;;  %v6795_v55 = vld [vmem:[#allocation5 + $0x120] ss:$16 sps:$4 sm:$0xff]  }
 0x353   :  { %9983 = vst [vmem:[#allocation84_spill] sm:$0xff] %v8261_v57  ;;  %v8263_v33 = vpop.f32.mrb[183].mxu1  ;;  %v6849_v57 = vld [vmem:[#allocation7 + $0x140] ss:$8 sps:$4 sm:$0xff]  }
 0x354   :  { %9984 = vst [vmem:[#allocation85_spill] sm:$0xff] %v8263_v33  ;;  %v6851_v33 = vld [vmem:[#allocation7 + $0x144] ss:$8 sps:$4 sm:$0xff]  }
 0x355   :  { %2661 = vmatpush1.bf16.msra.mxu0 %v6786_v12  ;;  %v6800_v12 = vld [vmem:[#allocation5 + $0x144] ss:$16 sps:$4 sm:$0xff]   ;;  %6434 = vmatprep.subr.bf16.mxu1 %v6851_v33 }
 0x356   :  { %2662 = vmatprep.subr.bf16.mxu0 %v6791_v38  ;;  %6450 = vmatpush1.bf16.msra.mxu1 %v6849_v57  ;;  %v6804_v57 = vld [vmem:[#allocation5 + $0x180] ss:$16 sps:$4 sm:$0xff]  }
 0x358   :  { %v8265_v19 = vpop.f32.mrb[184].mxu1 }
 0x359   :  { %9985 = vst [vmem:[#allocation86_spill] sm:$0xff] %v8265_v19  ;;  %2663 = vmatpush1.bf16.msra.mxu0 %v6789_v14  ;;  %v8267_v6 = vpop.f32.mrb[185].mxu1 }
 0x35a   :  { %9986 = vst [vmem:[#allocation87_spill] sm:$0xff] %v8267_v6  ;;  %v8269_v11 = vpop.f32.mrb[186].mxu1  ;;  %2664 = vmatprep.subr.bf16.mxu0 %v6794_v3  ;;  %v6798_v6 = vld [vmem:[#allocation5 + $0x140] ss:$16 sps:$4 sm:$0xff]   ;;  %v6803_v3 = vld [vmem:[#allocation5 + $0x164] ss:$16 sps:$4 sm:$0xff]  }
 0x35b   :  { %9987 = vst [vmem:[#allocation88_spill] sm:$0xff] %v8269_v11  ;;  %v8271_v54 = vpop.f32.mrb[187].mxu1 }
 0x35c   :  { %9988 = vst [vmem:[#allocation89_spill] sm:$0xff] %v8271_v54  ;;  %v6806_v54 = vld [vmem:[#allocation5 + $0x184] ss:$16 sps:$4 sm:$0xff]  }
 0x35d   :  { %2665 = vmatpush1.bf16.msra.mxu0 %v6792_v44  ;;  %v6801_v44 = vld [vmem:[#allocation5 + $0x160] ss:$16 sps:$4 sm:$0xff]  }
 0x35e   :  { %2666 = vmatprep.subr.bf16.mxu0 %v6797_v61 }
 0x360   :  { %v8273_v38 = vpop.f32.mrb[188].mxu1 }
 0x361   :  { %9989 = vst [vmem:[#allocation90_spill] sm:$0xff] %v8273_v38  ;;  %2667 = vmatpush1.bf16.msra.mxu0 %v6795_v55  ;;  %v8275_v14 = vpop.f32.mrb[189].mxu1  ;;  %v6809_v38 = vld [vmem:[#allocation5 + $0x1a4] ss:$16 sps:$4 sm:$0xff]  }
 0x362   :  { %9990 = vst [vmem:[#allocation91_spill] sm:$0xff] %v8275_v14  ;;  %v8277_v19 = vpop.f32.mrb[190].mxu1  ;;  %2668 = vmatprep.subr.bf16.mxu0 %v6800_v12  ;;  %v6807_v12 = vld [vmem:[#allocation5 + $0x1a0] ss:$16 sps:$4 sm:$0xff]  }
 0x363   :  { %9991 = vst [vmem:[#allocation92_spill] sm:$0xff] %v8277_v19  ;;  %v8279_v11 = vpop.f32.mrb[191].mxu1  ;;  %v6855_v19 = vld [vmem:[#allocation7 + $0x150] ss:$8 sps:$4 sm:$0xff]  }
 0x364   :  { %9992 = vst [vmem:[#allocation93_spill] sm:$0xff] %v8279_v11  ;;  %v6857_v11 = vld [vmem:[#allocation7 + $0x154] ss:$8 sps:$4 sm:$0xff]  }
 0x365   :  { %2669 = vmatpush1.bf16.msra.mxu0 %v6798_v6  ;;  %v6812_v6 = vld [vmem:[#allocation5 + $0x1c4] ss:$16 sps:$4 sm:$0xff]   ;;  %6435 = vmatprep.subr.bf16.mxu1 %v6857_v11 }
 0x366   :  { %2670 = vmatprep.subr.bf16.mxu0 %v6803_v3  ;;  %6451 = vmatpush1.bf16.msra.mxu1 %v6855_v19  ;;  %v6816_v19 = vld [vmem:[#allocation7] ss:$8 sps:$4 sm:$0xff]  }
 0x368   :  { %v8281_v61 = vpop.f32.mrb[192].mxu1 }
 0x369   :  { %9993 = vst [vmem:[#allocation94_spill] sm:$0xff] %v8281_v61  ;;  %2671 = vmatpush1.bf16.msra.mxu0 %v6801_v44  ;;  %v8283_v33 = vpop.f32.mrb[193].mxu1  ;;  %v6810_v61 = vld [vmem:[#allocation5 + $0x1c0] ss:$16 sps:$4 sm:$0xff]  }
 0x36a   :  { %9994 = vst [vmem:[#allocation95_spill] sm:$0xff] %v8283_v33  ;;  %v8285_v55 = vpop.f32.mrb[194].mxu1  ;;  %2672 = vmatprep.subr.bf16.mxu0 %v6806_v54  ;;  %v6815_v54 = vld [vmem:[#allocation5 + $0x1e4] ss:$16 sps:$4 sm:$0xff]  }
 0x36b   :  { %9995 = vst [vmem:[#allocation96_spill] sm:$0xff] %v8285_v55  ;;  %v8287_v14 = vpop.f32.mrb[195].mxu1 }
 0x36c   :  { %9996 = vst [vmem:[#allocation97_spill] sm:$0xff] %v8287_v14  ;;  %v6818_v14 = vld [vmem:[#allocation7 + $0x4] ss:$8 sps:$4 sm:$0xff]  }
 0x36d   :  { %2673 = vmatpush1.bf16.msra.mxu0 %v6804_v57  ;;  %v6813_v57 = vld [vmem:[#allocation5 + $0x1e0] ss:$16 sps:$4 sm:$0xff]  }
 0x36e   :  { %2674 = vmatprep.subr.bf16.mxu0 %v6809_v38 }
 0x370   :  { %v8289_v3 = vpop.f32.mrb[196].mxu1 }
 0x371   :  { %9997 = vst [vmem:[#allocation98_spill] sm:$0xff] %v8289_v3  ;;  %2675 = vmatpush1.bf16.msra.mxu0 %v6807_v12  ;;  %v8291_v44 = vpop.f32.mrb[197].mxu1  ;;  %v6821_v3 = vld [vmem:[#allocation7 + $0x14] ss:$8 sps:$4 sm:$0xff]  }
 0x372   :  { %9998 = vst [vmem:[#allocation99_spill] sm:$0xff] %v8291_v44  ;;  %v8293_v33 = vpop.f32.mrb[198].mxu1  ;;  %2676 = vmatprep.subr.bf16.mxu0 %v6812_v6  ;;  %v6863_v44 = vld [vmem:[#allocation7 + $0x164] ss:$8 sps:$4 sm:$0xff]   ;;  %v6861_v6 = vld [vmem:[#allocation7 + $0x160] ss:$8 sps:$4 sm:$0xff]  }
 0x373   :  { %9999 = vst [vmem:[#allocation100_spill] sm:$0xff] %v8293_v33  ;;  %v8295_v55 = vpop.f32.mrb[199].mxu1  ;;  %6436 = vmatprep.subr.bf16.mxu1 %v6863_v44 }
 0x374   :  { %6452 = vmatpush1.bf16.msra.mxu1 %v6861_v6  ;;  %v6872_v6 = vld [vmem:[#allocation7 + $0x194] ss:$8 sps:$4 sm:$0xff]  }
 0x375   :  { %2677 = vmatpush1.bf16.msra.mxu0 %v6810_v61  ;;  %v6819_v61 = vld [vmem:[#allocation7 + $0x10] ss:$8 sps:$4 sm:$0xff]  }
 0x376   :  { %2678 = vmatprep.subr.bf16.mxu0 %v6815_v54  ;;  %v6866_v54 = vld [vmem:[#allocation7 + $0x174] ss:$8 sps:$4 sm:$0xff]  }
 0x377   :  { %6437 = vmatprep.subr.bf16.mxu1 %v6866_v54  ;;  %v6870_v54 = vld [vmem:[#allocation7 + $0x190] ss:$8 sps:$4 sm:$0xff]  }
 0x378   :  { %v8297_v38 = vpop.f32.mrb[200].mxu1 }
 0x379   :  { %10000 = vst [vmem:[#allocation101_spill] sm:$0xff] %v8297_v38  ;;  %2679 = vmatpush1.bf16.msra.mxu0 %v6813_v57  ;;  %v8299_v11 = vpop.f32.mrb[201].mxu1  ;;  %v6824_v57 = vld [vmem:[#allocation7 + $0x24] ss:$8 sps:$4 sm:$0xff]   ;;  %v6864_v38 = vld [vmem:[#allocation7 + $0x170] ss:$8 sps:$4 sm:$0xff]  }
 0x37a   :  { %10001 = vst [vmem:[#allocation102_spill] sm:$0xff] %v8299_v11  ;;  %v8301_v12 = vpop.f32.mrb[202].mxu1  ;;  %4842 = vmatprep.subr.bf16.mxu0 %v6818_v14  ;;  %6453 = vmatpush1.bf16.msra.mxu1 %v6864_v38 }
 0x37b   :  { %10002 = vst [vmem:[#allocation103_spill] sm:$0xff] %v8301_v12  ;;  %v8303_v33 = vpop.f32.mrb[203].mxu1 }
 0x37c   :  { %10003 = vst [vmem:[#allocation104_spill] sm:$0xff] %v8303_v33  ;;  %2681 = vmatmul.mubr.bf16.vlgmr.msra.gmra.mrb[72].mxu0 %v7585_v51  ;;  %v6822_v33 = vld [vmem:[#allocation7 + $0x20] ss:$8 sps:$4 sm:$0xff]   ;;  %v6830_v51 = vld [vmem:[#allocation7 + $0x34] ss:$8 sps:$4 sm:$0xff]  }
 0x37d   :  { %2690 = vmatprep.mubr.bf16.mxu0 %v7599_v10  ;;  %4843 = vmatpush1.bf16.msra.mxu0 %v6816_v19  ;;  %v6869_v10 = vld [vmem:[#allocation7 + $0x184] ss:$8 sps:$4 sm:$0xff]   ;;  %v6867_v19 = vld [vmem:[#allocation7 + $0x180] ss:$8 sps:$4 sm:$0xff]  }
 0x37e   :  { %4844 = vmatprep.subr.bf16.mxu0 %v6821_v3  ;;  %6438 = vmatprep.subr.bf16.mxu1 %v6869_v10  ;;  %v6828_v3 = vld [vmem:[#allocation7 + $0x30] ss:$8 sps:$4 sm:$0xff]   ;;  %v6876_v10 = vld [vmem:[#allocation7 + $0x1a0] ss:$8 sps:$4 sm:$0xff]  }
 0x37f   :  { %6454 = vmatpush1.bf16.msra.mxu1 %v6867_v19  ;;  %v6848_v19 = vld [vmem:[#allocation7 + $0x64] ss:$8 sps:$4 sm:$0xff]  }
 0x380   :  { %v8307_v12 = vpop.f32.mrb[204].mxu1  ;;  %6439 = vmatprep.subr.bf16.mxu1 %v6872_v6  ;;  %v6879_v6 = vld [vmem:[#allocation7 + $0x1b0] ss:$8 sps:$4 sm:$0xff]  }
 0x381   :  { %10004 = vst [vmem:[#allocation105_spill] sm:$0xff] %v8307_v12  ;;  %v8309_v14 = vpop.f32.mrb[205].mxu1  ;;  %4845 = vmatpush1.bf16.msra.mxu0 %v6819_v61  ;;  %v6836_v61 = vld [vmem:[#allocation7 + $0x44] ss:$8 sps:$4 sm:$0xff]  }
 0x382   :  { %v8311_v11 = vpop.f32.mrb[206].mxu1  ;;  %4846 = vmatprep.subr.bf16.mxu0 %v6824_v57 }
 0x383   :  { %10005 = vst [vmem:[#allocation106_spill] sm:$0xff] %v8311_v11  ;;  %v8313_v44 = vpop.f32.mrb[207].mxu1  ;;  %v6834_v11 = vld [vmem:[#allocation7 + $0x40] ss:$8 sps:$4 sm:$0xff]   ;;  %6455 = vmatpush1.bf16.msra.mxu1 %v6870_v54 }
 0x384   :  { %2691 = vmatmul.mubr.bf16.gmra.mrb[76].mxu0 %v7596_v7  ;;  %v6842_v7 = vld [vmem:[#allocation7 + $0x54] ss:$8 sps:$4 sm:$0xff]   ;;  %v6846_v54 = vld [vmem:[#allocation7 + $0x60] ss:$8 sps:$4 sm:$0xff]  }
 0x385   :  { %2700 = vmatprep.mubr.bf16.mxu0 %v7609_v32  ;;  %4847 = vmatpush1.bf16.msra.mxu0 %v6822_v33  ;;  %v6878_v32 = vld [vmem:[#allocation7 + $0x1a4] ss:$8 sps:$4 sm:$0xff]  }
 0x386   :  { %4848 = vmatprep.subr.bf16.mxu0 %v6830_v51  ;;  %6440 = vmatprep.subr.bf16.mxu1 %v6878_v32  ;;  %v6840_v51 = vld [vmem:[#allocation7 + $0x50] ss:$8 sps:$4 sm:$0xff]  }
 0x387   :  { %6456 = vmatpush1.bf16.msra.mxu1 %v6876_v10  ;;  %v6852_v32 = vld [vmem:[#allocation7 + $0x70] ss:$8 sps:$4 sm:$0xff]   ;;  %v6860_v10 = vld [vmem:[#allocation7 + $0x84] ss:$8 sps:$4 sm:$0xff]  }
 0x388   :  { %v8317_v57 = vpop.f32.mrb[208].mxu1 }
 0x389   :  { %10006 = vst [vmem:[#allocation107_spill] sm:$0xff] %v8317_v57  ;;  %v8319_v38 = vpop.f32.mrb[209].mxu1  ;;  %4849 = vmatpush1.bf16.msra.mxu0 %v6828_v3  ;;  %v6881_v3 = vld [vmem:[#allocation7 + $0x1b4] ss:$8 sps:$4 sm:$0xff]  }
 0x38a   :  { %v8321_v12 = vpop.f32.mrb[210].mxu1  ;;  %4850 = vmatprep.subr.bf16.mxu0 %v6836_v61  ;;  %6441 = vmatprep.subr.bf16.mxu1 %v6881_v3 }
 0x38b   :  { %10007 = vst [vmem:[#allocation108_spill] sm:$0xff] %v8321_v12  ;;  %v8323_v33 = vpop.f32.mrb[211].mxu1  ;;  %6457 = vmatpush1.bf16.msra.mxu1 %v6879_v6  ;;  %v6858_v6 = vld [vmem:[#allocation7 + $0x80] ss:$8 sps:$4 sm:$0xff]  }
 0x38c   :  { %2701 = vmatmul.mubr.bf16.gmra.mrb[80].mxu0 %v7606_v26  ;;  %v6854_v26 = vld [vmem:[#allocation7 + $0x74] ss:$8 sps:$4 sm:$0xff]  }
 0x38d   :  { %2710 = vmatprep.mubr.bf16.mxu0 %v7619_v34  ;;  %4851 = vmatpush1.bf16.msra.mxu0 %v6834_v11  ;;  %v6884_v11 = vld [vmem:[#allocation7 + $0x1c4] ss:$8 sps:$4 sm:$0xff]  }
 0x38e   :  { %4852 = vmatprep.subr.bf16.mxu0 %v6842_v7  ;;  %v6882_v7 = vld [vmem:[#allocation7 + $0x1c0] ss:$8 sps:$4 sm:$0xff]   ;;  %6442 = vmatprep.subr.bf16.mxu1 %v6884_v11  ;;  %v6873_v11 = vld [vmem:[#allocation7 + $0x90] ss:$8 sps:$4 sm:$0xff]  }
 0x38f   :  { %6458 = vmatpush1.bf16.msra.mxu1 %v6882_v7  ;;  %v6896_v7 = vld [vmem:[#allocation7 + $0x1f4] ss:$8 sps:$4 sm:$0xff]  }
 0x390   :  { %v8327_v12 = vpop.f32.mrb[212].mxu1 }
 0x391   :  { %10008 = vst [vmem:[#allocation109_spill] sm:$0xff] %v8327_v12  ;;  %v8329_v61 = vpop.f32.mrb[213].mxu1  ;;  %4853 = vmatpush1.bf16.msra.mxu0 %v6840_v51  ;;  %v6887_v51 = vld [vmem:[#allocation7 + $0x1d4] ss:$8 sps:$4 sm:$0xff]  }
 0x392   :  { %v8331_v57 = vpop.f32.mrb[214].mxu1  ;;  %4854 = vmatprep.subr.bf16.mxu0 %v6848_v19  ;;  %v6885_v19 = vld [vmem:[#allocation7 + $0x1d0] ss:$8 sps:$4 sm:$0xff]   ;;  %6443 = vmatprep.subr.bf16.mxu1 %v6887_v51 }
 0x393   :  { %10009 = vst [vmem:[#allocation110_spill] sm:$0xff] %v8331_v57  ;;  %v8333_v34 = vpop.f32.mrb[215].mxu1  ;;  %6459 = vmatpush1.bf16.msra.mxu1 %v6885_v19  ;;  %v6894_v51 = vld [vmem:[#allocation7 + $0x1f0] ss:$8 sps:$4 sm:$0xff]   ;;  %v6890_v19 = vld [vmem:[#allocation7 + $0xa4] ss:$8 sps:$4 sm:$0xff]  }
 0x394   :  { %2711 = vmatmul.mubr.bf16.gmra.mrb[84].mxu0 %v7616_v56  ;;  %v6875_v56 = vld [vmem:[#allocation7 + $0x94] ss:$8 sps:$4 sm:$0xff]  }
 0x395   :  { %2720 = vmatprep.mubr.bf16.mxu0 %v7635_v17  ;;  %4855 = vmatpush1.bf16.msra.mxu0 %v6846_v54  ;;  %v6893_v54 = vld [vmem:[#allocation7 + $0x1e4] ss:$8 sps:$4 sm:$0xff]  }
 0x396   :  { %4856 = vmatprep.subr.bf16.mxu0 %v6854_v26  ;;  %v6891_v26 = vld [vmem:[#allocation7 + $0x1e0] ss:$8 sps:$4 sm:$0xff]   ;;  %6444 = vmatprep.subr.bf16.mxu1 %v6893_v54 }
 0x397   :  { %6460 = vmatpush1.bf16.msra.mxu1 %v6891_v26  ;;  %v6897_v26 = vld [vmem:[#allocation7 + $0xb0] ss:$8 sps:$4 sm:$0xff]  }
 0x398   :  { %v8337_v3 = vpop.f32.mrb[216].mxu1  ;;  %6445 = vmatprep.subr.bf16.mxu1 %v6896_v7 }
 0x399   :  { %10010 = vst [vmem:[#allocation111_spill] sm:$0xff] %v8337_v3  ;;  %v8339_v57 = vpop.f32.mrb[217].mxu1  ;;  %4857 = vmatpush1.bf16.msra.mxu0 %v6852_v32 }
 0x39a   :  { %v8341_v12 = vpop.f32.mrb[218].mxu1  ;;  %4858 = vmatprep.subr.bf16.mxu0 %v6860_v10 }
 0x39b   :  { %10011 = vst [vmem:[#allocation112_spill] sm:$0xff] %v8341_v12  ;;  %v8343_v17 = vpop.f32.mrb[219].mxu1  ;;  %v6888_v12 = vld [vmem:[#allocation7 + $0xa0] ss:$8 sps:$4 sm:$0xff]   ;;  %6461 = vmatpush1.bf16.msra.mxu1 %v6894_v51 }
 0x39c   :  { %2721 = vmatmul.mubr.bf16.gmra.mrb[88].mxu0 %v7632_v58 }
 0x39d   :  { %2730 = vmatprep.mubr.bf16.mxu0 %v7645_v46  ;;  %4859 = vmatpush1.bf16.msra.mxu0 %v6858_v6 }
 0x39e   :  { %4860 = vmatprep.subr.bf16.mxu0 %v6875_v56 }
 0x3a0   :  { %v8347_v32 = vpop.f32.mrb[220].mxu1 }
 0x3a1   :  { %10012 = vst [vmem:[#allocation113_spill] sm:$0xff] %v8347_v32  ;;  %v8349_v10 = vpop.f32.mrb[221].mxu1  ;;  %4861 = vmatpush1.bf16.msra.mxu0 %v6873_v11  ;;  %v6899_v11 = vld [vmem:[#allocation7 + $0xb4] ss:$8 sps:$4 sm:$0xff]   ;;  %v10064_v32 = vld [vmem:[#allocation32_spill] sm:$0xff] }
 0x3a2   :  { %v8351_v3 = vpop.f32.mrb[222].mxu1  ;;  %4862 = vmatprep.subr.bf16.mxu0 %v6890_v19 }
 0x3a3   :  { %10013 = vst [vmem:[#allocation114_spill] sm:$0xff] %v8351_v3  ;;  %v8353_v58 = vpop.f32.mrb[223].mxu1  ;;  %v10063_v3 = vld [vmem:[#allocation29_spill] sm:$0xff] }
 0x3a4   :  { %10014 = vst [vmem:[#allocation115_spill] sm:$0xff] %v8353_v58  ;;  %2731 = vmatmul.mubr.bf16.gmra.mrb[92].mxu0 %v7642_v18 }
 0x3a5   :  { %2740 = vmatprep.mubr.bf16.mxu0 %v7671_v21  ;;  %4863 = vmatpush1.bf16.msra.mxu0 %v6888_v12 }
 0x3a6   :  { %4864 = vmatprep.subr.bf16.mxu0 %v6899_v11  ;;  %v6902_v11 = vld [vmem:[#allocation7 + $0xc4] ss:$8 sps:$4 sm:$0xff]  }
 0x3a8   :  { %v8357_v46 = vpop.f32.mrb[224].mxu1 }
 0x3a9   :  { %10015 = vst [vmem:[#allocation116_spill] sm:$0xff] %v8357_v46  ;;  %v8359_v6 = vpop.f32.mrb[225].mxu1  ;;  %4865 = vmatpush1.bf16.msra.mxu0 %v6897_v26  ;;  %v6900_v26 = vld [vmem:[#allocation7 + $0xc0] ss:$8 sps:$4 sm:$0xff]  }
 0x3aa   :  { %10016 = vst [vmem:[#allocation117_spill] sm:$0xff] %v8359_v6  ;;  %v8361_v56 = vpop.f32.mrb[226].mxu1  ;;  %4866 = vmatprep.subr.bf16.mxu0 %v6902_v11 }
 0x3ab   :  { %10017 = vst [vmem:[#allocation118_spill] sm:$0xff] %v8361_v56  ;;  %v8363_v54 = vpop.f32.mrb[227].mxu1 }
 0x3ac   :  { %10018 = vst [vmem:[#allocation119_spill] sm:$0xff] %v8363_v54  ;;  %2741 = vmatmul.mubr.bf16.gmra.mrb[96].mxu0 %v7668_v16 }
 0x3ad   :  { %2750 = vmatprep.mubr.bf16.mxu0 %v7681_v50  ;;  %4867 = vmatpush1.bf16.msra.mxu0 %v6900_v26 }
 0x3b0   :  { %v8367_v18 = vpop.f32.mrb[228].mxu1 }
 0x3b1   :  { %10019 = vst [vmem:[#allocation120_spill] sm:$0xff] %v8367_v18  ;;  %v8369_v21 = vpop.f32.mrb[229].mxu1 }
 0x3b2   :  { %10020 = vst [vmem:[#allocation121_spill] sm:$0xff] %v8369_v21  ;;  %v8371_v12 = vpop.f32.mrb[230].mxu1 }
 0x3b3   :  { %10021 = vst [vmem:[#allocation122_spill] sm:$0xff] %v8371_v12  ;;  %v8373_v7 = vpop.f32.mrb[231].mxu1 }
 0x3b4   :  { %10022 = vst [vmem:[#allocation123_spill] sm:$0xff] %v8373_v7  ;;  %2751 = vmatmul.mubr.bf16.gmra.mrb[100].mxu0 %v7678_v29 }
 0x3b5   :  { %2760 = vmatprep.mubr.bf16.mxu0 %v7706_v24 }
 0x3b8   :  { %v8377_v51 = vpop.f32.mrb[232].mxu1 }
 0x3b9   :  { %10023 = vst [vmem:[#allocation124_spill] sm:$0xff] %v8377_v51  ;;  %v8379_v16 = vpop.f32.mrb[233].mxu1 }
 0x3ba   :  { %10024 = vst [vmem:[#allocation125_spill] sm:$0xff] %v8379_v16  ;;  %v8381_v19 = vpop.f32.mrb[234].mxu1 }
 0x3bb   :  { %10025 = vst [vmem:[#allocation126_spill] sm:$0xff] %v8381_v19  ;;  %v8383_v50 = vpop.f32.mrb[235].mxu1 }
 0x3bc   :  { %10026 = vst [vmem:[#allocation127_spill] sm:$0xff] %v8383_v50  ;;  %2761 = vmatmul.mubr.bf16.gmra.mrb[104].mxu0 %v7703_v20 }
 0x3bd   :  { %2770 = vmatprep.mubr.bf16.mxu0 %v7716_v2  ;;  %v8404_v2 = vld [vmem:[%s9823_s7] sm:$0xf] }
 0x3c0   :  { %v8387_v12 = vpop.f32.mrb[236].mxu1 }
 0x3c1   :  { %10027 = vst [vmem:[#allocation128_spill] sm:$0xff] %v8387_v12  ;;  %v8389_v29 = vpop.f32.mrb[237].mxu1 }
 0x3c2   :  { %10028 = vst [vmem:[#allocation129_spill] sm:$0xff] %v8389_v29  ;;  %v8391_v24 = vpop.f32.mrb[238].mxu1 }
 0x3c3   :  { %10029 = vst [vmem:[#allocation130_spill] sm:$0xff] %v8391_v24  ;;  %v8393_v51 = vpop.f32.mrb[239].mxu1  ;;  %v6903_v24 = vld [vmem:[#allocation7 + $0xd0] ss:$8 sps:$4 sm:$0xff]  }
 0x3c4   :  { %10030 = vst [vmem:[#allocation131_spill] sm:$0xff] %v8393_v51  ;;  %2771 = vmatmul.mubr.bf16.gmra.mrb[108].mxu0 %v7713_v30  ;;  %v1674_v30 = vrot.slane %v8404_v2, %v7565_v15 }
 0x3c5   :  { %2780 = vmatprep.mubr.bf16.mxu0 %v7740_v23  ;;  %v6905_v23 = vld [vmem:[#allocation7 + $0xd4] ss:$8 sps:$4 sm:$0xff]  }
 0x3c6   :  { %4868 = vmatprep.subr.bf16.mxu0 %v6905_v23 }
 0x3c7   :  { %4869 = vmatpush1.bf16.msra.mxu0 %v6903_v24 }
 0x3c8   :  { %v8397_v19 = vpop.f32.mrb[240].mxu1 }
 0x3c9   :  { %10031 = vst [vmem:[#allocation132_spill] sm:$0xff] %v8397_v19  ;;  %v8399_v20 = vpop.f32.mrb[241].mxu1  ;;  %v1678_v19 = vrot.slane %v8404_v2, %v7571_v36 }
 0x3ca   :  { %10032 = vst [vmem:[#allocation133_spill] sm:$0xff] %v8399_v20  ;;  %v8406_v26 = vpop.f32.mrb[242].mxu1 }
 0x3cb   :  { %10033 = vst [vmem:[#allocation134_spill] sm:$0xff] %v8406_v26  ;;  %v8408_v11 = vpop.f32.mrb[243].mxu1 }
 0x3cc   :  { %10034 = vst [vmem:[#allocation135_spill] sm:$0xff] %v8408_v11  ;;  %2781 = vmatmul.mubr.bf16.gmra.mrb[112].mxu0 %v7737_v43 }
 0x3cd   :  { %2790 = vmatprep.mubr.bf16.mxu0 %v7750_v53 }
 0x3cf   :  { %v2148_v20 = vpop.f32.mrb[64].mxu0 }
 0x3d0   :  { %v8416_v12 = vadd.f32 %v2148_v20, %v1674_v30  ;;  %v2150_v26 = vpop.f32.mrb[65].mxu0 }
 0x3d1   :  { %v8418_v51 = vadd.f32 %v2150_v26, %v1678_v19  ;;  %v8420_v11 = vpop.f32.mrb[244].mxu1  ;;  %v2152_v43 = vpop.f32.mrb[66].mxu0  ;;  %v10038_v26 = vld [vmem:[#allocation15_spill] sm:$0xff] }
 0x3d2   :  { %10035 = vst [vmem:[#allocation136_spill] sm:$0xff] %v8420_v11  ;;  %v8422_v29 = vadd.f32 %v2152_v43, %v1674_v30  ;;  %v8424_v50 = vpop.f32.mrb[245].mxu1  ;;  %v2154_v16 = vpop.f32.mrb[67].mxu0  ;;  %v10040_v11 = vld [vmem:[#allocation17_spill] sm:$0xff] }
 0x3d3   :  { %10036 = vst [vmem:[#allocation137_spill] sm:$0xff] %v8424_v50  ;;  %v3362_v53 = vcombine.low %v8416_v12, %v8418_v51  ;;  %v3363_v23 = vcombine.high %v8416_v12, %v8418_v51  ;;  %v8430_v24 = vadd.f32 %v2154_v16, %v1678_v19  ;;  %v8432_v20 = vpop.f32.mrb[246].mxu1  ;;  %v10044_v51 = vld [vmem:[#allocation16_spill] sm:$0xff]  ;;  %v10046_v19 = vld [vmem:[#allocation19_spill] sm:$0xff] }
 0x3d4   :  { %10037 = vst [vmem:[#allocation138_spill] sm:$0xff] %v8432_v20  ;;  %2791 = vmatmul.mubr.bf16.gmra.mrb[116].mxu0 %v10038_v26  ;;  %v8435_v18 = vpop.f32.mrb[247].mxu1  ;;  %v6906_v26 = vld [vmem:[#allocation7 + $0xe0] ss:$8 sps:$4 sm:$0xff]   ;;  %v6908_v20 = vld [vmem:[#allocation7 + $0xe4] ss:$8 sps:$4 sm:$0xff]  }
 0x3d5   :  { %10039 = vst [vmem:[#allocation15_spill] sm:$0xff] %v8435_v18  ;;  %2800 = vmatprep.mubr.bf16.mxu0 %v10040_v11  ;;  %4870 = vmatprep.subr.bf16.mxu0 %v6908_v20  ;;  %v6911_v18 = vld [vmem:[#allocation7 + $0xf4] ss:$8 sps:$4 sm:$0xff]   ;;  %v10055_v20 = vld [vmem:[#allocation24_spill] sm:$0xff] }
 0x3d6   :  { %4871 = vmatpush1.bf16.msra.mxu0 %v6906_v26  ;;  %v10056_v26 = vld [vmem:[#allocation23_spill] sm:$0xff] }
 0x3d7   :  { %4872 = vmatprep.subr.bf16.mxu0 %v6911_v18 }
 0x3d9   :  { %v8442_v50 = vpop.f32.mrb[248].mxu1 }
 0x3da   :  { %10041 = vst [vmem:[#allocation17_spill] sm:$0xff] %v8442_v50  ;;  %v8444_v7 = vpop.f32.mrb[249].mxu1  ;;  %v10050_v50 = vld [vmem:[#allocation18_spill] sm:$0xff] }
 0x3db   :  { %10042 = vst [vmem:[#allocation139_spill] sm:$0xff] %v8444_v7  ;;  %v8446_v12 = vpop.f32.mrb[250].mxu1 }
 0x3dc   :  { %10043 = vst [vmem:[#allocation140_spill] sm:$0xff] %v8446_v12  ;;  %2801 = vmatmul.mubr.bf16.gmra.mrb[120].mxu0 %v10044_v51  ;;  %v8449_v16 = vpop.f32.mrb[251].mxu1  ;;  %v10052_v12 = vld [vmem:[#allocation21_spill] sm:$0xff]  ;;  %v10053_v51 = vld [vmem:[#allocation20_spill] sm:$0xff] }
 0x3dd   :  { %10045 = vst [vmem:[#allocation16_spill] sm:$0xff] %v8449_v16  ;;  %2810 = vmatprep.mubr.bf16.mxu0 %v10046_v19  ;;  %v10054_v16 = vld [vmem:[#allocation22_spill] sm:$0xff] }
 0x3de   :  { %v6909_v19 = vld [vmem:[#allocation7 + $0xf0] ss:$8 sps:$4 sm:$0xff]  }
 0x3df   :  { %4873 = vmatpush1.bf16.msra.mxu0 %v6909_v19 }
 0x3e0   :  { %5195 = vmatprep.subr.bf16.mxu0 %v8168_v52 }
 0x3e1   :  { %v8452_v30 = vpop.f32.mrb[252].mxu1 }
 0x3e2   :  { %10047 = vst [vmem:[#allocation19_spill] sm:$0xff] %v8452_v30  ;;  %v8454_v43 = vpop.f32.mrb[253].mxu1  ;;  %v10060_v30 = vld [vmem:[#allocation12_spill] sm:$0xff] }
 0x3e3   :  { %10048 = vst [vmem:[#allocation141_spill] sm:$0xff] %v8454_v43  ;;  %v8456_v11 = vpop.f32.mrb[254].mxu1  ;;  %v8475_v18 = vsub.s32 3, %v10060_v30 }
 0x3e4   :  { %10049 = vst [vmem:[#allocation142_spill] sm:$0xff] %v8456_v11  ;;  %2811 = vmatmul.mubr.bf16.gmra.mrb[124].mxu0 %v10050_v50  ;;  %v8459_v7 = vpop.f32.mrb[255].mxu1  ;;  %v10057_v50 = vld [vmem:[#allocation26_spill] sm:$0xff]  ;;  %v10058_v11 = vld [vmem:[#allocation25_spill] sm:$0xff] }
 0x3e5   :  { %10051 = vst [vmem:[#allocation18_spill] sm:$0xff] %v8459_v7  ;;  %2820 = vmatprep.mubr.bf16.mxu0 %v10052_v12  ;;  %v10059_v12 = vld [vmem:[#allocation28_spill] sm:$0xff]  ;;  %v8472_v7 = vsub.s32 2, %v10060_v30 }
 0x3e7   :  { %v1682_v19 = vrot.slane %v8404_v2, %v8472_v7 }
 0x3ec   :  { %2821 = vmatmul.mubr.bf16.gmra.mrb[128].mxu0 %v10053_v51  ;;  %v7045_v51 = vmov 1966171168  }
 0x3ed   :  { %2830 = vmatprep.mubr.bf16.mxu0 %v10054_v16  ;;  %v3367_v16 = vunpack.c.l.s4 %v7045_v51 }
 0x3ef   :  { %v3368_v52 = vunpack.c.0.s8 %v3367_v16 }
 0x3f4   :  { %2831 = vmatmul.mubr.bf16.gmra.mrb[132].mxu0 %v7817_v63  ;;  %v10061_v63 = vld [vmem:[#allocation27_spill] sm:$0xff] }
 0x3f5   :  { %2840 = vmatprep.mubr.bf16.mxu0 %v10055_v20  ;;  %v10062_v20 = vld [vmem:[#allocation30_spill] sm:$0xff] }
 0x3fc   :  { %2841 = vmatmul.mubr.bf16.gmra.mrb[136].mxu0 %v10056_v26 }
 0x3fd   :  { %2850 = vmatprep.mubr.bf16.mxu0 %v10057_v50  ;;  %v8484_v50 = vsub.s32 %v3368_v52, %v10060_v30 }
 0x3ff   :  { %v3372_v6 = vrot.slane %v3362_v53, %v8484_v50  ;;  %v10065_v53 = vcombine.low %v8422_v29, %v8430_v24 }
 0x404   :  { %2851 = vmatmul.mubr.bf16.gmra.mrb[140].mxu0 %v10058_v11  ;;  %v1686_v11 = vrot.slane %v8404_v2, %v8475_v18 }
 0x405   :  { %2860 = vmatprep.mubr.bf16.mxu0 %v10059_v12 }
 0x40c   :  { %2861 = vmatmul.mubr.bf16.gmra.mrb[144].mxu0 %v10061_v63 }
 0x40d   :  { %2870 = vmatprep.mubr.bf16.mxu0 %v10062_v20  ;;  %v3379_v20 = vrot.slane %v3363_v23, %v8484_v50 }
 0x40f   :  { %v2191_v26 = vpop.f32.mrb[68].mxu0 }
 0x410   :  { %v2192_v12 = vadd.f32 %v2191_v26, %v1682_v19  ;;  %v2193_v51 = vpop.f32.mrb[69].mxu0 }
 0x411   :  { %v2194_v43 = vadd.f32 %v2193_v51, %v1686_v11  ;;  %v2195_v21 = vpop.f32.mrb[70].mxu0 }
 0x412   :  { %v2196_v56 = vadd.f32 %v2195_v21, %v1682_v19  ;;  %v2197_v16 = vpop.f32.mrb[71].mxu0 }
 0x413   :  { %v3364_v46 = vcombine.low %v2192_v12, %v2194_v43  ;;  %v3365_v63 = vcombine.high %v2192_v12, %v2194_v43  ;;  %v2198_v54 = vadd.f32 %v2197_v16, %v1686_v11  ;;  %v8496_v43 = vrot.slane %v10065_v53, %v8484_v50 }
 0x414   :  { %2871 = vmatmul.mubr.bf16.gmra.mrb[148].mxu0 %v10063_v3  ;;  %v10066_v3 = vcombine.high %v8422_v29, %v8430_v24 }
 0x415   :  { %v3386_v2 = vrot.slane %v3364_v46, %v8484_v50  ;;  %v3393_v30 = vrot.slane %v3365_v63, %v8484_v50  ;;  %v3432_v52 = vcombine.low %v2196_v56, %v2198_v54  ;;  %v3433_v26 = vcombine.high %v2196_v56, %v2198_v54  ;;  %2880 = vmatprep.mubr.bf16.mxu0 %v10064_v32 }
 0x416   :  { %v8502_v46 = vrot.slane %v10066_v3, %v8484_v50 }
 0x417   :  { %v3394_v51 = vcombine.low %v3372_v6, %v3386_v2  ;;  %v3395_v21 = vcombine.high %v3372_v6, %v3386_v2  ;;  %v3396_v19 = vcombine.low %v3379_v20, %v3393_v30  ;;  %v3397_v58 = vcombine.high %v3379_v20, %v3393_v30  ;;  %v10068_v20 = vld [vmem:[#allocation31_spill] sm:$0xff] }
 0x418   :  { %v8505_v56 = vrot.slane %v3432_v52, %v8484_v50  ;;  %v8508_v32 = vrot.slane %v3433_v26, %v8484_v50  ;;  %v10069_v52 = vld [vmem:[#allocation34_spill] sm:$0xff] }
 0x419   :  { %v8511_v6 = vrot.slane %v3396_v19, %v8484_v50  ;;  %v8514_v54 = vrot.slane %v3395_v21, %v8484_v50  ;;  %v8529_v63 = vrot.slane %v3394_v51, %v8484_v50  ;;  %v8538_v19 = vrot.slane %v3397_v58, %v8484_v50 }
 0x41b   :  { %10067 = vst [vmem:[#allocation21_spill] sm:$0xff] %v8511_v6  ;;  %v3525_v12 = vrot.slane %v8514_v54, %v8472_v7  ;;  %v3529_v16 = vrot.slane %v8514_v54, %v8475_v18  ;;  %10070 = vst [vmem:[#allocation20_spill] sm:$0xff] %v8538_v19  ;;  %v8542_v53 = vrot.slane %v8511_v6, %v8472_v7 }
 0x41c   :  { %2881 = vmatmul.mubr.bf16.gmra.mrb[152].mxu0 %v10068_v20  ;;  %v8550_v58 = vcombine.high %v8529_v63, %v8529_v63 }
 0x41d   :  { %v3836_v2 = vadd.f32 %v3525_v12, %v8060_v35  ;;  %v3840_v30 = vadd.f32 %v3525_v12, %v8072_v1  ;;  %2890 = vmatprep.mubr.bf16.mxu0 %v10069_v52  ;;  %v3837_v26 = vadd.f32 %v3529_v16, %v8066_v42  ;;  %v3841_v21 = vadd.f32 %v3529_v16, %v8077_v40 }
 0x41e   :  { %v3845_v35 = vadd.f32 %v3529_v16, %v8090_v37  ;;  %v3849_v1 = vadd.f32 %v3529_v16, %v8100_v9  ;;  %v3844_v52 = vadd.f32 %v3525_v12, %v8088_v4  ;;  %v3848_v42 = vadd.f32 %v3525_v12, %v8095_v27  ;;  %v10072_v12 = vld [vmem:[#allocation33_spill] sm:$0xff] }
 0x41f   :  { %v4092_v51 = vmax.f32 %v3836_v2, 0.0  ;;  %v4096_v3 = vmax.f32 %v3840_v30, 0.0  ;;  %v4093_v20 = vmax.f32 %v3837_v26, 0.0  ;;  %v4097_v11 = vmax.f32 %v3841_v21, 0.0 }
 0x420   :  { %v8554_v2 = vcombine.high %v8514_v54, %v8514_v54  ;;  %v4101_v30 = vmax.f32 %v3845_v35, 0.0  ;;  %v4105_v26 = vmax.f32 %v3849_v1, 0.0  ;;  %v4100_v21 = vmax.f32 %v3844_v52, 0.0 }
 0x421   :  { %v4340_v40 = vpack.c.bf16 %v4096_v3, %v4092_v51  ;;  %v4341_v24 = vpack.c.bf16 %v4097_v11, %v4093_v20  ;;  %v4104_v37 = vmax.f32 %v3848_v42, 0.0  ;;  %v3541_v4 = vrot.slane %v8550_v58, %v8472_v7  ;;  %v10073_v3 = vld [vmem:[#allocation36_spill] sm:$0xff] }
 0x422   :  { %10071 = vst [vmem:[#allocation22_spill] sm:$0xff] %v8554_v2  ;;  %v3545_v27 = vrot.slane %v8550_v58, %v8475_v18  ;;  %v3557_v9 = vrot.slane %v8554_v2, %v8472_v7  ;;  %v3561_v11 = vrot.slane %v8554_v2, %v8475_v18  ;;  %v4345_v16 = vpack.c.bf16 %v4105_v26, %v4101_v30 }
 0x423   :  { %5247 = vmatprep.mubr.bf16.mxu1 %v4341_v24  ;;  %v4344_v51 = vpack.c.bf16 %v4104_v37, %v4100_v21  ;;  %v3577_v24 = vrot.slane %v8511_v6, %v8475_v18  ;;  %v3852_v1 = vadd.f32 %v3541_v4, %v8110_v45  ;;  %v3856_v52 = vadd.f32 %v3541_v4, %v8117_v49 }
 0x424   :  { %2891 = vmatmul.mubr.bf16.gmra.mrb[156].mxu0 %v10072_v12  ;;  %5248 = vmatmul.mubr.bf16.vlgmr.msra.gmra.mrb[0].mxu1 %v4340_v40  ;;  %v3853_v20 = vadd.f32 %v3545_v27, %v8112_v62  ;;  %v3857_v35 = vadd.f32 %v3545_v27, %v8122_v59  ;;  %v3861_v42 = vadd.f32 %v3545_v27, %v8133_v60 }
 0x425   :  { %2900 = vmatprep.mubr.bf16.mxu0 %v10073_v3  ;;  %5257 = vmatprep.mubr.bf16.mxu1 %v4345_v16  ;;  %v3865_v40 = vadd.f32 %v3545_v27, %v8143_v0  ;;  %v3860_v30 = vadd.f32 %v3541_v4, %v8131_v5  ;;  %v3864_v26 = vadd.f32 %v3541_v4, %v8138_v41  ;;  %v4108_v12 = vmax.f32 %v3852_v1, 0.0  ;;  %v10074_v1 = vld [vmem:[#allocation35_spill] sm:$0xff] }
 0x426   :  { %v4109_v21 = vmax.f32 %v3853_v20, 0.0  ;;  %v4113_v37 = vmax.f32 %v3857_v35, 0.0  ;;  %v4112_v3 = vmax.f32 %v3856_v52, 0.0  ;;  %v4117_v62 = vmax.f32 %v3861_v42, 0.0 }
 0x427   :  { %v4121_v29 = vmax.f32 %v3865_v40, 0.0  ;;  %v4116_v59 = vmax.f32 %v3860_v30, 0.0  ;;  %v4120_v23 = vmax.f32 %v3864_v26, 0.0  ;;  %v3869_v49 = vadd.f32 %v3561_v11, %v8153_v47 }
 0x428   :  { %v4349_v45 = vpack.c.bf16 %v4113_v37, %v4109_v21  ;;  %v4348_v2 = vpack.c.bf16 %v4112_v3, %v4108_v12  ;;  %v3873_v60 = vadd.f32 %v3561_v11, %v8163_v28  ;;  %v3868_v5 = vadd.f32 %v3557_v9, %v8151_v48  ;;  %v10077_v37 = vld [vmem:[#allocation63_spill] sm:$0xff]  ;;  %v10078_v3 = vld [vmem:[#allocation64_spill] sm:$0xff] }
 0x429   :  { %v4353_v16 = vpack.c.bf16 %v4121_v29, %v4117_v62  ;;  %v8578_v0 = vpack.c.bf16 %v4120_v23, %v4116_v59  ;;  %v3872_v41 = vadd.f32 %v3557_v9, %v8158_v31  ;;  %v4125_v4 = vmax.f32 %v3869_v49, 0.0  ;;  %v10075_v29 = vld [vmem:[#allocation38_spill] sm:$0xff]  ;;  %v10079_v62 = vld [vmem:[#allocation67_spill] sm:$0xff] }
 0x42a   :  { %v4129_v27 = vmax.f32 %v3873_v60, 0.0  ;;  %v3877_v20 = vadd.f32 %v3561_v11, %v8176_v39  ;;  %v3881_v35 = vadd.f32 %v3561_v11, %v8186_v25  ;;  %v4124_v52 = vmax.f32 %v3868_v5, 0.0  ;;  %v10081_v60 = vld [vmem:[#allocation66_spill] sm:$0xff] }
 0x42b   :  { %v4128_v47 = vmax.f32 %v3872_v41, 0.0  ;;  %v3876_v28 = vadd.f32 %v3557_v9, %v8174_v8  ;;  %v3880_v23 = vadd.f32 %v3557_v9, %v8181_v22  ;;  %v3885_v39 = vadd.f32 %v3577_v24, %v8196_v13  ;;  %v10082_v41 = vld [vmem:[#allocation68_spill] sm:$0xff] }
 0x42c   :  { %2901 = vmatmul.mubr.bf16.gmra.mrb[160].mxu0 %v10074_v1  ;;  %5258 = vmatmul.mubr.bf16.gmra.mrb[4].mxu1 %v4344_v51  ;;  %v8588_v48 = vpack.c.bf16 %v4129_v27, %v4125_v4  ;;  %v4133_v31 = vmax.f32 %v3877_v20, 0.0  ;;  %v4137_v42 = vmax.f32 %v3881_v35, 0.0  ;;  %v10076_v51 = vld [vmem:[#allocation65_spill] sm:$0xff]  ;;  %v3589_v8 = vrot.slane %v8538_v19, %v8472_v7 }
 0x42d   :  { %2910 = vmatprep.mubr.bf16.mxu0 %v10075_v29  ;;  %5267 = vmatprep.mubr.bf16.mxu1 %v4349_v45  ;;  %v8591_v40 = vpack.c.bf16 %v4128_v47, %v4124_v52  ;;  %v4132_v25 = vmax.f32 %v3876_v28, 0.0  ;;  %v4136_v11 = vmax.f32 %v3880_v23, 0.0  ;;  %v3889_v30 = vadd.f32 %v3577_v24, %v10076_v51  ;;  %v10080_v45 = vld [vmem:[#allocation69_spill] sm:$0xff] }
 0x42e   :  { %v8596_v26 = vpack.c.bf16 %v4137_v42, %v4133_v31  ;;  %v4141_v22 = vmax.f32 %v3885_v39, 0.0  ;;  %v3884_v12 = vadd.f32 %v8542_v53, %v10077_v37  ;;  %v3888_v13 = vadd.f32 %v8542_v53, %v10078_v3  ;;  %v10083_v29 = vld [vmem:[#allocation37_spill] sm:$0xff]  ;;  %v10084_v31 = vld [vmem:[#allocation71_spill] sm:$0xff] }
 0x42f   :  { %v8598_v9 = vpack.c.bf16 %v4136_v11, %v4132_v25  ;;  %v4145_v21 = vmax.f32 %v3889_v30, 0.0  ;;  %v3893_v59 = vadd.f32 %v3577_v24, %v10079_v62  ;;  %v3897_v49 = vadd.f32 %v3577_v24, %v10080_v45  ;;  %v10085_v39 = vld [vmem:[#allocation73_spill] sm:$0xff]  ;;  %v10086_v25 = vld [vmem:[#allocation40_spill] sm:$0xff]  ;;  %v10091_v45 = vld [vmem:[#allocation74_spill] sm:$0xff] }
 0x430   :  { %v3892_v5 = vadd.f32 %v8542_v53, %v10081_v60  ;;  %v3896_v4 = vadd.f32 %v8542_v53, %v10082_v41  ;;  %v4140_v20 = vmax.f32 %v3884_v12, 0.0  ;;  %v4144_v35 = vmax.f32 %v3888_v13, 0.0  ;;  %v10088_v12 = vld [vmem:[#allocation72_spill] sm:$0xff]  ;;  %v10090_v62 = vld [vmem:[#allocation77_spill] sm:$0xff] }
 0x431   :  { %v8610_v27 = vpack.c.bf16 %v4145_v21, %v4141_v22  ;;  %v3593_v1 = vrot.slane %v8538_v19, %v8475_v18  ;;  %v4149_v52 = vmax.f32 %v3893_v59, 0.0  ;;  %v4153_v47 = vmax.f32 %v3897_v49, 0.0  ;;  %v10087_v21 = vld [vmem:[#allocation70_spill] sm:$0xff] }
 0x432   :  { %v4148_v28 = vmax.f32 %v3892_v5, 0.0  ;;  %v4152_v23 = vmax.f32 %v3896_v4, 0.0  ;;  %v8615_v24 = vpack.c.bf16 %v4144_v35, %v4140_v20  ;;  %v3900_v37 = vadd.f32 %v3589_v8, %v10087_v21  ;;  %v10099_v21 = vld [vmem:[#allocation81_spill] sm:$0xff] }
 0x433   :  { %v3901_v42 = vadd.f32 %v3593_v1, %v10084_v31  ;;  %v3905_v53 = vadd.f32 %v3593_v1, %v10085_v39  ;;  %v8620_v11 = vpack.c.bf16 %v4153_v47, %v4149_v52  ;;  %v3904_v3 = vadd.f32 %v3589_v8, %v10088_v12  ;;  %v10100_v12 = vld [vmem:[#allocation42_spill] sm:$0xff] }
 0x434   :  { %2911 = vmatmul.mubr.bf16.gmra.mrb[164].mxu0 %v10083_v29  ;;  %5268 = vmatmul.mubr.bf16.gmra.mrb[8].mxu1 %v4348_v2  ;;  %v8622_v51 = vpack.c.bf16 %v4152_v23, %v4148_v28  ;;  %v10089_v2 = vld [vmem:[#allocation75_spill] sm:$0xff]  ;;  %v3913_v59 = vadd.f32 %v3593_v1, %v10090_v62  ;;  %v3908_v49 = vadd.f32 %v3589_v8, %v10091_v45  ;;  %v4156_v5 = vmax.f32 %v3900_v37, 0.0 }
 0x435   :  { %2920 = vmatprep.mubr.bf16.mxu0 %v10086_v25  ;;  %5277 = vmatprep.mubr.bf16.mxu1 %v4353_v16  ;;  %v4157_v30 = vmax.f32 %v3901_v42, 0.0  ;;  %v4161_v22 = vmax.f32 %v3905_v53, 0.0  ;;  %v3909_v13 = vadd.f32 %v3593_v1, %v10089_v2  ;;  %v10092_v16 = vld [vmem:[#allocation76_spill] sm:$0xff]  ;;  %v8634_v4 = vcombine.high %v8511_v6, %v8511_v6  ;;  %v10097_v53 = vld [vmem:[#allocation39_spill] sm:$0xff] }
 0x436   :  { %v3912_v41 = vadd.f32 %v3589_v8, %v10092_v16  ;;  %v4160_v20 = vmax.f32 %v3904_v3, 0.0  ;;  %v4169_v52 = vmax.f32 %v3913_v59, 0.0  ;;  %v4164_v47 = vmax.f32 %v3908_v49, 0.0  ;;  %v10101_v3 = vld [vmem:[#allocation78_spill] sm:$0xff]  ;;  %v10103_v59 = vld [vmem:[#allocation83_spill] sm:$0xff]  ;;  %v10104_v16 = vld [vmem:[#allocation85_spill] sm:$0xff] }
 0x437   :  { %v8629_v60 = vpack.c.bf16 %v4161_v22, %v4157_v30  ;;  %10093 = vst [vmem:[#allocation24_spill] sm:$0xff] %v8634_v4  ;;  %v4165_v35 = vmax.f32 %v3909_v13, 0.0  ;;  %v3605_v23 = vrot.slane %v8634_v4, %v8472_v7  ;;  %v3609_v1 = vrot.slane %v8634_v4, %v8475_v18  ;;  %v10098_v30 = vld [vmem:[#allocation79_spill] sm:$0xff]  ;;  %v10102_v13 = vld [vmem:[#allocation80_spill] sm:$0xff] }
 0x438   :  { %v4168_v28 = vmax.f32 %v3912_v41, 0.0  ;;  %v10094_v29 = vcombine.low %v8496_v43, %v8505_v56  ;;  %v8646_v31 = vpack.c.bf16 %v4160_v20, %v4156_v5  ;;  %v8652_v39 = vcombine.high %v8538_v19, %v8538_v19  ;;  %v10105_v41 = vld [vmem:[#allocation82_spill] sm:$0xff]  ;;  %v10128_v6 = vld [vmem:[#allocation100_spill] sm:$0xff] }
 0x439   :  { %v8648_v42 = vpack.c.bf16 %v4169_v52, %v4165_v35  ;;  %v3917_v22 = vadd.f32 %v3609_v1, %v10098_v30  ;;  %v3921_v37 = vadd.f32 %v3609_v1, %v10099_v21  ;;  %v3916_v2 = vadd.f32 %v3605_v23, %v10101_v3 }
 0x43a   :  { %v8644_v8 = vrot.slane %v10094_v29, %v8484_v50  ;;  %10096 = vst [vmem:[#allocation26_spill] sm:$0xff] %v8652_v39  ;;  %v8656_v25 = vpack.c.bf16 %v4168_v28, %v4164_v47  ;;  %v3920_v62 = vadd.f32 %v3605_v23, %v10102_v13  ;;  %v3925_v45 = vadd.f32 %v3609_v1, %v10103_v59  ;;  %v10106_v28 = vld [vmem:[#allocation84_spill] sm:$0xff]  ;;  %v10109_v13 = vld [vmem:[#allocation86_spill] sm:$0xff] }
 0x43b   :  { %v4173_v49 = vmax.f32 %v3917_v22, 0.0  ;;  %v4177_v5 = vmax.f32 %v3921_v37, 0.0  ;;  %v3924_v20 = vadd.f32 %v3605_v23, %v10105_v41  ;;  %v4172_v35 = vmax.f32 %v3916_v2, 0.0  ;;  %v10110_v59 = vld [vmem:[#allocation88_spill] sm:$0xff] }
 0x43c   :  { %10095 = vst [vmem:[#allocation23_spill] sm:$0xff] %v8644_v8  ;;  %2921 = vmatmul.mubr.bf16.gmra.mrb[168].mxu0 %v10097_v53  ;;  %5278 = vmatmul.mubr.bf16.gmra.mrb[12].mxu1 %v8578_v0  ;;  %v3929_v0 = vadd.f32 %v3609_v1, %v10104_v16  ;;  %v4176_v52 = vmax.f32 %v3920_v62, 0.0  ;;  %v4181_v47 = vmax.f32 %v3925_v45, 0.0  ;;  %v3928_v29 = vadd.f32 %v3605_v23, %v10106_v28 }
 0x43d   :  { %2930 = vmatprep.mubr.bf16.mxu0 %v10100_v12  ;;  %5287 = vmatprep.mubr.bf16.mxu1 %v8588_v48  ;;  %v8668_v53 = vpack.c.bf16 %v4177_v5, %v4173_v49  ;;  %v4180_v30 = vmax.f32 %v3924_v20, 0.0  ;;  %v3621_v21 = vrot.slane %v8652_v39, %v8472_v7  ;;  %v10107_v22 = vcombine.high %v8496_v43, %v8505_v56  ;;  %v10111_v43 = vld [vmem:[#allocation87_spill] sm:$0xff]  ;;  %v10112_v5 = vld [vmem:[#allocation89_spill] sm:$0xff] }
 0x43e   :  { %v4185_v48 = vmax.f32 %v3929_v0, 0.0  ;;  %v8678_v1 = vpack.c.bf16 %v4176_v52, %v4172_v35  ;;  %v4184_v12 = vmax.f32 %v3928_v29, 0.0  ;;  %v3625_v3 = vrot.slane %v8652_v39, %v8475_v18  ;;  %v10113_v0 = vld [vmem:[#allocation91_spill] sm:$0xff]  ;;  %v10114_v20 = vld [vmem:[#allocation41_spill] sm:$0xff]  ;;  %v10116_v29 = vld [vmem:[#allocation90_spill] sm:$0xff] }
 0x43f   :  { %v8676_v37 = vrot.slane %v10107_v22, %v8484_v50  ;;  %v3637_v23 = vrot.slane %v8644_v8, %v8472_v7  ;;  %v3932_v62 = vadd.f32 %v3621_v21, %v10109_v13  ;;  %v3936_v45 = vadd.f32 %v3621_v21, %v10110_v59  ;;  %v10117_v22 = vld [vmem:[#allocation44_spill] sm:$0xff] }
 0x440   :  { %v8684_v2 = vpack.c.bf16 %v4185_v48, %v4181_v47  ;;  %v8688_v49 = vpack.c.bf16 %v4184_v12, %v4180_v30  ;;  %v3933_v56 = vadd.f32 %v3625_v3, %v10111_v43  ;;  %v3937_v16 = vadd.f32 %v3625_v3, %v10112_v5  ;;  %v10115_v47 = vld [vmem:[#allocation93_spill] sm:$0xff]  ;;  %v10118_v59 = vld [vmem:[#allocation92_spill] sm:$0xff] }
 0x441   :  { %10108 = vst [vmem:[#allocation25_spill] sm:$0xff] %v8676_v37  ;;  %v3941_v41 = vadd.f32 %v3625_v3, %v10113_v0  ;;  %v4188_v35 = vmax.f32 %v3932_v62, 0.0  ;;  %v4192_v52 = vmax.f32 %v3936_v45, 0.0  ;;  %v3945_v28 = vadd.f32 %v3625_v3, %v10115_v47  ;;  %v10124_v47 = vld [vmem:[#allocation94_spill] sm:$0xff] }
 0x442   :  { %v3940_v48 = vadd.f32 %v3621_v21, %v10116_v29  ;;  %v4189_v30 = vmax.f32 %v3933_v56, 0.0  ;;  %v4193_v12 = vmax.f32 %v3937_v16, 0.0  ;;  %v3944_v43 = vadd.f32 %v3621_v21, %v10118_v59  ;;  %v10122_v16 = vld [vmem:[#allocation95_spill] sm:$0xff] }
 0x443   :  { %v4197_v13 = vmax.f32 %v3941_v41, 0.0  ;;  %v8700_v5 = vpack.c.bf16 %v4192_v52, %v4188_v35  ;;  %v4201_v0 = vmax.f32 %v3945_v28, 0.0  ;;  %v10119_v3 = vcombine.low %v8502_v46, %v8508_v32  ;;  %v10123_v35 = vld [vmem:[#allocation97_spill] sm:$0xff]  ;;  %v10126_v59 = vld [vmem:[#allocation99_spill] sm:$0xff] }
 0x444   :  { %2931 = vmatmul.mubr.bf16.gmra.mrb[172].mxu0 %v10114_v20  ;;  %5288 = vmatmul.mubr.bf16.gmra.mrb[16].mxu1 %v8591_v40  ;;  %v4196_v20 = vmax.f32 %v3940_v48, 0.0  ;;  %v3641_v40 = vrot.slane %v8644_v8, %v8475_v18  ;;  %v8712_v45 = vpack.c.bf16 %v4193_v12, %v4189_v30  ;;  %v4200_v56 = vmax.f32 %v3944_v43, 0.0  ;;  %v10125_v48 = vld [vmem:[#allocation96_spill] sm:$0xff]  ;;  %v10127_v43 = vld [vmem:[#allocation98_spill] sm:$0xff] }
 0x445   :  { %2940 = vmatprep.mubr.bf16.mxu0 %v10117_v22  ;;  %5297 = vmatprep.mubr.bf16.mxu1 %v8596_v26  ;;  %v8708_v62 = vrot.slane %v10119_v3, %v8484_v50  ;;  %v3653_v26 = vrot.slane %v8676_v37, %v8472_v7  ;;  %v8714_v21 = vpack.c.bf16 %v4201_v0, %v4197_v13 }
 0x446   :  { %v3949_v41 = vadd.f32 %v3641_v40, %v10122_v16  ;;  %v3953_v52 = vadd.f32 %v3641_v40, %v10123_v35  ;;  %v3948_v28 = vadd.f32 %v3637_v23, %v10124_v47  ;;  %v8719_v29 = vpack.c.bf16 %v4200_v56, %v4196_v20 }
 0x447   :  { %10120 = vst [vmem:[#allocation28_spill] sm:$0xff] %v8708_v62  ;;  %10121 = vst [vmem:[#allocation12_spill] sm:$0xff] %v8714_v21  ;;  %v3952_v22 = vadd.f32 %v3637_v23, %v10125_v48  ;;  %v3957_v3 = vadd.f32 %v3641_v40, %v10126_v59  ;;  %v3961_v39 = vadd.f32 %v3641_v40, %v8295_v55  ;;  %v10129_v21 = vld [vmem:[#allocation43_spill] sm:$0xff] }
 0x448   :  { %v4205_v4 = vmax.f32 %v3949_v41, 0.0  ;;  %v4209_v30 = vmax.f32 %v3953_v52, 0.0  ;;  %v4204_v12 = vmax.f32 %v3948_v28, 0.0  ;;  %v3956_v13 = vadd.f32 %v3637_v23, %v10127_v43  ;;  %v10130_v41 = vld [vmem:[#allocation46_spill] sm:$0xff]  ;;  %v10133_v52 = vld [vmem:[#allocation104_spill] sm:$0xff]  ;;  %v10134_v28 = vld [vmem:[#allocation101_spill] sm:$0xff] }
 0x449   :  { %v4208_v0 = vmax.f32 %v3952_v22, 0.0  ;;  %v4213_v19 = vmax.f32 %v3957_v3, 0.0  ;;  %v4217_v16 = vmax.f32 %v3961_v39, 0.0  ;;  %v3960_v35 = vadd.f32 %v3637_v23, %v10128_v6  ;;  %v10135_v22 = vld [vmem:[#allocation103_spill] sm:$0xff] }
 0x44a   :  { %v8730_v20 = vrot.slane %v8529_v63, %v7565_v15  ;;  %v8732_v56 = vpack.c.bf16 %v4209_v30, %v4205_v4  ;;  %v4212_v55 = vmax.f32 %v3956_v13, 0.0  ;;  %v3657_v40 = vrot.slane %v8676_v37, %v8475_v18 }
 0x44b   :  { %v8740_v6 = vrot.slane %v8529_v63, %v7571_v36  ;;  %v8742_v39 = vpack.c.bf16 %v4208_v0, %v4204_v12  ;;  %v4216_v23 = vmax.f32 %v3960_v35, 0.0  ;;  %v3964_v48 = vadd.f32 %v3653_v26, %v10134_v28  ;;  %v10136_v12 = vld [vmem:[#allocation105_spill] sm:$0xff] }
 0x44c   :  { %2941 = vmatmul.mubr.bf16.gmra.mrb[176].mxu0 %v10129_v21  ;;  %5298 = vmatmul.mubr.bf16.gmra.mrb[20].mxu1 %v8598_v9  ;;  %v8744_v9 = vpack.c.bf16 %v4217_v16, %v4213_v19  ;;  %v10132_v21 = vld [vmem:[#allocation102_spill] sm:$0xff]  ;;  %v3969_v47 = vadd.f32 %v3657_v40, %v10133_v52  ;;  %v3968_v59 = vadd.f32 %v3653_v26, %v10135_v22 }
 0x44d   :  { %2950 = vmatprep.mubr.bf16.mxu0 %v10130_v41  ;;  %5307 = vmatprep.mubr.bf16.mxu1 %v8610_v27  ;;  %v3965_v4 = vadd.f32 %v3657_v40, %v10132_v21  ;;  %v8750_v30 = vpack.c.bf16 %v4216_v23, %v4212_v55  ;;  %v3973_v27 = vadd.f32 %v3657_v40, %v8309_v14  ;;  %v4220_v41 = vmax.f32 %v3964_v48, 0.0 }
 0x44e   :  { %10131 = vst [vmem:[#allocation27_spill] sm:$0xff] %v8744_v9  ;;  %v3977_v43 = vadd.f32 %v3657_v40, %v8313_v44  ;;  %v3972_v13 = vadd.f32 %v3653_v26, %v10136_v12  ;;  %v4225_v35 = vmax.f32 %v3969_v47, 0.0  ;;  %v4224_v28 = vmax.f32 %v3968_v59, 0.0 }
 0x44f   :  { %v2682_v3 = vpop.f32.mrb[72].mxu0  ;;  %v4221_v16 = vmax.f32 %v3965_v4, 0.0  ;;  %v4229_v22 = vmax.f32 %v3973_v27, 0.0  ;;  %v10137_v14 = vcombine.high %v8502_v46, %v8508_v32  ;;  %v10139_v4 = vld [vmem:[#allocation106_spill] sm:$0xff]  ;;  %v8776_v32 = vcombine.high %v8644_v8, %v8644_v8 }
 0x450   :  { %v3818_v19 = vadd.f32 %v8730_v20, %v2682_v3  ;;  %v2684_v0 = vpop.f32.mrb[73].mxu0  ;;  %v4233_v9 = vmax.f32 %v3977_v43, 0.0  ;;  %v3976_v47 = vadd.f32 %v3653_v26, %v10139_v4  ;;  %v8768_v12 = vpack.c.bf16 %v4224_v28, %v4220_v41  ;;  %v10140_v43 = vld [vmem:[#allocation45_spill] sm:$0xff] }
 0x451   :  { %v3819_v21 = vadd.f32 %v8740_v6, %v2684_v0  ;;  %v2686_v52 = vpop.f32.mrb[74].mxu0  ;;  %v8761_v55 = vrot.slane %v10137_v14, %v8484_v50  ;;  %v8764_v23 = vpack.c.bf16 %v4225_v35, %v4221_v16  ;;  %v4228_v50 = vmax.f32 %v3972_v13, 0.0  ;;  %10141 = vst [vmem:[#allocation29_spill] sm:$0xff] %v8776_v32  ;;  %v10142_v16 = vld [vmem:[#allocation48_spill] sm:$0xff] }
 0x452   :  { %v3822_v44 = vadd.f32 %v8730_v20, %v2686_v52  ;;  %v2688_v40 = vpop.f32.mrb[75].mxu0  ;;  %v4074_v48 = vmax.f32 %v3818_v19, 0.0  ;;  %v8770_v59 = vpack.c.bf16 %v4233_v9, %v4229_v22  ;;  %v4232_v46 = vmax.f32 %v3976_v47, 0.0  ;;  %v10144_v47 = vld [vmem:[#allocation107_spill] sm:$0xff] }
 0x453   :  { %10138 = vst [vmem:[#allocation30_spill] sm:$0xff] %v8761_v55  ;;  %v3823_v3 = vadd.f32 %v8740_v6, %v2688_v40  ;;  %v8780_v26 = vrot.slane %v8708_v62, %v8472_v7  ;;  %v4075_v19 = vmax.f32 %v3819_v21, 0.0  ;;  %v8786_v9 = vcombine.high %v8676_v37, %v8676_v37 }
 0x454   :  { %v4078_v27 = vmax.f32 %v3822_v44, 0.0  ;;  %2951 = vmatmul.mubr.bf16.gmra.mrb[180].mxu0 %v10140_v43  ;;  %5308 = vmatmul.mubr.bf16.gmra.mrb[24].mxu1 %v8615_v24  ;;  %v8790_v13 = vpack.c.bf16 %v4232_v46, %v4228_v50  ;;  %v3669_v35 = vrot.slane %v8776_v32, %v8472_v7  ;;  %v3673_v41 = vrot.slane %v8776_v32, %v8475_v18  ;;  %v10145_v43 = vld [vmem:[#allocation108_spill] sm:$0xff] }
 0x455   :  { %v4079_v0 = vmax.f32 %v3823_v3, 0.0  ;;  %2960 = vmatprep.mubr.bf16.mxu0 %v10142_v16  ;;  %5317 = vmatprep.mubr.bf16.mxu1 %v8620_v11  ;;  %10143 = vst [vmem:[#allocation32_spill] sm:$0xff] %v8786_v9  ;;  %v8800_v11 = vrot.slane %v8514_v54, %v7565_v15  ;;  %v8804_v28 = vrot.slane %v8786_v9, %v8472_v7 }
 0x456   :  { %v8788_v24 = vpack.c.bf16 %v4078_v27, %v4074_v48  ;;  %v3689_v22 = vrot.slane %v8786_v9, %v8475_v18  ;;  %v3981_v40 = vadd.f32 %v3673_v41, %v8319_v38  ;;  %v3985_v4 = vadd.f32 %v3673_v41, %v8323_v33 }
 0x457   :  { %v8796_v21 = vpack.c.bf16 %v4079_v0, %v4075_v19  ;;  %v2692_v52 = vpop.f32.mrb[76].mxu0  ;;  %v3980_v48 = vadd.f32 %v3669_v35, %v10144_v47  ;;  %v3984_v50 = vadd.f32 %v3669_v35, %v10145_v43  ;;  %v3989_v46 = vadd.f32 %v3673_v41, %v8329_v61 }
 0x458   :  { %v3826_v14 = vadd.f32 %v8730_v20, %v2692_v52  ;;  %v2694_v44 = vpop.f32.mrb[77].mxu0  ;;  %v3993_v19 = vadd.f32 %v3673_v41, %v8333_v34  ;;  %v4237_v9 = vmax.f32 %v3981_v40, 0.0  ;;  %v4241_v32 = vmax.f32 %v3985_v4, 0.0  ;;  %v10148_v40 = vld [vmem:[#allocation109_spill] sm:$0xff]  ;;  %v10149_v4 = vld [vmem:[#allocation110_spill] sm:$0xff] }
 0x459   :  { %v3827_v3 = vadd.f32 %v8740_v6, %v2694_v44  ;;  %v2696_v27 = vpop.f32.mrb[78].mxu0  ;;  %v4236_v37 = vmax.f32 %v3980_v48, 0.0  ;;  %v4240_v47 = vmax.f32 %v3984_v50, 0.0  ;;  %v10146_v44 = vld [vmem:[#allocation47_spill] sm:$0xff]  ;;  %v4245_v61 = vmax.f32 %v3989_v46, 0.0 }
 0x45a   :  { %v4082_v0 = vmax.f32 %v3826_v14, 0.0  ;;  %v3830_v16 = vadd.f32 %v8730_v20, %v2696_v27  ;;  %v2698_v52 = vpop.f32.mrb[79].mxu0  ;;  %v8820_v43 = vpack.c.bf16 %v4241_v32, %v4237_v9  ;;  %v4249_v34 = vmax.f32 %v3993_v19, 0.0  ;;  %v10147_v14 = vld [vmem:[#allocation50_spill] sm:$0xff] }
 0x45b   :  { %v4083_v38 = vmax.f32 %v3827_v3, 0.0  ;;  %v3831_v33 = vadd.f32 %v8740_v6, %v2698_v52  ;;  %v8824_v20 = vpack.c.bf16 %v4240_v47, %v4236_v37  ;;  %v3988_v6 = vadd.f32 %v3669_v35, %v10148_v40 }
 0x45c   :  { %v4086_v8 = vmax.f32 %v3830_v16, 0.0  ;;  %2961 = vmatmul.mubr.bf16.gmra.mrb[184].mxu0 %v10146_v44  ;;  %5318 = vmatmul.mubr.bf16.gmra.mrb[28].mxu1 %v8622_v51  ;;  %v3992_v48 = vadd.f32 %v3669_v35, %v10149_v4  ;;  %v8830_v27 = vpack.c.bf16 %v4249_v34, %v4245_v61  ;;  %v3997_v51 = vadd.f32 %v3689_v22, %v8339_v57 }
 0x45d   :  { %v4087_v41 = vmax.f32 %v3831_v33, 0.0  ;;  %2970 = vmatprep.mubr.bf16.mxu0 %v10147_v14  ;;  %5327 = vmatprep.mubr.bf16.mxu1 %v8629_v60  ;;  %v4001_v32 = vadd.f32 %v3689_v22, %v8343_v17  ;;  %v3521_v60 = vrot.slane %v8514_v54, %v7571_v36  ;;  %v4244_v37 = vmax.f32 %v3988_v6, 0.0  ;;  %v10151_v17 = vld [vmem:[#allocation112_spill] sm:$0xff] }
 0x45e   :  { %v8828_v3 = vpack.c.bf16 %v4086_v8, %v4082_v0  ;;  %v4248_v46 = vmax.f32 %v3992_v48, 0.0  ;;  %v4253_v35 = vmax.f32 %v3997_v51, 0.0  ;;  %v10150_v0 = vld [vmem:[#allocation111_spill] sm:$0xff]  ;;  %v4005_v44 = vadd.f32 %v3689_v22, %v8349_v10 }
 0x45f   :  { %v8834_v9 = vpack.c.bf16 %v4087_v41, %v4083_v38  ;;  %v2702_v50 = vpop.f32.mrb[80].mxu0  ;;  %v4257_v8 = vmax.f32 %v4001_v32, 0.0  ;;  %v3996_v52 = vadd.f32 %v8804_v28, %v10150_v0  ;;  %v4000_v38 = vadd.f32 %v8804_v28, %v10151_v17  ;;  %v10152_v48 = vld [vmem:[#allocation115_spill] sm:$0xff] }
 0x460   :  { %v3834_v19 = vadd.f32 %v8800_v11, %v2702_v50  ;;  %v2704_v16 = vpop.f32.mrb[81].mxu0  ;;  %v8841_v47 = vpack.c.bf16 %v4248_v46, %v4244_v37  ;;  %v4009_v51 = vadd.f32 %v3689_v22, %v10152_v48  ;;  %v10153_v50 = vld [vmem:[#allocation49_spill] sm:$0xff]  ;;  %v4261_v37 = vmax.f32 %v4005_v44, 0.0 }
 0x461   :  { %v3835_v33 = vadd.f32 %v3521_v60, %v2704_v16  ;;  %v2706_v57 = vpop.f32.mrb[82].mxu0  ;;  %v8847_v41 = vpack.c.bf16 %v4257_v8, %v4253_v35  ;;  %v4252_v14 = vmax.f32 %v3996_v52, 0.0  ;;  %v4256_v4 = vmax.f32 %v4000_v38, 0.0  ;;  %v10154_v46 = vld [vmem:[#allocation113_spill] sm:$0xff]  ;;  %v10156_v8 = vld [vmem:[#allocation52_spill] sm:$0xff] }
 0x462   :  { %v4090_v54 = vmax.f32 %v3834_v19, 0.0  ;;  %v3838_v61 = vadd.f32 %v8800_v11, %v2706_v57  ;;  %v2708_v34 = vpop.f32.mrb[83].mxu0  ;;  %v4004_v10 = vadd.f32 %v8804_v28, %v10154_v46  ;;  %v10155_v19 = vld [vmem:[#allocation114_spill] sm:$0xff]  ;;  %v4265_v22 = vmax.f32 %v4009_v51, 0.0  ;;  %v10160_v51 = vld [vmem:[#allocation116_spill] sm:$0xff] }
 0x463   :  { %v4091_v40 = vmax.f32 %v3835_v33, 0.0  ;;  %v3839_v6 = vadd.f32 %v3521_v60, %v2708_v34  ;;  %v4008_v16 = vadd.f32 %v8804_v28, %v10155_v19  ;;  %v8858_v0 = vpack.c.bf16 %v4256_v4, %v4252_v14  ;;  %v10158_v34 = vld [vmem:[#allocation119_spill] sm:$0xff] }
 0x464   :  { %v4094_v32 = vmax.f32 %v3838_v61, 0.0  ;;  %2971 = vmatmul.mubr.bf16.gmra.mrb[188].mxu0 %v10153_v50  ;;  %5328 = vmatmul.mubr.bf16.gmra.mrb[32].mxu1 %v8646_v31  ;;  %v3705_v52 = vrot.slane %v8708_v62, %v8475_v18  ;;  %v8864_v31 = vrot.slane %v8761_v55, %v8472_v7  ;;  %v4260_v57 = vmax.f32 %v4004_v10, 0.0  ;;  %v10161_v10 = vld [vmem:[#allocation118_spill] sm:$0xff] }
 0x465   :  { %v4095_v35 = vmax.f32 %v3839_v6, 0.0  ;;  %2980 = vmatprep.mubr.bf16.mxu0 %v10156_v8  ;;  %5337 = vmatprep.mubr.bf16.mxu1 %v8648_v42  ;;  %v4264_v17 = vmax.f32 %v4008_v16, 0.0  ;;  %v8870_v44 = vpack.c.bf16 %v4265_v22, %v4261_v37  ;;  %v10157_v42 = vld [vmem:[#allocation117_spill] sm:$0xff]  ;;  %v8877_v48 = vrot.slane %v8550_v58, %v7565_v15 }
 0x466   :  { %v8866_v33 = vpack.c.bf16 %v4094_v32, %v4090_v54  ;;  %v4013_v61 = vadd.f32 %v3705_v52, %v10157_v42  ;;  %v4017_v14 = vadd.f32 %v3705_v52, %v10158_v34  ;;  %v4016_v19 = vadd.f32 %v8780_v26, %v10161_v10 }
 0x467   :  { %v8868_v28 = vpack.c.bf16 %v4095_v35, %v4091_v40  ;;  %v2712_v38 = vpop.f32.mrb[84].mxu0  ;;  %v8879_v54 = vpack.c.bf16 %v4264_v17, %v4260_v57  ;;  %v4012_v40 = vadd.f32 %v8780_v26, %v10160_v51 }
 0x468   :  { %v3842_v6 = vadd.f32 %v8800_v11, %v2712_v38  ;;  %v2714_v4 = vpop.f32.mrb[85].mxu0  ;;  %v4269_v37 = vmax.f32 %v4013_v61, 0.0  ;;  %v4273_v46 = vmax.f32 %v4017_v14, 0.0  ;;  %v10162_v38 = vld [vmem:[#allocation121_spill] sm:$0xff]  ;;  %v10164_v61 = vld [vmem:[#allocation123_spill] sm:$0xff] }
 0x469   :  { %10159 = vst [vmem:[#allocation31_spill] sm:$0xff] %v8879_v54  ;;  %v3843_v32 = vadd.f32 %v3521_v60, %v2714_v4  ;;  %v2716_v50 = vpop.f32.mrb[86].mxu0  ;;  %v4268_v22 = vmax.f32 %v4012_v40, 0.0  ;;  %v4021_v42 = vadd.f32 %v3705_v52, %v10162_v38  ;;  %v4272_v54 = vmax.f32 %v4016_v19, 0.0  ;;  %v10163_v4 = vld [vmem:[#allocation51_spill] sm:$0xff]  ;;  %v10166_v40 = vld [vmem:[#allocation54_spill] sm:$0xff] }
 0x46a   :  { %v4098_v16 = vmax.f32 %v3842_v6, 0.0  ;;  %v3846_v35 = vadd.f32 %v8800_v11, %v2716_v50  ;;  %v2718_v8 = vpop.f32.mrb[87].mxu0  ;;  %v8887_v17 = vpack.c.bf16 %v4273_v46, %v4269_v37  ;;  %v4025_v14 = vadd.f32 %v3705_v52, %v10164_v61  ;;  %v10165_v6 = vld [vmem:[#allocation120_spill] sm:$0xff] }
 0x46b   :  { %v4099_v34 = vmax.f32 %v3843_v32, 0.0  ;;  %v3847_v57 = vadd.f32 %v3521_v60, %v2718_v8  ;;  %v4277_v10 = vmax.f32 %v4021_v42, 0.0  ;;  %v4020_v11 = vadd.f32 %v8780_v26, %v10165_v6  ;;  %v10167_v32 = vld [vmem:[#allocation122_spill] sm:$0xff]  ;;  %v10169_v42 = vld [vmem:[#allocation127_spill] sm:$0xff] }
 0x46c   :  { %v4102_v51 = vmax.f32 %v3846_v35, 0.0  ;;  %2981 = vmatmul.mubr.bf16.gmra.mrb[192].mxu0 %v10163_v4  ;;  %5338 = vmatmul.mubr.bf16.gmra.mrb[36].mxu1 %v8656_v25  ;;  %v8896_v60 = vpack.c.bf16 %v4272_v54, %v4268_v22  ;;  %v4024_v37 = vadd.f32 %v8780_v26, %v10167_v32  ;;  %v3721_v46 = vrot.slane %v8761_v55, %v8475_v18  ;;  %v10168_v54 = vld [vmem:[#allocation125_spill] sm:$0xff] }
 0x46d   :  { %v4103_v50 = vmax.f32 %v3847_v57, 0.0  ;;  %2990 = vmatprep.mubr.bf16.mxu0 %v10166_v40  ;;  %5347 = vmatprep.mubr.bf16.mxu1 %v8668_v53  ;;  %v8906_v52 = vrot.slane %v8550_v58, %v7571_v36  ;;  %v4281_v19 = vmax.f32 %v4025_v14, 0.0  ;;  %v4276_v35 = vmax.f32 %v4020_v11, 0.0 }
 0x46e   :  { %v8902_v25 = vpack.c.bf16 %v4102_v51, %v4098_v16  ;;  %v4280_v53 = vmax.f32 %v4024_v37, 0.0  ;;  %v4029_v22 = vadd.f32 %v3721_v46, %v10168_v54  ;;  %v4033_v57 = vadd.f32 %v3721_v46, %v10169_v42  ;;  %v10171_v16 = vld [vmem:[#allocation124_spill] sm:$0xff]  ;;  %v10172_v37 = vld [vmem:[#allocation126_spill] sm:$0xff] }
 0x46f   :  { %v8908_v8 = vpack.c.bf16 %v4103_v50, %v4099_v34  ;;  %v2722_v38 = vpop.f32.mrb[88].mxu0  ;;  %v8913_v61 = vpack.c.bf16 %v4281_v19, %v4277_v10  ;;  %v4028_v51 = vadd.f32 %v8864_v31, %v10171_v16  ;;  %v10174_v16 = vld [vmem:[#allocation129_spill] sm:$0xff] }
 0x470   :  { %v3850_v26 = vadd.f32 %v8877_v48, %v2722_v38  ;;  %v2724_v4 = vpop.f32.mrb[89].mxu0  ;;  %v8918_v6 = vpack.c.bf16 %v4280_v53, %v4276_v35  ;;  %v4285_v34 = vmax.f32 %v4029_v22, 0.0  ;;  %v4289_v11 = vmax.f32 %v4033_v57, 0.0  ;;  %v10175_v35 = vld [vmem:[#allocation53_spill] sm:$0xff]  ;;  %v10176_v22 = vld [vmem:[#allocation131_spill] sm:$0xff] }
 0x471   :  { %10170 = vst [vmem:[#allocation34_spill] sm:$0xff] %v8913_v61  ;;  %v3851_v58 = vadd.f32 %v8906_v52, %v2724_v4  ;;  %v2726_v14 = vpop.f32.mrb[90].mxu0  ;;  %v4032_v38 = vadd.f32 %v8864_v31, %v10172_v37  ;;  %v4284_v54 = vmax.f32 %v4028_v51, 0.0  ;;  %v4037_v4 = vadd.f32 %v3721_v46, %v10174_v16 }
 0x472   :  { %v4106_v50 = vmax.f32 %v3850_v26, 0.0  ;;  %v3854_v40 = vadd.f32 %v8877_v48, %v2726_v14  ;;  %v2728_v32 = vpop.f32.mrb[91].mxu0  ;;  %v8924_v42 = vpack.c.bf16 %v4289_v11, %v4285_v34  ;;  %v4041_v57 = vadd.f32 %v3721_v46, %v10176_v22  ;;  %v10177_v26 = vld [vmem:[#allocation128_spill] sm:$0xff] }
 0x473   :  { %v4107_v10 = vmax.f32 %v3851_v58, 0.0  ;;  %v3855_v19 = vadd.f32 %v8906_v52, %v2728_v32  ;;  %v4288_v53 = vmax.f32 %v4032_v38, 0.0  ;;  %v4036_v14 = vadd.f32 %v8864_v31, %v10177_v26  ;;  %v10178_v58 = vld [vmem:[#allocation130_spill] sm:$0xff] }
 0x474   :  { %10173 = vst [vmem:[#allocation33_spill] sm:$0xff] %v8924_v42  ;;  %v4110_v61 = vmax.f32 %v3854_v40, 0.0  ;;  %2991 = vmatmul.mubr.bf16.gmra.mrb[196].mxu0 %v10175_v35  ;;  %5348 = vmatmul.mubr.bf16.gmra.mrb[40].mxu1 %v8678_v1  ;;  %v4293_v51 = vmax.f32 %v4037_v4, 0.0  ;;  %v4040_v34 = vadd.f32 %v8864_v31, %v10178_v58  ;;  %v8938_v11 = vcombine.high %v8708_v62, %v8708_v62 }
 0x475   :  { %v4111_v37 = vmax.f32 %v3855_v19, 0.0  ;;  %4874 = vmatprep.mubr.bf16.mxu0 %v8796_v21  ;;  %5357 = vmatprep.mubr.bf16.mxu1 %v8684_v2  ;;  %v8942_v40 = vpack.c.bf16 %v4288_v53, %v4284_v54  ;;  %v4297_v46 = vmax.f32 %v4041_v57, 0.0  ;;  %v4292_v32 = vmax.f32 %v4036_v14, 0.0  ;;  %v10183_v57 = vld [vmem:[#allocation133_spill] sm:$0xff]  ;;  %v10184_v14 = vld [vmem:[#allocation135_spill] sm:$0xff] }
 0x476   :  { %10179 = vst [vmem:[#allocation36_spill] sm:$0xff] %v8938_v11  ;;  %v8940_v1 = vpack.c.bf16 %v4110_v61, %v4106_v50  ;;  %v4296_v21 = vmax.f32 %v4040_v34, 0.0  ;;  %v3733_v2 = vrot.slane %v8938_v11, %v8472_v7  ;;  %v3737_v31 = vrot.slane %v8938_v11, %v8475_v18  ;;  %v10181_v61 = vld [vmem:[#allocation22_spill] sm:$0xff]  ;;  %v10185_v11 = vld [vmem:[#allocation132_spill] sm:$0xff] }
 0x477   :  { %10180 = vst [vmem:[#allocation35_spill] sm:$0xff] %v8942_v40  ;;  %v8944_v38 = vpack.c.bf16 %v4111_v37, %v4107_v10  ;;  %v2732_v19 = vpop.f32.mrb[92].mxu0  ;;  %v8953_v50 = vrot.slane %v10181_v61, %v7565_v15  ;;  %v8957_v54 = vrot.slane %v10181_v61, %v7571_v36  ;;  %v8959_v10 = vpack.c.bf16 %v4297_v46, %v4293_v51  ;;  %v10186_v40 = vld [vmem:[#allocation134_spill] sm:$0xff] }
 0x478   :  { %v3858_v16 = vadd.f32 %v8877_v48, %v2732_v19  ;;  %v2734_v4 = vpop.f32.mrb[93].mxu0  ;;  %v8962_v22 = vpack.c.bf16 %v4296_v21, %v4292_v32  ;;  %v4045_v26 = vadd.f32 %v3737_v31, %v10183_v57  ;;  %v4049_v37 = vadd.f32 %v3737_v31, %v10184_v14 }
 0x479   :  { %10182 = vst [vmem:[#allocation38_spill] sm:$0xff] %v8959_v10  ;;  %v3859_v35 = vadd.f32 %v8906_v52, %v2734_v4  ;;  %v2736_v53 = vpop.f32.mrb[94].mxu0  ;;  %v4044_v62 = vadd.f32 %v3733_v2, %v10185_v11  ;;  %v4048_v61 = vadd.f32 %v3733_v2, %v10186_v40  ;;  %v6912_v11 = vld [vmem:[#allocation7 + $0x100] ss:$8 sps:$4 sm:$0xff]  }
 0x47a   :  { %v4114_v58 = vmax.f32 %v3858_v16, 0.0  ;;  %v3862_v34 = vadd.f32 %v8877_v48, %v2736_v53  ;;  %v2738_v19 = vpop.f32.mrb[95].mxu0  ;;  %v4301_v46 = vmax.f32 %v4045_v26, 0.0  ;;  %v4305_v4 = vmax.f32 %v4049_v37, 0.0  ;;  %v10187_v16 = vld [vmem:[#allocation137_spill] sm:$0xff]  ;;  %v10189_v53 = vld [vmem:[#allocation136_spill] sm:$0xff] }
 0x47b   :  { %v4115_v42 = vmax.f32 %v3859_v35, 0.0  ;;  %v3863_v51 = vadd.f32 %v8906_v52, %v2738_v19  ;;  %v4300_v32 = vmax.f32 %v4044_v62, 0.0  ;;  %v4304_v21 = vmax.f32 %v4048_v61, 0.0  ;;  %v10188_v35 = vld [vmem:[#allocation15_spill] sm:$0xff]  ;;  %v10190_v37 = vld [vmem:[#allocation138_spill] sm:$0xff] }
 0x47c   :  { %v4118_v10 = vmax.f32 %v3862_v34, 0.0  ;;  %4875 = vmatmul.mubr.bf16.vlgmr.msra.gmra.mrb[200].mxu0 %v8788_v24  ;;  %5358 = vmatmul.mubr.bf16.gmra.mrb[44].mxu1 %v8688_v49  ;;  %v4053_v57 = vadd.f32 %v3737_v31, %v10187_v16  ;;  %v8974_v40 = vpack.c.bf16 %v4305_v4, %v4301_v46  ;;  %v4057_v52 = vadd.f32 %v3737_v31, %v10188_v35  ;;  %v6913_v49 = vld [vmem:[#allocation7 + $0x114] ss:$8 sps:$4 sm:$0xff]  }
 0x47d   :  { %v4119_v48 = vmax.f32 %v3863_v51, 0.0  ;;  %4884 = vmatprep.mubr.bf16.mxu0 %v8834_v9  ;;  %5196 = vmatpush1.bf16.msra.mxu0 %v6912_v11  ;;  %v4052_v26 = vadd.f32 %v3733_v2, %v10189_v53  ;;  %v8981_v62 = vpack.c.bf16 %v4304_v21, %v4300_v32  ;;  %v4056_v34 = vadd.f32 %v3733_v2, %v10190_v37  ;;  %v6914_v32 = vld [vmem:[#allocation7 + $0x110] ss:$8 sps:$4 sm:$0xff]   ;;  %v6915_v11 = vld [vmem:[#allocation7 + $0x124] ss:$8 sps:$4 sm:$0xff]  }
 0x47e   :  { %v8978_v14 = vpack.c.bf16 %v4118_v10, %v4114_v58  ;;  %5367 = vmatprep.mubr.bf16.mxu1 %v8712_v45  ;;  %5197 = vmatprep.subr.bf16.mxu0 %v6913_v49  ;;  %v4309_v24 = vmax.f32 %v4053_v57, 0.0  ;;  %v4313_v61 = vmax.f32 %v4057_v52, 0.0  ;;  %v8988_v31 = vcombine.high %v8761_v55, %v8761_v55  ;;  %v6923_v55 = vld [vmem:[#allocation7 + $0x164] ss:$8 sps:$4 sm:$0xff]  }
 0x47f   :  { %v8984_v9 = vpack.c.bf16 %v4119_v48, %v4115_v42  ;;  %v2742_v19 = vpop.f32.mrb[96].mxu0  ;;  %v4308_v51 = vmax.f32 %v4052_v26, 0.0  ;;  %v4312_v45 = vmax.f32 %v4056_v34, 0.0  ;;  %v10192_v26 = vld [vmem:[#allocation139_spill] sm:$0xff] }
 0x480   :  { %10191 = vst [vmem:[#allocation65_spill] sm:$0xff] %v8988_v31  ;;  %v3866_v10 = vadd.f32 %v8953_v50, %v2742_v19  ;;  %v2744_v58 = vpop.f32.mrb[97].mxu0  ;;  %v8992_v21 = vpack.c.bf16 %v4313_v61, %v4309_v24  ;;  %v3749_v42 = vrot.slane %v8988_v31, %v8472_v7  ;;  %v3753_v2 = vrot.slane %v8988_v31, %v8475_v18  ;;  %v10193_v24 = vld [vmem:[#allocation16_spill] sm:$0xff]  ;;  %v10194_v19 = vld [vmem:[#allocation17_spill] sm:$0xff] }
 0x481   :  { %v3867_v46 = vadd.f32 %v8957_v54, %v2744_v58  ;;  %v2746_v4 = vpop.f32.mrb[98].mxu0  ;;  %5198 = vmatpush1.bf16.msra.mxu0 %v6914_v32  ;;  %v8999_v35 = vpack.c.bf16 %v4312_v45, %v4308_v51  ;;  %v10197_v45 = vld [vmem:[#allocation12_spill] sm:$0xff] }
 0x482   :  { %v4122_v16 = vmax.f32 %v3866_v10, 0.0  ;;  %v3870_v57 = vadd.f32 %v8953_v50, %v2746_v4  ;;  %v2748_v48 = vpop.f32.mrb[99].mxu0  ;;  %5199 = vmatprep.subr.bf16.mxu0 %v6915_v11  ;;  %v4061_v49 = vadd.f32 %v3753_v2, %v10192_v26  ;;  %v4065_v37 = vadd.f32 %v3753_v2, %v10193_v24  ;;  %v10195_v10 = vld [vmem:[#allocation140_spill] sm:$0xff]  ;;  %v10196_v4 = vld [vmem:[#allocation141_spill] sm:$0xff]  ;;  %v10198_v11 = vld [vmem:[#allocation18_spill] sm:$0xff] }
 0x483   :  { %v4123_v52 = vmax.f32 %v3867_v46, 0.0  ;;  %v3871_v53 = vadd.f32 %v8957_v54, %v2748_v48  ;;  %v4060_v61 = vadd.f32 %v3749_v42, %v10194_v19  ;;  %v4064_v58 = vadd.f32 %v3749_v42, %v10195_v10 }
 0x484   :  { %v4126_v34 = vmax.f32 %v3870_v57, 0.0  ;;  %4885 = vmatmul.mubr.bf16.gmra.mrb[204].mxu0 %v8828_v3  ;;  %5368 = vmatmul.mubr.bf16.gmra.mrb[48].mxu1 %v8700_v5  ;;  %v4069_v32 = vadd.f32 %v3753_v2, %v10196_v4  ;;  %v4317_v46 = vmax.f32 %v4061_v49, 0.0  ;;  %v4321_v48 = vmax.f32 %v4065_v37, 0.0  ;;  %v6916_v3 = vld [vmem:[#allocation7 + $0x120] ss:$8 sps:$4 sm:$0xff]  }
 0x485   :  { %v4127_v51 = vmax.f32 %v3871_v53, 0.0  ;;  %4894 = vmatprep.mubr.bf16.mxu0 %v8868_v28  ;;  %5377 = vmatprep.mubr.bf16.mxu1 %v10197_v45  ;;  %v4073_v26 = vadd.f32 %v3753_v2, %v10198_v11  ;;  %v4316_v5 = vmax.f32 %v4060_v61, 0.0  ;;  %v4320_v24 = vmax.f32 %v4064_v58, 0.0  ;;  %v6917_v4 = vld [vmem:[#allocation7 + $0x134] ss:$8 sps:$4 sm:$0xff]  }
 0x486   :  { %v9012_v57 = vpack.c.bf16 %v4126_v34, %v4122_v16  ;;  %5200 = vmatpush1.bf16.msra.mxu0 %v6916_v3  ;;  %v4325_v19 = vmax.f32 %v4069_v32, 0.0  ;;  %v9016_v53 = vpack.c.bf16 %v4321_v48, %v4317_v46  ;;  %v10199_v45 = vld [vmem:[#allocation19_spill] sm:$0xff]  ;;  %v10200_v34 = vld [vmem:[#allocation142_spill] sm:$0xff] }
 0x487   :  { %v9014_v31 = vpack.c.bf16 %v4127_v51, %v4123_v52  ;;  %v2752_v10 = vpop.f32.mrb[100].mxu0  ;;  %5201 = vmatprep.subr.bf16.mxu0 %v6917_v4  ;;  %v4329_v28 = vmax.f32 %v4073_v26, 0.0  ;;  %v4068_v49 = vadd.f32 %v3749_v42, %v10199_v45  ;;  %v9020_v16 = vpack.c.bf16 %v4320_v24, %v4316_v5  ;;  %v6918_v48 = vld [vmem:[#allocation7 + $0x130] ss:$8 sps:$4 sm:$0xff]  }
 0x488   :  { %v3874_v37 = vadd.f32 %v8953_v50, %v2752_v10  ;;  %v2754_v2 = vpop.f32.mrb[101].mxu0  ;;  %v4072_v11 = vadd.f32 %v3749_v42, %v10200_v34  ;;  %v6919_v10 = vld [vmem:[#allocation7 + $0x144] ss:$8 sps:$4 sm:$0xff]   ;;  %v10204_v34 = vld [vmem:[#allocation58_spill] sm:$0xff] }
 0x489   :  { %v3875_v61 = vadd.f32 %v8957_v54, %v2754_v2  ;;  %v2756_v58 = vpop.f32.mrb[102].mxu0  ;;  %v9024_v52 = vpack.c.bf16 %v4329_v28, %v4325_v19  ;;  %v4324_v32 = vmax.f32 %v4068_v49, 0.0  ;;  %v6920_v49 = vld [vmem:[#allocation7 + $0x140] ss:$8 sps:$4 sm:$0xff]  }
 0x48a   :  { %v3878_v51 = vadd.f32 %v8953_v50, %v2756_v58  ;;  %v2758_v46 = vpop.f32.mrb[103].mxu0  ;;  %5202 = vmatpush1.bf16.msra.mxu0 %v6918_v48  ;;  %v4328_v26 = vmax.f32 %v4072_v11, 0.0  ;;  %v4130_v5 = vmax.f32 %v3874_v37, 0.0  ;;  %v3513_v50 = vrot.slane %v8529_v63, %v8475_v18  ;;  %v10203_v2 = vld [vmem:[#allocation56_spill] sm:$0xff] }
 0x48b   :  { %v3879_v3 = vadd.f32 %v8957_v54, %v2758_v46  ;;  %5203 = vmatprep.subr.bf16.mxu0 %v6919_v10  ;;  %v4131_v19 = vmax.f32 %v3875_v61, 0.0  ;;  %v3509_v54 = vrot.slane %v8529_v63, %v8472_v7  ;;  %v10205_v7 = vld [vmem:[#allocation55_spill] sm:$0xff]  ;;  %v10207_v46 = vld [vmem:[#allocation60_spill] sm:$0xff] }
 0x48c   :  { %v4134_v24 = vmax.f32 %v3878_v51, 0.0  ;;  %4895 = vmatmul.mubr.bf16.gmra.mrb[208].mxu0 %v8866_v33  ;;  %5378 = vmatmul.mubr.bf16.gmra.mrb[52].mxu1 %v8719_v29  ;;  %v9030_v42 = vpack.c.bf16 %v4328_v26, %v4324_v32  ;;  %v10202_v33 = vld [vmem:[#allocation21_spill] sm:$0xff]  ;;  %v3821_v18 = vadd.f32 %v3513_v50, %v10203_v2  ;;  %v3825_v11 = vadd.f32 %v3513_v50, %v10204_v34  ;;  %v10208_v26 = vld [vmem:[#allocation62_spill] sm:$0xff] }
 0x48d   :  { %v4135_v4 = vmax.f32 %v3879_v3, 0.0  ;;  %4904 = vmatprep.mubr.bf16.mxu0 %v8908_v8  ;;  %5387 = vmatprep.mubr.bf16.mxu1 %v8732_v56  ;;  %v3565_v45 = vrot.slane %v10202_v33, %v7565_v15  ;;  %v3569_v29 = vrot.slane %v10202_v33, %v7571_v36  ;;  %v6921_v56 = vld [vmem:[#allocation7 + $0x154] ss:$8 sps:$4 sm:$0xff]   ;;  %v3820_v63 = vadd.f32 %v3509_v54, %v10205_v7  ;;  %v10206_v32 = vld [vmem:[#allocation57_spill] sm:$0xff] }
 0x48e   :  { %10201 = vst [vmem:[#allocation63_spill] sm:$0xff] %v9030_v42  ;;  %v9038_v28 = vpack.c.bf16 %v4134_v24, %v4130_v5  ;;  %5204 = vmatpush1.bf16.msra.mxu0 %v6920_v49  ;;  %v3824_v51 = vadd.f32 %v3509_v54, %v10206_v32  ;;  %v3829_v48 = vadd.f32 %v3513_v50, %v10207_v46  ;;  %v4077_v24 = vmax.f32 %v3821_v18, 0.0  ;;  %v10209_v18 = vld [vmem:[#allocation59_spill] sm:$0xff] }
 0x48f   :  { %v9044_v37 = vpack.c.bf16 %v4135_v4, %v4131_v19  ;;  %v2762_v8 = vpop.f32.mrb[104].mxu0  ;;  %5205 = vmatprep.subr.bf16.mxu0 %v6921_v56  ;;  %v3833_v3 = vadd.f32 %v3513_v50, %v10208_v26  ;;  %v4081_v19 = vmax.f32 %v3825_v11, 0.0  ;;  %v4076_v4 = vmax.f32 %v3820_v63, 0.0  ;;  %v6922_v56 = vld [vmem:[#allocation7 + $0x150] ss:$8 sps:$4 sm:$0xff]   ;;  %v10210_v63 = vld [vmem:[#allocation61_spill] sm:$0xff] }
 0x490   :  { %v3882_v61 = vadd.f32 %v3565_v45, %v2762_v8  ;;  %v2764_v58 = vpop.f32.mrb[105].mxu0  ;;  %v4080_v2 = vmax.f32 %v3824_v51, 0.0  ;;  %v4085_v34 = vmax.f32 %v3829_v48, 0.0  ;;  %v3828_v11 = vadd.f32 %v3509_v54, %v10209_v18 }
 0x491   :  { %v3883_v10 = vadd.f32 %v3569_v29, %v2764_v58  ;;  %v2766_v5 = vpop.f32.mrb[106].mxu0  ;;  %v9052_v32 = vpack.c.bf16 %v4081_v19, %v4077_v24  ;;  %v4089_v46 = vmax.f32 %v3833_v3, 0.0  ;;  %v3832_v58 = vadd.f32 %v3509_v54, %v10210_v63  ;;  %v6924_v3 = vld [vmem:[#allocation7 + $0x160] ss:$8 sps:$4 sm:$0xff]   ;;  %v6925_v19 = vld [vmem:[#allocation7 + $0x174] ss:$8 sps:$4 sm:$0xff]  }
 0x492   :  { %v3886_v33 = vadd.f32 %v3565_v45, %v2766_v5  ;;  %v2768_v49 = vpop.f32.mrb[107].mxu0  ;;  %5206 = vmatpush1.bf16.msra.mxu0 %v6922_v56  ;;  %v4138_v7 = vmax.f32 %v3882_v61, 0.0  ;;  %v9056_v50 = vpack.c.bf16 %v4080_v2, %v4076_v4  ;;  %v10211_v61 = vld [vmem:[#allocation27_spill] sm:$0xff] }
 0x493   :  { %v3887_v8 = vadd.f32 %v3569_v29, %v2768_v49  ;;  %5207 = vmatprep.subr.bf16.mxu0 %v6923_v55  ;;  %v4139_v51 = vmax.f32 %v3883_v10, 0.0  ;;  %v9062_v55 = vpack.c.bf16 %v4089_v46, %v4085_v34  ;;  %v6926_v2 = vld [vmem:[#allocation7 + $0x170] ss:$8 sps:$4 sm:$0xff]   ;;  %v6927_v34 = vld [vmem:[#allocation7 + $0x184] ss:$8 sps:$4 sm:$0xff]  }
 0x494   :  { %v4142_v42 = vmax.f32 %v3886_v33, 0.0  ;;  %4905 = vmatmul.mubr.bf16.gmra.mrb[212].mxu0 %v8902_v25  ;;  %5388 = vmatmul.mubr.bf16.gmra.mrb[56].mxu1 %v8742_v39  ;;  %v4084_v25 = vmax.f32 %v3828_v11, 0.0  ;;  %v4088_v39 = vmax.f32 %v3832_v58, 0.0 }
 0x495   :  { %v4143_v48 = vmax.f32 %v3887_v8, 0.0  ;;  %4914 = vmatprep.mubr.bf16.mxu0 %v8944_v38  ;;  %5397 = vmatprep.mubr.bf16.mxu1 %v10211_v61 }
 0x496   :  { %v9064_v26 = vpack.c.bf16 %v4142_v42, %v4138_v7  ;;  %5208 = vmatpush1.bf16.msra.mxu0 %v6924_v3  ;;  %v9068_v4 = vpack.c.bf16 %v4088_v39, %v4084_v25  ;;  %v6930_v39 = vld [vmem:[#allocation7 + $0x190] ss:$8 sps:$4 sm:$0xff]  }
 0x497   :  { %v9066_v5 = vpack.c.bf16 %v4143_v48, %v4139_v51  ;;  %v2772_v24 = vpop.f32.mrb[108].mxu0  ;;  %5209 = vmatprep.subr.bf16.mxu0 %v6925_v19  ;;  %v6931_v19 = vld [vmem:[#allocation7 + $0x1a4] ss:$8 sps:$4 sm:$0xff]  }
 0x498   :  { %v3890_v54 = vadd.f32 %v3565_v45, %v2772_v24  ;;  %v2774_v10 = vpop.f32.mrb[109].mxu0 }
 0x499   :  { %v3891_v38 = vadd.f32 %v3569_v29, %v2774_v10  ;;  %v2776_v33 = vpop.f32.mrb[110].mxu0 }
 0x49a   :  { %v3894_v49 = vadd.f32 %v3565_v45, %v2776_v33  ;;  %v2778_v56 = vpop.f32.mrb[111].mxu0  ;;  %5210 = vmatpush1.bf16.msra.mxu0 %v6926_v2  ;;  %v4146_v7 = vmax.f32 %v3890_v54, 0.0  ;;  %v10212_v45 = vld [vmem:[#allocation20_spill] sm:$0xff] }
 0x49b   :  { %v3895_v42 = vadd.f32 %v3569_v29, %v2778_v56  ;;  %5211 = vmatprep.subr.bf16.mxu0 %v6927_v34  ;;  %v4147_v46 = vmax.f32 %v3891_v38, 0.0  ;;  %v3581_v63 = vrot.slane %v10212_v45, %v7565_v15  ;;  %v6928_v29 = vld [vmem:[#allocation7 + $0x180] ss:$8 sps:$4 sm:$0xff]   ;;  %v6933_v34 = vld [vmem:[#allocation7 + $0x1b4] ss:$8 sps:$4 sm:$0xff]  }
 0x49c   :  { %v4150_v8 = vmax.f32 %v3894_v49, 0.0  ;;  %4915 = vmatmul.mubr.bf16.gmra.mrb[216].mxu0 %v8940_v1  ;;  %5398 = vmatmul.mubr.bf16.gmra.mrb[60].mxu1 %v8750_v30  ;;  %v3585_v1 = vrot.slane %v10212_v45, %v7571_v36  ;;  %v6929_v30 = vld [vmem:[#allocation7 + $0x194] ss:$8 sps:$4 sm:$0xff]   ;;  %v6932_v56 = vld [vmem:[#allocation7 + $0x1a0] ss:$8 sps:$4 sm:$0xff]  }
 0x49d   :  { %v4151_v18 = vmax.f32 %v3895_v42, 0.0  ;;  %4924 = vmatprep.mubr.bf16.mxu0 %v8984_v9  ;;  %5407 = vmatprep.mubr.bf16.mxu1 %v8764_v23  ;;  %v6934_v45 = vld [vmem:[#allocation7 + $0x1b0] ss:$8 sps:$4 sm:$0xff]  }
 0x49e   :  { %v9074_v11 = vpack.c.bf16 %v4150_v8, %v4146_v7  ;;  %5212 = vmatpush1.bf16.msra.mxu0 %v6928_v29  ;;  %v6935_v29 = vld [vmem:[#allocation7 + $0x1c4] ss:$8 sps:$4 sm:$0xff]  }
 0x49f   :  { %v9078_v58 = vpack.c.bf16 %v4151_v18, %v4147_v46  ;;  %v2782_v51 = vpop.f32.mrb[112].mxu0  ;;  %5213 = vmatprep.subr.bf16.mxu0 %v6929_v30 }
 0x4a0   :  { %v3898_v48 = vadd.f32 %v3581_v63, %v2782_v51  ;;  %v2784_v61 = vpop.f32.mrb[113].mxu0 }
 0x4a1   :  { %v3899_v9 = vadd.f32 %v3585_v1, %v2784_v61  ;;  %v2786_v3 = vpop.f32.mrb[114].mxu0 }
 0x4a2   :  { %v3902_v23 = vadd.f32 %v3581_v63, %v2786_v3  ;;  %v2788_v25 = vpop.f32.mrb[115].mxu0  ;;  %5214 = vmatpush1.bf16.msra.mxu0 %v6930_v39  ;;  %v4154_v54 = vmax.f32 %v3898_v48, 0.0 }
 0x4a3   :  { %v3903_v24 = vadd.f32 %v3585_v1, %v2788_v25  ;;  %5215 = vmatprep.subr.bf16.mxu0 %v6931_v19  ;;  %v4155_v38 = vmax.f32 %v3899_v9, 0.0 }
 0x4a4   :  { %v4158_v10 = vmax.f32 %v3902_v23, 0.0  ;;  %4925 = vmatmul.mubr.bf16.gmra.mrb[220].mxu0 %v8978_v14  ;;  %5408 = vmatmul.mubr.bf16.gmra.mrb[64].mxu1 %v8768_v12 }
 0x4a5   :  { %v4159_v33 = vmax.f32 %v3903_v24, 0.0  ;;  %4934 = vmatprep.mubr.bf16.mxu0 %v9014_v31  ;;  %5417 = vmatprep.mubr.bf16.mxu1 %v8770_v59 }
 0x4a6   :  { %v9086_v49 = vpack.c.bf16 %v4158_v10, %v4154_v54  ;;  %5216 = vmatpush1.bf16.msra.mxu0 %v6932_v56  ;;  %v6938_v54 = vld [vmem:[#allocation7 + $0x1d0] ss:$8 sps:$4 sm:$0xff]  }
 0x4a7   :  { %v9088_v2 = vpack.c.bf16 %v4159_v33, %v4155_v38  ;;  %v2792_v42 = vpop.f32.mrb[116].mxu0  ;;  %5217 = vmatprep.subr.bf16.mxu0 %v6933_v34  ;;  %v6939_v38 = vld [vmem:[#allocation7 + $0x1e4] ss:$8 sps:$4 sm:$0xff]  }
 0x4a8   :  { %v3906_v7 = vadd.f32 %v3581_v63, %v2792_v42  ;;  %v2794_v8 = vpop.f32.mrb[117].mxu0 }
 0x4a9   :  { %v3907_v14 = vadd.f32 %v3585_v1, %v2794_v8  ;;  %v2796_v46 = vpop.f32.mrb[118].mxu0  ;;  %v6940_v8 = vld [vmem:[#allocation7 + $0x1e0] ss:$8 sps:$4 sm:$0xff]  }
 0x4aa   :  { %v3910_v12 = vadd.f32 %v3581_v63, %v2796_v46  ;;  %v2798_v18 = vpop.f32.mrb[119].mxu0  ;;  %5218 = vmatpush1.bf16.msra.mxu0 %v6934_v45  ;;  %v4162_v59 = vmax.f32 %v3906_v7, 0.0  ;;  %v10213_v63 = vld [vmem:[#allocation24_spill] sm:$0xff] }
 0x4ab   :  { %v3911_v31 = vadd.f32 %v3585_v1, %v2798_v18  ;;  %5219 = vmatprep.subr.bf16.mxu0 %v6935_v29  ;;  %v4163_v30 = vmax.f32 %v3907_v14, 0.0  ;;  %v3597_v9 = vrot.slane %v10213_v63, %v7565_v15  ;;  %v6936_v1 = vld [vmem:[#allocation7 + $0x1c0] ss:$8 sps:$4 sm:$0xff]  }
 0x4ac   :  { %v4166_v51 = vmax.f32 %v3910_v12, 0.0  ;;  %4935 = vmatmul.mubr.bf16.gmra.mrb[224].mxu0 %v9012_v57  ;;  %5418 = vmatmul.mubr.bf16.gmra.mrb[68].mxu1 %v8790_v13  ;;  %v3601_v57 = vrot.slane %v10213_v63, %v7571_v36  ;;  %v6937_v13 = vld [vmem:[#allocation7 + $0x1d4] ss:$8 sps:$4 sm:$0xff]  }
 0x4ad   :  { %v4167_v48 = vmax.f32 %v3911_v31, 0.0  ;;  %4944 = vmatprep.mubr.bf16.mxu0 %v9044_v37  ;;  %5427 = vmatprep.mubr.bf16.mxu1 %v8820_v43  ;;  %v6941_v12 = vld [vmem:[#allocation7 + $0x1f4] ss:$8 sps:$4 sm:$0xff]  }
 0x4ae   :  { %v9094_v61 = vpack.c.bf16 %v4166_v51, %v4162_v59  ;;  %5220 = vmatpush1.bf16.msra.mxu0 %v6936_v1  ;;  %v6942_v59 = vld [vmem:[#allocation7 + $0x1f0] ss:$8 sps:$4 sm:$0xff]  }
 0x4af   :  { %v9098_v3 = vpack.c.bf16 %v4167_v48, %v4163_v30  ;;  %v2802_v23 = vpop.f32.mrb[120].mxu0  ;;  %5221 = vmatprep.subr.bf16.mxu0 %v6937_v13 }
 0x4b0   :  { %v3914_v25 = vadd.f32 %v3597_v9, %v2802_v23  ;;  %v2804_v39 = vpop.f32.mrb[121].mxu0 }
 0x4b1   :  { %v3915_v37 = vadd.f32 %v3601_v57, %v2804_v39  ;;  %v2806_v24 = vpop.f32.mrb[122].mxu0 }
 0x4b2   :  { %v3918_v43 = vadd.f32 %v3597_v9, %v2806_v24  ;;  %v2808_v19 = vpop.f32.mrb[123].mxu0  ;;  %5222 = vmatpush1.bf16.msra.mxu0 %v6938_v54  ;;  %v4170_v33 = vmax.f32 %v3914_v25, 0.0 }
 0x4b3   :  { %v3919_v10 = vadd.f32 %v3601_v57, %v2808_v19  ;;  %5223 = vmatprep.subr.bf16.mxu0 %v6939_v38  ;;  %v4171_v42 = vmax.f32 %v3915_v37, 0.0 }
 0x4b4   :  { %v4174_v56 = vmax.f32 %v3918_v43, 0.0  ;;  %4945 = vmatmul.mubr.bf16.gmra.mrb[228].mxu0 %v9038_v28  ;;  %5428 = vmatmul.mubr.bf16.gmra.mrb[72].mxu1 %v8824_v20 }
 0x4b5   :  { %v4175_v34 = vmax.f32 %v3919_v10, 0.0  ;;  %4954 = vmatprep.mubr.bf16.mxu0 %v9066_v5  ;;  %5437 = vmatprep.mubr.bf16.mxu1 %v8830_v27 }
 0x4b6   :  { %v9106_v7 = vpack.c.bf16 %v4174_v56, %v4170_v33  ;;  %5224 = vmatpush1.bf16.msra.mxu0 %v6940_v8 }
 0x4b7   :  { %v9108_v14 = vpack.c.bf16 %v4175_v34, %v4171_v42  ;;  %v2812_v46 = vpop.f32.mrb[124].mxu0  ;;  %5225 = vmatprep.subr.bf16.mxu0 %v6941_v12 }
 0x4b8   :  { %v3922_v18 = vadd.f32 %v3597_v9, %v2812_v46  ;;  %v2814_v45 = vpop.f32.mrb[125].mxu0 }
 0x4b9   :  { %v3923_v28 = vadd.f32 %v3601_v57, %v2814_v45  ;;  %v2816_v31 = vpop.f32.mrb[126].mxu0  ;;  %v10215_v45 = vld [vmem:[#allocation31_spill] sm:$0xff] }
 0x4ba   :  { %v3926_v20 = vadd.f32 %v3597_v9, %v2816_v31  ;;  %v2818_v29 = vpop.f32.mrb[127].mxu0  ;;  %5226 = vmatpush1.bf16.msra.mxu0 %v6942_v59  ;;  %v4178_v51 = vmax.f32 %v3922_v18, 0.0  ;;  %v10214_v9 = vld [vmem:[#allocation26_spill] sm:$0xff]  ;;  %v10216_v31 = vld [vmem:[#allocation23_spill] sm:$0xff] }
 0x4bb   :  { %v3927_v5 = vadd.f32 %v3601_v57, %v2818_v29  ;;  %v4179_v30 = vmax.f32 %v3923_v28, 0.0  ;;  %v3613_v1 = vrot.slane %v10214_v9, %v7565_v15  ;;  %v3617_v13 = vrot.slane %v10214_v9, %v7571_v36 }
 0x4bc   :  { %v4182_v27 = vmax.f32 %v3926_v20, 0.0  ;;  %4955 = vmatmul.mubr.bf16.gmra.mrb[232].mxu0 %v9064_v26  ;;  %5438 = vmatmul.mubr.bf16.gmra.mrb[76].mxu1 %v8841_v47  ;;  %v3629_v20 = vrot.slane %v10216_v31, %v7565_v15 }
 0x4bd   :  { %v4183_v48 = vmax.f32 %v3927_v5, 0.0  ;;  %4964 = vmatprep.mubr.bf16.mxu0 %v9078_v58  ;;  %5447 = vmatprep.mubr.bf16.mxu1 %v8847_v41  ;;  %v3633_v5 = vrot.slane %v10216_v31, %v7571_v36 }
 0x4be   :  { %v9114_v63 = vpack.c.bf16 %v4182_v27, %v4178_v51 }
 0x4bf   :  { %v9118_v23 = vpack.c.bf16 %v4183_v48, %v4179_v30  ;;  %v2822_v57 = vpop.f32.mrb[128].mxu0 }
 0x4c0   :  { %v3930_v26 = vadd.f32 %v3613_v1, %v2822_v57  ;;  %v2824_v25 = vpop.f32.mrb[129].mxu0 }
 0x4c1   :  { %v3931_v47 = vadd.f32 %v3617_v13, %v2824_v25  ;;  %v2826_v39 = vpop.f32.mrb[130].mxu0 }
 0x4c2   :  { %v3934_v37 = vadd.f32 %v3613_v1, %v2826_v39  ;;  %v2828_v24 = vpop.f32.mrb[131].mxu0  ;;  %v4186_v43 = vmax.f32 %v3930_v26, 0.0  ;;  %v10217_v26 = vld [vmem:[#allocation34_spill] sm:$0xff] }
 0x4c3   :  { %v3935_v58 = vadd.f32 %v3617_v13, %v2828_v24  ;;  %v4187_v19 = vmax.f32 %v3931_v47, 0.0 }
 0x4c4   :  { %v4190_v41 = vmax.f32 %v3934_v37, 0.0  ;;  %4965 = vmatmul.mubr.bf16.gmra.mrb[236].mxu0 %v9074_v11  ;;  %5448 = vmatmul.mubr.bf16.gmra.mrb[80].mxu1 %v8858_v0 }
 0x4c5   :  { %v4191_v54 = vmax.f32 %v3935_v58, 0.0  ;;  %4974 = vmatprep.mubr.bf16.mxu0 %v9088_v2  ;;  %5457 = vmatprep.mubr.bf16.mxu1 %v8870_v44 }
 0x4c6   :  { %v9126_v10 = vpack.c.bf16 %v4190_v41, %v4186_v43 }
 0x4c7   :  { %v9128_v38 = vpack.c.bf16 %v4191_v54, %v4187_v19  ;;  %v2832_v33 = vpop.f32.mrb[132].mxu0 }
 0x4c8   :  { %v3938_v56 = vadd.f32 %v3613_v1, %v2832_v33  ;;  %v2834_v42 = vpop.f32.mrb[133].mxu0 }
 0x4c9   :  { %v3939_v34 = vadd.f32 %v3617_v13, %v2834_v42  ;;  %v2836_v8 = vpop.f32.mrb[134].mxu0 }
 0x4ca   :  { %v3942_v46 = vadd.f32 %v3613_v1, %v2836_v8  ;;  %v2838_v12 = vpop.f32.mrb[135].mxu0  ;;  %v4194_v18 = vmax.f32 %v3938_v56, 0.0  ;;  %v10218_v56 = vld [vmem:[#allocation33_spill] sm:$0xff] }
 0x4cb   :  { %v3943_v11 = vadd.f32 %v3617_v13, %v2838_v12  ;;  %v4195_v2 = vmax.f32 %v3939_v34, 0.0  ;;  %v10219_v34 = vld [vmem:[#allocation25_spill] sm:$0xff] }
 0x4cc   :  { %v4198_v0 = vmax.f32 %v3942_v46, 0.0  ;;  %4975 = vmatmul.mubr.bf16.gmra.mrb[240].mxu0 %v9086_v49  ;;  %5458 = vmatmul.mubr.bf16.gmra.mrb[84].mxu1 %v10215_v45  ;;  %v3645_v8 = vrot.slane %v10219_v34, %v7565_v15 }
 0x4cd   :  { %v4199_v44 = vmax.f32 %v3943_v11, 0.0  ;;  %4984 = vmatprep.mubr.bf16.mxu0 %v9098_v3  ;;  %5467 = vmatprep.mubr.bf16.mxu1 %v8887_v17  ;;  %v3649_v11 = vrot.slane %v10219_v34, %v7571_v36 }
 0x4ce   :  { %v9134_v28 = vpack.c.bf16 %v4198_v0, %v4194_v18 }
 0x4cf   :  { %v9138_v29 = vpack.c.bf16 %v4199_v44, %v4195_v2  ;;  %v2842_v59 = vpop.f32.mrb[136].mxu0 }
 0x4d0   :  { %v3946_v49 = vadd.f32 %v3629_v20, %v2842_v59  ;;  %v2844_v51 = vpop.f32.mrb[137].mxu0 }
 0x4d1   :  { %v3947_v27 = vadd.f32 %v3633_v5, %v2844_v51  ;;  %v2846_v30 = vpop.f32.mrb[138].mxu0 }
 0x4d2   :  { %v3950_v48 = vadd.f32 %v3629_v20, %v2846_v30  ;;  %v2848_v9 = vpop.f32.mrb[139].mxu0  ;;  %v4202_v1 = vmax.f32 %v3946_v49, 0.0  ;;  %v10221_v49 = vld [vmem:[#allocation38_spill] sm:$0xff] }
 0x4d3   :  { %v3951_v3 = vadd.f32 %v3633_v5, %v2848_v9  ;;  %v4203_v57 = vmax.f32 %v3947_v27, 0.0 }
 0x4d4   :  { %v4206_v17 = vmax.f32 %v3950_v48, 0.0  ;;  %4985 = vmatmul.mubr.bf16.gmra.mrb[244].mxu0 %v9094_v61  ;;  %5468 = vmatmul.mubr.bf16.gmra.mrb[88].mxu1 %v8896_v60 }
 0x4d5   :  { %v4207_v13 = vmax.f32 %v3951_v3, 0.0  ;;  %4994 = vmatprep.mubr.bf16.mxu0 %v9108_v14  ;;  %5477 = vmatprep.mubr.bf16.mxu1 %v10217_v26 }
 0x4d6   :  { %v9146_v25 = vpack.c.bf16 %v4206_v17, %v4202_v1 }
 0x4d7   :  { %v9148_v47 = vpack.c.bf16 %v4207_v13, %v4203_v57  ;;  %v2852_v39 = vpop.f32.mrb[140].mxu0 }
 0x4d8   :  { %v3954_v37 = vadd.f32 %v3629_v20, %v2852_v39  ;;  %v2854_v24 = vpop.f32.mrb[141].mxu0 }
 0x4d9   :  { %v3955_v58 = vadd.f32 %v3633_v5, %v2854_v24  ;;  %v2856_v43 = vpop.f32.mrb[142].mxu0  ;;  %v10222_v24 = vld [vmem:[#allocation29_spill] sm:$0xff] }
 0x4da   :  { %v3958_v41 = vadd.f32 %v3629_v20, %v2856_v43  ;;  %v2858_v19 = vpop.f32.mrb[143].mxu0  ;;  %v4210_v54 = vmax.f32 %v3954_v37, 0.0  ;;  %v10220_v20 = vld [vmem:[#allocation35_spill] sm:$0xff] }
 0x4db   :  { %v3959_v61 = vadd.f32 %v3633_v5, %v2858_v19  ;;  %v4211_v14 = vmax.f32 %v3955_v58, 0.0  ;;  %v3661_v58 = vrot.slane %v10222_v24, %v7565_v15  ;;  %v3665_v19 = vrot.slane %v10222_v24, %v7571_v36 }
 0x4dc   :  { %v4214_v60 = vmax.f32 %v3958_v41, 0.0  ;;  %4995 = vmatmul.mubr.bf16.gmra.mrb[248].mxu0 %v9106_v7  ;;  %5478 = vmatmul.mubr.bf16.gmra.mrb[92].mxu1 %v8918_v6 }
 0x4dd   :  { %v4215_v33 = vmax.f32 %v3959_v61, 0.0  ;;  %5004 = vmatprep.mubr.bf16.mxu0 %v9118_v23  ;;  %5487 = vmatprep.mubr.bf16.mxu1 %v10218_v56 }
 0x4de   :  { %v9154_v42 = vpack.c.bf16 %v4214_v60, %v4210_v54 }
 0x4df   :  { %v9158_v46 = vpack.c.bf16 %v4215_v33, %v4211_v14  ;;  %v2862_v12 = vpop.f32.mrb[144].mxu0 }
 0x4e0   :  { %v3962_v7 = vadd.f32 %v3645_v8, %v2862_v12  ;;  %v2864_v18 = vpop.f32.mrb[145].mxu0 }
 0x4e1   :  { %v3963_v6 = vadd.f32 %v3649_v11, %v2864_v18  ;;  %v2866_v0 = vpop.f32.mrb[146].mxu0 }
 0x4e2   :  { %v3966_v45 = vadd.f32 %v3645_v8, %v2866_v0  ;;  %v2868_v2 = vpop.f32.mrb[147].mxu0  ;;  %v4218_v44 = vmax.f32 %v3962_v7, 0.0 }
 0x4e3   :  { %v3967_v23 = vadd.f32 %v3649_v11, %v2868_v2  ;;  %v4219_v59 = vmax.f32 %v3963_v6, 0.0 }
 0x4e4   :  { %v4222_v31 = vmax.f32 %v3966_v45, 0.0  ;;  %5005 = vmatmul.mubr.bf16.gmra.mrb[252].mxu0 %v9114_v63  ;;  %5488 = vmatmul.mubr.bf16.gmra.mrb[96].mxu1 %v10220_v20 }
 0x4e5   :  { %v4223_v5 = vmax.f32 %v3967_v23, 0.0  ;;  %5014 = vmatprep.mubr.bf16.mxu0 %v9128_v38  ;;  %5497 = vmatprep.mubr.bf16.mxu1 %v10221_v49  ;;  %v10223_v49 = vld [vmem:[#allocation32_spill] sm:$0xff] }
 0x4e6   :  { %v9166_v51 = vpack.c.bf16 %v4222_v31, %v4218_v44 }
 0x4e7   :  { %v9168_v27 = vpack.c.bf16 %v4223_v5, %v4219_v59  ;;  %v2872_v30 = vpop.f32.mrb[148].mxu0 }
 0x4e8   :  { %v3970_v48 = vadd.f32 %v3645_v8, %v2872_v30  ;;  %v2874_v9 = vpop.f32.mrb[149].mxu0  ;;  %v3677_v30 = vrot.slane %v10223_v49, %v7565_v15 }
 0x4e9   :  { %v3971_v3 = vadd.f32 %v3649_v11, %v2874_v9  ;;  %v2876_v1 = vpop.f32.mrb[150].mxu0 }
 0x4ea   :  { %v3974_v17 = vadd.f32 %v3645_v8, %v2876_v1  ;;  %v2878_v57 = vpop.f32.mrb[151].mxu0  ;;  %v4226_v13 = vmax.f32 %v3970_v48, 0.0 }
 0x4eb   :  { %v3975_v63 = vadd.f32 %v3649_v11, %v2878_v57  ;;  %v4227_v38 = vmax.f32 %v3971_v3, 0.0 }
 0x4ec   :  { %v4230_v26 = vmax.f32 %v3974_v17, 0.0  ;;  %5015 = vmatmul.mubr.bf16.gmra.mrb[0].mxu0 %v9126_v10  ;;  %5498 = vmatmul.mubr.bf16.gmra.mrb[100].mxu1 %v8962_v22 }
 0x4ed   :  { %v4231_v39 = vmax.f32 %v3975_v63, 0.0  ;;  %5024 = vmatprep.mubr.bf16.mxu0 %v9138_v29  ;;  %5507 = vmatprep.mubr.bf16.mxu1 %v8974_v40 }
 0x4ee   :  { %v9174_v37 = vpack.c.bf16 %v4230_v26, %v4226_v13 }
 0x4ef   :  { %v9178_v43 = vpack.c.bf16 %v4231_v39, %v4227_v38  ;;  %v2882_v41 = vpop.f32.mrb[152].mxu0 }
 0x4f0   :  { %v3978_v10 = vadd.f32 %v3661_v58, %v2882_v41  ;;  %v2884_v61 = vpop.f32.mrb[153].mxu0 }
 0x4f1   :  { %v3979_v22 = vadd.f32 %v3665_v19, %v2884_v61  ;;  %v2886_v54 = vpop.f32.mrb[154].mxu0 }
 0x4f2   :  { %v3982_v60 = vadd.f32 %v3661_v58, %v2886_v54  ;;  %v2888_v14 = vpop.f32.mrb[155].mxu0  ;;  %v4234_v33 = vmax.f32 %v3978_v10, 0.0 }
 0x4f3   :  { %v3983_v29 = vadd.f32 %v3665_v19, %v2888_v14  ;;  %v4235_v56 = vmax.f32 %v3979_v22, 0.0 }
 0x4f4   :  { %v4238_v40 = vmax.f32 %v3982_v60, 0.0  ;;  %5025 = vmatmul.mubr.bf16.gmra.mrb[4].mxu0 %v9134_v28  ;;  %5508 = vmatmul.mubr.bf16.gmra.mrb[104].mxu1 %v8981_v62 }
 0x4f5   :  { %v4239_v34 = vmax.f32 %v3983_v29, 0.0  ;;  %5034 = vmatprep.mubr.bf16.mxu0 %v9148_v47  ;;  %5517 = vmatprep.mubr.bf16.mxu1 %v8992_v21 }
 0x4f6   :  { %v9186_v8 = vpack.c.bf16 %v4238_v40, %v4234_v33 }
 0x4f7   :  { %v9188_v12 = vpack.c.bf16 %v4239_v34, %v4235_v56  ;;  %v2892_v11 = vpop.f32.mrb[156].mxu0  ;;  %v9190_v7 = vpop.f32.mrb[0].mxu1 }
 0x4f8   :  { %v3986_v18 = vadd.f32 %v3661_v58, %v2892_v11  ;;  %v2894_v6 = vpop.f32.mrb[157].mxu0  ;;  %v9192_v0 = vpop.f32.mrb[1].mxu1  ;;  %v10224_v11 = vld [vmem:[#allocation63_spill] sm:$0xff] }
 0x4f9   :  { %v3987_v28 = vadd.f32 %v3665_v19, %v2894_v6  ;;  %v2896_v45 = vpop.f32.mrb[158].mxu0  ;;  %v9194_v62 = vpop.f32.mrb[2].mxu1 }
 0x4fa   :  { %v3990_v2 = vadd.f32 %v3661_v58, %v2896_v45  ;;  %v2898_v23 = vpop.f32.mrb[159].mxu0  ;;  %v9196_v47 = vpop.f32.mrb[3].mxu1  ;;  %v4242_v44 = vmax.f32 %v3986_v18, 0.0  ;;  %v10225_v45 = vld [vmem:[#allocation28_spill] sm:$0xff] }
 0x4fb   :  { %v3991_v21 = vadd.f32 %v3665_v19, %v2898_v23  ;;  %v4243_v20 = vmax.f32 %v3987_v28, 0.0 }
 0x4fc   :  { %v4246_v31 = vmax.f32 %v3990_v2, 0.0  ;;  %5035 = vmatmul.mubr.bf16.gmra.mrb[8].mxu0 %v9146_v25  ;;  %5518 = vmatmul.mubr.bf16.gmra.mrb[108].mxu1 %v8999_v35  ;;  %v3681_v25 = vrot.slane %v10223_v49, %v7571_v36  ;;  %v3693_v2 = vrot.slane %v10225_v45, %v7565_v15 }
 0x4fd   :  { %v4247_v59 = vmax.f32 %v3991_v21, 0.0  ;;  %5044 = vmatprep.mubr.bf16.mxu0 %v9158_v46  ;;  %5527 = vmatprep.mubr.bf16.mxu1 %v9016_v53 }
 0x4fe   :  { %v9202_v5 = vpack.c.bf16 %v4246_v31, %v4242_v44  ;;  %v3697_v31 = vrot.slane %v10225_v45, %v7571_v36 }
 0x4ff   :  { %v9206_v48 = vpack.c.bf16 %v4247_v59, %v4243_v20  ;;  %v2902_v9 = vpop.f32.mrb[160].mxu0  ;;  %v9208_v3 = vpop.f32.mrb[4].mxu1 }
 0x500   :  { %v3994_v35 = vadd.f32 %v3677_v30, %v2902_v9  ;;  %v2904_v1 = vpop.f32.mrb[161].mxu0  ;;  %v9212_v17 = vpop.f32.mrb[5].mxu1 }
 0x501   :  { %v3995_v46 = vadd.f32 %v3681_v25, %v2904_v1  ;;  %v2906_v57 = vpop.f32.mrb[162].mxu0  ;;  %v9214_v53 = vpop.f32.mrb[6].mxu1 }
 0x502   :  { %v3998_v63 = vadd.f32 %v3677_v30, %v2906_v57  ;;  %v2908_v13 = vpop.f32.mrb[163].mxu0  ;;  %v9216_v26 = vpop.f32.mrb[7].mxu1  ;;  %v4250_v39 = vmax.f32 %v3994_v35, 0.0 }
 0x503   :  { %v3999_v38 = vadd.f32 %v3681_v25, %v2908_v13  ;;  %v4251_v58 = vmax.f32 %v3995_v46, 0.0 }
 0x504   :  { %v4254_v24 = vmax.f32 %v3998_v63, 0.0  ;;  %5045 = vmatmul.mubr.bf16.gmra.mrb[12].mxu0 %v9154_v42  ;;  %5528 = vmatmul.mubr.bf16.gmra.mrb[112].mxu1 %v9020_v16 }
 0x505   :  { %v4255_v41 = vmax.f32 %v3999_v38, 0.0  ;;  %5054 = vmatprep.mubr.bf16.mxu0 %v9168_v27  ;;  %5537 = vmatprep.mubr.bf16.mxu1 %v9024_v52 }
 0x506   :  { %v9222_v19 = vpack.c.bf16 %v4254_v24, %v4250_v39 }
 0x507   :  { %v9224_v10 = vpack.c.bf16 %v4255_v41, %v4251_v58  ;;  %v2912_v61 = vpop.f32.mrb[164].mxu0  ;;  %v9226_v22 = vpop.f32.mrb[8].mxu1 }
 0x508   :  { %v4002_v54 = vadd.f32 %v3677_v30, %v2912_v61  ;;  %v2914_v60 = vpop.f32.mrb[165].mxu0  ;;  %v9228_v14 = vpop.f32.mrb[9].mxu1 }
 0x509   :  { %v4003_v42 = vadd.f32 %v3681_v25, %v2914_v60  ;;  %v2916_v29 = vpop.f32.mrb[166].mxu0  ;;  %v9230_v16 = vpop.f32.mrb[10].mxu1 }
 0x50a   :  { %v4006_v33 = vadd.f32 %v3677_v30, %v2916_v29  ;;  %v2918_v40 = vpop.f32.mrb[167].mxu0  ;;  %v9232_v27 = vpop.f32.mrb[11].mxu1  ;;  %v4258_v56 = vmax.f32 %v4002_v54, 0.0 }
 0x50b   :  { %v4007_v52 = vadd.f32 %v3681_v25, %v2918_v40  ;;  %v4259_v18 = vmax.f32 %v4003_v42, 0.0 }
 0x50c   :  { %v4262_v34 = vmax.f32 %v4006_v33, 0.0  ;;  %5055 = vmatmul.mubr.bf16.gmra.mrb[16].mxu0 %v9166_v51  ;;  %5538 = vmatmul.mubr.bf16.gmra.mrb[116].mxu1 %v10224_v11 }
 0x50d   :  { %v4263_v6 = vmax.f32 %v4007_v52, 0.0  ;;  %5064 = vmatprep.mubr.bf16.mxu0 %v9178_v43 }
 0x50e   :  { %v9237_v28 = vpack.c.bf16 %v4262_v34, %v4258_v56 }
 0x50f   :  { %v9241_v23 = vpack.c.bf16 %v4263_v6, %v4259_v18  ;;  %v2922_v21 = vpop.f32.mrb[168].mxu0  ;;  %v9243_v44 = vpop.f32.mrb[12].mxu1  ;;  %v10226_v6 = vld [vmem:[#allocation30_spill] sm:$0xff] }
 0x510   :  { %v4010_v51 = vadd.f32 %v3693_v2, %v2922_v21  ;;  %v2924_v20 = vpop.f32.mrb[169].mxu0  ;;  %v9247_v59 = vpop.f32.mrb[13].mxu1  ;;  %v3709_v45 = vrot.slane %v10226_v6, %v7565_v15 }
 0x511   :  { %v4011_v49 = vadd.f32 %v3697_v31, %v2924_v20  ;;  %v2926_v30 = vpop.f32.mrb[170].mxu0  ;;  %v9249_v43 = vpop.f32.mrb[14].mxu1 }
 0x512   :  { %v4014_v9 = vadd.f32 %v3693_v2, %v2926_v30  ;;  %v2928_v25 = vpop.f32.mrb[171].mxu0  ;;  %v9251_v35 = vpop.f32.mrb[15].mxu1  ;;  %v4266_v46 = vmax.f32 %v4010_v51, 0.0 }
 0x513   :  { %v4015_v1 = vadd.f32 %v3697_v31, %v2928_v25  ;;  %v4267_v63 = vmax.f32 %v4011_v49, 0.0 }
 0x514   :  { %v4270_v57 = vmax.f32 %v4014_v9, 0.0  ;;  %5065 = vmatmul.mubr.bf16.gmra.mrb[20].mxu0 %v9174_v37 }
 0x515   :  { %v4271_v13 = vmax.f32 %v4015_v1, 0.0  ;;  %5074 = vmatprep.mubr.bf16.mxu0 %v9188_v12 }
 0x516   :  { %v9255_v38 = vpack.c.bf16 %v4270_v57, %v4266_v46 }
 0x517   :  { %v9257_v39 = vpack.c.bf16 %v4271_v13, %v4267_v63  ;;  %v2932_v24 = vpop.f32.mrb[172].mxu0  ;;  %v9259_v58 = vpop.f32.mrb[16].mxu1 }
 0x518   :  { %v4018_v41 = vadd.f32 %v3693_v2, %v2932_v24  ;;  %v2934_v61 = vpop.f32.mrb[173].mxu0  ;;  %v9261_v54 = vpop.f32.mrb[17].mxu1 }
 0x519   :  { %v4019_v60 = vadd.f32 %v3697_v31, %v2934_v61  ;;  %v2936_v42 = vpop.f32.mrb[174].mxu0  ;;  %v9263_v29 = vpop.f32.mrb[18].mxu1 }
 0x51a   :  { %v4022_v37 = vadd.f32 %v3693_v2, %v2936_v42  ;;  %v2938_v33 = vpop.f32.mrb[175].mxu0  ;;  %v9265_v40 = vpop.f32.mrb[19].mxu1  ;;  %v4274_v52 = vmax.f32 %v4018_v41, 0.0 }
 0x51b   :  { %v4023_v12 = vadd.f32 %v3697_v31, %v2938_v33  ;;  %v4275_v34 = vmax.f32 %v4019_v60, 0.0  ;;  %v3713_v31 = vrot.slane %v10226_v6, %v7571_v36 }
 0x51c   :  { %v4278_v56 = vmax.f32 %v4022_v37, 0.0  ;;  %5075 = vmatmul.mubr.bf16.gmra.mrb[24].mxu0 %v9186_v8 }
 0x51d   :  { %v4279_v11 = vmax.f32 %v4023_v12, 0.0  ;;  %5084 = vmatprep.mubr.bf16.mxu0 %v9206_v48 }
 0x51e   :  { %v9269_v18 = vpack.c.bf16 %v4278_v56, %v4274_v52 }
 0x51f   :  { %v9273_v21 = vpack.c.bf16 %v4279_v11, %v4275_v34  ;;  %v2942_v2 = vpop.f32.mrb[176].mxu0  ;;  %v9275_v51 = vpop.f32.mrb[20].mxu1 }
 0x520   :  { %v4026_v20 = vadd.f32 %v3709_v45, %v2942_v2  ;;  %v2944_v49 = vpop.f32.mrb[177].mxu0  ;;  %v9279_v8 = vpop.f32.mrb[21].mxu1 }
 0x521   :  { %v4027_v30 = vadd.f32 %v3713_v31, %v2944_v49  ;;  %v2946_v9 = vpop.f32.mrb[178].mxu0  ;;  %v9281_v48 = vpop.f32.mrb[22].mxu1 }
 0x522   :  { %v4030_v25 = vadd.f32 %v3709_v45, %v2946_v9  ;;  %v2948_v1 = vpop.f32.mrb[179].mxu0  ;;  %v9283_v46 = vpop.f32.mrb[23].mxu1  ;;  %v4282_v63 = vmax.f32 %v4026_v20, 0.0 }
 0x523   :  { %v4031_v57 = vadd.f32 %v3713_v31, %v2948_v1  ;;  %v4283_v24 = vmax.f32 %v4027_v30, 0.0  ;;  %v10227_v1 = vld [vmem:[#allocation36_spill] sm:$0xff] }
 0x524   :  { %v4286_v13 = vmax.f32 %v4030_v25, 0.0  ;;  %5085 = vmatmul.mubr.bf16.gmra.mrb[28].mxu0 %v9202_v5 }
 0x525   :  { %v4287_v41 = vmax.f32 %v4031_v57, 0.0  ;;  %5094 = vmatprep.mubr.bf16.mxu0 %v9224_v10  ;;  %v3725_v57 = vrot.slane %v10227_v1, %v7565_v15 }
 0x526   :  { %v9287_v61 = vpack.c.bf16 %v4286_v13, %v4282_v63 }
 0x527   :  { %v9289_v60 = vpack.c.bf16 %v4287_v41, %v4283_v24  ;;  %v2952_v42 = vpop.f32.mrb[180].mxu0  ;;  %v9291_v37 = vpop.f32.mrb[24].mxu1 }
 0x528   :  { %v4034_v33 = vadd.f32 %v3709_v45, %v2952_v42  ;;  %v2954_v12 = vpop.f32.mrb[181].mxu0  ;;  %v9293_v52 = vpop.f32.mrb[25].mxu1 }
 0x529   :  { %v4035_v56 = vadd.f32 %v3713_v31, %v2954_v12  ;;  %v2956_v34 = vpop.f32.mrb[182].mxu0  ;;  %v9295_v11 = vpop.f32.mrb[26].mxu1 }
 0x52a   :  { %v4038_v5 = vadd.f32 %v3709_v45, %v2956_v34  ;;  %v2958_v6 = vpop.f32.mrb[183].mxu0  ;;  %v9297_v2 = vpop.f32.mrb[27].mxu1  ;;  %v4290_v20 = vmax.f32 %v4034_v33, 0.0 }
 0x52b   :  { %v4039_v10 = vadd.f32 %v3713_v31, %v2958_v6  ;;  %v4291_v30 = vmax.f32 %v4035_v56, 0.0  ;;  %v3729_v31 = vrot.slane %v10227_v1, %v7571_v36 }
 0x52c   :  { %v4294_v49 = vmax.f32 %v4038_v5, 0.0  ;;  %5095 = vmatmul.mubr.bf16.gmra.mrb[32].mxu0 %v9222_v19 }
 0x52d   :  { %v4295_v9 = vmax.f32 %v4039_v10, 0.0  ;;  %5104 = vmatprep.mubr.bf16.mxu0 %v9241_v23 }
 0x52e   :  { %v9301_v25 = vpack.c.bf16 %v4294_v49, %v4290_v20 }
 0x52f   :  { %v9305_v63 = vpack.c.bf16 %v4295_v9, %v4291_v30  ;;  %v2962_v45 = vpop.f32.mrb[184].mxu0  ;;  %v9307_v13 = vpop.f32.mrb[28].mxu1 }
 0x530   :  { %v4042_v24 = vadd.f32 %v3725_v57, %v2962_v45  ;;  %v2964_v41 = vpop.f32.mrb[185].mxu0  ;;  %v9311_v19 = vpop.f32.mrb[29].mxu1 }
 0x531   :  { %v4043_v42 = vadd.f32 %v3729_v31, %v2964_v41  ;;  %v2966_v33 = vpop.f32.mrb[186].mxu0  ;;  %v9313_v23 = vpop.f32.mrb[30].mxu1 }
 0x532   :  { %10228 = vst [vmem:[#allocation64_spill] sm:$0xff] %v9313_v23  ;;  %v4046_v12 = vadd.f32 %v3725_v57, %v2966_v33  ;;  %v2968_v56 = vpop.f32.mrb[187].mxu0  ;;  %v9315_v34 = vpop.f32.mrb[31].mxu1  ;;  %v4298_v6 = vmax.f32 %v4042_v24, 0.0 }
 0x533   :  { %v4047_v5 = vadd.f32 %v3729_v31, %v2968_v56  ;;  %v4299_v20 = vmax.f32 %v4043_v42, 0.0 }
 0x534   :  { %v4302_v10 = vmax.f32 %v4046_v12, 0.0  ;;  %5105 = vmatmul.mubr.bf16.gmra.mrb[36].mxu0 %v9237_v28 }
 0x535   :  { %v4303_v49 = vmax.f32 %v4047_v5, 0.0  ;;  %5114 = vmatprep.mubr.bf16.mxu0 %v9257_v39 }
 0x536   :  { %v9319_v30 = vpack.c.bf16 %v4302_v10, %v4298_v6 }
 0x537   :  { %v9321_v9 = vpack.c.bf16 %v4303_v49, %v4299_v20  ;;  %v2972_v1 = vpop.f32.mrb[188].mxu0  ;;  %v9323_v45 = vpop.f32.mrb[32].mxu1 }
 0x538   :  { %10229 = vst [vmem:[#allocation67_spill] sm:$0xff] %v9323_v45  ;;  %v4050_v41 = vadd.f32 %v3725_v57, %v2972_v1  ;;  %v2974_v33 = vpop.f32.mrb[189].mxu0  ;;  %v9325_v23 = vpop.f32.mrb[33].mxu1 }
 0x539   :  { %10230 = vst [vmem:[#allocation69_spill] sm:$0xff] %v9325_v23  ;;  %v4051_v56 = vadd.f32 %v3729_v31, %v2974_v33  ;;  %v2976_v24 = vpop.f32.mrb[190].mxu0  ;;  %v9327_v12 = vpop.f32.mrb[34].mxu1  ;;  %v10232_v33 = vld [vmem:[#allocation65_spill] sm:$0xff] }
 0x53a   :  { %10231 = vst [vmem:[#allocation66_spill] sm:$0xff] %v9327_v12  ;;  %v4054_v28 = vadd.f32 %v3725_v57, %v2976_v24  ;;  %v2978_v42 = vpop.f32.mrb[191].mxu0  ;;  %v9329_v5 = vpop.f32.mrb[35].mxu1  ;;  %v4306_v6 = vmax.f32 %v4050_v41, 0.0  ;;  %v3741_v23 = vrot.slane %v10232_v33, %v7565_v15 }
 0x53b   :  { %v4055_v39 = vadd.f32 %v3729_v31, %v2978_v42  ;;  %v4307_v20 = vmax.f32 %v4051_v56, 0.0  ;;  %v3745_v31 = vrot.slane %v10232_v33, %v7571_v36 }
 0x53c   :  { %v4310_v10 = vmax.f32 %v4054_v28, 0.0  ;;  %5115 = vmatmul.mubr.bf16.gmra.mrb[40].mxu0 %v9255_v38 }
 0x53d   :  { %v4311_v49 = vmax.f32 %v4055_v39, 0.0  ;;  %5124 = vmatprep.mubr.bf16.mxu0 %v9273_v21 }
 0x53e   :  { %v9333_v1 = vpack.c.bf16 %v4310_v10, %v4306_v6 }
 0x53f   :  { %v4447_v45 = vpack.c.bf16 %v4311_v49, %v4307_v20  ;;  %v2982_v12 = vpop.f32.mrb[192].mxu0  ;;  %v9337_v57 = vpop.f32.mrb[36].mxu1 }
 0x540   :  { %10233 = vst [vmem:[#allocation68_spill] sm:$0xff] %v9337_v57  ;;  %v4058_v41 = vadd.f32 %v3741_v23, %v2982_v12  ;;  %v2984_v24 = vpop.f32.mrb[193].mxu0  ;;  %v9341_v28 = vpop.f32.mrb[37].mxu1 }
 0x541   :  { %10234 = vst [vmem:[#allocation37_spill] sm:$0xff] %v9341_v28  ;;  %v4059_v38 = vadd.f32 %v3745_v31, %v2984_v24  ;;  %v2986_v56 = vpop.f32.mrb[194].mxu0  ;;  %v9343_v42 = vpop.f32.mrb[38].mxu1 }
 0x542   :  { %10235 = vst [vmem:[#allocation71_spill] sm:$0xff] %v9343_v42  ;;  %v4062_v21 = vadd.f32 %v3741_v23, %v2986_v56  ;;  %v2988_v39 = vpop.f32.mrb[195].mxu0  ;;  %v9345_v6 = vpop.f32.mrb[39].mxu1  ;;  %v4314_v20 = vmax.f32 %v4058_v41, 0.0 }
 0x543   :  { %10236 = vst [vmem:[#allocation73_spill] sm:$0xff] %v9345_v6  ;;  %v4063_v10 = vadd.f32 %v3745_v31, %v2988_v39  ;;  %v4315_v15 = vmax.f32 %v4059_v38, 0.0 }
 0x544   :  { %v4318_v49 = vmax.f32 %v4062_v21, 0.0  ;;  %5125 = vmatmul.mubr.bf16.gmra.mrb[44].mxu0 %v9269_v18 }
 0x545   :  { %v4319_v57 = vmax.f32 %v4063_v10, 0.0  ;;  %5134 = vmatprep.mubr.bf16.mxu0 %v9289_v60 }
 0x546   :  { %v9349_v12 = vpack.c.bf16 %v4318_v49, %v4314_v20 }
 0x547   :  { %v4451_v33 = vpack.c.bf16 %v4319_v57, %v4315_v15  ;;  %v2992_v24 = vpop.f32.mrb[196].mxu0  ;;  %v9351_v36 = vpop.f32.mrb[40].mxu1 }
 0x548   :  { %v4066_v42 = vadd.f32 %v3741_v23, %v2992_v24  ;;  %v2994_v56 = vpop.f32.mrb[197].mxu0  ;;  %v9353_v28 = vpop.f32.mrb[41].mxu1 }
 0x549   :  { %10237 = vst [vmem:[#allocation40_spill] sm:$0xff] %v9353_v28  ;;  %v4067_v6 = vadd.f32 %v3745_v31, %v2994_v56  ;;  %v2996_v39 = vpop.f32.mrb[198].mxu0  ;;  %v9355_v41 = vpop.f32.mrb[42].mxu1 }
 0x54a   :  { %10238 = vst [vmem:[#allocation70_spill] sm:$0xff] %v9355_v41  ;;  %v4070_v21 = vadd.f32 %v3741_v23, %v2996_v39  ;;  %v2998_v18 = vpop.f32.mrb[199].mxu0  ;;  %v9357_v38 = vpop.f32.mrb[43].mxu1  ;;  %v4322_v60 = vmax.f32 %v4066_v42, 0.0 }
 0x54b   :  { %v4071_v10 = vadd.f32 %v3745_v31, %v2998_v18  ;;  %v4323_v15 = vmax.f32 %v4067_v6, 0.0 }
 0x54c   :  { %v4326_v20 = vmax.f32 %v4070_v21, 0.0  ;;  %5135 = vmatmul.mubr.bf16.gmra.mrb[48].mxu0 %v9287_v61 }
 0x54d   :  { %v4327_v57 = vmax.f32 %v4071_v10, 0.0  ;;  %5144 = vmatprep.mubr.bf16.mxu0 %v9305_v63 }
 0x54e   :  { %v4454_v49 = vpack.c.bf16 %v4326_v20, %v4322_v60 }
 0x54f   :  { %v4455_v24 = vpack.c.bf16 %v4327_v57, %v4323_v15  ;;  %v9361_v28 = vpop.f32.mrb[44].mxu1 }
 0x550   :  { %v9363_v56 = vpop.f32.mrb[45].mxu1 }
 0x551   :  { %v9365_v41 = vpop.f32.mrb[46].mxu1 }
 0x552   :  { %v9367_v23 = vpop.f32.mrb[47].mxu1 }
 0x554   :  { %5145 = vmatmul.mubr.bf16.gmra.mrb[52].mxu0 %v9301_v25 }
 0x555   :  { %5154 = vmatprep.mubr.bf16.mxu0 %v9321_v9 }
 0x557   :  { %v9371_v31 = vpop.f32.mrb[48].mxu1 }
 0x558   :  { %v9373_v61 = vpop.f32.mrb[49].mxu1 }
 0x559   :  { %v9375_v42 = vpop.f32.mrb[50].mxu1 }
 0x55a   :  { %v9377_v63 = vpop.f32.mrb[51].mxu1 }
 0x55c   :  { %5155 = vmatmul.mubr.bf16.gmra.mrb[56].mxu0 %v9319_v30 }
 0x55d   :  { %5164 = vmatprep.mubr.bf16.mxu0 %v4447_v45 }
 0x55f   :  { %v4896_v6 = vpop.f32.mrb[208].mxu0  ;;  %v9380_v39 = vpop.f32.mrb[52].mxu1 }
 0x560   :  { %10239 = vst [vmem:[#allocation72_spill] sm:$0xff] %v9380_v39  ;;  %v5250_v21 = vadd.f32 %v9190_v7, %v4896_v6  ;;  %v4898_v18 = vpop.f32.mrb[209].mxu0  ;;  %v9383_v25 = vpop.f32.mrb[53].mxu1 }
 0x561   :  { %10240 = vst [vmem:[#allocation75_spill] sm:$0xff] %v9383_v25  ;;  %v5252_v9 = vadd.f32 %v9192_v0, %v4898_v18  ;;  %v4900_v10 = vpop.f32.mrb[210].mxu0  ;;  %v9386_v60 = vpop.f32.mrb[54].mxu1 }
 0x562   :  { %10241 = vst [vmem:[#allocation77_spill] sm:$0xff] %v9386_v60  ;;  %v5254_v20 = vadd.f32 %v9194_v62, %v4900_v10  ;;  %v4902_v15 = vpop.f32.mrb[211].mxu0  ;;  %v9389_v57 = vpop.f32.mrb[55].mxu1 }
 0x563   :  { %10242 = vst [vmem:[#allocation74_spill] sm:$0xff] %v9389_v57  ;;  %v5256_v30 = vadd.f32 %v9196_v47, %v4902_v15 }
 0x564   :  { %v5566_v45 = vmax.f32 %v5250_v21, %v5254_v20  ;;  %5165 = vmatmul.mubr.bf16.gmra.mrb[60].mxu0 %v9333_v1 }
 0x565   :  { %v5575_v39 = vmax.f32 %v5252_v9, %v5256_v30  ;;  %5174 = vmatprep.mubr.bf16.mxu0 %v4451_v33 }
 0x567   :  { %v4906_v7 = vpop.f32.mrb[212].mxu0  ;;  %v9393_v6 = vpop.f32.mrb[56].mxu1 }
 0x568   :  { %v5260_v0 = vadd.f32 %v9208_v3, %v4906_v7  ;;  %v4908_v18 = vpop.f32.mrb[213].mxu0  ;;  %v9396_v25 = vpop.f32.mrb[57].mxu1 }
 0x569   :  { %v5262_v62 = vadd.f32 %v9212_v17, %v4908_v18  ;;  %v4910_v10 = vpop.f32.mrb[214].mxu0  ;;  %v9399_v60 = vpop.f32.mrb[58].mxu1 }
 0x56a   :  { %v5567_v57 = vmax.f32 %v5566_v45, %v5260_v0  ;;  %v5264_v47 = vadd.f32 %v9214_v53, %v4910_v10  ;;  %v4912_v21 = vpop.f32.mrb[215].mxu0  ;;  %v9402_v1 = vpop.f32.mrb[59].mxu1 }
 0x56b   :  { %v5576_v33 = vmax.f32 %v5575_v39, %v5262_v62  ;;  %v5266_v9 = vadd.f32 %v9216_v26, %v4912_v21 }
 0x56c   :  { %v9405_v20 = vmax.f32 %v5567_v57, %v5264_v47  ;;  %5175 = vmatmul.mubr.bf16.gmra.mrb[64].mxu0 %v9349_v12 }
 0x56d   :  { %v9408_v3 = vmax.f32 %v5576_v33, %v5266_v9  ;;  %5184 = vmatprep.mubr.bf16.mxu0 %v4455_v24 }
 0x56e   :  { %10243 = vst [vmem:[#allocation76_spill] sm:$0xff] %v9405_v20 }
 0x56f   :  { %10244 = vst [vmem:[#allocation39_spill] sm:$0xff] %v9408_v3  ;;  %v4916_v17 = vpop.f32.mrb[216].mxu0  ;;  %v9410_v15 = vpop.f32.mrb[60].mxu1 }
 0x570   :  { %v5270_v30 = vadd.f32 %v9226_v22, %v4916_v17  ;;  %v4918_v45 = vpop.f32.mrb[217].mxu0  ;;  %v9413_v53 = vpop.f32.mrb[61].mxu1 }
 0x571   :  { %v5272_v7 = vadd.f32 %v9228_v14, %v4918_v45  ;;  %v4920_v39 = vpop.f32.mrb[218].mxu0  ;;  %v9416_v0 = vpop.f32.mrb[62].mxu1 }
 0x572   :  { %v5274_v26 = vadd.f32 %v9230_v16, %v4920_v39  ;;  %v4922_v57 = vpop.f32.mrb[219].mxu0  ;;  %v9419_v12 = vpop.f32.mrb[63].mxu1 }
 0x573   :  { %v5276_v24 = vadd.f32 %v9232_v27, %v4922_v57 }
 0x574   :  { %v5584_v18 = vmax.f32 %v5270_v30, %v5274_v26  ;;  %5185 = vmatmul.mubr.bf16.gmra.mrb[68].mxu0 %v4454_v49 }
 0x575   :  { %v5593_v62 = vmax.f32 %v5272_v7, %v5276_v24  ;;  %5227 = vmatprep.mubr.bf16.mxu0 %v9052_v32 }
 0x577   :  { %v4926_v22 = vpop.f32.mrb[220].mxu0  ;;  %v9423_v10 = vpop.f32.mrb[64].mxu1 }
 0x578   :  { %v5280_v14 = vadd.f32 %v9243_v44, %v4926_v22  ;;  %v4928_v47 = vpop.f32.mrb[221].mxu0  ;;  %v9426_v21 = vpop.f32.mrb[65].mxu1 }
 0x579   :  { %v5282_v16 = vadd.f32 %v9247_v59, %v4928_v47  ;;  %v4930_v33 = vpop.f32.mrb[222].mxu0  ;;  %v9429_v9 = vpop.f32.mrb[66].mxu1 }
 0x57a   :  { %v5585_v17 = vmax.f32 %v5584_v18, %v5280_v14  ;;  %v5284_v27 = vadd.f32 %v9249_v43, %v4930_v33  ;;  %v4932_v49 = vpop.f32.mrb[223].mxu0  ;;  %v9432_v30 = vpop.f32.mrb[67].mxu1 }
 0x57b   :  { %v5594_v32 = vmax.f32 %v5593_v62, %v5282_v16  ;;  %v5286_v45 = vadd.f32 %v9251_v35, %v4932_v49 }
 0x57c   :  { %v9435_v7 = vmax.f32 %v5585_v17, %v5284_v27  ;;  %5228 = vmatmul.mubr.bf16.vlgmr.msra.gmra.mrb[200].mxu0 %v9056_v50 }
 0x57d   :  { %v9438_v44 = vmax.f32 %v5594_v32, %v5286_v45  ;;  %5237 = vmatprep.mubr.bf16.mxu0 %v9062_v55 }
 0x57e   :  { %10245 = vst [vmem:[#allocation79_spill] sm:$0xff] %v9435_v7 }
 0x57f   :  { %10246 = vst [vmem:[#allocation81_spill] sm:$0xff] %v9438_v44  ;;  %v4936_v59 = vpop.f32.mrb[224].mxu0  ;;  %v9441_v39 = vpop.f32.mrb[68].mxu1 }
 0x580   :  { %v5290_v26 = vadd.f32 %v9259_v58, %v4936_v59  ;;  %v4938_v43 = vpop.f32.mrb[225].mxu0  ;;  %v9444_v57 = vpop.f32.mrb[69].mxu1 }
 0x581   :  { %v5292_v24 = vadd.f32 %v9261_v54, %v4938_v43  ;;  %v4940_v18 = vpop.f32.mrb[226].mxu0  ;;  %v9447_v35 = vpop.f32.mrb[70].mxu1 }
 0x582   :  { %v5294_v62 = vadd.f32 %v9263_v29, %v4940_v18  ;;  %v4942_v50 = vpop.f32.mrb[227].mxu0  ;;  %v9450_v22 = vpop.f32.mrb[71].mxu1 }
 0x583   :  { %v5296_v55 = vadd.f32 %v9265_v40, %v4942_v50 }
 0x584   :  { %v5602_v14 = vmax.f32 %v5290_v26, %v5294_v62  ;;  %5238 = vmatmul.mubr.bf16.gmra.mrb[204].mxu0 %v9068_v4 }
 0x585   :  { %v5611_v47 = vmax.f32 %v5292_v24, %v5296_v55 }
 0x587   :  { %v4946_v58 = vpop.f32.mrb[228].mxu0  ;;  %v9454_v16 = vpop.f32.mrb[72].mxu1 }
 0x588   :  { %v5300_v33 = vadd.f32 %v9275_v51, %v4946_v58  ;;  %v4948_v54 = vpop.f32.mrb[229].mxu0  ;;  %v9457_v17 = vpop.f32.mrb[73].mxu1 }
 0x589   :  { %v5302_v27 = vadd.f32 %v9279_v8, %v4948_v54  ;;  %v4950_v29 = vpop.f32.mrb[230].mxu0  ;;  %v9460_v49 = vpop.f32.mrb[74].mxu1 }
 0x58a   :  { %v5603_v32 = vmax.f32 %v5602_v14, %v5300_v33  ;;  %v5304_v40 = vadd.f32 %v9281_v48, %v4950_v29  ;;  %v4952_v45 = vpop.f32.mrb[231].mxu0  ;;  %v9463_v59 = vpop.f32.mrb[75].mxu1 }
 0x58b   :  { %v5612_v4 = vmax.f32 %v5611_v47, %v5302_v27  ;;  %v5306_v26 = vadd.f32 %v9283_v46, %v4952_v45 }
 0x58c   :  { %v9466_v43 = vmax.f32 %v5603_v32, %v5304_v40 }
 0x58d   :  { %v9468_v51 = vmax.f32 %v5612_v4, %v5306_v26 }
 0x58e   :  { %10247 = vst [vmem:[#allocation42_spill] sm:$0xff] %v9466_v43 }
 0x58f   :  { %10248 = vst [vmem:[#allocation78_spill] sm:$0xff] %v9468_v51  ;;  %v4956_v24 = vpop.f32.mrb[232].mxu0  ;;  %v9470_v18 = vpop.f32.mrb[76].mxu1 }
 0x590   :  { %v5310_v8 = vadd.f32 %v9291_v37, %v4956_v24  ;;  %v4958_v62 = vpop.f32.mrb[233].mxu0  ;;  %v9473_v50 = vpop.f32.mrb[77].mxu1  ;;  %v10249_v24 = vld [vmem:[#allocation64_spill] sm:$0xff] }
 0x591   :  { %v5312_v48 = vadd.f32 %v9293_v52, %v4958_v62  ;;  %v4960_v55 = vpop.f32.mrb[234].mxu0  ;;  %v9476_v14 = vpop.f32.mrb[78].mxu1 }
 0x592   :  { %v5314_v47 = vadd.f32 %v9295_v11, %v4960_v55  ;;  %v4962_v46 = vpop.f32.mrb[235].mxu0  ;;  %v9479_v58 = vpop.f32.mrb[79].mxu1 }
 0x593   :  { %v5316_v33 = vadd.f32 %v9297_v2, %v4962_v46 }
 0x594   :  { %v5620_v54 = vmax.f32 %v5310_v8, %v5314_v47 }
 0x595   :  { %v5629_v27 = vmax.f32 %v5312_v48, %v5316_v33 }
 0x597   :  { %v4966_v29 = vpop.f32.mrb[236].mxu0  ;;  %v9482_v32 = vpop.f32.mrb[80].mxu1 }
 0x598   :  { %v5320_v37 = vadd.f32 %v9307_v13, %v4966_v29  ;;  %v4968_v40 = vpop.f32.mrb[237].mxu0  ;;  %v9485_v45 = vpop.f32.mrb[81].mxu1 }
 0x599   :  { %v5322_v52 = vadd.f32 %v9311_v19, %v4968_v40  ;;  %v4970_v4 = vpop.f32.mrb[238].mxu0  ;;  %v9488_v26 = vpop.f32.mrb[82].mxu1  ;;  %v10252_v19 = vld [vmem:[#allocation67_spill] sm:$0xff] }
 0x59a   :  { %v5621_v11 = vmax.f32 %v5620_v54, %v5320_v37  ;;  %v5324_v62 = vadd.f32 %v10249_v24, %v4970_v4  ;;  %v4972_v55 = vpop.f32.mrb[239].mxu0  ;;  %v9491_v2 = vpop.f32.mrb[83].mxu1  ;;  %v10253_v54 = vld [vmem:[#allocation69_spill] sm:$0xff] }
 0x59b   :  { %v5630_v8 = vmax.f32 %v5629_v27, %v5322_v52  ;;  %v5326_v48 = vadd.f32 %v9315_v34, %v4972_v55  ;;  %v10254_v27 = vld [vmem:[#allocation66_spill] sm:$0xff] }
 0x59c   :  { %v9494_v47 = vmax.f32 %v5621_v11, %v5324_v62 }
 0x59d   :  { %v9496_v13 = vmax.f32 %v5630_v8, %v5326_v48 }
 0x59e   :  { %10250 = vst [vmem:[#allocation80_spill] sm:$0xff] %v9494_v47 }
 0x59f   :  { %10251 = vst [vmem:[#allocation83_spill] sm:$0xff] %v9496_v13  ;;  %v4976_v46 = vpop.f32.mrb[240].mxu0  ;;  %v9498_v33 = vpop.f32.mrb[84].mxu1 }
 0x5a0   :  { %v5330_v29 = vadd.f32 %v10252_v19, %v4976_v46  ;;  %v4978_v40 = vpop.f32.mrb[241].mxu0  ;;  %v9501_v51 = vpop.f32.mrb[85].mxu1  ;;  %v10255_v46 = vld [vmem:[#allocation68_spill] sm:$0xff] }
 0x5a1   :  { %v5332_v37 = vadd.f32 %v10253_v54, %v4978_v40  ;;  %v4980_v4 = vpop.f32.mrb[242].mxu0  ;;  %v9504_v24 = vpop.f32.mrb[86].mxu1  ;;  %v10256_v40 = vld [vmem:[#allocation37_spill] sm:$0xff] }
 0x5a2   :  { %v5334_v52 = vadd.f32 %v10254_v27, %v4980_v4  ;;  %v4982_v34 = vpop.f32.mrb[243].mxu0  ;;  %v9507_v11 = vpop.f32.mrb[87].mxu1  ;;  %v10258_v27 = vld [vmem:[#allocation71_spill] sm:$0xff] }
 0x5a3   :  { %v5336_v62 = vadd.f32 %v9329_v5, %v4982_v34 }
 0x5a4   :  { %v5638_v55 = vmax.f32 %v5330_v29, %v5334_v52 }
 0x5a5   :  { %v5647_v8 = vmax.f32 %v5332_v37, %v5336_v62  ;;  %v10259_v37 = vld [vmem:[#allocation73_spill] sm:$0xff] }
 0x5a7   :  { %v4986_v48 = vpop.f32.mrb[244].mxu0  ;;  %v9510_v13 = vpop.f32.mrb[88].mxu1 }
 0x5a8   :  { %v5340_v19 = vadd.f32 %v10255_v46, %v4986_v48  ;;  %v4988_v47 = vpop.f32.mrb[245].mxu0  ;;  %v9513_v43 = vpop.f32.mrb[89].mxu1 }
 0x5a9   :  { %v5342_v54 = vadd.f32 %v10256_v40, %v4988_v47  ;;  %v4990_v44 = vpop.f32.mrb[246].mxu0  ;;  %v9516_v7 = vpop.f32.mrb[90].mxu1 }
 0x5aa   :  { %10257 = vst [vmem:[#allocation85_spill] sm:$0xff] %v9516_v7  ;;  %v5639_v4 = vmax.f32 %v5638_v55, %v5340_v19  ;;  %v5344_v3 = vadd.f32 %v10258_v27, %v4990_v44  ;;  %v4992_v20 = vpop.f32.mrb[247].mxu0  ;;  %v9519_v5 = vpop.f32.mrb[91].mxu1  ;;  %v10262_v55 = vld [vmem:[#allocation40_spill] sm:$0xff] }
 0x5ab   :  { %v5648_v29 = vmax.f32 %v5647_v8, %v5342_v54  ;;  %v5346_v52 = vadd.f32 %v10259_v37, %v4992_v20  ;;  %v10264_v8 = vld [vmem:[#allocation70_spill] sm:$0xff] }
 0x5ac   :  { %v9522_v34 = vmax.f32 %v5639_v4, %v5344_v3 }
 0x5ad   :  { %v9524_v62 = vmax.f32 %v5648_v29, %v5346_v52 }
 0x5ae   :  { %10260 = vst [vmem:[#allocation82_spill] sm:$0xff] %v9522_v34 }
 0x5af   :  { %10261 = vst [vmem:[#allocation84_spill] sm:$0xff] %v9524_v62  ;;  %v4996_v48 = vpop.f32.mrb[248].mxu0  ;;  %v9526_v46 = vpop.f32.mrb[92].mxu1 }
 0x5b0   :  { %v5350_v47 = vadd.f32 %v9351_v36, %v4996_v48  ;;  %v4998_v40 = vpop.f32.mrb[249].mxu0  ;;  %v9529_v7 = vpop.f32.mrb[93].mxu1 }
 0x5b1   :  { %v5352_v44 = vadd.f32 %v10262_v55, %v4998_v40  ;;  %v5000_v19 = vpop.f32.mrb[250].mxu0  ;;  %v9532_v27 = vpop.f32.mrb[94].mxu1 }
 0x5b2   :  { %10263 = vst [vmem:[#allocation86_spill] sm:$0xff] %v9532_v27  ;;  %v5354_v54 = vadd.f32 %v10264_v8, %v5000_v19  ;;  %v5002_v20 = vpop.f32.mrb[251].mxu0  ;;  %v9535_v3 = vpop.f32.mrb[95].mxu1 }
 0x5b3   :  { %10265 = vst [vmem:[#allocation88_spill] sm:$0xff] %v9535_v3  ;;  %v5356_v4 = vadd.f32 %v9357_v38, %v5002_v20 }
 0x5b4   :  { %v5656_v29 = vmax.f32 %v5350_v47, %v5354_v54 }
 0x5b5   :  { %v5665_v37 = vmax.f32 %v5352_v44, %v5356_v4 }
 0x5b7   :  { %v5006_v52 = vpop.f32.mrb[252].mxu0  ;;  %v9538_v62 = vpop.f32.mrb[96].mxu1 }
 0x5b8   :  { %v5360_v36 = vadd.f32 %v9361_v28, %v5006_v52  ;;  %v5008_v48 = vpop.f32.mrb[253].mxu0  ;;  %v9541_v34 = vpop.f32.mrb[97].mxu1 }
 0x5b9   :  { %v5362_v40 = vadd.f32 %v9363_v56, %v5008_v48  ;;  %v5010_v55 = vpop.f32.mrb[254].mxu0  ;;  %v9544_v27 = vpop.f32.mrb[98].mxu1 }
 0x5ba   :  { %v5657_v19 = vmax.f32 %v5656_v29, %v5360_v36  ;;  %v5364_v8 = vadd.f32 %v9365_v41, %v5010_v55  ;;  %v5012_v3 = vpop.f32.mrb[255].mxu0  ;;  %v9547_v38 = vpop.f32.mrb[99].mxu1 }
 0x5bb   :  { %v5666_v47 = vmax.f32 %v5665_v37, %v5362_v40  ;;  %v5366_v44 = vadd.f32 %v9367_v23, %v5012_v3 }
 0x5bc   :  { %v9550_v54 = vmax.f32 %v5657_v19, %v5364_v8 }
 0x5bd   :  { %v9552_v28 = vmax.f32 %v5666_v47, %v5366_v44 }
 0x5be   :  { %10266 = vst [vmem:[#allocation87_spill] sm:$0xff] %v9550_v54 }
 0x5bf   :  { %10267 = vst [vmem:[#allocation89_spill] sm:$0xff] %v9552_v28  ;;  %v5016_v20 = vpop.f32.mrb[0].mxu0  ;;  %v9554_v4 = vpop.f32.mrb[100].mxu1 }
 0x5c0   :  { %v5370_v56 = vadd.f32 %v9371_v31, %v5016_v20  ;;  %v5018_v52 = vpop.f32.mrb[1].mxu0  ;;  %v9557_v48 = vpop.f32.mrb[101].mxu1  ;;  %v10271_v31 = vld [vmem:[#allocation72_spill] sm:$0xff] }
 0x5c1   :  { %10268 = vst [vmem:[#allocation91_spill] sm:$0xff] %v9557_v48  ;;  %v5372_v41 = vadd.f32 %v9373_v61, %v5018_v52  ;;  %v5020_v29 = vpop.f32.mrb[2].mxu0  ;;  %v9560_v36 = vpop.f32.mrb[102].mxu1  ;;  %v10272_v61 = vld [vmem:[#allocation75_spill] sm:$0xff] }
 0x5c2   :  { %10269 = vst [vmem:[#allocation41_spill] sm:$0xff] %v9560_v36  ;;  %v5374_v37 = vadd.f32 %v9375_v42, %v5020_v29  ;;  %v5022_v23 = vpop.f32.mrb[3].mxu0  ;;  %v9563_v3 = vpop.f32.mrb[103].mxu1  ;;  %v10274_v29 = vld [vmem:[#allocation77_spill] sm:$0xff] }
 0x5c3   :  { %10270 = vst [vmem:[#allocation93_spill] sm:$0xff] %v9563_v3  ;;  %v5376_v40 = vadd.f32 %v9377_v63, %v5022_v23 }
 0x5c4   :  { %v5674_v55 = vmax.f32 %v5370_v56, %v5374_v37 }
 0x5c5   :  { %v5683_v19 = vmax.f32 %v5372_v41, %v5376_v40  ;;  %v10275_v41 = vld [vmem:[#allocation74_spill] sm:$0xff] }
 0x5c7   :  { %v5026_v8 = vpop.f32.mrb[4].mxu0  ;;  %v9566_v47 = vpop.f32.mrb[104].mxu1 }
 0x5c8   :  { %v5380_v44 = vadd.f32 %v10271_v31, %v5026_v8  ;;  %v5028_v20 = vpop.f32.mrb[5].mxu0  ;;  %v9569_v28 = vpop.f32.mrb[105].mxu1 }
 0x5c9   :  { %v5382_v52 = vadd.f32 %v10272_v61, %v5028_v20  ;;  %v5030_v54 = vpop.f32.mrb[6].mxu0  ;;  %v9572_v36 = vpop.f32.mrb[106].mxu1 }
 0x5ca   :  { %10273 = vst [vmem:[#allocation90_spill] sm:$0xff] %v9572_v36  ;;  %v5675_v42 = vmax.f32 %v5674_v55, %v5380_v44  ;;  %v5384_v3 = vadd.f32 %v10274_v29, %v5030_v54  ;;  %v5032_v48 = vpop.f32.mrb[7].mxu0  ;;  %v9575_v63 = vpop.f32.mrb[107].mxu1 }
 0x5cb   :  { %v5684_v56 = vmax.f32 %v5683_v19, %v5382_v52  ;;  %v5386_v37 = vadd.f32 %v10275_v41, %v5032_v48 }
 0x5cc   :  { %v9578_v23 = vmax.f32 %v5675_v42, %v5384_v3 }
 0x5cd   :  { %v9580_v40 = vmax.f32 %v5684_v56, %v5386_v37 }
 0x5ce   :  { %10276 = vst [vmem:[#allocation44_spill] sm:$0xff] %v9578_v23 }
 0x5cf   :  { %10277 = vst [vmem:[#allocation92_spill] sm:$0xff] %v9580_v40  ;;  %v5036_v8 = vpop.f32.mrb[8].mxu0  ;;  %v9582_v31 = vpop.f32.mrb[108].mxu1 }
 0x5d0   :  { %v5390_v20 = vadd.f32 %v9393_v6, %v5036_v8  ;;  %v5038_v61 = vpop.f32.mrb[9].mxu0  ;;  %v9585_v36 = vpop.f32.mrb[109].mxu1 }
 0x5d1   :  { %v5392_v54 = vadd.f32 %v9396_v25, %v5038_v61  ;;  %v5040_v55 = vpop.f32.mrb[10].mxu0  ;;  %v9588_v44 = vpop.f32.mrb[110].mxu1 }
 0x5d2   :  { %v5394_v19 = vadd.f32 %v9399_v60, %v5040_v55  ;;  %v5042_v48 = vpop.f32.mrb[11].mxu0  ;;  %v9591_v3 = vpop.f32.mrb[111].mxu1 }
 0x5d3   :  { %v5396_v52 = vadd.f32 %v9402_v1, %v5042_v48 }
 0x5d4   :  { %v5692_v42 = vmax.f32 %v5390_v20, %v5394_v19 }
 0x5d5   :  { %v5701_v29 = vmax.f32 %v5392_v54, %v5396_v52 }
 0x5d7   :  { %v5046_v56 = vpop.f32.mrb[12].mxu0  ;;  %v9594_v41 = vpop.f32.mrb[112].mxu1 }
 0x5d8   :  { %v5400_v6 = vadd.f32 %v9410_v15, %v5046_v56  ;;  %v5048_v37 = vpop.f32.mrb[13].mxu0  ;;  %v9597_v8 = vpop.f32.mrb[113].mxu1 }
 0x5d9   :  { %v5402_v25 = vadd.f32 %v9413_v53, %v5048_v37  ;;  %v5050_v61 = vpop.f32.mrb[14].mxu0  ;;  %v9600_v40 = vpop.f32.mrb[114].mxu1 }
 0x5da   :  { %v5693_v60 = vmax.f32 %v5692_v42, %v5400_v6  ;;  %v5404_v55 = vadd.f32 %v9416_v0, %v5050_v61  ;;  %v5052_v23 = vpop.f32.mrb[15].mxu0  ;;  %v9603_v1 = vpop.f32.mrb[115].mxu1 }
 0x5db   :  { %v5702_v20 = vmax.f32 %v5701_v29, %v5402_v25  ;;  %v5406_v54 = vadd.f32 %v9419_v12, %v5052_v23 }
 0x5dc   :  { %v5694_v19 = vmax.f32 %v5693_v60, %v5404_v55 }
 0x5dd   :  { %v5703_v48 = vmax.f32 %v5702_v20, %v5406_v54 }
 0x5de   :  { %v5695_v23 = vrot.slane %v5694_v19, 4 }
 0x5df   :  { %v5056_v15 = vpop.f32.mrb[16].mxu0  ;;  %v9606_v52 = vpop.f32.mrb[116].mxu1  ;;  %v5704_v55 = vrot.slane %v5703_v48, 4 }
 0x5e0   :  { %10278 = vst [vmem:[#allocation95_spill] sm:$0xff] %v9606_v52  ;;  %v5410_v56 = vadd.f32 %v9423_v10, %v5056_v15  ;;  %v5058_v53 = vpop.f32.mrb[17].mxu0  ;;  %v9609_v37 = vpop.f32.mrb[117].mxu1  ;;  %v5696_v54 = vmax.f32 %v5694_v19, %v5695_v23 }
 0x5e1   :  { %10279 = vst [vmem:[#allocation97_spill] sm:$0xff] %v9609_v37  ;;  %v5412_v42 = vadd.f32 %v9426_v21, %v5058_v53  ;;  %v5060_v6 = vpop.f32.mrb[18].mxu0  ;;  %v9612_v0 = vpop.f32.mrb[118].mxu1  ;;  %v5705_v21 = vmax.f32 %v5703_v48, %v5704_v55 }
 0x5e2   :  { %10280 = vst [vmem:[#allocation94_spill] sm:$0xff] %v9612_v0  ;;  %v5414_v61 = vadd.f32 %v9429_v9, %v5060_v6  ;;  %v5062_v29 = vpop.f32.mrb[19].mxu0  ;;  %v9615_v25 = vpop.f32.mrb[119].mxu1 }
 0x5e3   :  { %10281 = vst [vmem:[#allocation96_spill] sm:$0xff] %v9615_v25  ;;  %v5416_v12 = vadd.f32 %v9432_v30, %v5062_v29  ;;  %v5697_v29 = vrot.slane %v5696_v54, 2 }
 0x5e4   :  { %v5710_v60 = vmax.f32 %v5410_v56, %v5414_v61  ;;  %v5706_v61 = vrot.slane %v5705_v21, 2 }
 0x5e5   :  { %v5719_v20 = vmax.f32 %v5412_v42, %v5416_v12 }
 0x5e7   :  { %v5066_v10 = vpop.f32.mrb[20].mxu0 }
 0x5e8   :  { %v5420_v15 = vadd.f32 %v9441_v39, %v5066_v10  ;;  %v5068_v37 = vpop.f32.mrb[21].mxu0  ;;  %v5698_v39 = vmax.f32 %v5696_v54, %v5697_v29 }
 0x5e9   :  { %v5422_v53 = vadd.f32 %v9444_v57, %v5068_v37  ;;  %v5070_v0 = vpop.f32.mrb[22].mxu0  ;;  %v5707_v37 = vmax.f32 %v5705_v21, %v5706_v61 }
 0x5ea   :  { %v5711_v52 = vmax.f32 %v5710_v60, %v5420_v15  ;;  %v5424_v9 = vadd.f32 %v9447_v35, %v5070_v0  ;;  %v5072_v6 = vpop.f32.mrb[23].mxu0  ;;  %v5699_v15 = vrot.slane %v5698_v39, 1 }
 0x5eb   :  { %v5720_v25 = vmax.f32 %v5719_v20, %v5422_v53  ;;  %v5426_v30 = vadd.f32 %v9450_v22, %v5072_v6  ;;  %v5708_v54 = vrot.slane %v5707_v37, 1 }
 0x5ec   :  { %v5712_v56 = vmax.f32 %v5711_v52, %v5424_v9 }
 0x5ed   :  { %v5721_v42 = vmax.f32 %v5720_v25, %v5426_v30 }
 0x5ee   :  { %v5713_v12 = vrot.slane %v5712_v56, 4 }
 0x5ef   :  { %v5722_v19 = vrot.slane %v5721_v42, 4  ;;  %v5076_v23 = vpop.f32.mrb[24].mxu0 }
 0x5f0   :  { %v5714_v10 = vmax.f32 %v5712_v56, %v5713_v12  ;;  %v5430_v48 = vadd.f32 %v9454_v16, %v5076_v23  ;;  %v5078_v57 = vpop.f32.mrb[25].mxu0  ;;  %v5836_v16 = vld [vmem:[%s9825_s9] sm:$0x3]  ;;  %v10282_v56 = vld [vmem:[#allocation13_spill] sm:$0xff]  ;;  %s7046_s9 = smov [#allocation8]  }
 0x5f1   :  { %v5723_v60 = vmax.f32 %v5721_v42, %v5722_v19  ;;  %v5432_v35 = vadd.f32 %v9457_v17, %v5078_v57  ;;  %v5080_v0 = vpop.f32.mrb[26].mxu0  ;;  %v9630_v61 = vrot.slane %v5836_v16, %v10282_v56  ;;  %v10283_v19 = vld [vmem:[#allocation14_spill] sm:$0xff]  ;;  %s5981_s18 = sshll.u32 %s7046_s9, 4  ;;  %s5982_s18 = int_to_ptr.vmem [resolvable:$true] %s5981_s18 }
 0x5f2   :  { %v5715_v55 = vrot.slane %v5714_v10, 2  ;;  %v5434_v22 = vadd.f32 %v9460_v49, %v5080_v0  ;;  %v5082_v20 = vpop.f32.mrb[27].mxu0  ;;  %v5700_v49 = vmax.f32 %v5698_v39, %v5699_v15  ;;  %v9634_v23 = vrot.slane %v5836_v16, %v10283_v19  ;;  %s7009_s19 = scalar_lea.vmem %s5982_s18, 512  ;;  %p7014_p11 = scmp.lt.s32.totalorder %s5982_s18, %s5982_s18 }
 0x5f3   :  { %v5724_v52 = vrot.slane %v5723_v60, 2  ;;  %v5436_v25 = vadd.f32 %v9463_v59, %v5082_v20  ;;  %p7010_p10 = scmp.ne.s32.totalorder %s5982_s18, %s7009_s19  ;;  %p7015_p12 = scmp.lt.s32.totalorder %s7009_s19, %s7009_s19 }
 0x5f4   :  { %v5716_v53 = vmax.f32 %v5714_v10, %v5715_v55  ;;  %v5728_v9 = vmax.f32 %v5430_v48, %v5434_v22  ;;  %v5709_v10 = vmax.f32 %v5707_v37, %v5708_v54 }
 0x5f5   :  { %v5725_v21 = vmax.f32 %v5723_v60, %v5724_v52  ;;  %v5737_v6 = vmax.f32 %v5432_v35, %v5436_v25  ;;  %v5864_v52 = vadd.f32 %v9630_v61, %v5700_v49  ;;  %p7016_p13 = por %p7015_p12, %p7014_p11 }
 0x5f6   :  { %v5717_v30 = vrot.slane %v5716_v53, 1  ;;  %v5865_v37 = vadd.f32 %v9634_v23, %v5709_v10 }
 0x5f7   :  { %v5726_v17 = vrot.slane %v5725_v21, 1  ;;  %v5086_v29 = vpop.f32.mrb[28].mxu0  ;;  %p7017_p0 = pnand %p7016_p13, %p7010_p10 }
 0x5f8   :  { %v5718_v42 = vmax.f32 %v5716_v53, %v5717_v30  ;;  %v5440_v59 = vadd.f32 %v9470_v18, %v5086_v29  ;;  %v5088_v12 = vpop.f32.mrb[29].mxu0 }
 0x5f9   :  { %v5727_v48 = vmax.f32 %v5725_v21, %v5726_v17  ;;  %v5442_v57 = vadd.f32 %v9473_v50, %v5088_v12  ;;  %v5090_v60 = vpop.f32.mrb[30].mxu0 }
 0x5fa   :  { %v5866_v35 = vadd.f32 %v9630_v61, %v5718_v42  ;;  %v5729_v0 = vmax.f32 %v5728_v9, %v5440_v59  ;;  %v5444_v55 = vadd.f32 %v9476_v14, %v5090_v60  ;;  %v5092_v22 = vpop.f32.mrb[31].mxu0 }
 0x5fb   :  { %v5867_v39 = vadd.f32 %v9634_v23, %v5727_v48  ;;  %v5738_v20 = vmax.f32 %v5737_v6, %v5442_v57  ;;  %v5446_v18 = vadd.f32 %v9479_v58, %v5092_v22 }
 0x5fc   :  { %v5940_v25 = vrot.slane %v5866_v35, 7  ;;  %v5730_v15 = vmax.f32 %v5729_v0, %v5444_v55 }
 0x5fd   :  { %v5954_v53 = vrot.slane %v5867_v39, 7  ;;  %v5739_v50 = vmax.f32 %v5738_v20, %v5446_v18 }
 0x5fe   :  { %v5941_v16 = vsel %vm1755_vm1, %v5940_v25, %v5864_v52  ;;  %v5731_v54 = vrot.slane %v5730_v15, 4 }
 0x5ff   :  { %v5955_v9 = vsel %vm1755_vm1, %v5954_v53, %v5865_v37  ;;  %v5740_v14 = vrot.slane %v5739_v50, 4  ;;  %v5096_v21 = vpop.f32.mrb[32].mxu0 }
 0x600   :  { %v5732_v30 = vmax.f32 %v5730_v15, %v5731_v54  ;;  %v5450_v6 = vadd.f32 %v9482_v32, %v5096_v21  ;;  %v5098_v17 = vpop.f32.mrb[33].mxu0 }
 0x601   :  { %v5741_v58 = vmax.f32 %v5739_v50, %v5740_v14  ;;  %v5452_v29 = vadd.f32 %v9485_v45, %v5098_v17  ;;  %v5100_v56 = vpop.f32.mrb[34].mxu0 }
 0x602   :  { %v5733_v49 = vrot.slane %v5732_v30, 2  ;;  %v5454_v42 = vadd.f32 %v9488_v26, %v5100_v56  ;;  %v5102_v59 = vpop.f32.mrb[35].mxu0 }
 0x603   :  { %v5742_v12 = vrot.slane %v5741_v58, 2  ;;  %v5456_v19 = vadd.f32 %v9491_v2, %v5102_v59  ;;  %v10284_v59 = vld [vmem:[#allocation85_spill] sm:$0xff] }
 0x604   :  { %v5734_v10 = vmax.f32 %v5732_v30, %v5733_v49  ;;  %v5746_v48 = vmax.f32 %v5450_v6, %v5454_v42 }
 0x605   :  { %v5743_v57 = vmax.f32 %v5741_v58, %v5742_v12  ;;  %v5755_v60 = vmax.f32 %v5452_v29, %v5456_v19 }
 0x606   :  { %v5735_v35 = vrot.slane %v5734_v10, 1 }
 0x607   :  { %v5744_v0 = vrot.slane %v5743_v57, 1  ;;  %v5106_v55 = vpop.f32.mrb[36].mxu0 }
 0x608   :  { %v5736_v32 = vmax.f32 %v5734_v10, %v5735_v35  ;;  %v5460_v22 = vadd.f32 %v9498_v33, %v5106_v55  ;;  %v5108_v39 = vpop.f32.mrb[37].mxu0 }
 0x609   :  { %v5745_v45 = vmax.f32 %v5743_v57, %v5744_v0  ;;  %v5462_v20 = vadd.f32 %v9501_v51, %v5108_v39  ;;  %v5110_v18 = vpop.f32.mrb[38].mxu0 }
 0x60a   :  { %v5868_v26 = vadd.f32 %v9630_v61, %v5736_v32  ;;  %v5747_v52 = vmax.f32 %v5746_v48, %v5460_v22  ;;  %v5464_v2 = vadd.f32 %v9504_v24, %v5110_v18  ;;  %v5112_v25 = vpop.f32.mrb[39].mxu0 }
 0x60b   :  { %v5869_v15 = vadd.f32 %v9634_v23, %v5745_v45  ;;  %v5756_v37 = vmax.f32 %v5755_v60, %v5462_v20  ;;  %v5466_v53 = vadd.f32 %v9507_v11, %v5112_v25 }
 0x60c   :  { %v5942_v50 = vrot.slane %v5868_v26, 6  ;;  %v5748_v54 = vmax.f32 %v5747_v52, %v5464_v2  ;;  %v10285_v26 = vld [vmem:[#allocation86_spill] sm:$0xff] }
 0x60d   :  { %v5956_v14 = vrot.slane %v5869_v15, 6  ;;  %v5757_v33 = vmax.f32 %v5756_v37, %v5466_v53  ;;  %v10286_v15 = vld [vmem:[#allocation88_spill] sm:$0xff] }
 0x60e   :  { %v5943_v21 = vsel %vm1757_vm2, %v5942_v50, %v5941_v16  ;;  %v5749_v30 = vrot.slane %v5748_v54, 4 }
 0x60f   :  { %v5957_v51 = vsel %vm1757_vm2, %v5956_v14, %v5955_v9  ;;  %v5758_v6 = vrot.slane %v5757_v33, 4  ;;  %v5116_v17 = vpop.f32.mrb[40].mxu0 }
 0x610   :  { %v5750_v58 = vmax.f32 %v5748_v54, %v5749_v30  ;;  %v5470_v24 = vadd.f32 %v9510_v13, %v5116_v17  ;;  %v5118_v29 = vpop.f32.mrb[41].mxu0 }
 0x611   :  { %v5759_v56 = vmax.f32 %v5757_v33, %v5758_v6  ;;  %v5472_v49 = vadd.f32 %v9513_v43, %v5118_v29  ;;  %v5120_v42 = vpop.f32.mrb[42].mxu0 }
 0x612   :  { %v5751_v11 = vrot.slane %v5750_v58, 2  ;;  %v5474_v12 = vadd.f32 %v10284_v59, %v5120_v42  ;;  %v5122_v19 = vpop.f32.mrb[43].mxu0 }
 0x613   :  { %v5760_v10 = vrot.slane %v5759_v56, 2  ;;  %v5476_v16 = vadd.f32 %v9519_v5, %v5122_v19 }
 0x614   :  { %v5752_v48 = vmax.f32 %v5750_v58, %v5751_v11  ;;  %v5764_v57 = vmax.f32 %v5470_v24, %v5474_v12 }
 0x615   :  { %v5761_v9 = vmax.f32 %v5759_v56, %v5760_v10  ;;  %v5773_v60 = vmax.f32 %v5472_v49, %v5476_v16 }
 0x616   :  { %v5753_v35 = vrot.slane %v5752_v48, 1 }
 0x617   :  { %v5762_v0 = vrot.slane %v5761_v9, 1  ;;  %v5126_v55 = vpop.f32.mrb[44].mxu0 }
 0x618   :  { %v5754_v13 = vmax.f32 %v5752_v48, %v5753_v35  ;;  %v5480_v32 = vadd.f32 %v9526_v46, %v5126_v55  ;;  %v5128_v22 = vpop.f32.mrb[45].mxu0 }
 0x619   :  { %v5763_v43 = vmax.f32 %v5761_v9, %v5762_v0  ;;  %v5482_v39 = vadd.f32 %v9529_v7, %v5128_v22  ;;  %v5130_v45 = vpop.f32.mrb[46].mxu0  ;;  %v10287_v0 = vld [vmem:[#allocation91_spill] sm:$0xff]  ;;  %v10288_v22 = vld [vmem:[#allocation41_spill] sm:$0xff] }
 0x61a   :  { %v5870_v20 = vadd.f32 %v9630_v61, %v5754_v13  ;;  %v5765_v18 = vmax.f32 %v5764_v57, %v5480_v32  ;;  %v5484_v5 = vadd.f32 %v10285_v26, %v5130_v45  ;;  %v5132_v52 = vpop.f32.mrb[47].mxu0 }
 0x61b   :  { %v5871_v2 = vadd.f32 %v9634_v23, %v5763_v43  ;;  %v5774_v25 = vmax.f32 %v5773_v60, %v5482_v39  ;;  %v5486_v37 = vadd.f32 %v10286_v15, %v5132_v52 }
 0x61c   :  { %v5944_v53 = vrot.slane %v5870_v20, 5  ;;  %v5766_v50 = vmax.f32 %v5765_v18, %v5484_v5  ;;  %v10289_v20 = vld [vmem:[#allocation93_spill] sm:$0xff] }
 0x61d   :  { %v5958_v54 = vrot.slane %v5871_v2, 5  ;;  %v5775_v46 = vmax.f32 %v5774_v25, %v5486_v37 }
 0x61e   :  { %v5945_v14 = vsel %vm1759_vm3, %v5944_v53, %v5943_v21  ;;  %v5767_v33 = vrot.slane %v5766_v50, 4 }
 0x61f   :  { %v5959_v7 = vsel %vm1759_vm3, %v5958_v54, %v5957_v51  ;;  %v5776_v30 = vrot.slane %v5775_v46, 4  ;;  %v5136_v6 = vpop.f32.mrb[48].mxu0 }
 0x620   :  { %v5768_v17 = vmax.f32 %v5766_v50, %v5767_v33  ;;  %v5490_v58 = vadd.f32 %v9538_v62, %v5136_v6  ;;  %v5138_v24 = vpop.f32.mrb[49].mxu0  ;;  %v10290_v50 = vld [vmem:[#allocation76_spill] sm:$0xff]  ;;  %v10291_v6 = vld [vmem:[#allocation39_spill] sm:$0xff] }
 0x621   :  { %v5777_v29 = vmax.f32 %v5775_v46, %v5776_v30  ;;  %v5492_v56 = vadd.f32 %v9541_v34, %v5138_v24  ;;  %v5140_v49 = vpop.f32.mrb[50].mxu0  ;;  %v5569_v54 = vrot.slane %v10290_v50, 4 }
 0x622   :  { %v5769_v42 = vrot.slane %v5768_v17, 2  ;;  %v5494_v11 = vadd.f32 %v9544_v27, %v5140_v49  ;;  %v5142_v59 = vpop.f32.mrb[51].mxu0  ;;  %v10292_v49 = vld [vmem:[#allocation90_spill] sm:$0xff] }
 0x623   :  { %v5778_v12 = vrot.slane %v5777_v29, 2  ;;  %v5496_v21 = vadd.f32 %v9547_v38, %v5142_v59  ;;  %v5570_v59 = vmax.f32 %v10290_v50, %v5569_v54 }
 0x624   :  { %v5770_v19 = vmax.f32 %v5768_v17, %v5769_v42  ;;  %v5782_v10 = vmax.f32 %v5490_v58, %v5494_v11  ;;  %v5578_v17 = vrot.slane %v10291_v6, 4 }
 0x625   :  { %v5779_v51 = vmax.f32 %v5777_v29, %v5778_v12  ;;  %v5791_v16 = vmax.f32 %v5492_v56, %v5496_v21 }
 0x626   :  { %v5771_v48 = vrot.slane %v5770_v19, 1 }
 0x627   :  { %v5780_v57 = vrot.slane %v5779_v51, 1  ;;  %v5146_v9 = vpop.f32.mrb[52].mxu0 }
 0x628   :  { %v5772_v62 = vmax.f32 %v5770_v19, %v5771_v48  ;;  %v5500_v60 = vadd.f32 %v9554_v4, %v5146_v9  ;;  %v5148_v35 = vpop.f32.mrb[53].mxu0 }
 0x629   :  { %v5781_v34 = vmax.f32 %v5779_v51, %v5780_v57  ;;  %v5502_v55 = vadd.f32 %v10287_v0, %v5148_v35  ;;  %v5150_v13 = vpop.f32.mrb[54].mxu0 }
 0x62a   :  { %v5872_v27 = vadd.f32 %v9630_v61, %v5772_v62  ;;  %v5783_v32 = vmax.f32 %v5782_v10, %v5500_v60  ;;  %v5504_v38 = vadd.f32 %v10288_v22, %v5150_v13  ;;  %v5152_v43 = vpop.f32.mrb[55].mxu0 }
 0x62b   :  { %v5873_v39 = vadd.f32 %v9634_v23, %v5781_v34  ;;  %v5792_v45 = vmax.f32 %v5791_v16, %v5502_v55  ;;  %v5506_v18 = vadd.f32 %v10289_v20, %v5152_v43 }
 0x62c   :  { %v5946_v26 = vrot.slane %v5872_v27, 4  ;;  %v5784_v5 = vmax.f32 %v5783_v32, %v5504_v38 }
 0x62d   :  { %v5960_v52 = vrot.slane %v5873_v39, 4  ;;  %v5793_v4 = vmax.f32 %v5792_v45, %v5506_v18 }
 0x62e   :  { %v5947_v2 = vsel %vm1761_vm4, %v5946_v26, %v5945_v14  ;;  %v5785_v25 = vrot.slane %v5784_v5, 4 }
 0x62f   :  { %v5961_v15 = vsel %vm1761_vm4, %v5960_v52, %v5959_v7  ;;  %v5794_v37 = vrot.slane %v5793_v4, 4  ;;  %v5156_v53 = vpop.f32.mrb[56].mxu0 }
 0x630   :  { %v5786_v46 = vmax.f32 %v5784_v5, %v5785_v25  ;;  %v5510_v33 = vadd.f32 %v9566_v47, %v5156_v53  ;;  %v5158_v30 = vpop.f32.mrb[57].mxu0  ;;  %v5579_v47 = vmax.f32 %v10291_v6, %v5578_v17  ;;  %v10293_v5 = vld [vmem:[#allocation79_spill] sm:$0xff]  ;;  %v10294_v6 = vld [vmem:[#allocation81_spill] sm:$0xff] }
 0x631   :  { %v5795_v58 = vmax.f32 %v5793_v4, %v5794_v37  ;;  %v5512_v24 = vadd.f32 %v9569_v28, %v5158_v30  ;;  %v5160_v29 = vpop.f32.mrb[58].mxu0  ;;  %v5571_v28 = vrot.slane %v5570_v59, 2  ;;  %v5587_v52 = vrot.slane %v10293_v5, 4 }
 0x632   :  { %v5787_v56 = vrot.slane %v5786_v46, 2  ;;  %v5514_v14 = vadd.f32 %v10292_v49, %v5160_v29  ;;  %v5162_v42 = vpop.f32.mrb[59].mxu0  ;;  %v5580_v60 = vrot.slane %v5579_v47, 2 }
 0x633   :  { %v5796_v11 = vrot.slane %v5795_v58, 2  ;;  %v5516_v7 = vadd.f32 %v9575_v63, %v5162_v42  ;;  %v5572_v43 = vmax.f32 %v5570_v59, %v5571_v28  ;;  %v5588_v29 = vmax.f32 %v10293_v5, %v5587_v52  ;;  %v10296_v59 = vld [vmem:[#allocation78_spill] sm:$0xff]  ;;  %v10297_v28 = vld [vmem:[#allocation95_spill] sm:$0xff] }
 0x634   :  { %v5788_v12 = vmax.f32 %v5786_v46, %v5787_v56  ;;  %v5800_v21 = vmax.f32 %v5510_v33, %v5514_v14  ;;  %v5581_v45 = vmax.f32 %v5579_v47, %v5580_v60  ;;  %v10295_v14 = vld [vmem:[#allocation42_spill] sm:$0xff] }
 0x635   :  { %v5797_v19 = vmax.f32 %v5795_v58, %v5796_v11  ;;  %v5809_v10 = vmax.f32 %v5512_v24, %v5516_v7  ;;  %v5573_v37 = vrot.slane %v5572_v43, 1 }
 0x636   :  { %v5789_v51 = vrot.slane %v5788_v12, 1  ;;  %v5582_v54 = vrot.slane %v5581_v45, 1 }
 0x637   :  { %v5798_v16 = vrot.slane %v5797_v19, 1  ;;  %v5166_v48 = vpop.f32.mrb[60].mxu0  ;;  %v5574_v49 = vmax.f32 %v5572_v43, %v5573_v37 }
 0x638   :  { %v5790_v57 = vmax.f32 %v5788_v12, %v5789_v51  ;;  %v5520_v9 = vadd.f32 %v9582_v31, %v5166_v48  ;;  %v5168_v62 = vpop.f32.mrb[61].mxu0  ;;  %v5583_v7 = vmax.f32 %v5581_v45, %v5582_v54  ;;  %v10300_v45 = vld [vmem:[#allocation96_spill] sm:$0xff] }
 0x639   :  { %v5799_v35 = vmax.f32 %v5797_v19, %v5798_v16  ;;  %v5522_v63 = vadd.f32 %v9585_v36, %v5168_v62  ;;  %v5170_v34 = vpop.f32.mrb[62].mxu0  ;;  %v9712_v16 = vadd.f32 %v9630_v61, %v5574_v49 }
 0x63a   :  { %v5874_v0 = vadd.f32 %v9630_v61, %v5790_v57  ;;  %v5801_v55 = vmax.f32 %v5800_v21, %v5520_v9  ;;  %v5524_v13 = vadd.f32 %v9588_v44, %v5170_v34  ;;  %v5172_v27 = vpop.f32.mrb[63].mxu0  ;;  %v9717_v62 = vadd.f32 %v9634_v23, %v5583_v7 }
 0x63b   :  { %v5875_v32 = vadd.f32 %v9634_v23, %v5799_v35  ;;  %v5810_v22 = vmax.f32 %v5809_v10, %v5522_v63  ;;  %v5526_v38 = vadd.f32 %v9591_v3, %v5172_v27  ;;  %v10298_v63 = vld [vmem:[#allocation97_spill] sm:$0xff]  ;;  %v5912_v52 = vrot.slane %v9712_v16, 7 }
 0x63c   :  { %v5948_v39 = vrot.slane %v5874_v0, 3  ;;  %v5802_v31 = vmax.f32 %v5801_v55, %v5524_v13 }
 0x63d   :  { %v5962_v20 = vrot.slane %v5875_v32, 3  ;;  %v5811_v18 = vmax.f32 %v5810_v22, %v5526_v38  ;;  %v10299_v32 = vld [vmem:[#allocation94_spill] sm:$0xff] }
 0x63e   :  { %v5803_v26 = vrot.slane %v5802_v31, 4  ;;  %v9696_v36 = vsel %vm1763_vm5, %v5948_v39, %v5947_v2  ;;  %v5596_v2 = vrot.slane %v10294_v6, 4 }
 0x63f   :  { %v5812_v4 = vrot.slane %v5811_v18, 4  ;;  %v5176_v44 = vpop.f32.mrb[64].mxu0  ;;  %v9700_v25 = vsel %vm1763_vm5, %v5962_v20, %v5961_v15 }
 0x640   :  { %v5804_v53 = vmax.f32 %v5802_v31, %v5803_v26  ;;  %v5530_v3 = vadd.f32 %v9594_v41, %v5176_v44  ;;  %v5178_v50 = vpop.f32.mrb[65].mxu0  ;;  %v5605_v41 = vrot.slane %v10295_v14, 4  ;;  %v5597_v47 = vmax.f32 %v10294_v6, %v5596_v2 }
 0x641   :  { %v5813_v46 = vmax.f32 %v5811_v18, %v5812_v4  ;;  %v5532_v33 = vadd.f32 %v9597_v8, %v5178_v50  ;;  %v5180_v30 = vpop.f32.mrb[66].mxu0  ;;  %v5614_v8 = vrot.slane %v10296_v59, 4 }
 0x642   :  { %v5805_v17 = vrot.slane %v5804_v53, 2  ;;  %v5534_v58 = vadd.f32 %v9600_v40, %v5180_v30  ;;  %v5182_v24 = vpop.f32.mrb[67].mxu0  ;;  %v5589_v40 = vrot.slane %v5588_v29, 2  ;;  %v5598_v55 = vrot.slane %v5597_v47, 2 }
 0x643   :  { %v5814_v15 = vrot.slane %v5813_v46, 2  ;;  %v5536_v56 = vadd.f32 %v9603_v1, %v5182_v24  ;;  %v5606_v1 = vmax.f32 %v10295_v14, %v5605_v41  ;;  %v5615_v60 = vmax.f32 %v10296_v59, %v5614_v8  ;;  %v10302_v24 = vld [vmem:[#allocation83_spill] sm:$0xff] }
 0x644   :  { %v5806_v42 = vmax.f32 %v5804_v53, %v5805_v17  ;;  %v5818_v11 = vmax.f32 %v5530_v3, %v5534_v58  ;;  %v5590_v43 = vmax.f32 %v5588_v29, %v5589_v40  ;;  %v5926_v53 = vrot.slane %v9717_v62, 7 }
 0x645   :  { %v5815_v12 = vmax.f32 %v5813_v46, %v5814_v15  ;;  %v5827_v21 = vmax.f32 %v5532_v33, %v5536_v56  ;;  %v5607_v18 = vrot.slane %v5606_v1, 2  ;;  %v5616_v4 = vrot.slane %v5615_v60, 2  ;;  %v10301_v33 = vld [vmem:[#allocation80_spill] sm:$0xff]  ;;  %v10303_v15 = vld [vmem:[#allocation82_spill] sm:$0xff] }
 0x646   :  { %v5807_v19 = vrot.slane %v5806_v42, 1  ;;  %v9727_v3 = vmax.f32 %v5597_v47, %v5598_v55  ;;  %v5591_v46 = vrot.slane %v5590_v43, 1  ;;  %v5623_v30 = vrot.slane %v10301_v33, 4 }
 0x647   :  { %v5816_v10 = vrot.slane %v5815_v12, 1  ;;  %v5186_v51 = vpop.f32.mrb[68].mxu0  ;;  %v9738_v58 = vmax.f32 %v5606_v1, %v5607_v18  ;;  %v5632_v29 = vrot.slane %v10302_v24, 4  ;;  %v5641_v56 = vrot.slane %v10303_v15, 4  ;;  %v10308_v1 = vld [vmem:[#allocation92_spill] sm:$0xff] }
 0x648   :  { %v5808_v48 = vmax.f32 %v5806_v42, %v5807_v19  ;;  %v5540_v57 = vadd.f32 %v10297_v28, %v5186_v51  ;;  %v5188_v9 = vpop.f32.mrb[69].mxu0  ;;  %v9742_v41 = vmax.f32 %v5615_v60, %v5616_v4  ;;  %v5624_v51 = vmax.f32 %v10301_v33, %v5623_v30 }
 0x649   :  { %v5817_v35 = vmax.f32 %v5815_v12, %v5816_v10  ;;  %v5542_v34 = vadd.f32 %v10298_v63, %v5188_v9  ;;  %v5190_v0 = vpop.f32.mrb[70].mxu0  ;;  %v10306_v12 = vld [vmem:[#allocation89_spill] sm:$0xff]  ;;  %v5600_v9 = vrot.slane %v9727_v3, 1  ;;  %v5633_v60 = vmax.f32 %v10302_v24, %v5632_v29 }
 0x64a   :  { %v5876_v13 = vadd.f32 %v9630_v61, %v5808_v48  ;;  %v5819_v27 = vmax.f32 %v5818_v11, %v5540_v57  ;;  %v5544_v22 = vadd.f32 %v10299_v32, %v5190_v0  ;;  %v5192_v38 = vpop.f32.mrb[71].mxu0  ;;  %v10305_v11 = vld [vmem:[#allocation87_spill] sm:$0xff]  ;;  %v5686_v48 = vrot.slane %v10308_v1, 4 }
 0x64b   :  { %v5877_v39 = vadd.f32 %v9634_v23, %v5817_v35  ;;  %v5828_v31 = vmax.f32 %v5827_v21, %v5542_v34  ;;  %v5546_v20 = vadd.f32 %v10300_v45, %v5192_v38  ;;  %v5659_v7 = vrot.slane %v10305_v11, 4 }
 0x64c   :  { %v5950_v26 = vrot.slane %v5876_v13, 2  ;;  %v5820_v5 = vmax.f32 %v5819_v27, %v5544_v22  ;;  %v5668_v21 = vrot.slane %v10306_v12, 4  ;;  %v5642_v35 = vmax.f32 %v10303_v15, %v5641_v56 }
 0x64d   :  { %v5964_v44 = vrot.slane %v5877_v39, 2  ;;  %v5829_v37 = vmax.f32 %v5828_v31, %v5546_v20  ;;  %v5592_v34 = vmax.f32 %v5590_v43, %v5591_v46  ;;  %v5660_v55 = vmax.f32 %v10305_v11, %v5659_v7 }
 0x64e   :  { %v5821_v50 = vrot.slane %v5820_v5, 4  ;;  %v9731_v54 = vsel %vm1765_vm6, %v5950_v26, %v9696_v36  ;;  %v10304_v36 = vld [vmem:[#allocation84_spill] sm:$0xff]  ;;  %v5609_v27 = vrot.slane %v9738_v58, 1  ;;  %v5669_v32 = vmax.f32 %v10306_v12, %v5668_v21 }
 0x64f   :  { %v5830_v6 = vrot.slane %v5829_v37, 4  ;;  %v5229_v2 = vpop.f32.mrb[200].mxu0  ;;  %v9736_v17 = vsel %vm1765_vm6, %v5964_v44, %v9700_v25  ;;  %v5650_v42 = vrot.slane %v10304_v36, 4  ;;  %v10307_v25 = vld [vmem:[#allocation44_spill] sm:$0xff]  ;;  %v5618_v39 = vrot.slane %v9742_v41, 1 }
 0x650   :  { %v5822_v49 = vmax.f32 %v5820_v5, %v5821_v50  ;;  %v5231_v14 = vpop.f32.mrb[201].mxu0  ;;  %v5677_v47 = vrot.slane %v10307_v25, 4  ;;  %v5625_v31 = vrot.slane %v5624_v51, 2  ;;  %v5687_v45 = vmax.f32 %v10308_v1, %v5686_v48 }
 0x651   :  { %v5831_v59 = vmax.f32 %v5829_v37, %v5830_v6  ;;  %v5233_v8 = vpop.f32.mrb[202].mxu0  ;;  %v5651_v0 = vmax.f32 %v10304_v36, %v5650_v42  ;;  %v5634_v43 = vrot.slane %v5633_v60, 2  ;;  %v5643_v26 = vrot.slane %v5642_v35, 2 }
 0x652   :  { %v5823_v19 = vrot.slane %v5822_v49, 2  ;;  %v5548_v40 = vmax.f32 %v5229_v2, %v5233_v8  ;;  %v5235_v10 = vpop.f32.mrb[203].mxu0  ;;  %v5678_v22 = vmax.f32 %v10307_v25, %v5677_v47  ;;  %v5661_v50 = vrot.slane %v5660_v55, 2 }
 0x653   :  { %v5832_v28 = vrot.slane %v5831_v59, 2  ;;  %v5557_v57 = vmax.f32 %v5231_v14, %v5235_v10  ;;  %v5652_v37 = vrot.slane %v5651_v0, 2  ;;  %v5670_v6 = vrot.slane %v5669_v32, 2 }
 0x654   :  { %v5824_v63 = vmax.f32 %v5822_v49, %v5823_v19  ;;  %v5679_v2 = vrot.slane %v5678_v22, 2  ;;  %v5626_v56 = vmax.f32 %v5624_v51, %v5625_v31  ;;  %v5688_v49 = vrot.slane %v5687_v45, 2 }
 0x655   :  { %v5833_v13 = vmax.f32 %v5831_v59, %v5832_v28  ;;  %v5635_v42 = vmax.f32 %v5633_v60, %v5634_v43  ;;  %v5644_v11 = vmax.f32 %v5642_v35, %v5643_v26  ;;  %v5653_v8 = vmax.f32 %v5651_v0, %v5652_v37 }
 0x656   :  { %v5825_v38 = vrot.slane %v5824_v63, 1  ;;  %v5662_v12 = vmax.f32 %v5660_v55, %v5661_v50  ;;  %v5671_v47 = vmax.f32 %v5669_v32, %v5670_v6  ;;  %v5680_v19 = vmax.f32 %v5678_v22, %v5679_v2 }
 0x657   :  { %v5834_v20 = vrot.slane %v5833_v13, 1  ;;  %v5239_v18 = vpop.f32.mrb[204].mxu0  ;;  %v5627_v1 = vrot.slane %v5626_v56, 1  ;;  %v5689_v51 = vmax.f32 %v5687_v45, %v5688_v49  ;;  %v5636_v60 = vrot.slane %v5635_v42, 1 }
 0x658   :  { %v5826_v5 = vmax.f32 %v5824_v63, %v5825_v38  ;;  %v5549_v4 = vmax.f32 %v5548_v40, %v5239_v18  ;;  %v5241_v44 = vpop.f32.mrb[205].mxu0  ;;  %v5645_v35 = vrot.slane %v5644_v11, 1  ;;  %v5610_v0 = vmax.f32 %v9738_v58, %v5609_v27 }
 0x659   :  { %v5835_v46 = vmax.f32 %v5833_v13, %v5834_v20  ;;  %v5558_v33 = vmax.f32 %v5557_v57, %v5241_v44  ;;  %v5243_v30 = vpop.f32.mrb[206].mxu0  ;;  %v5601_v57 = vmax.f32 %v9727_v3, %v5600_v9  ;;  %v5654_v55 = vrot.slane %v5653_v8, 1 }
 0x65a   :  { %v5878_v24 = vadd.f32 %v9630_v61, %v5826_v5  ;;  %v5550_v29 = vmax.f32 %v5549_v4, %v5243_v30  ;;  %v5245_v15 = vpop.f32.mrb[207].mxu0  ;;  %v5663_v13 = vrot.slane %v5662_v12, 1  ;;  %v5672_v22 = vrot.slane %v5671_v47, 1 }
 0x65b   :  { %v5879_v14 = vadd.f32 %v9634_v23, %v5835_v46  ;;  %v5559_v36 = vmax.f32 %v5558_v33, %v5245_v15  ;;  %v5681_v38 = vrot.slane %v5680_v19, 1  ;;  %v5852_v45 = vadd.f32 %v9630_v61, %v5592_v34 }
 0x65c   :  { %v5952_v7 = vrot.slane %v5878_v24, 1  ;;  %v5551_v59 = vrot.slane %v5550_v29, 4  ;;  %v5690_v20 = vrot.slane %v5689_v51, 1  ;;  %v5853_v3 = vadd.f32 %v9634_v23, %v5601_v57 }
 0x65d   :  { %v5966_v21 = vrot.slane %v5879_v14, 1  ;;  %v5560_v25 = vrot.slane %v5559_v36, 4  ;;  %v5637_v9 = vmax.f32 %v5635_v42, %v5636_v60  ;;  %v5646_v43 = vmax.f32 %v5644_v11, %v5645_v35 }
 0x65e   :  { %v5552_v40 = vmax.f32 %v5550_v29, %v5551_v59  ;;  %v5953_v10 = vsel %vm1767_vm7, %v5952_v7, %v9731_v54  ;;  %v5619_v54 = vmax.f32 %v9742_v41, %v5618_v39  ;;  %v5854_v58 = vadd.f32 %v9630_v61, %v5610_v0 }
 0x65f   :  { %v5561_v48 = vmax.f32 %v5559_v36, %v5560_v25  ;;  %v5967_v28 = vsel %vm1767_vm7, %v5966_v21, %v9736_v17  ;;  %5974 = vst [vmem:[#allocation8 + $0x10] sm:$0xff] %v5953_v10  ;;  %v5628_v17 = vmax.f32 %v5626_v56, %v5627_v1  ;;  %v5655_v27 = vmax.f32 %v5653_v8, %v5654_v55 }
 0x660   :  { %v5553_v63 = vrot.slane %v5552_v40, 2  ;;  %5975 = vst [vmem:[#allocation8 + $0x18] sm:$0xff] %v5967_v28  ;;  %v5664_v5 = vmax.f32 %v5662_v12, %v5663_v13  ;;  %v5855_v41 = vadd.f32 %v9634_v23, %v5619_v54  ;;  %v5673_v39 = vmax.f32 %v5671_v47, %v5672_v22 }
 0x661   :  { %v5562_v32 = vrot.slane %v5561_v48, 2  ;;  %v5682_v44 = vmax.f32 %v5680_v19, %v5681_v38  ;;  %v5914_v50 = vrot.slane %v5852_v45, 6  ;;  %v5856_v34 = vadd.f32 %v9630_v61, %v5628_v17 }
 0x662   :  { %v5554_v31 = vmax.f32 %v5552_v40, %v5553_v63  ;;  %v5691_v46 = vmax.f32 %v5689_v51, %v5690_v20  ;;  %v5928_v30 = vrot.slane %v5853_v3, 6  ;;  %v5857_v6 = vadd.f32 %v9634_v23, %v5637_v9 }
 0x663   :  { %v5563_v18 = vmax.f32 %v5561_v48, %v5562_v32  ;;  %v5858_v2 = vadd.f32 %v9630_v61, %v5646_v43  ;;  %v5916_v29 = vrot.slane %v5854_v58, 5  ;;  %v5859_v15 = vadd.f32 %v9634_v23, %v5655_v27 }
 0x664   :  { %v5555_v26 = vrot.slane %v5554_v31, 1  ;;  %v5860_v56 = vadd.f32 %v9630_v61, %v5664_v5  ;;  %v5930_v14 = vrot.slane %v5855_v41, 5  ;;  %v5861_v36 = vadd.f32 %v9634_v23, %v5673_v39 }
 0x665   :  { %v5564_v4 = vrot.slane %v5563_v18, 1  ;;  %v5862_v42 = vadd.f32 %v9630_v61, %v5682_v44  ;;  %v5918_v7 = vrot.slane %v5856_v34, 4  ;;  %v5863_v59 = vadd.f32 %v9634_v23, %v5691_v46 }
 0x666   :  { %v5556_v37 = vmax.f32 %v5554_v31, %v5555_v26  ;;  %v5932_v21 = vrot.slane %v5857_v6, 4  ;;  %v5920_v25 = vrot.slane %v5858_v2, 3  ;;  %v5922_v40 = vrot.slane %v5860_v56, 2 }
 0x667   :  { %v5565_v33 = vmax.f32 %v5563_v18, %v5564_v4  ;;  %v5924_v10 = vrot.slane %v5862_v42, 1  ;;  %v5938_v1 = vrot.slane %v5863_v59, 1 }
 0x668   :  { %v5848_v24 = vadd.f32 %v9630_v61, %v5556_v37  ;;  %v5934_v61 = vrot.slane %v5859_v15, 3 }
 0x669   :  { %v5849_v49 = vadd.f32 %v9634_v23, %v5565_v33  ;;  %v5936_v23 = vrot.slane %v5861_v36, 2 }
 0x66a   :  { %v5913_v11 = vsel %vm1755_vm1, %v5912_v52, %v5848_v24 }
 0x66b   :  { %v5915_v8 = vsel %vm1757_vm2, %v5914_v50, %v5913_v11  ;;  %v5927_v12 = vsel %vm1755_vm1, %v5926_v53, %v5849_v49 }
 0x66c   :  { %v5917_v47 = vsel %vm1759_vm3, %v5916_v29, %v5915_v8  ;;  %v5929_v19 = vsel %vm1757_vm2, %v5928_v30, %v5927_v12 }
 0x66d   :  { %v5931_v16 = vsel %vm1759_vm3, %v5930_v14, %v5929_v19  ;;  %v5919_v52 = vsel %vm1761_vm4, %v5918_v7, %v5917_v47 }
 0x66e   :  { %v5921_v62 = vsel %vm1763_vm5, %v5920_v25, %v5919_v52  ;;  %v5933_v53 = vsel %vm1761_vm4, %v5932_v21, %v5931_v16 }
 0x66f   :  { %v5923_v51 = vsel %vm1765_vm6, %v5922_v40, %v5921_v62  ;;  %v5935_v48 = vsel %vm1763_vm5, %v5934_v61, %v5933_v53 }
 0x670   :  { %v5925_v28 = vsel %vm1767_vm7, %v5924_v10, %v5923_v51  ;;  %v5937_v57 = vsel %vm1765_vm6, %v5936_v23, %v5935_v48 }
 0x671   :  { %v5939_v60 = vsel %vm1767_vm7, %v5938_v1, %v5937_v57  ;;  %5972 = vst [vmem:[#allocation8] sm:$0xff] %v5925_v28 }
 0x672   :  { %5973 = vst [vmem:[#allocation8 + $0x8] sm:$0xff] %v5939_v60 }
 0x673   :  { %7020 = shalt.err (!%p7017_p0)
}
 0x674   :  { %s7021_s1 = scalar_lea.hbm %s9826_s10, 512 }
 0x675   :  { %p7022_p1 = scmp.ne.s32.totalorder %s9826_s10, %s7021_s1  ;;  %p7025_p2 = scmp.lt.u32.totalorder %s7021_s1, %s9826_s10 }
 0x677   :  { %p7027_p3 = pnand %p7025_p2, %p7022_p1 }
 0x679   :  { %7030 = shalt.err (!%p7027_p3)
}
 0x67a   :  { %5987 = dma.vmem_to_hbm [thread:$0]  %s5982_s18, 512, %s9826_s10, [#allocation4], %s7038_s23, %s7038_s23, %s7039_s24  }
 0x67b   :  { %7035 = dma.done.wait [#allocation4], 512  }
 0x67c   :  { %7036 = vsyncadd [#allocation4], 4294966784 }
 0x67d   :  { %5991 = vsyncpa [#allocation3], 1 }
 0x67e   :  { %5992 = vsyncpa [#allocation6], 1 }
 0x67f   :  { %5993 = vsyncpa [#allocation4], 1 }

</bundles_post_ra>
